<compile_context>
chip_gen: v7x
topology: tpu7x:2x2x1
jax: 0.10.0
libtpu: 0.0.40
codegen_flags: <defaults>
</compile_context>

<pallas_src>
import jax
import jax.numpy as jnp
from jax import lax
from jax.experimental import pallas as pl
from jax.experimental.pallas import tpu as pltpu


def _round_up(v, m):
    return ((v + m - 1) // m) * m


# ----------------------------- Pallas kernel ---------------------------------

def _make_backbone_kernel(*, Wr, Ppad, E, T, c1r, c2p, B_blk, inv_hw):
    n_chunks = Ppad // T
    c1pk = 3 * c1r                       # dx-packed scratch lane width

    def kernel(xe_ref, w1_ref, b1_ref, w2_ref, b2_ref, mcol_ref, mrow_ref,
               o_ref, y1e_ref):
        # xe_ref  : (B_blk, Ppad, K1) bf16 -- im2col 3x3 patches, flattened grid
        # w1_ref  : (K1, c1r)   bf16       -- conv1 weights (im2col layout)
        # b1_ref  : (1, c1r)    f32
        # w2_ref  : (3, 3*c1r, c2p) bf16   -- conv2 weights, rows = (dx, c1)
        # b2_ref  : (1, c2p)    f32
        # mcol_ref: (Ppad, 1)   f32        -- 1.0 on true pixels (zero ring/junk)
        # mrow_ref: (1, Ppad)   f32        -- same mask, row layout (pool lhs)
        # o_ref   : (B_blk, 1, c2p) f32    -- pooled features per image
        # y1e_ref : (Ppad + 2E, 3*c1r) f32 VMEM scratch (dx-packed conv1 output)

        # Zero halo bands unconditionally every step: safe under megacore
        # parallel sharding, cheap (2 x (E+8) x 96 f32), and also covers the two
        # scratch cells the dx-replication never writes.
        zeros_band = jnp.zeros((E + 8, c1pk), jnp.float32)
        y1e_ref[pl.ds(0, E + 8), :] = zeros_band
        y1e_ref[pl.ds(Ppad + E - 8, E + 8), :] = zeros_band

        for b in range(B_blk):
            # ---------------- conv1: single im2col dot per chunk ----------------
            for c in range(n_chunks):
                p0 = c * T
                xs = xe_ref[b, pl.ds(p0, T), :]                          # (T,K1) bf16
                a1 = jnp.dot(xs, w1_ref[...],
                             preferred_element_type=jnp.float32)        # (T,c1r) f32
                y1 = jnp.maximum(a1 + b1_ref[...], 0.0) * mcol_ref[pl.ds(p0, T), :]
                # Replicate into 3 dx-shifted lane blocks: block d at scratch row
                # r holds y1[r - E + d - 1]  -> conv2's dx taps are K-packed.
                y1e_ref[pl.ds(E + p0 + 1, T), pl.ds(0, c1r)] = y1
                y1e_ref[pl.ds(E + p0,     T), pl.ds(c1r, c1r)] = y1
                y1e_ref[pl.ds(E + p0 - 1, T), pl.ds(2 * c1r, c1r)] = y1

            # ------------- conv2 (+bias+ReLU) + masked avg-pool ------------------
            pooled = jnp.zeros((1, c2p), jnp.float32)
            for c in range(n_chunks):
                p0 = c * T
                acc = jnp.zeros((T, c2p), jnp.float32)
                for dy in range(3):
                    ys = y1e_ref[pl.ds(E + p0 + (dy - 1) * Wr, T), :]     # aligned
                    acc = acc + jnp.dot(ys.astype(jnp.bfloat16), w2_ref[dy],
                                        preferred_element_type=jnp.float32)
                act2 = jnp.maximum(acc + b2_ref[...], 0.0)
                # masked global-average-pool partial sum as one M=1 MXU push
                m = mrow_ref[:, pl.ds(p0, T)].astype(jnp.bfloat16)        # (1,T)
                pooled = pooled + jnp.dot(m, act2.astype(jnp.bfloat16),
                                          preferred_element_type=jnp.float32)
            o_ref[b, :, :] = pooled * inv_hw

    return kernel


def _backbone_pallas(xe, w1t, b1p, w2pk, b2p, mcol, mrow, *,
                     Wr, Ppad, E, T, c1r, c2p, B_blk, inv_hw):
    nb, _, K1 = xe.shape
    pe = Ppad + 2 * E
    kernel = _make_backbone_kernel(Wr=Wr, Ppad=Ppad, E=E, T=T, c1r=c1r,
                                   c2p=c2p, B_blk=B_blk, inv_hw=inv_hw)
    # NOTE: weight/bias/mask blocks have constant index maps; pl.Buffered(1)
    # would save one pipeline buffer but is omitted (working set is tiny here).
    return pl.pallas_call(
        kernel,
        out_shape=jax.ShapeDtypeStruct((nb, 1, c2p), jnp.float32),
        grid=(nb // B_blk,),
        in_specs=[
            pl.BlockSpec((B_blk, Ppad, K1), lambda i: (i, 0, 0)),   # im2col patches
            pl.BlockSpec((K1, c1r), lambda i: (0, 0)),              # w1
            pl.BlockSpec((1, c1r), lambda i: (0, 0)),               # b1
            pl.BlockSpec((3, 3 * c1r, c2p), lambda i: (0, 0, 0)),   # w2 (dx-packed)
            pl.BlockSpec((1, c2p), lambda i: (0, 0)),               # b2
            pl.BlockSpec((Ppad, 1), lambda i: (0, 0)),              # mask (column)
            pl.BlockSpec((1, Ppad), lambda i: (0, 0)),              # mask (row)
        ],
        out_specs=pl.BlockSpec((B_blk, 1, c2p), lambda i: (i, 0, 0)),
        scratch_shapes=[pltpu.VMEM((pe, 3 * c1r), jnp.float32)],
        compiler_params=pltpu.CompilerParams(
            dimension_semantics=("parallel",),
            vmem_limit_bytes=32 * 1024 * 1024),
    )(xe, w1t, b1p, w2pk, b2p, mcol, mrow)


# ------------------------------- glue (JAX) ----------------------------------

def backbone_forward(x_nchw, params):
    """BackBone.forward: NCHW in -> (N, C2, 1, 1) pooled features."""
    w1, b1, w2, b2 = params                 # (3,3,Cin,C1),(C1,),(3,3,C1,C2),(C2,)
    n, cin, H, W = x_nchw.shape
    c1, c2 = w1.shape[3], w2.shape[3]

    Hp = H + 2
    Wr = _round_up(W + 2, 8)                # sublane-aligned row pitch
    T = 128                                 # row-chunk size (16-vreg f32 acc)
    P = Hp * Wr
    Ppad = _round_up(P, T)
    E = _round_up(max(Wr, 8), 8)            # halo rows (>= dy tap shift)
    K1 = _round_up(9 * cin, 8)
    c1r = _round_up(c1, 32)
    c2p = _round_up(c2, 128)

    B_blk = max(1, min(n, 4))               # images per grid step
    nb = _round_up(n, B_blk)

    # NHWC; 3x3 im2col patches on the (Hp, Wr) work grid (zero ring / junk cols).
    x = jnp.transpose(x_nchw, (0, 2, 3, 1)).astype(jnp.float32)
    x2 = jnp.zeros((n, Hp + 2, Wr + 2, cin), jnp.float32)
    x2 = x2.at[:, 2:2 + H, 2:2 + W, :].set(x)
    patches = jnp.concatenate(
        [x2[:, di:di + Hp, dj:dj + Wr, :] for di in range(3) for dj in range(3)],
        axis=-1).reshape(n, P, 9 * cin)
    xe = jnp.zeros((nb, Ppad, K1), jnp.bfloat16)
    xe = xe.at[:n, :P, :9 * cin].set(patches.astype(jnp.bfloat16))

    # conv1 weights in im2col layout; conv2 weights packed as (dy, dx*C1, C2).
    w1t = jnp.zeros((K1, c1r), jnp.bfloat16)
    w1t = w1t.at[:9 * cin, :c1].set(w1.reshape(9 * cin, c1).astype(jnp.bfloat16))
    w2pk = jnp.zeros((3, 3, c1r, c2p), jnp.float32)
    w2pk = w2pk.at[:, :, :c1, :c2].set(w2)
    w2pk = w2pk.reshape(3, 3 * c1r, c2p).astype(jnp.bfloat16)
    b1p = jnp.zeros((1, c1r), jnp.float32).at[0, :c1].set(b1)
    b2p = jnp.zeros((1, c2p), jnp.float32).at[0, :c2].set(b2)

    # Interior (true-pixel) mask on the flattened work grid, padded to Ppad.
    ry = (jnp.arange(Hp) >= 1) & (jnp.arange(Hp) <= H)
    rx = (jnp.arange(Wr) >= 1) & (jnp.arange(Wr) <= W)
    m = (ry[:, None] & rx[None, :]).reshape(P).astype(jnp.float32)
    m = jnp.zeros((Ppad,), jnp.float32).at[:P].set(m)

    pooled = _backbone_pallas(
        xe, w1t, b1p, w2pk, b2p, m.reshape(Ppad, 1), m.reshape(1, Ppad),
        Wr=Wr, Ppad=Ppad, E=E, T=T, c1r=c1r, c2p=c2p, B_blk=B_blk,
        inv_hw=1.0 / float(H * W))                       # (nb, 1, c2p)
    return pooled[:n, 0, :c2].reshape(n, c2, 1, 1)


def backbone_reference(x_nchw, params):
    """Pure-JAX reference (lax conv) with matching bf16 rounding points."""
    w1, b1, w2, b2 = params
    x = jnp.transpose(x_nchw, (0, 2, 3, 1)).astype(jnp.float32)

    def conv_relu(inp, w, b):
        inp = inp.astype(jnp.bfloat16).astype(jnp.float32)
        w = w.astype(jnp.bfloat16).astype(jnp.float32)
        y = lax.conv_general_dilated(
            inp, w, window_strides=(1, 1), padding="SAME",
            dimension_numbers=("NHWC", "HWIO", "NHWC"),
            precision=lax.Precision.HIGHEST)
        return jnp.maximum(y + b.reshape(1, 1, 1, -1), 0.0)

    y = conv_relu(x, w1, b1)
    y = conv_relu(y, w2, b2)
    pooled = jnp.mean(y, axis=(1, 2))
    return pooled.reshape(x.shape[0], -1, 1, 1)


if __name__ == "__main__":
    key = jax.random.PRNGKey(0)
    k1, k2, k3, k4, kx = jax.random.split(key, 5)

    # Small shapes consistent with the module (3-channel images).
    N, CIN, H, W = 2, 3, 16, 16
    C1, C2 = 32, 64                     # BackBone.n_feats == C2

    # Deterministic synthetic parameters (no checkpoint loading).
    w1 = 0.10 * jax.random.normal(k1, (3, 3, CIN, C1), jnp.float32)
    b1 = 0.10 * jax.random.normal(k2, (C1,), jnp.float32)
    w2 = 0.05 * jax.random.normal(k3, (3, 3, C1, C2), jnp.float32)
    b2 = 0.10 * jax.random.normal(k4, (C2,), jnp.float32)
    params = (w1, b1, w2, b2)

    x = jax.random.normal(kx, (N, CIN, H, W), jnp.float32)

    out = jax.block_until_ready(jax.jit(backbone_forward)(x, params))
    ref = backbone_reference(x, params)

    assert out.shape == (N, C2, 1, 1), out.shape
    err = float(jnp.max(jnp.abs(out - ref)))
    assert jnp.allclose(out, ref, atol=2e-3, rtol=2e-3), f"mismatch {err}"
    print("KERNEL_OK")
</pallas_src>

<mosaic_0001>
module attributes {stable_mosaic.version = 11 : i64} {
  func.func @kernel(%arg0: i32, %arg1: memref<2x512x32xbf16, #tpu.memory_space<vmem>>, %arg2: memref<32x32xbf16, #tpu.memory_space<vmem>>, %arg3: memref<1x32xf32, #tpu.memory_space<vmem>>, %arg4: memref<3x96x128xbf16, #tpu.memory_space<vmem>>, %arg5: memref<1x128xf32, #tpu.memory_space<vmem>>, %arg6: memref<512x1xf32, #tpu.memory_space<vmem>>, %arg7: memref<1x512xf32, #tpu.memory_space<vmem>>, %arg8: memref<2x1x128xf32, #tpu.memory_space<vmem>>, %arg9: memref<560x96xf32, #tpu.memory_space<vmem>>) attributes {dimension_semantics = [#tpu.dimension_semantics<parallel>], iteration_bounds = array<i64: 1>, scalar_prefetch = 0 : i64, scratch_operands = 1 : i64, tpu.core_type = #tpu.core_type<tc>, window_params = [{transform_indices = @transform_0, window_bounds = array<i64: 2, 512, 32>}, {pipeline_mode = #tpu.pipeline_mode<synchronous>, transform_indices = @transform_1, window_bounds = array<i64: 32, 32>}, {pipeline_mode = #tpu.pipeline_mode<synchronous>, transform_indices = @transform_2, window_bounds = array<i64: 1, 32>}, {pipeline_mode = #tpu.pipeline_mode<synchronous>, transform_indices = @transform_3, window_bounds = array<i64: 3, 96, 128>}, {pipeline_mode = #tpu.pipeline_mode<synchronous>, transform_indices = @transform_4, window_bounds = array<i64: 1, 128>}, {pipeline_mode = #tpu.pipeline_mode<synchronous>, transform_indices = @transform_5, window_bounds = array<i64: 512, 1>}, {pipeline_mode = #tpu.pipeline_mode<synchronous>, transform_indices = @transform_6, window_bounds = array<i64: 1, 512>}, {transform_indices = @transform_7, window_bounds = array<i64: 2, 1, 128>}]} {
    %cst = arith.constant 0.000000e+00 : f32
    %0 = vector.broadcast %cst : f32 to vector<32x96xf32>
    %c0 = arith.constant 0 : index
    %c0_0 = arith.constant 0 : index
    %1 = vector.load %arg9[%c0, %c0_0] : memref<560x96xf32, #tpu.memory_space<vmem>>, vector<32x96xf32>
    tpu.vector_store %arg9[%c0, %c0_0], %0 {strides = array<i32>} : memref<560x96xf32, #tpu.memory_space<vmem>>, vector<32x96xf32>,
    %c528 = arith.constant 528 : index
    %c0_1 = arith.constant 0 : index
    %2 = vector.load %arg9[%c528, %c0_1] : memref<560x96xf32, #tpu.memory_space<vmem>>, vector<32x96xf32>
    tpu.vector_store %arg9[%c528, %c0_1], %0 {strides = array<i32>} : memref<560x96xf32, #tpu.memory_space<vmem>>, vector<32x96xf32>,
    %c0_2 = arith.constant 0 : index
    %c0_3 = arith.constant 0 : index
    %c0_4 = arith.constant 0 : index
    %3 = vector.load %arg1[%c0_2, %c0_3, %c0_4] : memref<2x512x32xbf16, #tpu.memory_space<vmem>>, vector<1x128x32xbf16>
    %4 = vector.shape_cast %3 : vector<1x128x32xbf16> to vector<128x32xbf16>
    %c0_5 = arith.constant 0 : index
    %c0_6 = arith.constant 0 : index
    %5 = vector.load %arg2[%c0_5, %c0_6] : memref<32x32xbf16, #tpu.memory_space<vmem>>, vector<32x32xbf16>
    %cst_7 = arith.constant dense<0.000000e+00> : vector<128x32xf32>
    %6 = tpu.matmul %4, %5, %cst_7 {dimension_numbers = #tpu.dot_dimension_numbers<[1], [0], [0], [1], [0, 0, 1, 1], [], []>} : vector<128x32xbf16>, vector<32x32xbf16>, vector<128x32xf32> -> vector<128x32xf32>
    %c0_8 = arith.constant 0 : index
    %c0_9 = arith.constant 0 : index
    %7 = vector.load %arg3[%c0_8, %c0_9] : memref<1x32xf32, #tpu.memory_space<vmem>>, vector<1x32xf32>
    %8 = vector.broadcast %7 : vector<1x32xf32> to vector<128x32xf32>
    %9 = arith.addf %6, %8 : vector<128x32xf32>
    %cst_10 = arith.constant 0.000000e+00 : f32
    %10 = vector.broadcast %cst_10 : f32 to vector<128x32xf32>
    %11 = arith.maximumf %9, %10 : vector<128x32xf32>
    %c0_11 = arith.constant 0 : index
    %c0_12 = arith.constant 0 : index
    %12 = vector.load %arg6[%c0_11, %c0_12] : memref<512x1xf32, #tpu.memory_space<vmem>>, vector<128x1xf32>
    %13 = vector.broadcast %12 : vector<128x1xf32> to vector<128x32xf32>
    %14 = arith.mulf %11, %13 : vector<128x32xf32>
    %c25 = arith.constant 25 : index
    %c0_13 = arith.constant 0 : index
    %15 = vector.load %arg9[%c25, %c0_13] : memref<560x96xf32, #tpu.memory_space<vmem>>, vector<128x32xf32>
    tpu.vector_store %arg9[%c25, %c0_13], %14 {strides = array<i32>} : memref<560x96xf32, #tpu.memory_space<vmem>>, vector<128x32xf32>,
    %c24 = arith.constant 24 : index
    %c32 = arith.constant 32 : index
    %16 = vector.load %arg9[%c24, %c32] : memref<560x96xf32, #tpu.memory_space<vmem>>, vector<128x32xf32>
    tpu.vector_store %arg9[%c24, %c32], %14 {strides = array<i32>} : memref<560x96xf32, #tpu.memory_space<vmem>>, vector<128x32xf32>,
    %c23 = arith.constant 23 : index
    %c64 = arith.constant 64 : index
    %17 = vector.load %arg9[%c23, %c64] : memref<560x96xf32, #tpu.memory_space<vmem>>, vector<128x32xf32>
    tpu.vector_store %arg9[%c23, %c64], %14 {strides = array<i32>} : memref<560x96xf32, #tpu.memory_space<vmem>>, vector<128x32xf32>,
    %c0_14 = arith.constant 0 : index
    %c128 = arith.constant 128 : index
    %c0_15 = arith.constant 0 : index
    %18 = vector.load %arg1[%c0_14, %c128, %c0_15] : memref<2x512x32xbf16, #tpu.memory_space<vmem>>, vector<1x128x32xbf16>
    %19 = vector.shape_cast %18 : vector<1x128x32xbf16> to vector<128x32xbf16>
    %c0_16 = arith.constant 0 : index
    %c0_17 = arith.constant 0 : index
    %20 = vector.load %arg2[%c0_16, %c0_17] : memref<32x32xbf16, #tpu.memory_space<vmem>>, vector<32x32xbf16>
    %cst_18 = arith.constant dense<0.000000e+00> : vector<128x32xf32>
    %21 = tpu.matmul %19, %20, %cst_18 {dimension_numbers = #tpu.dot_dimension_numbers<[1], [0], [0], [1], [0, 0, 1, 1], [], []>} : vector<128x32xbf16>, vector<32x32xbf16>, vector<128x32xf32> -> vector<128x32xf32>
    %c0_19 = arith.constant 0 : index
    %c0_20 = arith.constant 0 : index
    %22 = vector.load %arg3[%c0_19, %c0_20] : memref<1x32xf32, #tpu.memory_space<vmem>>, vector<1x32xf32>
    %23 = vector.broadcast %22 : vector<1x32xf32> to vector<128x32xf32>
    %24 = arith.addf %21, %23 : vector<128x32xf32>
    %cst_21 = arith.constant 0.000000e+00 : f32
    %25 = vector.broadcast %cst_21 : f32 to vector<128x32xf32>
    %26 = arith.maximumf %24, %25 : vector<128x32xf32>
    %c128_22 = arith.constant 128 : index
    %c0_23 = arith.constant 0 : index
    %27 = vector.load %arg6[%c128_22, %c0_23] : memref<512x1xf32, #tpu.memory_space<vmem>>, vector<128x1xf32>
    %28 = vector.broadcast %27 : vector<128x1xf32> to vector<128x32xf32>
    %29 = arith.mulf %26, %28 : vector<128x32xf32>
    %c153 = arith.constant 153 : index
    %c0_24 = arith.constant 0 : index
    %30 = vector.load %arg9[%c153, %c0_24] : memref<560x96xf32, #tpu.memory_space<vmem>>, vector<128x32xf32>
    tpu.vector_store %arg9[%c153, %c0_24], %29 {strides = array<i32>} : memref<560x96xf32, #tpu.memory_space<vmem>>, vector<128x32xf32>,
    %c152 = arith.constant 152 : index
    %c32_25 = arith.constant 32 : index
    %31 = vector.load %arg9[%c152, %c32_25] : memref<560x96xf32, #tpu.memory_space<vmem>>, vector<128x32xf32>
    tpu.vector_store %arg9[%c152, %c32_25], %29 {strides = array<i32>} : memref<560x96xf32, #tpu.memory_space<vmem>>, vector<128x32xf32>,
    %c151 = arith.constant 151 : index
    %c64_26 = arith.constant 64 : index
    %32 = vector.load %arg9[%c151, %c64_26] : memref<560x96xf32, #tpu.memory_space<vmem>>, vector<128x32xf32>
    tpu.vector_store %arg9[%c151, %c64_26], %29 {strides = array<i32>} : memref<560x96xf32, #tpu.memory_space<vmem>>, vector<128x32xf32>,
    %c0_27 = arith.constant 0 : index
    %c256 = arith.constant 256 : index
    %c0_28 = arith.constant 0 : index
    %33 = vector.load %arg1[%c0_27, %c256, %c0_28] : memref<2x512x32xbf16, #tpu.memory_space<vmem>>, vector<1x128x32xbf16>
    %34 = vector.shape_cast %33 : vector<1x128x32xbf16> to vector<128x32xbf16>
    %c0_29 = arith.constant 0 : index
    %c0_30 = arith.constant 0 : index
    %35 = vector.load %arg2[%c0_29, %c0_30] : memref<32x32xbf16, #tpu.memory_space<vmem>>, vector<32x32xbf16>
    %cst_31 = arith.constant dense<0.000000e+00> : vector<128x32xf32>
    %36 = tpu.matmul %34, %35, %cst_31 {dimension_numbers = #tpu.dot_dimension_numbers<[1], [0], [0], [1], [0, 0, 1, 1], [], []>} : vector<128x32xbf16>, vector<32x32xbf16>, vector<128x32xf32> -> vector<128x32xf32>
    %c0_32 = arith.constant 0 : index
    %c0_33 = arith.constant 0 : index
    %37 = vector.load %arg3[%c0_32, %c0_33] : memref<1x32xf32, #tpu.memory_space<vmem>>, vector<1x32xf32>
    %38 = vector.broadcast %37 : vector<1x32xf32> to vector<128x32xf32>
    %39 = arith.addf %36, %38 : vector<128x32xf32>
    %cst_34 = arith.constant 0.000000e+00 : f32
    %40 = vector.broadcast %cst_34 : f32 to vector<128x32xf32>
    %41 = arith.maximumf %39, %40 : vector<128x32xf32>
    %c256_35 = arith.constant 256 : index
    %c0_36 = arith.constant 0 : index
    %42 = vector.load %arg6[%c256_35, %c0_36] : memref<512x1xf32, #tpu.memory_space<vmem>>, vector<128x1xf32>
    %43 = vector.broadcast %42 : vector<128x1xf32> to vector<128x32xf32>
    %44 = arith.mulf %41, %43 : vector<128x32xf32>
    %c281 = arith.constant 281 : index
    %c0_37 = arith.constant 0 : index
    %45 = vector.load %arg9[%c281, %c0_37] : memref<560x96xf32, #tpu.memory_space<vmem>>, vector<128x32xf32>
    tpu.vector_store %arg9[%c281, %c0_37], %44 {strides = array<i32>} : memref<560x96xf32, #tpu.memory_space<vmem>>, vector<128x32xf32>,
    %c280 = arith.constant 280 : index
    %c32_38 = arith.constant 32 : index
    %46 = vector.load %arg9[%c280, %c32_38] : memref<560x96xf32, #tpu.memory_space<vmem>>, vector<128x32xf32>
    tpu.vector_store %arg9[%c280, %c32_38], %44 {strides = array<i32>} : memref<560x96xf32, #tpu.memory_space<vmem>>, vector<128x32xf32>,
    %c279 = arith.constant 279 : index
    %c64_39 = arith.constant 64 : index
    %47 = vector.load %arg9[%c279, %c64_39] : memref<560x96xf32, #tpu.memory_space<vmem>>, vector<128x32xf32>
    tpu.vector_store %arg9[%c279, %c64_39], %44 {strides = array<i32>} : memref<560x96xf32, #tpu.memory_space<vmem>>, vector<128x32xf32>,
    %c0_40 = arith.constant 0 : index
    %c384 = arith.constant 384 : index
    %c0_41 = arith.constant 0 : index
    %48 = vector.load %arg1[%c0_40, %c384, %c0_41] : memref<2x512x32xbf16, #tpu.memory_space<vmem>>, vector<1x128x32xbf16>
    %49 = vector.shape_cast %48 : vector<1x128x32xbf16> to vector<128x32xbf16>
    %c0_42 = arith.constant 0 : index
    %c0_43 = arith.constant 0 : index
    %50 = vector.load %arg2[%c0_42, %c0_43] : memref<32x32xbf16, #tpu.memory_space<vmem>>, vector<32x32xbf16>
    %cst_44 = arith.constant dense<0.000000e+00> : vector<128x32xf32>
    %51 = tpu.matmul %49, %50, %cst_44 {dimension_numbers = #tpu.dot_dimension_numbers<[1], [0], [0], [1], [0, 0, 1, 1], [], []>} : vector<128x32xbf16>, vector<32x32xbf16>, vector<128x32xf32> -> vector<128x32xf32>
    %c0_45 = arith.constant 0 : index
    %c0_46 = arith.constant 0 : index
    %52 = vector.load %arg3[%c0_45, %c0_46] : memref<1x32xf32, #tpu.memory_space<vmem>>, vector<1x32xf32>
    %53 = vector.broadcast %52 : vector<1x32xf32> to vector<128x32xf32>
    %54 = arith.addf %51, %53 : vector<128x32xf32>
    %cst_47 = arith.constant 0.000000e+00 : f32
    %55 = vector.broadcast %cst_47 : f32 to vector<128x32xf32>
    %56 = arith.maximumf %54, %55 : vector<128x32xf32>
    %c384_48 = arith.constant 384 : index
    %c0_49 = arith.constant 0 : index
    %57 = vector.load %arg6[%c384_48, %c0_49] : memref<512x1xf32, #tpu.memory_space<vmem>>, vector<128x1xf32>
    %58 = vector.broadcast %57 : vector<128x1xf32> to vector<128x32xf32>
    %59 = arith.mulf %56, %58 : vector<128x32xf32>
    %c409 = arith.constant 409 : index
    %c0_50 = arith.constant 0 : index
    %60 = vector.load %arg9[%c409, %c0_50] : memref<560x96xf32, #tpu.memory_space<vmem>>, vector<128x32xf32>
    tpu.vector_store %arg9[%c409, %c0_50], %59 {strides = array<i32>} : memref<560x96xf32, #tpu.memory_space<vmem>>, vector<128x32xf32>,
    %c408 = arith.constant 408 : index
    %c32_51 = arith.constant 32 : index
    %61 = vector.load %arg9[%c408, %c32_51] : memref<560x96xf32, #tpu.memory_space<vmem>>, vector<128x32xf32>
    tpu.vector_store %arg9[%c408, %c32_51], %59 {strides = array<i32>} : memref<560x96xf32, #tpu.memory_space<vmem>>, vector<128x32xf32>,
    %c407 = arith.constant 407 : index
    %c64_52 = arith.constant 64 : index
    %62 = vector.load %arg9[%c407, %c64_52] : memref<560x96xf32, #tpu.memory_space<vmem>>, vector<128x32xf32>
    tpu.vector_store %arg9[%c407, %c64_52], %59 {strides = array<i32>} : memref<560x96xf32, #tpu.memory_space<vmem>>, vector<128x32xf32>,
    %cst_53 = arith.constant 0.000000e+00 : f32
    %63 = vector.broadcast %cst_53 : f32 to vector<1x128xf32>
    %cst_54 = arith.constant 0.000000e+00 : f32
    %64 = vector.broadcast %cst_54 : f32 to vector<128x128xf32>
    %c0_55 = arith.constant 0 : index
    %c0_56 = arith.constant 0 : index
    %65 = vector.load %arg9[%c0_55, %c0_56] : memref<560x96xf32, #tpu.memory_space<vmem>>, vector<128x96xf32>
    %66 = arith.truncf %65 : vector<128x96xf32> to vector<128x96xbf16>
    %c0_57 = arith.constant 0 : index
    %c0_58 = arith.constant 0 : index
    %c0_59 = arith.constant 0 : index
    %67 = vector.load %arg4[%c0_57, %c0_58, %c0_59] : memref<3x96x128xbf16, #tpu.memory_space<vmem>>, vector<1x96x128xbf16>
    %68 = vector.shape_cast %67 : vector<1x96x128xbf16> to vector<96x128xbf16>
    %cst_60 = arith.constant dense<0.000000e+00> : vector<128x128xf32>
    %69 = tpu.matmul %66, %68, %cst_60 {dimension_numbers = #tpu.dot_dimension_numbers<[1], [0], [0], [1], [0, 0, 1, 1], [], []>} : vector<128x96xbf16>, vector<96x128xbf16>, vector<128x128xf32> -> vector<128x128xf32>
    %70 = arith.addf %64, %69 : vector<128x128xf32>
    %c24_61 = arith.constant 24 : index
    %c0_62 = arith.constant 0 : index
    %71 = vector.load %arg9[%c24_61, %c0_62] : memref<560x96xf32, #tpu.memory_space<vmem>>, vector<128x96xf32>
    %72 = arith.truncf %71 : vector<128x96xf32> to vector<128x96xbf16>
    %c1 = arith.constant 1 : index
    %c0_63 = arith.constant 0 : index
    %c0_64 = arith.constant 0 : index
    %73 = vector.load %arg4[%c1, %c0_63, %c0_64] : memref<3x96x128xbf16, #tpu.memory_space<vmem>>, vector<1x96x128xbf16>
    %74 = vector.shape_cast %73 : vector<1x96x128xbf16> to vector<96x128xbf16>
    %cst_65 = arith.constant dense<0.000000e+00> : vector<128x128xf32>
    %75 = tpu.matmul %72, %74, %cst_65 {dimension_numbers = #tpu.dot_dimension_numbers<[1], [0], [0], [1], [0, 0, 1, 1], [], []>} : vector<128x96xbf16>, vector<96x128xbf16>, vector<128x128xf32> -> vector<128x128xf32>
    %76 = arith.addf %70, %75 : vector<128x128xf32>
    %c48 = arith.constant 48 : index
    %c0_66 = arith.constant 0 : index
    %77 = vector.load %arg9[%c48, %c0_66] : memref<560x96xf32, #tpu.memory_space<vmem>>, vector<128x96xf32>
    %78 = arith.truncf %77 : vector<128x96xf32> to vector<128x96xbf16>
    %c2 = arith.constant 2 : index
    %c0_67 = arith.constant 0 : index
    %c0_68 = arith.constant 0 : index
    %79 = vector.load %arg4[%c2, %c0_67, %c0_68] : memref<3x96x128xbf16, #tpu.memory_space<vmem>>, vector<1x96x128xbf16>
    %80 = vector.shape_cast %79 : vector<1x96x128xbf16> to vector<96x128xbf16>
    %cst_69 = arith.constant dense<0.000000e+00> : vector<128x128xf32>
    %81 = tpu.matmul %78, %80, %cst_69 {dimension_numbers = #tpu.dot_dimension_numbers<[1], [0], [0], [1], [0, 0, 1, 1], [], []>} : vector<128x96xbf16>, vector<96x128xbf16>, vector<128x128xf32> -> vector<128x128xf32>
    %82 = arith.addf %76, %81 : vector<128x128xf32>
    %c0_70 = arith.constant 0 : index
    %c0_71 = arith.constant 0 : index
    %83 = vector.load %arg5[%c0_70, %c0_71] : memref<1x128xf32, #tpu.memory_space<vmem>>, vector<1x128xf32>
    %84 = vector.broadcast %83 : vector<1x128xf32> to vector<128x128xf32>
    %85 = arith.addf %82, %84 : vector<128x128xf32>
    %cst_72 = arith.constant 0.000000e+00 : f32
    %86 = vector.broadcast %cst_72 : f32 to vector<128x128xf32>
    %87 = arith.maximumf %85, %86 : vector<128x128xf32>
    %c0_73 = arith.constant 0 : index
    %c0_74 = arith.constant 0 : index
    %88 = vector.load %arg7[%c0_73, %c0_74] : memref<1x512xf32, #tpu.memory_space<vmem>>, vector<1x128xf32>
    %89 = arith.truncf %88 : vector<1x128xf32> to vector<1x128xbf16>
    %90 = arith.truncf %87 : vector<128x128xf32> to vector<128x128xbf16>
    %cst_75 = arith.constant dense<0.000000e+00> : vector<1x128xf32>
    %91 = tpu.matmul %89, %90, %cst_75 {dimension_numbers = #tpu.dot_dimension_numbers<[1], [0], [0], [1], [0, 0, 1, 1], [], []>} : vector<1x128xbf16>, vector<128x128xbf16>, vector<1x128xf32> -> vector<1x128xf32>
    %92 = arith.addf %63, %91 : vector<1x128xf32>
    %cst_76 = arith.constant 0.000000e+00 : f32
    %93 = vector.broadcast %cst_76 : f32 to vector<128x128xf32>
    %c128_77 = arith.constant 128 : index
    %c0_78 = arith.constant 0 : index
    %94 = vector.load %arg9[%c128_77, %c0_78] : memref<560x96xf32, #tpu.memory_space<vmem>>, vector<128x96xf32>
    %95 = arith.truncf %94 : vector<128x96xf32> to vector<128x96xbf16>
    %c0_79 = arith.constant 0 : index
    %c0_80 = arith.constant 0 : index
    %c0_81 = arith.constant 0 : index
    %96 = vector.load %arg4[%c0_79, %c0_80, %c0_81] : memref<3x96x128xbf16, #tpu.memory_space<vmem>>, vector<1x96x128xbf16>
    %97 = vector.shape_cast %96 : vector<1x96x128xbf16> to vector<96x128xbf16>
    %cst_82 = arith.constant dense<0.000000e+00> : vector<128x128xf32>
    %98 = tpu.matmul %95, %97, %cst_82 {dimension_numbers = #tpu.dot_dimension_numbers<[1], [0], [0], [1], [0, 0, 1, 1], [], []>} : vector<128x96xbf16>, vector<96x128xbf16>, vector<128x128xf32> -> vector<128x128xf32>
    %99 = arith.addf %93, %98 : vector<128x128xf32>
    %c152_83 = arith.constant 152 : index
    %c0_84 = arith.constant 0 : index
    %100 = vector.load %arg9[%c152_83, %c0_84] : memref<560x96xf32, #tpu.memory_space<vmem>>, vector<128x96xf32>
    %101 = arith.truncf %100 : vector<128x96xf32> to vector<128x96xbf16>
    %c1_85 = arith.constant 1 : index
    %c0_86 = arith.constant 0 : index
    %c0_87 = arith.constant 0 : index
    %102 = vector.load %arg4[%c1_85, %c0_86, %c0_87] : memref<3x96x128xbf16, #tpu.memory_space<vmem>>, vector<1x96x128xbf16>
    %103 = vector.shape_cast %102 : vector<1x96x128xbf16> to vector<96x128xbf16>
    %cst_88 = arith.constant dense<0.000000e+00> : vector<128x128xf32>
    %104 = tpu.matmul %101, %103, %cst_88 {dimension_numbers = #tpu.dot_dimension_numbers<[1], [0], [0], [1], [0, 0, 1, 1], [], []>} : vector<128x96xbf16>, vector<96x128xbf16>, vector<128x128xf32> -> vector<128x128xf32>
    %105 = arith.addf %99, %104 : vector<128x128xf32>
    %c176 = arith.constant 176 : index
    %c0_89 = arith.constant 0 : index
    %106 = vector.load %arg9[%c176, %c0_89] : memref<560x96xf32, #tpu.memory_space<vmem>>, vector<128x96xf32>
    %107 = arith.truncf %106 : vector<128x96xf32> to vector<128x96xbf16>
    %c2_90 = arith.constant 2 : index
    %c0_91 = arith.constant 0 : index
    %c0_92 = arith.constant 0 : index
    %108 = vector.load %arg4[%c2_90, %c0_91, %c0_92] : memref<3x96x128xbf16, #tpu.memory_space<vmem>>, vector<1x96x128xbf16>
    %109 = vector.shape_cast %108 : vector<1x96x128xbf16> to vector<96x128xbf16>
    %cst_93 = arith.constant dense<0.000000e+00> : vector<128x128xf32>
    %110 = tpu.matmul %107, %109, %cst_93 {dimension_numbers = #tpu.dot_dimension_numbers<[1], [0], [0], [1], [0, 0, 1, 1], [], []>} : vector<128x96xbf16>, vector<96x128xbf16>, vector<128x128xf32> -> vector<128x128xf32>
    %111 = arith.addf %105, %110 : vector<128x128xf32>
    %c0_94 = arith.constant 0 : index
    %c0_95 = arith.constant 0 : index
    %112 = vector.load %arg5[%c0_94, %c0_95] : memref<1x128xf32, #tpu.memory_space<vmem>>, vector<1x128xf32>
    %113 = vector.broadcast %112 : vector<1x128xf32> to vector<128x128xf32>
    %114 = arith.addf %111, %113 : vector<128x128xf32>
    %cst_96 = arith.constant 0.000000e+00 : f32
    %115 = vector.broadcast %cst_96 : f32 to vector<128x128xf32>
    %116 = arith.maximumf %114, %115 : vector<128x128xf32>
    %c0_97 = arith.constant 0 : index
    %c128_98 = arith.constant 128 : index
    %117 = vector.load %arg7[%c0_97, %c128_98] : memref<1x512xf32, #tpu.memory_space<vmem>>, vector<1x128xf32>
    %118 = arith.truncf %117 : vector<1x128xf32> to vector<1x128xbf16>
    %119 = arith.truncf %116 : vector<128x128xf32> to vector<128x128xbf16>
    %cst_99 = arith.constant dense<0.000000e+00> : vector<1x128xf32>
    %120 = tpu.matmul %118, %119, %cst_99 {dimension_numbers = #tpu.dot_dimension_numbers<[1], [0], [0], [1], [0, 0, 1, 1], [], []>} : vector<1x128xbf16>, vector<128x128xbf16>, vector<1x128xf32> -> vector<1x128xf32>
    %121 = arith.addf %92, %120 : vector<1x128xf32>
    %cst_100 = arith.constant 0.000000e+00 : f32
    %122 = vector.broadcast %cst_100 : f32 to vector<128x128xf32>
    %c256_101 = arith.constant 256 : index
    %c0_102 = arith.constant 0 : index
    %123 = vector.load %arg9[%c256_101, %c0_102] : memref<560x96xf32, #tpu.memory_space<vmem>>, vector<128x96xf32>
    %124 = arith.truncf %123 : vector<128x96xf32> to vector<128x96xbf16>
    %c0_103 = arith.constant 0 : index
    %c0_104 = arith.constant 0 : index
    %c0_105 = arith.constant 0 : index
    %125 = vector.load %arg4[%c0_103, %c0_104, %c0_105] : memref<3x96x128xbf16, #tpu.memory_space<vmem>>, vector<1x96x128xbf16>
    %126 = vector.shape_cast %125 : vector<1x96x128xbf16> to vector<96x128xbf16>
    %cst_106 = arith.constant dense<0.000000e+00> : vector<128x128xf32>
    %127 = tpu.matmul %124, %126, %cst_106 {dimension_numbers = #tpu.dot_dimension_numbers<[1], [0], [0], [1], [0, 0, 1, 1], [], []>} : vector<128x96xbf16>, vector<96x128xbf16>, vector<128x128xf32> -> vector<128x128xf32>
    %128 = arith.addf %122, %127 : vector<128x128xf32>
    %c280_107 = arith.constant 280 : index
    %c0_108 = arith.constant 0 : index
    %129 = vector.load %arg9[%c280_107, %c0_108] : memref<560x96xf32, #tpu.memory_space<vmem>>, vector<128x96xf32>
    %130 = arith.truncf %129 : vector<128x96xf32> to vector<128x96xbf16>
    %c1_109 = arith.constant 1 : index
    %c0_110 = arith.constant 0 : index
    %c0_111 = arith.constant 0 : index
    %131 = vector.load %arg4[%c1_109, %c0_110, %c0_111] : memref<3x96x128xbf16, #tpu.memory_space<vmem>>, vector<1x96x128xbf16>
    %132 = vector.shape_cast %131 : vector<1x96x128xbf16> to vector<96x128xbf16>
    %cst_112 = arith.constant dense<0.000000e+00> : vector<128x128xf32>
    %133 = tpu.matmul %130, %132, %cst_112 {dimension_numbers = #tpu.dot_dimension_numbers<[1], [0], [0], [1], [0, 0, 1, 1], [], []>} : vector<128x96xbf16>, vector<96x128xbf16>, vector<128x128xf32> -> vector<128x128xf32>
    %134 = arith.addf %128, %133 : vector<128x128xf32>
    %c304 = arith.constant 304 : index
    %c0_113 = arith.constant 0 : index
    %135 = vector.load %arg9[%c304, %c0_113] : memref<560x96xf32, #tpu.memory_space<vmem>>, vector<128x96xf32>
    %136 = arith.truncf %135 : vector<128x96xf32> to vector<128x96xbf16>
    %c2_114 = arith.constant 2 : index
    %c0_115 = arith.constant 0 : index
    %c0_116 = arith.constant 0 : index
    %137 = vector.load %arg4[%c2_114, %c0_115, %c0_116] : memref<3x96x128xbf16, #tpu.memory_space<vmem>>, vector<1x96x128xbf16>
    %138 = vector.shape_cast %137 : vector<1x96x128xbf16> to vector<96x128xbf16>
    %cst_117 = arith.constant dense<0.000000e+00> : vector<128x128xf32>
    %139 = tpu.matmul %136, %138, %cst_117 {dimension_numbers = #tpu.dot_dimension_numbers<[1], [0], [0], [1], [0, 0, 1, 1], [], []>} : vector<128x96xbf16>, vector<96x128xbf16>, vector<128x128xf32> -> vector<128x128xf32>
    %140 = arith.addf %134, %139 : vector<128x128xf32>
    %c0_118 = arith.constant 0 : index
    %c0_119 = arith.constant 0 : index
    %141 = vector.load %arg5[%c0_118, %c0_119] : memref<1x128xf32, #tpu.memory_space<vmem>>, vector<1x128xf32>
    %142 = vector.broadcast %141 : vector<1x128xf32> to vector<128x128xf32>
    %143 = arith.addf %140, %142 : vector<128x128xf32>
    %cst_120 = arith.constant 0.000000e+00 : f32
    %144 = vector.broadcast %cst_120 : f32 to vector<128x128xf32>
    %145 = arith.maximumf %143, %144 : vector<128x128xf32>
    %c0_121 = arith.constant 0 : index
    %c256_122 = arith.constant 256 : index
    %146 = vector.load %arg7[%c0_121, %c256_122] : memref<1x512xf32, #tpu.memory_space<vmem>>, vector<1x128xf32>
    %147 = arith.truncf %146 : vector<1x128xf32> to vector<1x128xbf16>
    %148 = arith.truncf %145 : vector<128x128xf32> to vector<128x128xbf16>
    %cst_123 = arith.constant dense<0.000000e+00> : vector<1x128xf32>
    %149 = tpu.matmul %147, %148, %cst_123 {dimension_numbers = #tpu.dot_dimension_numbers<[1], [0], [0], [1], [0, 0, 1, 1], [], []>} : vector<1x128xbf16>, vector<128x128xbf16>, vector<1x128xf32> -> vector<1x128xf32>
    %150 = arith.addf %121, %149 : vector<1x128xf32>
    %cst_124 = arith.constant 0.000000e+00 : f32
    %151 = vector.broadcast %cst_124 : f32 to vector<128x128xf32>
    %c384_125 = arith.constant 384 : index
    %c0_126 = arith.constant 0 : index
    %152 = vector.load %arg9[%c384_125, %c0_126] : memref<560x96xf32, #tpu.memory_space<vmem>>, vector<128x96xf32>
    %153 = arith.truncf %152 : vector<128x96xf32> to vector<128x96xbf16>
    %c0_127 = arith.constant 0 : index
    %c0_128 = arith.constant 0 : index
    %c0_129 = arith.constant 0 : index
    %154 = vector.load %arg4[%c0_127, %c0_128, %c0_129] : memref<3x96x128xbf16, #tpu.memory_space<vmem>>, vector<1x96x128xbf16>
    %155 = vector.shape_cast %154 : vector<1x96x128xbf16> to vector<96x128xbf16>
    %cst_130 = arith.constant dense<0.000000e+00> : vector<128x128xf32>
    %156 = tpu.matmul %153, %155, %cst_130 {dimension_numbers = #tpu.dot_dimension_numbers<[1], [0], [0], [1], [0, 0, 1, 1], [], []>} : vector<128x96xbf16>, vector<96x128xbf16>, vector<128x128xf32> -> vector<128x128xf32>
    %157 = arith.addf %151, %156 : vector<128x128xf32>
    %c408_131 = arith.constant 408 : index
    %c0_132 = arith.constant 0 : index
    %158 = vector.load %arg9[%c408_131, %c0_132] : memref<560x96xf32, #tpu.memory_space<vmem>>, vector<128x96xf32>
    %159 = arith.truncf %158 : vector<128x96xf32> to vector<128x96xbf16>
    %c1_133 = arith.constant 1 : index
    %c0_134 = arith.constant 0 : index
    %c0_135 = arith.constant 0 : index
    %160 = vector.load %arg4[%c1_133, %c0_134, %c0_135] : memref<3x96x128xbf16, #tpu.memory_space<vmem>>, vector<1x96x128xbf16>
    %161 = vector.shape_cast %160 : vector<1x96x128xbf16> to vector<96x128xbf16>
    %cst_136 = arith.constant dense<0.000000e+00> : vector<128x128xf32>
    %162 = tpu.matmul %159, %161, %cst_136 {dimension_numbers = #tpu.dot_dimension_numbers<[1], [0], [0], [1], [0, 0, 1, 1], [], []>} : vector<128x96xbf16>, vector<96x128xbf16>, vector<128x128xf32> -> vector<128x128xf32>
    %163 = arith.addf %157, %162 : vector<128x128xf32>
    %c432 = arith.constant 432 : index
    %c0_137 = arith.constant 0 : index
    %164 = vector.load %arg9[%c432, %c0_137] : memref<560x96xf32, #tpu.memory_space<vmem>>, vector<128x96xf32>
    %165 = arith.truncf %164 : vector<128x96xf32> to vector<128x96xbf16>
    %c2_138 = arith.constant 2 : index
    %c0_139 = arith.constant 0 : index
    %c0_140 = arith.constant 0 : index
    %166 = vector.load %arg4[%c2_138, %c0_139, %c0_140] : memref<3x96x128xbf16, #tpu.memory_space<vmem>>, vector<1x96x128xbf16>
    %167 = vector.shape_cast %166 : vector<1x96x128xbf16> to vector<96x128xbf16>
    %cst_141 = arith.constant dense<0.000000e+00> : vector<128x128xf32>
    %168 = tpu.matmul %165, %167, %cst_141 {dimension_numbers = #tpu.dot_dimension_numbers<[1], [0], [0], [1], [0, 0, 1, 1], [], []>} : vector<128x96xbf16>, vector<96x128xbf16>, vector<128x128xf32> -> vector<128x128xf32>
    %169 = arith.addf %163, %168 : vector<128x128xf32>
    %c0_142 = arith.constant 0 : index
    %c0_143 = arith.constant 0 : index
    %170 = vector.load %arg5[%c0_142, %c0_143] : memref<1x128xf32, #tpu.memory_space<vmem>>, vector<1x128xf32>
    %171 = vector.broadcast %170 : vector<1x128xf32> to vector<128x128xf32>
    %172 = arith.addf %169, %171 : vector<128x128xf32>
    %cst_144 = arith.constant 0.000000e+00 : f32
    %173 = vector.broadcast %cst_144 : f32 to vector<128x128xf32>
    %174 = arith.maximumf %172, %173 : vector<128x128xf32>
    %c0_145 = arith.constant 0 : index
    %c384_146 = arith.constant 384 : index
    %175 = vector.load %arg7[%c0_145, %c384_146] : memref<1x512xf32, #tpu.memory_space<vmem>>, vector<1x128xf32>
    %176 = arith.truncf %175 : vector<1x128xf32> to vector<1x128xbf16>
    %177 = arith.truncf %174 : vector<128x128xf32> to vector<128x128xbf16>
    %cst_147 = arith.constant dense<0.000000e+00> : vector<1x128xf32>
    %178 = tpu.matmul %176, %177, %cst_147 {dimension_numbers = #tpu.dot_dimension_numbers<[1], [0], [0], [1], [0, 0, 1, 1], [], []>} : vector<1x128xbf16>, vector<128x128xbf16>, vector<1x128xf32> -> vector<1x128xf32>
    %179 = arith.addf %150, %178 : vector<1x128xf32>
    %cst_148 = arith.constant 3.906250e-03 : f32
    %180 = vector.broadcast %cst_148 : f32 to vector<1x128xf32>
    %181 = arith.mulf %179, %180 : vector<1x128xf32>
    %c0_149 = arith.constant 0 : index
    %c0_150 = arith.constant 0 : index
    %c0_151 = arith.constant 0 : index
    %182 = vector.load %arg8[%c0_149, %c0_150, %c0_151] : memref<2x1x128xf32, #tpu.memory_space<vmem>>, vector<1x1x128xf32>
    %183 = vector.shape_cast %182 : vector<1x1x128xf32> to vector<1x128xf32>
    %184 = vector.shape_cast %181 : vector<1x128xf32> to vector<1x1x128xf32>
    tpu.vector_store %arg8[%c0_149, %c0_150, %c0_151], %184 {strides = array<i32>} : memref<2x1x128xf32, #tpu.memory_space<vmem>>, vector<1x1x128xf32>,
    %c1_152 = arith.constant 1 : index
    %c0_153 = arith.constant 0 : index
    %c0_154 = arith.constant 0 : index
    %185 = vector.load %arg1[%c1_152, %c0_153, %c0_154] : memref<2x512x32xbf16, #tpu.memory_space<vmem>>, vector<1x128x32xbf16>
    %186 = vector.shape_cast %185 : vector<1x128x32xbf16> to vector<128x32xbf16>
    %c0_155 = arith.constant 0 : index
    %c0_156 = arith.constant 0 : index
    %187 = vector.load %arg2[%c0_155, %c0_156] : memref<32x32xbf16, #tpu.memory_space<vmem>>, vector<32x32xbf16>
    %cst_157 = arith.constant dense<0.000000e+00> : vector<128x32xf32>
    %188 = tpu.matmul %186, %187, %cst_157 {dimension_numbers = #tpu.dot_dimension_numbers<[1], [0], [0], [1], [0, 0, 1, 1], [], []>} : vector<128x32xbf16>, vector<32x32xbf16>, vector<128x32xf32> -> vector<128x32xf32>
    %c0_158 = arith.constant 0 : index
    %c0_159 = arith.constant 0 : index
    %189 = vector.load %arg3[%c0_158, %c0_159] : memref<1x32xf32, #tpu.memory_space<vmem>>, vector<1x32xf32>
    %190 = vector.broadcast %189 : vector<1x32xf32> to vector<128x32xf32>
    %191 = arith.addf %188, %190 : vector<128x32xf32>
    %cst_160 = arith.constant 0.000000e+00 : f32
    %192 = vector.broadcast %cst_160 : f32 to vector<128x32xf32>
    %193 = arith.maximumf %191, %192 : vector<128x32xf32>
    %c0_161 = arith.constant 0 : index
    %c0_162 = arith.constant 0 : index
    %194 = vector.load %arg6[%c0_161, %c0_162] : memref<512x1xf32, #tpu.memory_space<vmem>>, vector<128x1xf32>
    %195 = vector.broadcast %194 : vector<128x1xf32> to vector<128x32xf32>
    %196 = arith.mulf %193, %195 : vector<128x32xf32>
    %c25_163 = arith.constant 25 : index
    %c0_164 = arith.constant 0 : index
    %197 = vector.load %arg9[%c25_163, %c0_164] : memref<560x96xf32, #tpu.memory_space<vmem>>, vector<128x32xf32>
    tpu.vector_store %arg9[%c25_163, %c0_164], %196 {strides = array<i32>} : memref<560x96xf32, #tpu.memory_space<vmem>>, vector<128x32xf32>,
    %c24_165 = arith.constant 24 : index
    %c32_166 = arith.constant 32 : index
    %198 = vector.load %arg9[%c24_165, %c32_166] : memref<560x96xf32, #tpu.memory_space<vmem>>, vector<128x32xf32>
    tpu.vector_store %arg9[%c24_165, %c32_166], %196 {strides = array<i32>} : memref<560x96xf32, #tpu.memory_space<vmem>>, vector<128x32xf32>,
    %c23_167 = arith.constant 23 : index
    %c64_168 = arith.constant 64 : index
    %199 = vector.load %arg9[%c23_167, %c64_168] : memref<560x96xf32, #tpu.memory_space<vmem>>, vector<128x32xf32>
    tpu.vector_store %arg9[%c23_167, %c64_168], %196 {strides = array<i32>} : memref<560x96xf32, #tpu.memory_space<vmem>>, vector<128x32xf32>,
    %c1_169 = arith.constant 1 : index
    %c128_170 = arith.constant 128 : index
    %c0_171 = arith.constant 0 : index
    %200 = vector.load %arg1[%c1_169, %c128_170, %c0_171] : memref<2x512x32xbf16, #tpu.memory_space<vmem>>, vector<1x128x32xbf16>
    %201 = vector.shape_cast %200 : vector<1x128x32xbf16> to vector<128x32xbf16>
    %c0_172 = arith.constant 0 : index
    %c0_173 = arith.constant 0 : index
    %202 = vector.load %arg2[%c0_172, %c0_173] : memref<32x32xbf16, #tpu.memory_space<vmem>>, vector<32x32xbf16>
    %cst_174 = arith.constant dense<0.000000e+00> : vector<128x32xf32>
    %203 = tpu.matmul %201, %202, %cst_174 {dimension_numbers = #tpu.dot_dimension_numbers<[1], [0], [0], [1], [0, 0, 1, 1], [], []>} : vector<128x32xbf16>, vector<32x32xbf16>, vector<128x32xf32> -> vector<128x32xf32>
    %c0_175 = arith.constant 0 : index
    %c0_176 = arith.constant 0 : index
    %204 = vector.load %arg3[%c0_175, %c0_176] : memref<1x32xf32, #tpu.memory_space<vmem>>, vector<1x32xf32>
    %205 = vector.broadcast %204 : vector<1x32xf32> to vector<128x32xf32>
    %206 = arith.addf %203, %205 : vector<128x32xf32>
    %cst_177 = arith.constant 0.000000e+00 : f32
    %207 = vector.broadcast %cst_177 : f32 to vector<128x32xf32>
    %208 = arith.maximumf %206, %207 : vector<128x32xf32>
    %c128_178 = arith.constant 128 : index
    %c0_179 = arith.constant 0 : index
    %209 = vector.load %arg6[%c128_178, %c0_179] : memref<512x1xf32, #tpu.memory_space<vmem>>, vector<128x1xf32>
    %210 = vector.broadcast %209 : vector<128x1xf32> to vector<128x32xf32>
    %211 = arith.mulf %208, %210 : vector<128x32xf32>
    %c153_180 = arith.constant 153 : index
    %c0_181 = arith.constant 0 : index
    %212 = vector.load %arg9[%c153_180, %c0_181] : memref<560x96xf32, #tpu.memory_space<vmem>>, vector<128x32xf32>
    tpu.vector_store %arg9[%c153_180, %c0_181], %211 {strides = array<i32>} : memref<560x96xf32, #tpu.memory_space<vmem>>, vector<128x32xf32>,
    %c152_182 = arith.constant 152 : index
    %c32_183 = arith.constant 32 : index
    %213 = vector.load %arg9[%c152_182, %c32_183] : memref<560x96xf32, #tpu.memory_space<vmem>>, vector<128x32xf32>
    tpu.vector_store %arg9[%c152_182, %c32_183], %211 {strides = array<i32>} : memref<560x96xf32, #tpu.memory_space<vmem>>, vector<128x32xf32>,
    %c151_184 = arith.constant 151 : index
    %c64_185 = arith.constant 64 : index
    %214 = vector.load %arg9[%c151_184, %c64_185] : memref<560x96xf32, #tpu.memory_space<vmem>>, vector<128x32xf32>
    tpu.vector_store %arg9[%c151_184, %c64_185], %211 {strides = array<i32>} : memref<560x96xf32, #tpu.memory_space<vmem>>, vector<128x32xf32>,
    %c1_186 = arith.constant 1 : index
    %c256_187 = arith.constant 256 : index
    %c0_188 = arith.constant 0 : index
    %215 = vector.load %arg1[%c1_186, %c256_187, %c0_188] : memref<2x512x32xbf16, #tpu.memory_space<vmem>>, vector<1x128x32xbf16>
    %216 = vector.shape_cast %215 : vector<1x128x32xbf16> to vector<128x32xbf16>
    %c0_189 = arith.constant 0 : index
    %c0_190 = arith.constant 0 : index
    %217 = vector.load %arg2[%c0_189, %c0_190] : memref<32x32xbf16, #tpu.memory_space<vmem>>, vector<32x32xbf16>
    %cst_191 = arith.constant dense<0.000000e+00> : vector<128x32xf32>
    %218 = tpu.matmul %216, %217, %cst_191 {dimension_numbers = #tpu.dot_dimension_numbers<[1], [0], [0], [1], [0, 0, 1, 1], [], []>} : vector<128x32xbf16>, vector<32x32xbf16>, vector<128x32xf32> -> vector<128x32xf32>
    %c0_192 = arith.constant 0 : index
    %c0_193 = arith.constant 0 : index
    %219 = vector.load %arg3[%c0_192, %c0_193] : memref<1x32xf32, #tpu.memory_space<vmem>>, vector<1x32xf32>
    %220 = vector.broadcast %219 : vector<1x32xf32> to vector<128x32xf32>
    %221 = arith.addf %218, %220 : vector<128x32xf32>
    %cst_194 = arith.constant 0.000000e+00 : f32
    %222 = vector.broadcast %cst_194 : f32 to vector<128x32xf32>
    %223 = arith.maximumf %221, %222 : vector<128x32xf32>
    %c256_195 = arith.constant 256 : index
    %c0_196 = arith.constant 0 : index
    %224 = vector.load %arg6[%c256_195, %c0_196] : memref<512x1xf32, #tpu.memory_space<vmem>>, vector<128x1xf32>
    %225 = vector.broadcast %224 : vector<128x1xf32> to vector<128x32xf32>
    %226 = arith.mulf %223, %225 : vector<128x32xf32>
    %c281_197 = arith.constant 281 : index
    %c0_198 = arith.constant 0 : index
    %227 = vector.load %arg9[%c281_197, %c0_198] : memref<560x96xf32, #tpu.memory_space<vmem>>, vector<128x32xf32>
    tpu.vector_store %arg9[%c281_197, %c0_198], %226 {strides = array<i32>} : memref<560x96xf32, #tpu.memory_space<vmem>>, vector<128x32xf32>,
    %c280_199 = arith.constant 280 : index
    %c32_200 = arith.constant 32 : index
    %228 = vector.load %arg9[%c280_199, %c32_200] : memref<560x96xf32, #tpu.memory_space<vmem>>, vector<128x32xf32>
    tpu.vector_store %arg9[%c280_199, %c32_200], %226 {strides = array<i32>} : memref<560x96xf32, #tpu.memory_space<vmem>>, vector<128x32xf32>,
    %c279_201 = arith.constant 279 : index
    %c64_202 = arith.constant 64 : index
    %229 = vector.load %arg9[%c279_201, %c64_202] : memref<560x96xf32, #tpu.memory_space<vmem>>, vector<128x32xf32>
    tpu.vector_store %arg9[%c279_201, %c64_202], %226 {strides = array<i32>} : memref<560x96xf32, #tpu.memory_space<vmem>>, vector<128x32xf32>,
    %c1_203 = arith.constant 1 : index
    %c384_204 = arith.constant 384 : index
    %c0_205 = arith.constant 0 : index
    %230 = vector.load %arg1[%c1_203, %c384_204, %c0_205] : memref<2x512x32xbf16, #tpu.memory_space<vmem>>, vector<1x128x32xbf16>
    %231 = vector.shape_cast %230 : vector<1x128x32xbf16> to vector<128x32xbf16>
    %c0_206 = arith.constant 0 : index
    %c0_207 = arith.constant 0 : index
    %232 = vector.load %arg2[%c0_206, %c0_207] : memref<32x32xbf16, #tpu.memory_space<vmem>>, vector<32x32xbf16>
    %cst_208 = arith.constant dense<0.000000e+00> : vector<128x32xf32>
    %233 = tpu.matmul %231, %232, %cst_208 {dimension_numbers = #tpu.dot_dimension_numbers<[1], [0], [0], [1], [0, 0, 1, 1], [], []>} : vector<128x32xbf16>, vector<32x32xbf16>, vector<128x32xf32> -> vector<128x32xf32>
    %c0_209 = arith.constant 0 : index
    %c0_210 = arith.constant 0 : index
    %234 = vector.load %arg3[%c0_209, %c0_210] : memref<1x32xf32, #tpu.memory_space<vmem>>, vector<1x32xf32>
    %235 = vector.broadcast %234 : vector<1x32xf32> to vector<128x32xf32>
    %236 = arith.addf %233, %235 : vector<128x32xf32>
    %cst_211 = arith.constant 0.000000e+00 : f32
    %237 = vector.broadcast %cst_211 : f32 to vector<128x32xf32>
    %238 = arith.maximumf %236, %237 : vector<128x32xf32>
    %c384_212 = arith.constant 384 : index
    %c0_213 = arith.constant 0 : index
    %239 = vector.load %arg6[%c384_212, %c0_213] : memref<512x1xf32, #tpu.memory_space<vmem>>, vector<128x1xf32>
    %240 = vector.broadcast %239 : vector<128x1xf32> to vector<128x32xf32>
    %241 = arith.mulf %238, %240 : vector<128x32xf32>
    %c409_214 = arith.constant 409 : index
    %c0_215 = arith.constant 0 : index
    %242 = vector.load %arg9[%c409_214, %c0_215] : memref<560x96xf32, #tpu.memory_space<vmem>>, vector<128x32xf32>
    tpu.vector_store %arg9[%c409_214, %c0_215], %241 {strides = array<i32>} : memref<560x96xf32, #tpu.memory_space<vmem>>, vector<128x32xf32>,
    %c408_216 = arith.constant 408 : index
    %c32_217 = arith.constant 32 : index
    %243 = vector.load %arg9[%c408_216, %c32_217] : memref<560x96xf32, #tpu.memory_space<vmem>>, vector<128x32xf32>
    tpu.vector_store %arg9[%c408_216, %c32_217], %241 {strides = array<i32>} : memref<560x96xf32, #tpu.memory_space<vmem>>, vector<128x32xf32>,
    %c407_218 = arith.constant 407 : index
    %c64_219 = arith.constant 64 : index
    %244 = vector.load %arg9[%c407_218, %c64_219] : memref<560x96xf32, #tpu.memory_space<vmem>>, vector<128x32xf32>
    tpu.vector_store %arg9[%c407_218, %c64_219], %241 {strides = array<i32>} : memref<560x96xf32, #tpu.memory_space<vmem>>, vector<128x32xf32>,
    %cst_220 = arith.constant 0.000000e+00 : f32
    %245 = vector.broadcast %cst_220 : f32 to vector<1x128xf32>
    %cst_221 = arith.constant 0.000000e+00 : f32
    %246 = vector.broadcast %cst_221 : f32 to vector<128x128xf32>
    %c0_222 = arith.constant 0 : index
    %c0_223 = arith.constant 0 : index
    %247 = vector.load %arg9[%c0_222, %c0_223] : memref<560x96xf32, #tpu.memory_space<vmem>>, vector<128x96xf32>
    %248 = arith.truncf %247 : vector<128x96xf32> to vector<128x96xbf16>
    %c0_224 = arith.constant 0 : index
    %c0_225 = arith.constant 0 : index
    %c0_226 = arith.constant 0 : index
    %249 = vector.load %arg4[%c0_224, %c0_225, %c0_226] : memref<3x96x128xbf16, #tpu.memory_space<vmem>>, vector<1x96x128xbf16>
    %250 = vector.shape_cast %249 : vector<1x96x128xbf16> to vector<96x128xbf16>
    %cst_227 = arith.constant dense<0.000000e+00> : vector<128x128xf32>
    %251 = tpu.matmul %248, %250, %cst_227 {dimension_numbers = #tpu.dot_dimension_numbers<[1], [0], [0], [1], [0, 0, 1, 1], [], []>} : vector<128x96xbf16>, vector<96x128xbf16>, vector<128x128xf32> -> vector<128x128xf32>
    %252 = arith.addf %246, %251 : vector<128x128xf32>
    %c24_228 = arith.constant 24 : index
    %c0_229 = arith.constant 0 : index
    %253 = vector.load %arg9[%c24_228, %c0_229] : memref<560x96xf32, #tpu.memory_space<vmem>>, vector<128x96xf32>
    %254 = arith.truncf %253 : vector<128x96xf32> to vector<128x96xbf16>
    %c1_230 = arith.constant 1 : index
    %c0_231 = arith.constant 0 : index
    %c0_232 = arith.constant 0 : index
    %255 = vector.load %arg4[%c1_230, %c0_231, %c0_232] : memref<3x96x128xbf16, #tpu.memory_space<vmem>>, vector<1x96x128xbf16>
    %256 = vector.shape_cast %255 : vector<1x96x128xbf16> to vector<96x128xbf16>
    %cst_233 = arith.constant dense<0.000000e+00> : vector<128x128xf32>
    %257 = tpu.matmul %254, %256, %cst_233 {dimension_numbers = #tpu.dot_dimension_numbers<[1], [0], [0], [1], [0, 0, 1, 1], [], []>} : vector<128x96xbf16>, vector<96x128xbf16>, vector<128x128xf32> -> vector<128x128xf32>
    %258 = arith.addf %252, %257 : vector<128x128xf32>
    %c48_234 = arith.constant 48 : index
    %c0_235 = arith.constant 0 : index
    %259 = vector.load %arg9[%c48_234, %c0_235] : memref<560x96xf32, #tpu.memory_space<vmem>>, vector<128x96xf32>
    %260 = arith.truncf %259 : vector<128x96xf32> to vector<128x96xbf16>
    %c2_236 = arith.constant 2 : index
    %c0_237 = arith.constant 0 : index
    %c0_238 = arith.constant 0 : index
    %261 = vector.load %arg4[%c2_236, %c0_237, %c0_238] : memref<3x96x128xbf16, #tpu.memory_space<vmem>>, vector<1x96x128xbf16>
    %262 = vector.shape_cast %261 : vector<1x96x128xbf16> to vector<96x128xbf16>
    %cst_239 = arith.constant dense<0.000000e+00> : vector<128x128xf32>
    %263 = tpu.matmul %260, %262, %cst_239 {dimension_numbers = #tpu.dot_dimension_numbers<[1], [0], [0], [1], [0, 0, 1, 1], [], []>} : vector<128x96xbf16>, vector<96x128xbf16>, vector<128x128xf32> -> vector<128x128xf32>
    %264 = arith.addf %258, %263 : vector<128x128xf32>
    %c0_240 = arith.constant 0 : index
    %c0_241 = arith.constant 0 : index
    %265 = vector.load %arg5[%c0_240, %c0_241] : memref<1x128xf32, #tpu.memory_space<vmem>>, vector<1x128xf32>
    %266 = vector.broadcast %265 : vector<1x128xf32> to vector<128x128xf32>
    %267 = arith.addf %264, %266 : vector<128x128xf32>
    %cst_242 = arith.constant 0.000000e+00 : f32
    %268 = vector.broadcast %cst_242 : f32 to vector<128x128xf32>
    %269 = arith.maximumf %267, %268 : vector<128x128xf32>
    %c0_243 = arith.constant 0 : index
    %c0_244 = arith.constant 0 : index
    %270 = vector.load %arg7[%c0_243, %c0_244] : memref<1x512xf32, #tpu.memory_space<vmem>>, vector<1x128xf32>
    %271 = arith.truncf %270 : vector<1x128xf32> to vector<1x128xbf16>
    %272 = arith.truncf %269 : vector<128x128xf32> to vector<128x128xbf16>
    %cst_245 = arith.constant dense<0.000000e+00> : vector<1x128xf32>
    %273 = tpu.matmul %271, %272, %cst_245 {dimension_numbers = #tpu.dot_dimension_numbers<[1], [0], [0], [1], [0, 0, 1, 1], [], []>} : vector<1x128xbf16>, vector<128x128xbf16>, vector<1x128xf32> -> vector<1x128xf32>
    %274 = arith.addf %245, %273 : vector<1x128xf32>
    %cst_246 = arith.constant 0.000000e+00 : f32
    %275 = vector.broadcast %cst_246 : f32 to vector<128x128xf32>
    %c128_247 = arith.constant 128 : index
    %c0_248 = arith.constant 0 : index
    %276 = vector.load %arg9[%c128_247, %c0_248] : memref<560x96xf32, #tpu.memory_space<vmem>>, vector<128x96xf32>
    %277 = arith.truncf %276 : vector<128x96xf32> to vector<128x96xbf16>
    %c0_249 = arith.constant 0 : index
    %c0_250 = arith.constant 0 : index
    %c0_251 = arith.constant 0 : index
    %278 = vector.load %arg4[%c0_249, %c0_250, %c0_251] : memref<3x96x128xbf16, #tpu.memory_space<vmem>>, vector<1x96x128xbf16>
    %279 = vector.shape_cast %278 : vector<1x96x128xbf16> to vector<96x128xbf16>
    %cst_252 = arith.constant dense<0.000000e+00> : vector<128x128xf32>
    %280 = tpu.matmul %277, %279, %cst_252 {dimension_numbers = #tpu.dot_dimension_numbers<[1], [0], [0], [1], [0, 0, 1, 1], [], []>} : vector<128x96xbf16>, vector<96x128xbf16>, vector<128x128xf32> -> vector<128x128xf32>
    %281 = arith.addf %275, %280 : vector<128x128xf32>
    %c152_253 = arith.constant 152 : index
    %c0_254 = arith.constant 0 : index
    %282 = vector.load %arg9[%c152_253, %c0_254] : memref<560x96xf32, #tpu.memory_space<vmem>>, vector<128x96xf32>
    %283 = arith.truncf %282 : vector<128x96xf32> to vector<128x96xbf16>
    %c1_255 = arith.constant 1 : index
    %c0_256 = arith.constant 0 : index
    %c0_257 = arith.constant 0 : index
    %284 = vector.load %arg4[%c1_255, %c0_256, %c0_257] : memref<3x96x128xbf16, #tpu.memory_space<vmem>>, vector<1x96x128xbf16>
    %285 = vector.shape_cast %284 : vector<1x96x128xbf16> to vector<96x128xbf16>
    %cst_258 = arith.constant dense<0.000000e+00> : vector<128x128xf32>
    %286 = tpu.matmul %283, %285, %cst_258 {dimension_numbers = #tpu.dot_dimension_numbers<[1], [0], [0], [1], [0, 0, 1, 1], [], []>} : vector<128x96xbf16>, vector<96x128xbf16>, vector<128x128xf32> -> vector<128x128xf32>
    %287 = arith.addf %281, %286 : vector<128x128xf32>
    %c176_259 = arith.constant 176 : index
    %c0_260 = arith.constant 0 : index
    %288 = vector.load %arg9[%c176_259, %c0_260] : memref<560x96xf32, #tpu.memory_space<vmem>>, vector<128x96xf32>
    %289 = arith.truncf %288 : vector<128x96xf32> to vector<128x96xbf16>
    %c2_261 = arith.constant 2 : index
    %c0_262 = arith.constant 0 : index
    %c0_263 = arith.constant 0 : index
    %290 = vector.load %arg4[%c2_261, %c0_262, %c0_263] : memref<3x96x128xbf16, #tpu.memory_space<vmem>>, vector<1x96x128xbf16>
    %291 = vector.shape_cast %290 : vector<1x96x128xbf16> to vector<96x128xbf16>
    %cst_264 = arith.constant dense<0.000000e+00> : vector<128x128xf32>
    %292 = tpu.matmul %289, %291, %cst_264 {dimension_numbers = #tpu.dot_dimension_numbers<[1], [0], [0], [1], [0, 0, 1, 1], [], []>} : vector<128x96xbf16>, vector<96x128xbf16>, vector<128x128xf32> -> vector<128x128xf32>
    %293 = arith.addf %287, %292 : vector<128x128xf32>
    %c0_265 = arith.constant 0 : index
    %c0_266 = arith.constant 0 : index
    %294 = vector.load %arg5[%c0_265, %c0_266] : memref<1x128xf32, #tpu.memory_space<vmem>>, vector<1x128xf32>
    %295 = vector.broadcast %294 : vector<1x128xf32> to vector<128x128xf32>
    %296 = arith.addf %293, %295 : vector<128x128xf32>
    %cst_267 = arith.constant 0.000000e+00 : f32
    %297 = vector.broadcast %cst_267 : f32 to vector<128x128xf32>
    %298 = arith.maximumf %296, %297 : vector<128x128xf32>
    %c0_268 = arith.constant 0 : index
    %c128_269 = arith.constant 128 : index
    %299 = vector.load %arg7[%c0_268, %c128_269] : memref<1x512xf32, #tpu.memory_space<vmem>>, vector<1x128xf32>
    %300 = arith.truncf %299 : vector<1x128xf32> to vector<1x128xbf16>
    %301 = arith.truncf %298 : vector<128x128xf32> to vector<128x128xbf16>
    %cst_270 = arith.constant dense<0.000000e+00> : vector<1x128xf32>
    %302 = tpu.matmul %300, %301, %cst_270 {dimension_numbers = #tpu.dot_dimension_numbers<[1], [0], [0], [1], [0, 0, 1, 1], [], []>} : vector<1x128xbf16>, vector<128x128xbf16>, vector<1x128xf32> -> vector<1x128xf32>
    %303 = arith.addf %274, %302 : vector<1x128xf32>
    %cst_271 = arith.constant 0.000000e+00 : f32
    %304 = vector.broadcast %cst_271 : f32 to vector<128x128xf32>
    %c256_272 = arith.constant 256 : index
    %c0_273 = arith.constant 0 : index
    %305 = vector.load %arg9[%c256_272, %c0_273] : memref<560x96xf32, #tpu.memory_space<vmem>>, vector<128x96xf32>
    %306 = arith.truncf %305 : vector<128x96xf32> to vector<128x96xbf16>
    %c0_274 = arith.constant 0 : index
    %c0_275 = arith.constant 0 : index
    %c0_276 = arith.constant 0 : index
    %307 = vector.load %arg4[%c0_274, %c0_275, %c0_276] : memref<3x96x128xbf16, #tpu.memory_space<vmem>>, vector<1x96x128xbf16>
    %308 = vector.shape_cast %307 : vector<1x96x128xbf16> to vector<96x128xbf16>
    %cst_277 = arith.constant dense<0.000000e+00> : vector<128x128xf32>
    %309 = tpu.matmul %306, %308, %cst_277 {dimension_numbers = #tpu.dot_dimension_numbers<[1], [0], [0], [1], [0, 0, 1, 1], [], []>} : vector<128x96xbf16>, vector<96x128xbf16>, vector<128x128xf32> -> vector<128x128xf32>
    %310 = arith.addf %304, %309 : vector<128x128xf32>
    %c280_278 = arith.constant 280 : index
    %c0_279 = arith.constant 0 : index
    %311 = vector.load %arg9[%c280_278, %c0_279] : memref<560x96xf32, #tpu.memory_space<vmem>>, vector<128x96xf32>
    %312 = arith.truncf %311 : vector<128x96xf32> to vector<128x96xbf16>
    %c1_280 = arith.constant 1 : index
    %c0_281 = arith.constant 0 : index
    %c0_282 = arith.constant 0 : index
    %313 = vector.load %arg4[%c1_280, %c0_281, %c0_282] : memref<3x96x128xbf16, #tpu.memory_space<vmem>>, vector<1x96x128xbf16>
    %314 = vector.shape_cast %313 : vector<1x96x128xbf16> to vector<96x128xbf16>
    %cst_283 = arith.constant dense<0.000000e+00> : vector<128x128xf32>
    %315 = tpu.matmul %312, %314, %cst_283 {dimension_numbers = #tpu.dot_dimension_numbers<[1], [0], [0], [1], [0, 0, 1, 1], [], []>} : vector<128x96xbf16>, vector<96x128xbf16>, vector<128x128xf32> -> vector<128x128xf32>
    %316 = arith.addf %310, %315 : vector<128x128xf32>
    %c304_284 = arith.constant 304 : index
    %c0_285 = arith.constant 0 : index
    %317 = vector.load %arg9[%c304_284, %c0_285] : memref<560x96xf32, #tpu.memory_space<vmem>>, vector<128x96xf32>
    %318 = arith.truncf %317 : vector<128x96xf32> to vector<128x96xbf16>
    %c2_286 = arith.constant 2 : index
    %c0_287 = arith.constant 0 : index
    %c0_288 = arith.constant 0 : index
    %319 = vector.load %arg4[%c2_286, %c0_287, %c0_288] : memref<3x96x128xbf16, #tpu.memory_space<vmem>>, vector<1x96x128xbf16>
    %320 = vector.shape_cast %319 : vector<1x96x128xbf16> to vector<96x128xbf16>
    %cst_289 = arith.constant dense<0.000000e+00> : vector<128x128xf32>
    %321 = tpu.matmul %318, %320, %cst_289 {dimension_numbers = #tpu.dot_dimension_numbers<[1], [0], [0], [1], [0, 0, 1, 1], [], []>} : vector<128x96xbf16>, vector<96x128xbf16>, vector<128x128xf32> -> vector<128x128xf32>
    %322 = arith.addf %316, %321 : vector<128x128xf32>
    %c0_290 = arith.constant 0 : index
    %c0_291 = arith.constant 0 : index
    %323 = vector.load %arg5[%c0_290, %c0_291] : memref<1x128xf32, #tpu.memory_space<vmem>>, vector<1x128xf32>
    %324 = vector.broadcast %323 : vector<1x128xf32> to vector<128x128xf32>
    %325 = arith.addf %322, %324 : vector<128x128xf32>
    %cst_292 = arith.constant 0.000000e+00 : f32
    %326 = vector.broadcast %cst_292 : f32 to vector<128x128xf32>
    %327 = arith.maximumf %325, %326 : vector<128x128xf32>
    %c0_293 = arith.constant 0 : index
    %c256_294 = arith.constant 256 : index
    %328 = vector.load %arg7[%c0_293, %c256_294] : memref<1x512xf32, #tpu.memory_space<vmem>>, vector<1x128xf32>
    %329 = arith.truncf %328 : vector<1x128xf32> to vector<1x128xbf16>
    %330 = arith.truncf %327 : vector<128x128xf32> to vector<128x128xbf16>
    %cst_295 = arith.constant dense<0.000000e+00> : vector<1x128xf32>
    %331 = tpu.matmul %329, %330, %cst_295 {dimension_numbers = #tpu.dot_dimension_numbers<[1], [0], [0], [1], [0, 0, 1, 1], [], []>} : vector<1x128xbf16>, vector<128x128xbf16>, vector<1x128xf32> -> vector<1x128xf32>
    %332 = arith.addf %303, %331 : vector<1x128xf32>
    %cst_296 = arith.constant 0.000000e+00 : f32
    %333 = vector.broadcast %cst_296 : f32 to vector<128x128xf32>
    %c384_297 = arith.constant 384 : index
    %c0_298 = arith.constant 0 : index
    %334 = vector.load %arg9[%c384_297, %c0_298] : memref<560x96xf32, #tpu.memory_space<vmem>>, vector<128x96xf32>
    %335 = arith.truncf %334 : vector<128x96xf32> to vector<128x96xbf16>
    %c0_299 = arith.constant 0 : index
    %c0_300 = arith.constant 0 : index
    %c0_301 = arith.constant 0 : index
    %336 = vector.load %arg4[%c0_299, %c0_300, %c0_301] : memref<3x96x128xbf16, #tpu.memory_space<vmem>>, vector<1x96x128xbf16>
    %337 = vector.shape_cast %336 : vector<1x96x128xbf16> to vector<96x128xbf16>
    %cst_302 = arith.constant dense<0.000000e+00> : vector<128x128xf32>
    %338 = tpu.matmul %335, %337, %cst_302 {dimension_numbers = #tpu.dot_dimension_numbers<[1], [0], [0], [1], [0, 0, 1, 1], [], []>} : vector<128x96xbf16>, vector<96x128xbf16>, vector<128x128xf32> -> vector<128x128xf32>
    %339 = arith.addf %333, %338 : vector<128x128xf32>
    %c408_303 = arith.constant 408 : index
    %c0_304 = arith.constant 0 : index
    %340 = vector.load %arg9[%c408_303, %c0_304] : memref<560x96xf32, #tpu.memory_space<vmem>>, vector<128x96xf32>
    %341 = arith.truncf %340 : vector<128x96xf32> to vector<128x96xbf16>
    %c1_305 = arith.constant 1 : index
    %c0_306 = arith.constant 0 : index
    %c0_307 = arith.constant 0 : index
    %342 = vector.load %arg4[%c1_305, %c0_306, %c0_307] : memref<3x96x128xbf16, #tpu.memory_space<vmem>>, vector<1x96x128xbf16>
    %343 = vector.shape_cast %342 : vector<1x96x128xbf16> to vector<96x128xbf16>
    %cst_308 = arith.constant dense<0.000000e+00> : vector<128x128xf32>
    %344 = tpu.matmul %341, %343, %cst_308 {dimension_numbers = #tpu.dot_dimension_numbers<[1], [0], [0], [1], [0, 0, 1, 1], [], []>} : vector<128x96xbf16>, vector<96x128xbf16>, vector<128x128xf32> -> vector<128x128xf32>
    %345 = arith.addf %339, %344 : vector<128x128xf32>
    %c432_309 = arith.constant 432 : index
    %c0_310 = arith.constant 0 : index
    %346 = vector.load %arg9[%c432_309, %c0_310] : memref<560x96xf32, #tpu.memory_space<vmem>>, vector<128x96xf32>
    %347 = arith.truncf %346 : vector<128x96xf32> to vector<128x96xbf16>
    %c2_311 = arith.constant 2 : index
    %c0_312 = arith.constant 0 : index
    %c0_313 = arith.constant 0 : index
    %348 = vector.load %arg4[%c2_311, %c0_312, %c0_313] : memref<3x96x128xbf16, #tpu.memory_space<vmem>>, vector<1x96x128xbf16>
    %349 = vector.shape_cast %348 : vector<1x96x128xbf16> to vector<96x128xbf16>
    %cst_314 = arith.constant dense<0.000000e+00> : vector<128x128xf32>
    %350 = tpu.matmul %347, %349, %cst_314 {dimension_numbers = #tpu.dot_dimension_numbers<[1], [0], [0], [1], [0, 0, 1, 1], [], []>} : vector<128x96xbf16>, vector<96x128xbf16>, vector<128x128xf32> -> vector<128x128xf32>
    %351 = arith.addf %345, %350 : vector<128x128xf32>
    %c0_315 = arith.constant 0 : index
    %c0_316 = arith.constant 0 : index
    %352 = vector.load %arg5[%c0_315, %c0_316] : memref<1x128xf32, #tpu.memory_space<vmem>>, vector<1x128xf32>
    %353 = vector.broadcast %352 : vector<1x128xf32> to vector<128x128xf32>
    %354 = arith.addf %351, %353 : vector<128x128xf32>
    %cst_317 = arith.constant 0.000000e+00 : f32
    %355 = vector.broadcast %cst_317 : f32 to vector<128x128xf32>
    %356 = arith.maximumf %354, %355 : vector<128x128xf32>
    %c0_318 = arith.constant 0 : index
    %c384_319 = arith.constant 384 : index
    %357 = vector.load %arg7[%c0_318, %c384_319] : memref<1x512xf32, #tpu.memory_space<vmem>>, vector<1x128xf32>
    %358 = arith.truncf %357 : vector<1x128xf32> to vector<1x128xbf16>
    %359 = arith.truncf %356 : vector<128x128xf32> to vector<128x128xbf16>
    %cst_320 = arith.constant dense<0.000000e+00> : vector<1x128xf32>
    %360 = tpu.matmul %358, %359, %cst_320 {dimension_numbers = #tpu.dot_dimension_numbers<[1], [0], [0], [1], [0, 0, 1, 1], [], []>} : vector<1x128xbf16>, vector<128x128xbf16>, vector<1x128xf32> -> vector<1x128xf32>
    %361 = arith.addf %332, %360 : vector<1x128xf32>
    %cst_321 = arith.constant 3.906250e-03 : f32
    %362 = vector.broadcast %cst_321 : f32 to vector<1x128xf32>
    %363 = arith.mulf %361, %362 : vector<1x128xf32>
    %c1_322 = arith.constant 1 : index
    %c0_323 = arith.constant 0 : index
    %c0_324 = arith.constant 0 : index
    %364 = vector.load %arg8[%c1_322, %c0_323, %c0_324] : memref<2x1x128xf32, #tpu.memory_space<vmem>>, vector<1x1x128xf32>
    %365 = vector.shape_cast %364 : vector<1x1x128xf32> to vector<1x128xf32>
    %366 = vector.shape_cast %363 : vector<1x128xf32> to vector<1x1x128xf32>
    tpu.vector_store %arg8[%c1_322, %c0_323, %c0_324], %366 {strides = array<i32>} : memref<2x1x128xf32, #tpu.memory_space<vmem>>, vector<1x1x128xf32>,
    return
  }
  func.func @transform_0(%arg0: i32) -> (i32, i32, i32) {
    %c0_i32 = arith.constant 0 : i32
    %c0_i32_0 = arith.constant 0 : i32
    %c0_i32_1 = arith.constant 0 : i32
    return %arg0, %c0_i32, %c0_i32_0 : i32, i32, i32
  }
  func.func @transform_1(%arg0: i32) -> (i32, i32) {
    %c0_i32 = arith.constant 0 : i32
    %c0_i32_0 = arith.constant 0 : i32
    %c0_i32_1 = arith.constant 0 : i32
    return %c0_i32, %c0_i32_0 : i32, i32
  }
  func.func @transform_2(%arg0: i32) -> (i32, i32) {
    %c0_i32 = arith.constant 0 : i32
    %c0_i32_0 = arith.constant 0 : i32
    %c0_i32_1 = arith.constant 0 : i32
    return %c0_i32, %c0_i32_0 : i32, i32
  }
  func.func @transform_3(%arg0: i32) -> (i32, i32, i32) {
    %c0_i32 = arith.constant 0 : i32
    %c0_i32_0 = arith.constant 0 : i32
    %c0_i32_1 = arith.constant 0 : i32
    %c0_i32_2 = arith.constant 0 : i32
    return %c0_i32, %c0_i32_0, %c0_i32_1 : i32, i32, i32
  }
  func.func @transform_4(%arg0: i32) -> (i32, i32) {
    %c0_i32 = arith.constant 0 : i32
    %c0_i32_0 = arith.constant 0 : i32
    %c0_i32_1 = arith.constant 0 : i32
    return %c0_i32, %c0_i32_0 : i32, i32
  }
  func.func @transform_5(%arg0: i32) -> (i32, i32) {
    %c0_i32 = arith.constant 0 : i32
    %c0_i32_0 = arith.constant 0 : i32
    %c0_i32_1 = arith.constant 0 : i32
    return %c0_i32, %c0_i32_0 : i32, i32
  }
  func.func @transform_6(%arg0: i32) -> (i32, i32) {
    %c0_i32 = arith.constant 0 : i32
    %c0_i32_0 = arith.constant 0 : i32
    %c0_i32_1 = arith.constant 0 : i32
    return %c0_i32, %c0_i32_0 : i32, i32
  }
  func.func @transform_7(%arg0: i32) -> (i32, i32, i32) {
    %c0_i32 = arith.constant 0 : i32
    %c0_i32_0 = arith.constant 0 : i32
    %c0_i32_1 = arith.constant 0 : i32
    return %arg0, %c0_i32, %c0_i32_0 : i32, i32, i32
  }
}

</mosaic_0001>

<bundles_post_ra>
// kernel: backbone_forward.1
= control target key start
LH: loop header
LB: loop body
LE: loop exit
PB: predicated region body
PF: predicated region fallthrough
CT: control target
= control target key end

     0   :  { %v10852_v0 = vmov 0   ;;  %vm115_vm0 = vcmask 261120   ;;  %vm27_vm1 = vcmask 785408   ;;  %s10854_s14 = smov 64   ;;  %s10855_s15 = smov 32   ;;  %vm445_vm2 = vcmask 523520   ;;  %s14480_s5 = inlined_call_operand.vmem [shape: f32[512,1], index: 5, kind: input, shape index: {}]   ;;  %s14481_s1 = inlined_call_operand.vmem [shape: bf16[32,32], index: 1, kind: input, shape index: {}]   ;;  %s14482_s0 = inlined_call_operand.vmem [shape: bf16[2,512,32], index: 0, kind: input, shape index: {}]   ;;  %s14483_s2 = inlined_call_operand.vmem [shape: f32[1,32], index: 2, kind: input, shape index: {}]   ;;  %s14484_s3 = inlined_call_operand.vmem [shape: bf16[3,96,128], index: 3, kind: input, shape index: {}]   ;;  %s14485_s4 = inlined_call_operand.vmem [shape: f32[1,128], index: 4, kind: input, shape index: {}]   ;;  %s14486_s6 = inlined_call_operand.vmem [shape: f32[1,512], index: 6, kind: input, shape index: {}]   ;;  %s14487_s7 = inlined_call_operand.vmem [shape: f32[2,1,128], index: 7, kind: output, shape index: {}]  }
   0x1   :  { %10682 = vset.pattern.permute.xlu1 %v10852_v0  ;;  %10681 = vset.pattern.permute.xlu0 %v10852_v0  ;;  %v744_v1 = vld [vmem:[%s14480_s5 + $0x88] sm:$0xff]  ;;  %v268_v2 = vld [vmem:[%s14480_s5 + $0x78] sm:$0xff]  ;;  %v10683_v3 = vld [vmem:[%s14481_s1] sm:$0xff]   ;;  %vm510_vm3 = vcmask 785920   ;;  %vm10856_vm4 = vmmov 0  }
   0x2   :  { %766 = vperm.xlu1 %10682, %v744_v1   ;;  %346 = vperm.xlu0 %10681, %v268_v2   ;;  %v10684_v4 = vld [vmem:[%s14481_s1] sm:$0xff]   ;;  %v745_v5 = vld [vmem:[%s14480_s5 + $0x90] sm:$0xff]  ;;  %v10685_v7 = vld [vmem:[%s14481_s1 + $0x8] sm:$0xff]  }
   0x3   :  { %9404 = vmatprep.subr.bf16.mxu0 %v10683_v3  ;;  %v743_v6 = vld [vmem:[%s14480_s5 + $0x80] sm:$0xff]  ;;  %9464 = vmatprep.subr.bf16.mxu1 %v10684_v4  ;;  %v10686_v8 = vld [vmem:[%s14481_s1 + $0x8] sm:$0xff]   ;;  %v746_v10 = vld [vmem:[%s14480_s5 + $0x98] sm:$0xff] }
   0x4   :  { %9405 = vmatpush3.bf16.msra.mxu0 %v10683_v3  ;;  %9465 = vmatpush3.bf16.msra.mxu1 %v10684_v4  ;;  %v747_v9 = vld [vmem:[%s14480_s5 + $0xa0] sm:$0xff]  ;;  %v10689_v13 = vld [vmem:[%s14482_s0 + $0x8] sm:$0xff]   ;;  %v749_v15 = vld [vmem:[%s14480_s5 + $0xb0] sm:$0xff] }
   0x5   :  { %9406 = vmatprep.subr.bf16.mxu0 %v10685_v7  ;;  %v10687_v11 = vld [vmem:[%s14482_s0] sm:$0xff]   ;;  %9466 = vmatprep.subr.bf16.mxu1 %v10686_v8  ;;  %v10690_v14 = vld [vmem:[%s14482_s0 + $0xc8] sm:$0xff]   ;;  %v10692_v18 = vld [vmem:[%s14482_s0 + $0x10] sm:$0xff]  }
   0x6   :  { %771 = vperm.xlu1 %10682, %v745_v5   ;;  %761 = vperm.xlu0 %10681, %v743_v6   ;;  %v10688_v12 = vld [vmem:[%s14482_s0 + $0xc0] sm:$0xff]   ;;  %v748_v16 = vld [vmem:[%s14480_s5 + $0xa8] sm:$0xff]  ;;  %v750_v20 = vld [vmem:[%s14480_s5 + $0xb8] sm:$0xff] }
   0x7   :  { %9408 = vmatprep.mubr.msk.bf16.mxu0 %vm115_vm0, %v10687_v11  ;;  %9468 = vmatprep.mubr.msk.bf16.mxu1 %vm115_vm0, %v10688_v12  ;;  %v10691_v17 = vld [vmem:[%s14481_s1] sm:$0xff]   ;;  %v10693_v21 = vld [vmem:[%s14482_s0 + $0x18] sm:$0xff]   ;;  %v753_v23 = vld [vmem:[%s14480_s5 + $0xd0] sm:$0xff] }
   0x8   :  { %9407 = vmatpush3.bf16.msra.mxu0 %v10685_v7  ;;  %9467 = vmatpush3.bf16.msra.mxu1 %v10686_v8  ;;  %v751_v19 = vld [vmem:[%s14480_s5 + $0xc0] sm:$0xff]  ;;  %v752_v24 = vld [vmem:[%s14480_s5 + $0xc8] sm:$0xff]  ;;  %v754_v27 = vld [vmem:[%s14480_s5 + $0xd8] sm:$0xff] }
   0x9   :  { %9424 = vmatprep.subr.bf16.mxu0 %v10691_v17  ;;  %v10694_v22 = vld [vmem:[%s14482_s0 + $0x20] sm:$0xff]   ;;  %v10696_v25 = vld [vmem:[%s14481_s1 + $0x8] sm:$0xff]   ;;  %v10697_v29 = vld [vmem:[%s14482_s0 + $0x30] sm:$0xff]  }
   0xa   :  { %781 = vperm.xlu1 %10682, %v747_v9   ;;  %776 = vperm.xlu0 %10681, %v746_v10   ;;  %v755_v26 = vld [vmem:[%s14480_s5 + $0xe0] sm:$0xff]  ;;  %v10695_v28 = vld [vmem:[%s14482_s0 + $0x28] sm:$0xff]   ;;  %v757_v30 = vld [vmem:[%s14480_s5 + $0xf0] sm:$0xff] }
   0xb   :  { %9409 = vmatmul.mubr.msk.bf16.vlgmr.msra.gmra.mrb[0].mxu0 %vm115_vm0, %v10689_v13  ;;  %9469 = vmatmul.mubr.msk.bf16.vlgmr.msra.gmra.mrb[0].mxu1 %vm115_vm0, %v10690_v14  ;;  %v756_v31 = vld [vmem:[%s14480_s5 + $0xe8] sm:$0xff]  ;;  %v1231_v32 = vld [vmem:[%s14480_s5 + $0x100] sm:$0xff]  ;;  %v758_v33 = vld [vmem:[%s14480_s5 + $0xf8] sm:$0xff] }
   0xc   :  { %9412 = vmatprep.mubr.msk.bf16.mxu0 %vm115_vm0, %v10692_v18  ;;  %9425 = vmatpush3.bf16.msra.mxu0 %v10691_v17  ;;  %v10698_v34 = vld [vmem:[%s14482_s0 + $0x38] sm:$0xff]   ;;  %v10699_v35 = vld [vmem:[%s14482_s0 + $0x40] sm:$0xff]   ;;  %v266_v36 = vld [vmem:[%s14480_s5 + $0x68] sm:$0xff] }
   0xd   :  { %9426 = vmatprep.subr.bf16.mxu0 %v10696_v25  ;;  %v265_v37 = vld [vmem:[%s14480_s5 + $0x60] sm:$0xff]  ;;  %v267_v39 = vld [vmem:[%s14480_s5 + $0x70] sm:$0xff]  ;;  %v10700_v41 = vld [vmem:[%s14482_s0 + $0x48] sm:$0xff]  }
   0xe   :  { %791 = vperm.xlu1 %10682, %v749_v15   ;;  %786 = vperm.xlu0 %10681, %v748_v16   ;;  %v10707_v38 = vld [vmem:[%s14481_s1] sm:$0xff]   ;;  %v10701_v42 = vld [vmem:[%s14482_s0 + $0x50] sm:$0xff]   ;;  %v10708_v43 = vld [vmem:[%s14481_s1 + $0x8] sm:$0xff]  }
   0xf   :  { %v253_v40 = vld [vmem:[%s14480_s5] sm:$0xff]  ;;  %v255_v44 = vld [vmem:[%s14480_s5 + $0x10] sm:$0xff]  ;;  %v254_v45 = vld [vmem:[%s14480_s5 + $0x8] sm:$0xff] }
  0x10   :  { %9427 = vmatpush3.bf16.msra.mxu0 %v10696_v25  ;;  %v257_v46 = vld [vmem:[%s14480_s5 + $0x20] sm:$0xff]  ;;  %v256_v47 = vld [vmem:[%s14480_s5 + $0x18] sm:$0xff]  ;;  %v259_v50 = vld [vmem:[%s14480_s5 + $0x30] sm:$0xff] }
  0x11   :  { %9444 = vmatprep.subr.bf16.mxu0 %v10707_v38  ;;  %v10702_v48 = vld [vmem:[%s14482_s0 + $0x58] sm:$0xff]   ;;  %v10703_v49 = vld [vmem:[%s14482_s0 + $0x60] sm:$0xff]   ;;  %v258_v51 = vld [vmem:[%s14480_s5 + $0x28] sm:$0xff] }
  0x12   :  { %801 = vperm.xlu1 %10682, %v751_v19   ;;  %796 = vperm.xlu0 %10681, %v750_v20   ;;  %v260_v52 = vld [vmem:[%s14480_s5 + $0x38] sm:$0xff]  ;;  %v261_v53 = vld [vmem:[%s14480_s5 + $0x40] sm:$0xff]  ;;  %v10704_v54 = vld [vmem:[%s14482_s0 + $0x68] sm:$0xff]   ;;  %v10853_v20 = vmov 0.0  }
  0x13   :  { %9413 = vmatmul.mubr.msk.bf16.gmra.mrb[4].mxu0 %vm115_vm0, %v10693_v21  ;;  %v10705_v55 = vld [vmem:[%s14482_s0 + $0x70] sm:$0xff]   ;;  %v262_v56 = vld [vmem:[%s14480_s5 + $0x48] sm:$0xff]  ;;  %v264_v58 = vld [vmem:[%s14480_s5 + $0x58] sm:$0xff]  ;;  %30 = vst.msk [vmem:[#allocation2 + $0x10] sm:$0xff] %vm27_vm1, %v10853_v20 }
  0x14   :  { %9416 = vmatprep.mubr.msk.bf16.mxu0 %vm115_vm0, %v10694_v22  ;;  %v263_v57 = vld [vmem:[%s14480_s5 + $0x50] sm:$0xff]  ;;  %v1232_v59 = vld [vmem:[%s14480_s5 + $0x108] sm:$0xff]  ;;  %v10706_v60 = vld [vmem:[%s14482_s0 + $0x78] sm:$0xff]   ;;  %31 = vst.msk [vmem:[#allocation2 + $0x18] sm:$0xff] %vm27_vm1, %v10853_v20 }
  0x15   :  { %v10709_v61 = vld [vmem:[%s14482_s0 + $0x80] sm:$0xff]   ;;  %v1233_v62 = vld [vmem:[%s14480_s5 + $0x110] sm:$0xff]  ;;  %v1234_v63 = vld [vmem:[%s14480_s5 + $0x118] sm:$0xff]  ;;  %28 = vst.msk [vmem:[#allocation2] sm:$0xff] %vm27_vm1, %v10853_v20 }
  0x16   :  { %811 = vperm.xlu1 %10682, %v753_v23   ;;  %806 = vperm.xlu0 %10681, %v752_v24   ;;  %v1235_v0 = vld [vmem:[%s14480_s5 + $0x120] sm:$0xff]  ;;  %v1236_v1 = vld [vmem:[%s14480_s5 + $0x128] sm:$0xff]  ;;  %v10711_v3 = vld [vmem:[%s14482_s0 + $0x90] sm:$0xff]   ;;  %29 = vst.msk [vmem:[#allocation2 + $0x8] sm:$0xff] %vm27_vm1, %v10853_v20 }
  0x17   :  { %v10710_v2 = vld [vmem:[%s14482_s0 + $0x88] sm:$0xff]   ;;  %v1237_v4 = vld [vmem:[%s14480_s5 + $0x130] sm:$0xff]  ;;  %v1238_v5 = vld [vmem:[%s14480_s5 + $0x138] sm:$0xff]  ;;  %32 = vst.msk [vmem:[#allocation2 + $0x210] sm:$0xff] %vm27_vm1, %v10853_v20 }
  0x18   :  { %v1239_v6 = vld [vmem:[%s14480_s5 + $0x140] sm:$0xff]  ;;  %v1240_v7 = vld [vmem:[%s14480_s5 + $0x148] sm:$0xff]  ;;  %v10712_v8 = vld [vmem:[%s14482_s0 + $0x98] sm:$0xff]   ;;  %33 = vst.msk [vmem:[#allocation2 + $0x218] sm:$0xff] %vm27_vm1, %v10853_v20 }
  0x19   :  { %v10713_v9 = vld [vmem:[%s14482_s0 + $0xa0] sm:$0xff]   ;;  %v1241_v10 = vld [vmem:[%s14480_s5 + $0x150] sm:$0xff]  ;;  %v1242_v11 = vld [vmem:[%s14480_s5 + $0x158] sm:$0xff]  ;;  %34 = vst.msk [vmem:[#allocation2 + $0x220] sm:$0xff] %vm27_vm1, %v10853_v20 }
  0x1a   :  { %821 = vperm.xlu1 %10682, %v755_v26   ;;  %816 = vperm.xlu0 %10681, %v754_v27   ;;  %v1243_v12 = vld [vmem:[%s14480_s5 + $0x160] sm:$0xff]  ;;  %v1244_v13 = vld [vmem:[%s14480_s5 + $0x168] sm:$0xff]  ;;  %v10715_v15 = vld [vmem:[%s14482_s0 + $0xb0] sm:$0xff]   ;;  %35 = vst.msk [vmem:[#allocation2 + $0x228] sm:$0xff] %vm27_vm1, %v10853_v20 }
  0x1b   :  { %9417 = vmatmul.mubr.msk.bf16.gmra.mrb[8].mxu0 %vm115_vm0, %v10695_v28  ;;  %v10714_v14 = vld [vmem:[%s14482_s0 + $0xa8] sm:$0xff]   ;;  %v1245_v16 = vld [vmem:[%s14480_s5 + $0x170] sm:$0xff]  ;;  %v1246_v17 = vld [vmem:[%s14480_s5 + $0x178] sm:$0xff] }
  0x1c   :  { %9420 = vmatprep.mubr.msk.bf16.mxu0 %vm115_vm0, %v10697_v29  ;;  %v1719_v18 = vld [vmem:[%s14480_s5 + $0x180] sm:$0xff]  ;;  %v10716_v19 = vld [vmem:[%s14482_s0 + $0xb8] sm:$0xff]  }
  0x1e   :  { %831 = vperm.xlu1 %10682, %v757_v30   ;;  %826 = vperm.xlu0 %10681, %v756_v31  }
  0x22   :  { %1249 = vperm.xlu1 %10682, %v1231_v32   ;;  %836 = vperm.xlu0 %10681, %v758_v33  }
  0x23   :  { %9421 = vmatmul.mubr.msk.bf16.gmra.mrb[12].mxu0 %vm115_vm0, %v10698_v34 }
  0x24   :  { %9428 = vmatprep.mubr.msk.bf16.mxu0 %vm115_vm0, %v10699_v35 }
  0x26   :  { %336 = vperm.xlu1 %10682, %v266_v36   ;;  %331 = vperm.xlu0 %10681, %v265_v37  }
  0x2a   :  { %271 = vperm.xlu1 %10682, %v253_v40   ;;  %341 = vperm.xlu0 %10681, %v267_v39  }
  0x2b   :  { %9429 = vmatmul.mubr.msk.bf16.vlgmr.msra.gmra.mrb[16].mxu0 %vm115_vm0, %v10700_v41 }
  0x2c   :  { %9432 = vmatprep.mubr.msk.bf16.mxu0 %vm115_vm0, %v10701_v42  ;;  %9445 = vmatpush3.bf16.msra.mxu0 %v10707_v38 }
  0x2d   :  { %9446 = vmatprep.subr.bf16.mxu0 %v10708_v43 }
  0x2e   :  { %281 = vperm.xlu1 %10682, %v255_v44   ;;  %276 = vperm.xlu0 %10681, %v254_v45  }
  0x30   :  { %9447 = vmatpush3.bf16.msra.mxu0 %v10708_v43 }
  0x32   :  { %291 = vperm.xlu1 %10682, %v257_v46   ;;  %286 = vperm.xlu0 %10681, %v256_v47  }
  0x33   :  { %9433 = vmatmul.mubr.msk.bf16.gmra.mrb[20].mxu0 %vm115_vm0, %v10702_v48 }
  0x34   :  { %9436 = vmatprep.mubr.msk.bf16.mxu0 %vm115_vm0, %v10703_v49 }
  0x36   :  { %296 = vperm.xlu1 %10682, %v258_v51   ;;  %301 = vperm.xlu0 %10681, %v259_v50  }
  0x3a   :  { %306 = vperm.xlu1 %10682, %v260_v52   ;;  %311 = vperm.xlu0 %10681, %v261_v53  }
  0x3b   :  { %9437 = vmatmul.mubr.msk.bf16.gmra.mrb[24].mxu0 %vm115_vm0, %v10704_v54 }
  0x3c   :  { %9440 = vmatprep.mubr.msk.bf16.mxu0 %vm115_vm0, %v10705_v55 }
  0x3e   :  { %316 = vperm.xlu1 %10682, %v262_v56   ;;  %321 = vperm.xlu0 %10681, %v263_v57   ;;  %v10717_v56 = vld [vmem:[%s14484_s3 + $0x30] sm:$0xff]   ;;  %v11258_v57 = vld [vmem:[%s14483_s2] ss:$0 sm:$0xff] }
  0x3f   :  { %9484 = vmatprep.subr.bf16.mxu0 %v10717_v56  ;;  %9568 = vmatprep.subr.bf16.mxu1 %v10717_v56 }
  0x40   :  { %9569 = vmatpush3.bf16.msra.mxu1 %v10717_v56 }
  0x42   :  { %326 = vperm.xlu1 %10682, %v264_v58   ;;  %1254 = vperm.xlu0 %10681, %v1232_v59   ;;  %v10718_v58 = vld [vmem:[%s14484_s3 + $0x38] sm:$0xff]  }
  0x43   :  { %9441 = vmatmul.mubr.msk.bf16.gmra.mrb[28].mxu0 %vm115_vm0, %v10706_v60  ;;  %9570 = vmatprep.subr.bf16.mxu1 %v10718_v58 }
  0x44   :  { %9448 = vmatprep.mubr.msk.bf16.mxu0 %vm115_vm0, %v10709_v61  ;;  %9571 = vmatpush3.bf16.msra.mxu1 %v10718_v58 }
  0x46   :  { %1259 = vperm.xlu1 %10682, %v1233_v62   ;;  %1264 = vperm.xlu0 %10681, %v1234_v63  }
  0x4a   :  { %1269 = vperm.xlu1 %10682, %v1235_v0   ;;  %1274 = vperm.xlu0 %10681, %v1236_v1  }
  0x4b   :  { %9449 = vmatmul.mubr.msk.bf16.vlgmr.msra.gmra.mrb[32].mxu0 %vm115_vm0, %v10710_v2 }
  0x4c   :  { %9452 = vmatprep.mubr.msk.bf16.mxu0 %vm115_vm0, %v10711_v3  ;;  %9485 = vmatpush3.bf16.msra.mxu0 %v10717_v56 }
  0x4d   :  { %9486 = vmatprep.subr.bf16.mxu0 %v10718_v58 }
  0x4e   :  { %1279 = vperm.xlu1 %10682, %v1237_v4   ;;  %1284 = vperm.xlu0 %10681, %v1238_v5  }
  0x50   :  { %9487 = vmatpush3.bf16.msra.mxu0 %v10718_v58 }
  0x52   :  { %1289 = vperm.xlu1 %10682, %v1239_v6   ;;  %1294 = vperm.xlu0 %10681, %v1240_v7   ;;  %v10719_v6 = vld [vmem:[%s14484_s3 + $0x40] sm:$0xff]  }
  0x53   :  { %9453 = vmatmul.mubr.msk.bf16.gmra.mrb[36].mxu0 %vm115_vm0, %v10712_v8  ;;  %9488 = vmatprep.subr.bf16.mxu0 %v10719_v6 }
  0x54   :  { %9456 = vmatprep.mubr.msk.bf16.mxu0 %vm115_vm0, %v10713_v9  ;;  %9572 = vmatprep.subr.bf16.mxu1 %v10719_v6 }
  0x55   :  { %9489 = vmatpush3.bf16.msra.mxu0 %v10719_v6  ;;  %9573 = vmatpush3.bf16.msra.mxu1 %v10719_v6 }
  0x56   :  { %1299 = vperm.xlu1 %10682, %v1241_v10   ;;  %1304 = vperm.xlu0 %10681, %v1242_v11  }
  0x5a   :  { %1309 = vperm.xlu1 %10682, %v1243_v12   ;;  %1314 = vperm.xlu0 %10681, %v1244_v13  }
  0x5b   :  { %9457 = vmatmul.mubr.msk.bf16.gmra.mrb[40].mxu0 %vm115_vm0, %v10714_v14 }
  0x5c   :  { %9460 = vmatprep.mubr.msk.bf16.mxu0 %vm115_vm0, %v10715_v15 }
  0x5e   :  { %1319 = vperm.xlu1 %10682, %v1245_v16   ;;  %1324 = vperm.xlu0 %10681, %v1246_v17  }
  0x62   :  { %1737 = vperm.xlu1 %10682, %v1719_v18   ;;  %v10720_v18 = vld [vmem:[%s14484_s3 + $0x48] sm:$0xff]  }
  0x63   :  { %9461 = vmatmul.mubr.msk.bf16.gmra.mrb[44].mxu0 %vm115_vm0, %v10716_v19  ;;  %9490 = vmatprep.subr.bf16.mxu0 %v10720_v18 }
  0x64   :  { %9574 = vmatprep.subr.bf16.mxu1 %v10720_v18  ;;  %9491 = vmatpush3.bf16.msra.mxu0 %v10720_v18 }
  0x65   :  { %9575 = vmatpush3.bf16.msra.mxu1 %v10720_v18 }
  0x81   :  { %v11188_v21 = vpop.permute.xlu1 %766  ;;  %v11200_v27 = vpop.permute.xlu0 %346 }
  0x85   :  { %v11190_v22 = vpop.permute.xlu1 %771  ;;  %v11206_v30 = vpop.permute.xlu0 %761 }
  0x89   :  { %v11192_v23 = vpop.permute.xlu1 %781  ;;  %v11210_v32 = vpop.permute.xlu0 %776 }
  0x8d   :  { %v11194_v24 = vpop.permute.xlu1 %791  ;;  %v11214_v35 = vpop.permute.xlu0 %786 }
  0x91   :  { %v11196_v25 = vpop.permute.xlu1 %801  ;;  %v11216_v37 = vpop.permute.xlu0 %796 }
  0x95   :  { %v11198_v26 = vpop.permute.xlu1 %811  ;;  %v11222_v40 = vpop.permute.xlu0 %806 }
  0x99   :  { %v11202_v28 = vpop.permute.xlu1 %821  ;;  %v11226_v42 = vpop.permute.xlu0 %816 }
  0x9d   :  { %v11204_v29 = vpop.permute.xlu1 %831  ;;  %v11232_v45 = vpop.permute.xlu0 %826 }
  0xa1   :  { %v11208_v31 = vpop.permute.xlu1 %1249  ;;  %v11236_v47 = vpop.permute.xlu0 %836 }
  0xa5   :  { %v11212_v33 = vpop.permute.xlu1 %336  ;;  %v11242_v50 = vpop.permute.xlu0 %331 }
  0xa9   :  { %v272_v34 = vpop.permute.xlu1 %271  ;;  %v11246_v52 = vpop.permute.xlu0 %341 }
  0xad   :  { %v282_v36 = vpop.permute.xlu1 %281  ;;  %v277_v55 = vpop.permute.xlu0 %276 }
  0xb1   :  { %v11218_v38 = vpop.permute.xlu1 %291  ;;  %v287_v0 = vpop.permute.xlu0 %286 }
  0xb5   :  { %v11220_v39 = vpop.permute.xlu1 %296  ;;  %v302_v19 = vpop.permute.xlu0 %301 }
  0xb9   :  { %v11224_v41 = vpop.permute.xlu1 %306 }
  0xbd   :  { %v11228_v43 = vpop.permute.xlu1 %316 }
  0xc1   :  { %v11230_v44 = vpop.permute.xlu1 %326 }
  0xc5   :  { %v11234_v46 = vpop.permute.xlu1 %1259 }
  0xc9   :  { %v11238_v48 = vpop.permute.xlu1 %1269 }
  0xcd   :  { %v11240_v49 = vpop.permute.xlu1 %1279 }
  0xd1   :  { %v11244_v51 = vpop.permute.xlu1 %1289 }
  0xd5   :  { %v11248_v53 = vpop.permute.xlu1 %1299 }
  0xd9   :  { %v11250_v54 = vpop.permute.xlu1 %1309 }
  0xdd   :  { %v11263_v59 = vpop.permute.xlu1 %1319 }
  0xde   :  { %v9410_v60 = vpop.f32.mrb[0].mxu0  ;;  %v11266_v62 = vpop.f32.mrb[0].mxu1 }
  0xdf   :  { %v183_v61 = vadd.f32 %v9410_v60, %v11258_v57  ;;  %v174_v63 = vpop.f32.mrb[1].mxu0  ;;  %v1640_v2 = vpop.f32.mrb[1].mxu1 }
  0xe0   :  { %v175_v1 = vadd.f32 %v11258_v57, %v174_v63  ;;  %v1641_v4 = vadd.f32 %v11258_v57, %v1640_v2  ;;  %v9411_v5 = vpop.f32.mrb[2].mxu0 }
  0xe1   :  { %v239_v3 = vmax.f32 %v183_v61, 0.0  ;;  %v186_v8 = vadd.f32 %v9411_v5, %v11258_v57  ;;  %v177_v9 = vpop.f32.mrb[3].mxu0  ;;  %v1738_v14 = vpop.permute.xlu1 %1737 }
  0xe2   :  { %v237_v7 = vmax.f32 %v175_v1, 0.0  ;;  %v1703_v11 = vmax.f32 %v1641_v4, 0.0  ;;  %v178_v12 = vadd.f32 %v11258_v57, %v177_v9 }
  0xe3   :  { %v351_v10 = vmul.f32 %v282_v36, %v239_v3  ;;  %v240_v15 = vmax.f32 %v186_v8, 0.0 }
  0xe4   :  { %v349_v13 = vmul.f32 %v272_v34, %v237_v7  ;;  %v11276_v16 = vmul.f32 %v1738_v14, %v1703_v11  ;;  %v238_v17 = vmax.f32 %v178_v12, 0.0  ;;  %v312_v7 = vpop.permute.xlu0 %311  ;;  %v10722_v11 = vld [vmem:[%s14484_s3 + $0x58] sm:$0xff]  }
  0xe5   :  { %367 = vst.msk [vmem:[#allocation2 + $0x29] sm:$0xff] %vm115_vm0, %v351_v10  ;;  %466 = vrot.lane.b32.xlu1 %v351_v10, %s10854_s14  ;;  %401 = vrot.lane.b32.xlu0 %v351_v10, %s10855_s15  ;;  %v352_v36 = vmul.f32 %v287_v0, %v240_v15 }
  0xe6   :  { %v9414_v34 = vpop.f32.mrb[4].mxu0  ;;  %365 = vst.msk [vmem:[#allocation2 + $0x19] sm:$0xff] %vm115_vm0, %v349_v13  ;;  %1831 = vst.msk [vmem:[#allocation2 + $0x199] sm:$0xff] %vm115_vm0, %v11276_v16  ;;  %v350_v56 = vmul.f32 %v277_v55, %v238_v17  ;;  %v10721_v55 = vld [vmem:[%s14484_s3 + $0x50] sm:$0xff]  }
  0xe7   :  { %v199_v58 = vadd.f32 %v9414_v34, %v11258_v57  ;;  %v190_v60 = vpop.f32.mrb[5].mxu0  ;;  %368 = vst.msk [vmem:[#allocation2 + $0x31] sm:$0xff] %vm115_vm0, %v352_v36  ;;  %9492 = vmatprep.subr.bf16.mxu0 %v10721_v55  ;;  %9576 = vmatprep.subr.bf16.mxu1 %v10721_v55 }
  0xe8   :  { %v191_v61 = vadd.f32 %v11258_v57, %v190_v60  ;;  %v9415_v63 = vpop.f32.mrb[6].mxu0  ;;  %366 = vst.msk [vmem:[#allocation2 + $0x21] sm:$0xff] %vm115_vm0, %v350_v56  ;;  %9493 = vmatpush3.bf16.msra.mxu0 %v10721_v55  ;;  %9577 = vmatpush3.bf16.msra.mxu1 %v10721_v55 }
  0xe9   :  { %v243_v0 = vmax.f32 %v199_v58, 0.0  ;;  %v202_v1 = vadd.f32 %v9415_v63, %v11258_v57  ;;  %v193_v2 = vpop.f32.mrb[7].mxu0  ;;  %462 = vrot.lane.b32.xlu1 %v349_v13, %s10854_s14  ;;  %397 = vrot.lane.b32.xlu0 %v349_v13, %s10855_s15 }
  0xea   :  { %v241_v3 = vmax.f32 %v191_v61, 0.0  ;;  %v194_v4 = vadd.f32 %v11258_v57, %v193_v2  ;;  %9494 = vmatprep.subr.bf16.mxu0 %v10722_v11  ;;  %9578 = vmatprep.subr.bf16.mxu1 %v10722_v11 }
  0xeb   :  { %v11297_v5 = vmul.f32 %v302_v19, %v243_v0  ;;  %v244_v6 = vmax.f32 %v202_v1, 0.0  ;;  %v322_v19 = vpop.permute.xlu0 %321 }
  0xec   :  { %v353_v8 = vmul.f32 %v11218_v38, %v241_v3  ;;  %v242_v9 = vmax.f32 %v194_v4, 0.0  ;;  %9495 = vmatpush3.bf16.msra.mxu0 %v10722_v11  ;;  %9579 = vmatpush3.bf16.msra.mxu1 %v10722_v11 }
  0xed   :  { %371 = vst.msk [vmem:[#allocation2 + $0x49] sm:$0xff] %vm115_vm0, %v11297_v5  ;;  %v11303_v10 = vmul.f32 %v11224_v41, %v244_v6  ;;  %403 = vrot.lane.b32.xlu1 %v352_v36, %s10855_s15  ;;  %468 = vrot.lane.b32.xlu0 %v352_v36, %s10854_s14 }
  0xee   :  { %369 = vst.msk [vmem:[#allocation2 + $0x39] sm:$0xff] %vm115_vm0, %v353_v8  ;;  %v11312_v12 = vmul.f32 %v11220_v39, %v242_v9  ;;  %v9418_v38 = vpop.f32.mrb[8].mxu0  ;;  %v11350_v9 = vpop.f32.mrb[2].mxu1 }
  0xef   :  { %372 = vst.msk [vmem:[#allocation2 + $0x51] sm:$0xff] %vm115_vm0, %v11303_v10  ;;  %v215_v41 = vadd.f32 %v9418_v38, %v11258_v57  ;;  %v206_v13 = vpop.f32.mrb[9].mxu0 }
  0xf0   :  { %370 = vst.msk [vmem:[#allocation2 + $0x41] sm:$0xff] %vm115_vm0, %v11312_v12  ;;  %v207_v14 = vadd.f32 %v11258_v57, %v206_v13  ;;  %v9419_v15 = vpop.f32.mrb[10].mxu0 }
  0xf1   :  { %v247_v17 = vmax.f32 %v215_v41, 0.0  ;;  %v218_v39 = vadd.f32 %v9419_v15, %v11258_v57  ;;  %v209_v18 = vpop.f32.mrb[11].mxu0  ;;  %399 = vrot.lane.b32.xlu1 %v350_v56, %s10855_s15  ;;  %464 = vrot.lane.b32.xlu0 %v350_v56, %s10854_s14  ;;  %v11359_v15 = vpop.f32.mrb[3].mxu1 }
  0xf2   :  { %v245_v36 = vmax.f32 %v207_v14, 0.0  ;;  %v210_v34 = vadd.f32 %v11258_v57, %v209_v18 }
  0xf3   :  { %v11324_v58 = vmul.f32 %v322_v19, %v247_v17  ;;  %v248_v60 = vmax.f32 %v218_v39, 0.0 }
  0xf4   :  { %v11326_v61 = vmul.f32 %v312_v7, %v245_v36  ;;  %v246_v63 = vmax.f32 %v210_v34, 0.0 }
  0xf5   :  { %375 = vst.msk [vmem:[#allocation2 + $0x69] sm:$0xff] %vm115_vm0, %v11324_v58  ;;  %v11331_v0 = vmul.f32 %v11230_v44, %v248_v60  ;;  %470 = vrot.lane.b32.xlu1 %v353_v8, %s10854_s14  ;;  %405 = vrot.lane.b32.xlu0 %v353_v8, %s10855_s15 }
  0xf6   :  { %373 = vst.msk [vmem:[#allocation2 + $0x59] sm:$0xff] %vm115_vm0, %v11326_v61  ;;  %v11338_v56 = vmul.f32 %v11228_v43, %v246_v63  ;;  %v9422_v1 = vpop.f32.mrb[12].mxu0 }
  0xf7   :  { %376 = vst.msk [vmem:[#allocation2 + $0x71] sm:$0xff] %vm115_vm0, %v11331_v0  ;;  %v231_v2 = vadd.f32 %v9422_v1, %v11258_v57  ;;  %v222_v55 = vpop.f32.mrb[13].mxu0 }
  0xf8   :  { %374 = vst.msk [vmem:[#allocation2 + $0x61] sm:$0xff] %vm115_vm0, %v11338_v56  ;;  %v223_v44 = vadd.f32 %v11258_v57, %v222_v55  ;;  %v9423_v3 = vpop.f32.mrb[14].mxu0 }
  0xf9   :  { %v251_v4 = vmax.f32 %v231_v2, 0.0  ;;  %v234_v6 = vadd.f32 %v9423_v3, %v11258_v57  ;;  %v225_v7 = vpop.f32.mrb[15].mxu0  ;;  %407 = vrot.lane.b32.xlu0 %v11312_v12, %s10855_s15 }
  0xfa   :  { %v249_v43 = vmax.f32 %v223_v44, 0.0  ;;  %v226_v8 = vadd.f32 %v11258_v57, %v225_v7  ;;  %v10723_v44 = vld [vmem:[%s14482_s0 + $0xd0] sm:$0xff]  }
  0xfb   :  { %v363_v11 = vmul.f32 %v11246_v52, %v251_v4  ;;  %v252_v38 = vmax.f32 %v234_v6, 0.0  ;;  %9472 = vmatprep.mubr.msk.bf16.mxu1 %vm115_vm0, %v10723_v44 }
  0xfc   :  { %v11354_v41 = vmul.f32 %v11242_v50, %v249_v43  ;;  %v250_v13 = vmax.f32 %v226_v8, 0.0 }
  0xfd   :  { %379 = vst.msk [vmem:[#allocation2 + $0x89] sm:$0xff] %vm115_vm0, %v363_v11  ;;  %v364_v14 = vmul.f32 %v11200_v27, %v252_v38  ;;  %425 = vrot.lane.b32.xlu0 %v363_v11, %s10855_s15 }
  0xfe   :  { %377 = vst.msk [vmem:[#allocation2 + $0x79] sm:$0xff] %vm115_vm0, %v11354_v41  ;;  %v362_v17 = vmul.f32 %v11212_v33, %v250_v13  ;;  %v9430_v39 = vpop.f32.mrb[16].mxu0 }
  0xff   :  { %380 = vst.msk [vmem:[#allocation2 + $0x91] sm:$0xff] %vm115_vm0, %v364_v14  ;;  %v673_v50 = vadd.f32 %v9430_v39, %v11258_v57  ;;  %v664_v52 = vpop.f32.mrb[17].mxu0  ;;  %492 = vrot.lane.b32.xlu1 %v364_v14, %s10854_s14 }
 0x100   :  { %378 = vst.msk [vmem:[#allocation2 + $0x81] sm:$0xff] %vm115_vm0, %v362_v17  ;;  %v665_v27 = vadd.f32 %v11258_v57, %v664_v52  ;;  %v9431_v18 = vpop.f32.mrb[18].mxu0 }
 0x101   :  { %v729_v19 = vmax.f32 %v673_v50, 0.0  ;;  %v676_v36 = vadd.f32 %v9431_v18, %v11258_v57  ;;  %v667_v34 = vpop.f32.mrb[19].mxu0  ;;  %490 = vrot.lane.b32.xlu0 %v363_v11, %s10854_s14 }
 0x102   :  { %v727_v33 = vmax.f32 %v665_v27, 0.0  ;;  %v668_v60 = vadd.f32 %v11258_v57, %v667_v34  ;;  %v10725_v27 = vld [vmem:[%s14482_s0 + $0xe0] sm:$0xff]  }
 0x103   :  { %v841_v63 = vmul.f32 %v11190_v22, %v729_v19  ;;  %v730_v1 = vmax.f32 %v676_v36, 0.0  ;;  %423 = vrot.lane.b32.xlu1 %v362_v17, %s10855_s15  ;;  %v10724_v22 = vld [vmem:[%s14482_s0 + $0xd8] sm:$0xff]  }
 0x104   :  { %v839_v2 = vmul.f32 %v11206_v30, %v727_v33  ;;  %v728_v55 = vmax.f32 %v668_v60, 0.0  ;;  %9473 = vmatmul.mubr.msk.bf16.gmra.mrb[4].mxu1 %vm115_vm0, %v10724_v22 }
 0x105   :  { %857 = vst.msk [vmem:[#allocation2 + $0xa9] sm:$0xff] %vm115_vm0, %v841_v63  ;;  %v842_v3 = vmul.f32 %v11210_v32, %v730_v1  ;;  %421 = vrot.lane.b32.xlu0 %v11354_v41, %s10855_s15  ;;  %9476 = vmatprep.mubr.msk.bf16.mxu1 %vm115_vm0, %v10725_v27 }
 0x106   :  { %855 = vst.msk [vmem:[#allocation2 + $0x99] sm:$0xff] %vm115_vm0, %v839_v2  ;;  %v11387_v30 = vmul.f32 %v11188_v21, %v728_v55  ;;  %v9434_v4 = vpop.f32.mrb[20].mxu0 }
 0x107   :  { %858 = vst.msk [vmem:[#allocation2 + $0xb1] sm:$0xff] %vm115_vm0, %v842_v3  ;;  %v689_v6 = vadd.f32 %v9434_v4, %v11258_v57  ;;  %v680_v32 = vpop.f32.mrb[21].mxu0  ;;  %488 = vrot.lane.b32.xlu1 %v362_v17, %s10854_s14  ;;  %v10727_v4 = vld [vmem:[%s14482_s0 + $0xf0] sm:$0xff]  }
 0x108   :  { %856 = vst.msk [vmem:[#allocation2 + $0xa1] sm:$0xff] %vm115_vm0, %v11387_v30  ;;  %v681_v7 = vadd.f32 %v11258_v57, %v680_v32  ;;  %v9435_v43 = vpop.f32.mrb[22].mxu0 }
 0x109   :  { %v733_v21 = vmax.f32 %v689_v6, 0.0  ;;  %v692_v8 = vadd.f32 %v9435_v43, %v11258_v57  ;;  %v683_v11 = vpop.f32.mrb[23].mxu0  ;;  %427 = vrot.lane.b32.xlu0 %v364_v14, %s10855_s15 }
 0x10a   :  { %v731_v38 = vmax.f32 %v681_v7, 0.0  ;;  %v684_v13 = vadd.f32 %v11258_v57, %v683_v11 }
 0x10b   :  { %v11401_v39 = vmul.f32 %v11194_v24, %v733_v21  ;;  %v734_v17 = vmax.f32 %v692_v8, 0.0  ;;  %891 = vrot.lane.b32.xlu1 %v841_v63, %s10855_s15  ;;  %v10726_v24 = vld [vmem:[%s14482_s0 + $0xe8] sm:$0xff]  }
 0x10c   :  { %v11405_v50 = vmul.f32 %v11192_v23, %v731_v38  ;;  %v732_v52 = vmax.f32 %v684_v13, 0.0  ;;  %9477 = vmatmul.mubr.msk.bf16.gmra.mrb[8].mxu1 %vm115_vm0, %v10726_v24 }
 0x10d   :  { %861 = vst.msk [vmem:[#allocation2 + $0xc9] sm:$0xff] %vm115_vm0, %v11401_v39  ;;  %v11413_v14 = vmul.f32 %v11216_v37, %v734_v17  ;;  %955 = vrot.lane.b32.xlu0 %v841_v63, %s10854_s14  ;;  %v11435_v63 = vpop.permute.xlu0 %1254  ;;  %9480 = vmatprep.mubr.msk.bf16.mxu1 %vm115_vm0, %v10727_v4 }
 0x10e   :  { %859 = vst.msk [vmem:[#allocation2 + $0xb9] sm:$0xff] %vm115_vm0, %v11405_v50  ;;  %v11422_v23 = vmul.f32 %v11214_v35, %v732_v52  ;;  %v9438_v18 = vpop.f32.mrb[24].mxu0 }
 0x10f   :  { %862 = vst.msk [vmem:[#allocation2 + $0xd1] sm:$0xff] %vm115_vm0, %v11413_v14  ;;  %v705_v37 = vadd.f32 %v9438_v18, %v11258_v57  ;;  %v696_v19 = vpop.f32.mrb[25].mxu0  ;;  %887 = vrot.lane.b32.xlu1 %v839_v2, %s10855_s15 }
 0x110   :  { %860 = vst.msk [vmem:[#allocation2 + $0xc1] sm:$0xff] %vm115_vm0, %v11422_v23  ;;  %v697_v36 = vadd.f32 %v11258_v57, %v696_v19  ;;  %v9439_v35 = vpop.f32.mrb[26].mxu0 }
 0x111   :  { %v737_v34 = vmax.f32 %v705_v37, 0.0  ;;  %v708_v33 = vadd.f32 %v9439_v35, %v11258_v57  ;;  %v699_v60 = vpop.f32.mrb[27].mxu0  ;;  %951 = vrot.lane.b32.xlu0 %v839_v2, %s10854_s14 }
 0x112   :  { %v735_v1 = vmax.f32 %v697_v36, 0.0  ;;  %v700_v55 = vadd.f32 %v11258_v57, %v699_v60 }
 0x113   :  { %v11439_v44 = vmul.f32 %v11198_v26, %v737_v34  ;;  %v738_v22 = vmax.f32 %v708_v33, 0.0  ;;  %957 = vrot.lane.b32.xlu1 %v842_v3, %s10854_s14  ;;  %v10728_v26 = vld [vmem:[%s14482_s0 + $0xf8] sm:$0xff]  }
 0x114   :  { %v11446_v6 = vmul.f32 %v11196_v25, %v735_v1  ;;  %v736_v32 = vmax.f32 %v700_v55, 0.0  ;;  %9481 = vmatmul.mubr.msk.bf16.gmra.mrb[12].mxu1 %vm115_vm0, %v10728_v26 }
 0x115   :  { %865 = vst.msk [vmem:[#allocation2 + $0xe9] sm:$0xff] %vm115_vm0, %v11439_v44  ;;  %v11451_v2 = vmul.f32 %v11226_v42, %v738_v22  ;;  %893 = vrot.lane.b32.xlu0 %v842_v3, %s10855_s15  ;;  %v1265_v3 = vpop.permute.xlu0 %1264 }
 0x116   :  { %863 = vst.msk [vmem:[#allocation2 + $0xd9] sm:$0xff] %vm115_vm0, %v11446_v6  ;;  %v11461_v25 = vmul.f32 %v11222_v40, %v736_v32  ;;  %v9442_v7 = vpop.f32.mrb[28].mxu0 }
 0x117   :  { %866 = vst.msk [vmem:[#allocation2 + $0xf1] sm:$0xff] %vm115_vm0, %v11451_v2  ;;  %v721_v42 = vadd.f32 %v9442_v7, %v11258_v57  ;;  %v712_v43 = vpop.f32.mrb[29].mxu0  ;;  %953 = vrot.lane.b32.xlu1 %v11387_v30, %s10854_s14 }
 0x118   :  { %864 = vst.msk [vmem:[#allocation2 + $0xe1] sm:$0xff] %vm115_vm0, %v11461_v25  ;;  %v713_v21 = vadd.f32 %v11258_v57, %v712_v43  ;;  %v9443_v40 = vpop.f32.mrb[30].mxu0 }
 0x119   :  { %v741_v8 = vmax.f32 %v721_v42, 0.0  ;;  %v724_v11 = vadd.f32 %v9443_v40, %v11258_v57  ;;  %v715_v38 = vpop.f32.mrb[31].mxu0  ;;  %889 = vrot.lane.b32.xlu0 %v11387_v30, %s10855_s15  ;;  %v1275_v30 = vpop.permute.xlu0 %1274 }
 0x11a   :  { %v739_v13 = vmax.f32 %v713_v21, 0.0  ;;  %v716_v17 = vadd.f32 %v11258_v57, %v715_v38 }
 0x11b   :  { %v11477_v52 = vmul.f32 %v11204_v29, %v741_v8  ;;  %v742_v27 = vmax.f32 %v724_v11, 0.0  ;;  %895 = vrot.lane.b32.xlu1 %v11405_v50, %s10855_s15 }
 0x11c   :  { %v11482_v24 = vmul.f32 %v11202_v28, %v739_v13  ;;  %v740_v18 = vmax.f32 %v716_v17, 0.0 }
 0x11d   :  { %869 = vst.msk [vmem:[#allocation2 + $0x109] sm:$0xff] %vm115_vm0, %v11477_v52  ;;  %v11487_v37 = vmul.f32 %v11236_v47, %v742_v27  ;;  %899 = vrot.lane.b32.xlu0 %v11401_v39, %s10855_s15  ;;  %v1285_v4 = vpop.permute.xlu0 %1284 }
 0x11e   :  { %867 = vst.msk [vmem:[#allocation2 + $0xf9] sm:$0xff] %vm115_vm0, %v11482_v24  ;;  %v11494_v29 = vmul.f32 %v11232_v45, %v740_v18  ;;  %v9450_v19 = vpop.f32.mrb[32].mxu0 }
 0x11f   :  { %870 = vst.msk [vmem:[#allocation2 + $0x111] sm:$0xff] %vm115_vm0, %v11487_v37  ;;  %v1161_v28 = vadd.f32 %v9450_v19, %v11258_v57  ;;  %v1152_v36 = vpop.f32.mrb[33].mxu0  ;;  %901 = vrot.lane.b32.xlu1 %v11413_v14, %s10855_s15 }
 0x120   :  { %868 = vst.msk [vmem:[#allocation2 + $0x101] sm:$0xff] %vm115_vm0, %v11494_v29  ;;  %v1153_v47 = vadd.f32 %v11258_v57, %v1152_v36  ;;  %v9451_v35 = vpop.f32.mrb[34].mxu0 }
 0x121   :  { %v1217_v34 = vmax.f32 %v1161_v28, 0.0  ;;  %v1164_v45 = vadd.f32 %v9451_v35, %v11258_v57  ;;  %v1155_v33 = vpop.f32.mrb[35].mxu0  ;;  %963 = vrot.lane.b32.xlu0 %v11401_v39, %s10854_s14  ;;  %v1295_v21 = vpop.permute.xlu0 %1294 }
 0x122   :  { %v1215_v60 = vmax.f32 %v1153_v47, 0.0  ;;  %v1156_v1 = vadd.f32 %v11258_v57, %v1155_v33 }
 0x123   :  { %v11509_v55 = vmul.f32 %v11234_v46, %v1217_v34  ;;  %v1218_v22 = vmax.f32 %v1164_v45, 0.0  ;;  %965 = vrot.lane.b32.xlu1 %v11413_v14, %s10854_s14 }
 0x124   :  { %v11514_v32 = vmul.f32 %v11208_v31, %v1215_v60  ;;  %v1216_v26 = vmax.f32 %v1156_v1, 0.0 }
 0x125   :  { %1345 = vst.msk [vmem:[#allocation2 + $0x129] sm:$0xff] %vm115_vm0, %v11509_v55  ;;  %v11518_v7 = vmul.f32 %v1265_v3, %v1218_v22  ;;  %959 = vrot.lane.b32.xlu0 %v11405_v50, %s10854_s14  ;;  %v1305_v19 = vpop.permute.xlu0 %1304 }
 0x126   :  { %1343 = vst.msk [vmem:[#allocation2 + $0x119] sm:$0xff] %vm115_vm0, %v11514_v32  ;;  %v11525_v46 = vmul.f32 %v11435_v63, %v1216_v26  ;;  %v9454_v39 = vpop.f32.mrb[36].mxu0 }
 0x127   :  { %1346 = vst.msk [vmem:[#allocation2 + $0x131] sm:$0xff] %vm115_vm0, %v11518_v7  ;;  %v1177_v31 = vadd.f32 %v9454_v39, %v11258_v57  ;;  %v1168_v14 = vpop.f32.mrb[37].mxu0  ;;  %897 = vrot.lane.b32.xlu1 %v11422_v23, %s10855_s15 }
 0x128   :  { %1344 = vst.msk [vmem:[#allocation2 + $0x121] sm:$0xff] %vm115_vm0, %v11525_v46  ;;  %v1169_v50 = vadd.f32 %v11258_v57, %v1168_v14  ;;  %v9455_v42 = vpop.f32.mrb[38].mxu0 }
 0x129   :  { %v1221_v43 = vmax.f32 %v1177_v31, 0.0  ;;  %v1180_v63 = vadd.f32 %v9455_v42, %v11258_v57  ;;  %v1171_v3 = vpop.f32.mrb[39].mxu0  ;;  %903 = vrot.lane.b32.xlu0 %v11446_v6, %s10855_s15  ;;  %v11601_v42 = vld [vmem:[%s14484_s3] sm:$0xff]  }
 0x12a   :  { %v1219_v40 = vmax.f32 %v1169_v50, 0.0  ;;  %v1172_v8 = vadd.f32 %v11258_v57, %v1171_v3  ;;  %9596 = vmatprep.subr.bf16.mxu1 %v11601_v42  ;;  %9512 = vmatprep.subr.bf16.mxu0 %v11601_v42 }
 0x12b   :  { %v11540_v11 = vmul.f32 %v11240_v49, %v1221_v43  ;;  %v1222_v38 = vmax.f32 %v1180_v63, 0.0  ;;  %961 = vrot.lane.b32.xlu1 %v11422_v23, %s10854_s14 }
 0x12c   :  { %v11545_v13 = vmul.f32 %v11238_v48, %v1219_v40  ;;  %v1220_v17 = vmax.f32 %v1172_v8, 0.0 }
 0x12d   :  { %1349 = vst.msk [vmem:[#allocation2 + $0x149] sm:$0xff] %vm115_vm0, %v11540_v11  ;;  %v11549_v27 = vmul.f32 %v1285_v4, %v1222_v38  ;;  %967 = vrot.lane.b32.xlu0 %v11446_v6, %s10854_s14  ;;  %v1315_v4 = vpop.permute.xlu0 %1314 }
 0x12e   :  { %1347 = vst.msk [vmem:[#allocation2 + $0x139] sm:$0xff] %vm115_vm0, %v11545_v13  ;;  %v11555_v49 = vmul.f32 %v1275_v30, %v1220_v17  ;;  %v9458_v18 = vpop.f32.mrb[40].mxu0  ;;  %v1721_v17 = vld [vmem:[%s14480_s5 + $0x190] sm:$0xff] }
 0x12f   :  { %1350 = vst.msk [vmem:[#allocation2 + $0x151] sm:$0xff] %vm115_vm0, %v11549_v27  ;;  %v1193_v48 = vadd.f32 %v9458_v18, %v11258_v57  ;;  %v1184_v23 = vpop.f32.mrb[41].mxu0  ;;  %907 = vrot.lane.b32.xlu1 %v11439_v44, %s10855_s15 }
 0x130   :  { %1348 = vst.msk [vmem:[#allocation2 + $0x141] sm:$0xff] %vm115_vm0, %v11555_v49  ;;  %v1185_v6 = vadd.f32 %v11258_v57, %v1184_v23  ;;  %v9459_v28 = vpop.f32.mrb[42].mxu0 }
 0x131   :  { %v1225_v36 = vmax.f32 %v1193_v48, 0.0  ;;  %v1196_v30 = vadd.f32 %v9459_v28, %v11258_v57  ;;  %v1187_v47 = vpop.f32.mrb[43].mxu0  ;;  %909 = vrot.lane.b32.xlu0 %v11451_v2, %s10855_s15  ;;  %v1325_v40 = vpop.permute.xlu0 %1324  ;;  %v1722_v48 = vld [vmem:[%s14480_s5 + $0x198] sm:$0xff] }
 0x132   :  { %v1223_v35 = vmax.f32 %v1185_v6, 0.0  ;;  %v1188_v34 = vadd.f32 %v11258_v57, %v1187_v47 }
 0x133   :  { %v11570_v45 = vmul.f32 %v11248_v53, %v1225_v36  ;;  %v1226_v33 = vmax.f32 %v1196_v30, 0.0  ;;  %971 = vrot.lane.b32.xlu1 %v11439_v44, %s10854_s14  ;;  %v11714_v36 = vld [vmem:[%s14484_s3 + $0x8] sm:$0xff]  }
 0x134   :  { %v11575_v60 = vmul.f32 %v11244_v51, %v1223_v35  ;;  %v1224_v1 = vmax.f32 %v1188_v34, 0.0  ;;  %v11727_v35 = vld [vmem:[%s14484_s3 + $0x10] sm:$0xff]  }
 0x135   :  { %1353 = vst.msk [vmem:[#allocation2 + $0x169] sm:$0xff] %vm115_vm0, %v11570_v45  ;;  %v11579_v22 = vmul.f32 %v1305_v19, %v1226_v33  ;;  %973 = vrot.lane.b32.xlu0 %v11451_v2, %s10854_s14 }
 0x136   :  { %1351 = vst.msk [vmem:[#allocation2 + $0x159] sm:$0xff] %vm115_vm0, %v11575_v60  ;;  %v11585_v53 = vmul.f32 %v1295_v21, %v1224_v1  ;;  %v9462_v26 = vpop.f32.mrb[44].mxu0  ;;  %v11740_v1 = vld [vmem:[%s14484_s3 + $0x18] sm:$0xff]  }
 0x137   :  { %1354 = vst.msk [vmem:[#allocation2 + $0x171] sm:$0xff] %vm115_vm0, %v11579_v22  ;;  %v1209_v51 = vadd.f32 %v9462_v26, %v11258_v57  ;;  %v1200_v44 = vpop.f32.mrb[45].mxu0  ;;  %979 = vrot.lane.b32.xlu1 %v11477_v52, %s10854_s14  ;;  %v11754_v26 = vld [vmem:[%s14484_s3 + $0x20] sm:$0xff]  }
 0x138   :  { %1352 = vst.msk [vmem:[#allocation2 + $0x161] sm:$0xff] %vm115_vm0, %v11585_v53  ;;  %v1201_v2 = vadd.f32 %v11258_v57, %v1200_v44  ;;  %v9463_v39 = vpop.f32.mrb[46].mxu0  ;;  %v11766_v44 = vld [vmem:[%s14484_s3 + $0x28] sm:$0xff]  }
 0x139   :  { %v1229_v31 = vmax.f32 %v1209_v51, 0.0  ;;  %v1212_v14 = vadd.f32 %v9463_v39, %v11258_v57  ;;  %v1203_v50 = vpop.f32.mrb[47].mxu0  ;;  %905 = vrot.lane.b32.xlu0 %v11461_v25, %s10855_s15  ;;  %v11778_v39 = vld [vmem:[%s14484_s3 + $0x60] sm:$0xff]  }
 0x13a   :  { %v1227_v43 = vmax.f32 %v1201_v2, 0.0  ;;  %v1204_v63 = vadd.f32 %v11258_v57, %v1203_v50 }
 0x13b   :  { %v11605_v3 = vmul.f32 %v11263_v59, %v1229_v31  ;;  %v1230_v21 = vmax.f32 %v1212_v14, 0.0  ;;  %911 = vrot.lane.b32.xlu1 %v11482_v24, %s10855_s15 }
 0x13c   :  { %v11611_v8 = vmul.f32 %v11250_v54, %v1227_v43  ;;  %v1228_v38 = vmax.f32 %v1204_v63, 0.0 }
 0x13d   :  { %1357 = vst.msk [vmem:[#allocation2 + $0x189] sm:$0xff] %vm115_vm0, %v11605_v3  ;;  %v11616_v57 = vmul.f32 %v1325_v40, %v1230_v21  ;;  %969 = vrot.lane.b32.xlu0 %v11461_v25, %s10854_s14 }
 0x13e   :  { %1355 = vst.msk [vmem:[#allocation2 + $0x179] sm:$0xff] %vm115_vm0, %v11611_v8  ;;  %v11622_v59 = vmul.f32 %v1315_v4, %v1228_v38 }
 0x13f   :  { %1358 = vst.msk [vmem:[#allocation2 + $0x191] sm:$0xff] %vm115_vm0, %v11616_v57  ;;  %975 = vrot.lane.b32.xlu1 %v11482_v24, %s10854_s14 }
 0x140   :  { %1356 = vst.msk [vmem:[#allocation2 + $0x181] sm:$0xff] %vm115_vm0, %v11622_v59 }
 0x141   :  { %915 = vrot.lane.b32.xlu0 %v11477_v52, %s10855_s15 }
 0x143   :  { %917 = vrot.lane.b32.xlu1 %v11487_v37, %s10855_s15 }
 0x145   :  { %977 = vrot.lane.b32.xlu0 %v11494_v29, %s10854_s14 }
 0x147   :  { %981 = vrot.lane.b32.xlu1 %v11487_v37, %s10854_s14 }
 0x149   :  { %1375 = vrot.lane.b32.xlu0 %v11514_v32, %s10855_s15 }
 0x14b   :  { %913 = vrot.lane.b32.xlu1 %v11494_v29, %s10855_s15 }
 0x14d   :  { %1439 = vrot.lane.b32.xlu0 %v11514_v32, %s10854_s14 }
 0x14f   :  { %409 = vrot.lane.b32.xlu1 %v11297_v5, %s10855_s15 }
 0x151   :  { %411 = vrot.lane.b32.xlu0 %v11303_v10, %s10855_s15 }
 0x153   :  { %413 = vrot.lane.b32.xlu1 %v11326_v61, %s10855_s15 }
 0x155   :  { %472 = vrot.lane.b32.xlu0 %v11312_v12, %s10854_s14 }
 0x157   :  { %v467_v54 = vpop.permute.xlu1 %466  ;;  %v402_v25 = vpop.permute.xlu0 %401  ;;  %474 = vrot.lane.b32.xlu1 %v11297_v5, %s10854_s14 }
 0x158   :  { %448 = vst.msk [vmem:[#allocation2 + $0x28] sm:$0xff] %vm445_vm2, %v402_v25 }
 0x159   :  { %476 = vrot.lane.b32.xlu0 %v11303_v10, %s10854_s14 }
 0x15b   :  { %478 = vrot.lane.b32.xlu1 %v11326_v61, %s10854_s14  ;;  %v463_v52 = vpop.permute.xlu1 %462  ;;  %v398_v24 = vpop.permute.xlu0 %397 }
 0x15c   :  { %446 = vst.msk [vmem:[#allocation2 + $0x18] sm:$0xff] %vm445_vm2, %v398_v24 }
 0x15d   :  { %511 = vst.msk [vmem:[#allocation2 + $0x17] sm:$0xff] %vm510_vm3, %v463_v52  ;;  %415 = vrot.lane.b32.xlu0 %v11338_v56, %s10855_s15 }
 0x15f   :  { %417 = vrot.lane.b32.xlu1 %v11324_v58, %s10855_s15  ;;  %v404_v5 = vpop.permute.xlu1 %403  ;;  %v469_v12 = vpop.permute.xlu0 %468 }
 0x160   :  { %449 = vst.msk [vmem:[#allocation2 + $0x30] sm:$0xff] %vm445_vm2, %v404_v5 }
 0x161   :  { %514 = vst.msk [vmem:[#allocation2 + $0x2f] sm:$0xff] %vm510_vm3, %v469_v12  ;;  %419 = vrot.lane.b32.xlu0 %v11331_v0, %s10855_s15 }
 0x163   :  { %480 = vrot.lane.b32.xlu1 %v11338_v56, %s10854_s14  ;;  %v400_v10 = vpop.permute.xlu1 %399  ;;  %v465_v61 = vpop.permute.xlu0 %464 }
 0x164   :  { %447 = vst.msk [vmem:[#allocation2 + $0x20] sm:$0xff] %vm445_vm2, %v400_v10 }
 0x165   :  { %513 = vst.msk [vmem:[#allocation2 + $0x27] sm:$0xff] %vm510_vm3, %v467_v54  ;;  %512 = vst.msk [vmem:[#allocation2 + $0x1f] sm:$0xff] %vm510_vm3, %v465_v61  ;;  %482 = vrot.lane.b32.xlu0 %v11324_v58, %s10854_s14  ;;  %v1720_v58 = vld [vmem:[%s14480_s5 + $0x188] sm:$0xff] }
 0x167   :  { %484 = vrot.lane.b32.xlu1 %v11331_v0, %s10854_s14  ;;  %v471_v37 = vpop.permute.xlu1 %470  ;;  %v406_v29 = vpop.permute.xlu0 %405 }
 0x168   :  { %450 = vst.msk [vmem:[#allocation2 + $0x38] sm:$0xff] %vm445_vm2, %v406_v29 }
 0x169   :  { %515 = vst.msk [vmem:[#allocation2 + $0x37] sm:$0xff] %vm510_vm3, %v471_v37  ;;  %486 = vrot.lane.b32.xlu0 %v11354_v41, %s10854_s14 }
 0x16b   :  { %1443 = vrot.lane.b32.xlu1 %v11509_v55, %s10854_s14  ;;  %v408_v56 = vpop.permute.xlu0 %407 }
 0x16c   :  { %451 = vst.msk [vmem:[#allocation2 + $0x40] sm:$0xff] %vm445_vm2, %v408_v56  ;;  %v11688_v0 = vld [vmem:[#allocation2 + $0x18] sm:$0xff]  ;;  %v11690_v32 = vld [vmem:[#allocation2 + $0x20] sm:$0xff]  ;;  %v11704_v23 = vld [vmem:[#allocation2 + $0x28] sm:$0xff] }
 0x16d   :  { %1379 = vrot.lane.b32.xlu0 %v11509_v55, %s10855_s15  ;;  %v2030_v41 = vpack.c.bf16 %v11690_v32, %v11688_v0 }
 0x16f   :  { %1742 = vperm.xlu1 %10682, %v1720_v58   ;;  %v426_v18 = vpop.permute.xlu0 %425  ;;  %9496 = vmatprep.mubr.msk.bf16.mxu0 %vm27_vm1, %v2030_v41 }
 0x170   :  { %460 = vst.msk [vmem:[#allocation2 + $0x88] sm:$0xff] %vm445_vm2, %v426_v18  ;;  %v11706_v55 = vld [vmem:[#allocation2 + $0x30] sm:$0xff] }
 0x171   :  { %v493_v19 = vpop.permute.xlu1 %492  ;;  %1747 = vperm.xlu0 %10681, %v1721_v17   ;;  %v2031_v6 = vpack.c.bf16 %v11706_v55, %v11704_v23 }
 0x173   :  { %1752 = vperm.xlu1 %10682, %v1722_v48   ;;  %v491_v28 = vpop.permute.xlu0 %490  ;;  %9497 = vmatmul.mubr.msk.bf16.vlgmr.msra.gmra.mrb[48].mxu0 %vm27_vm1, %v2031_v6 }
 0x174   :  { %9513 = vmatpush3.bf16.msra.mxu0 %v11601_v42 }
 0x175   :  { %v424_v30 = vpop.permute.xlu1 %423  ;;  %1445 = vrot.lane.b32.xlu0 %v11518_v7, %s10854_s14  ;;  %9514 = vmatprep.subr.bf16.mxu0 %v11714_v36 }
 0x176   :  { %459 = vst.msk [vmem:[#allocation2 + $0x80] sm:$0xff] %vm445_vm2, %v424_v30 }
 0x177   :  { %525 = vst.msk [vmem:[#allocation2 + $0x87] sm:$0xff] %vm510_vm3, %v491_v28  ;;  %1863 = vrot.lane.b32.xlu1 %v11276_v16, %s10855_s15  ;;  %v422_v47 = vpop.permute.xlu0 %421 }
 0x178   :  { %458 = vst.msk [vmem:[#allocation2 + $0x78] sm:$0xff] %vm445_vm2, %v422_v47  ;;  %9515 = vmatpush3.bf16.msra.mxu0 %v11714_v36 }
 0x179   :  { %v489_v34 = vpop.permute.xlu1 %488  ;;  %1441 = vrot.lane.b32.xlu0 %v11525_v46, %s10854_s14  ;;  %9516 = vmatprep.subr.bf16.mxu0 %v11727_v35 }
 0x17a   :  { %524 = vst.msk [vmem:[#allocation2 + $0x7f] sm:$0xff] %vm510_vm3, %v489_v34 }
 0x17b   :  { %1381 = vrot.lane.b32.xlu1 %v11518_v7, %s10855_s15  ;;  %v428_v33 = vpop.permute.xlu0 %427 }
 0x17c   :  { %461 = vst.msk [vmem:[#allocation2 + $0x90] sm:$0xff] %vm445_vm2, %v428_v33  ;;  %9517 = vmatpush3.bf16.msra.mxu0 %v11727_v35 }
 0x17d   :  { %526 = vst.msk [vmem:[#allocation2 + $0x8f] sm:$0xff] %vm510_vm3, %v493_v19  ;;  %v892_v4 = vpop.permute.xlu1 %891  ;;  %1387 = vrot.lane.b32.xlu0 %v11540_v11, %s10855_s15  ;;  %9518 = vmatprep.subr.bf16.mxu0 %v11740_v1 }
 0x17e   :  { %937 = vst.msk [vmem:[#allocation2 + $0xa8] sm:$0xff] %vm445_vm2, %v892_v4 }
 0x17f   :  { %1377 = vrot.lane.b32.xlu1 %v11525_v46, %s10855_s15  ;;  %v956_v7 = vpop.permute.xlu0 %955 }
 0x180   :  { %9519 = vmatpush3.bf16.msra.mxu0 %v11740_v1 }
 0x181   :  { %v888_v51 = vpop.permute.xlu1 %887  ;;  %1451 = vrot.lane.b32.xlu0 %v11540_v11, %s10854_s14  ;;  %9520 = vmatprep.subr.bf16.mxu0 %v11754_v26 }
 0x182   :  { %935 = vst.msk [vmem:[#allocation2 + $0x98] sm:$0xff] %vm445_vm2, %v888_v51 }
 0x183   :  { %1383 = vrot.lane.b32.xlu1 %v11545_v13, %s10855_s15  ;;  %v952_v46 = vpop.permute.xlu0 %951 }
 0x184   :  { %999 = vst.msk [vmem:[#allocation2 + $0x97] sm:$0xff] %vm510_vm3, %v952_v46  ;;  %9521 = vmatpush3.bf16.msra.mxu0 %v11754_v26 }
 0x185   :  { %v958_v2 = vpop.permute.xlu1 %957  ;;  %1447 = vrot.lane.b32.xlu0 %v11545_v13, %s10854_s14  ;;  %9522 = vmatprep.subr.bf16.mxu0 %v11766_v44 }
 0x187   :  { %1389 = vrot.lane.b32.xlu1 %v11549_v27, %s10855_s15  ;;  %v894_v11 = vpop.permute.xlu0 %893 }
 0x188   :  { %938 = vst.msk [vmem:[#allocation2 + $0xb0] sm:$0xff] %vm445_vm2, %v894_v11  ;;  %9523 = vmatpush3.bf16.msra.mxu0 %v11766_v44 }
 0x189   :  { %1002 = vst.msk [vmem:[#allocation2 + $0xaf] sm:$0xff] %vm510_vm3, %v958_v2  ;;  %v954_v31 = vpop.permute.xlu1 %953  ;;  %1395 = vrot.lane.b32.xlu0 %v11570_v45, %s10855_s15  ;;  %9540 = vmatprep.subr.bf16.mxu0 %v11778_v39 }
 0x18b   :  { %1453 = vrot.lane.b32.xlu1 %v11549_v27, %s10854_s14  ;;  %v890_v13 = vpop.permute.xlu0 %889 }
 0x18c   :  { %936 = vst.msk [vmem:[#allocation2 + $0xa0] sm:$0xff] %vm445_vm2, %v890_v13 }
 0x18d   :  { %1000 = vst.msk [vmem:[#allocation2 + $0x9f] sm:$0xff] %vm510_vm3, %v954_v31  ;;  %1001 = vst.msk [vmem:[#allocation2 + $0xa7] sm:$0xff] %vm510_vm3, %v956_v7  ;;  %v896_v14 = vpop.permute.xlu1 %895  ;;  %1459 = vrot.lane.b32.xlu0 %v11570_v45, %s10854_s14  ;;  %v11909_v31 = vld [vmem:[#allocation2 + $0x88] sm:$0xff] }
 0x18e   :  { %939 = vst.msk [vmem:[#allocation2 + $0xb8] sm:$0xff] %vm445_vm2, %v896_v14 }
 0x18f   :  { %1385 = vrot.lane.b32.xlu1 %v11555_v49, %s10855_s15  ;;  %v900_v50 = vpop.permute.xlu0 %899 }
 0x190   :  { %941 = vst.msk [vmem:[#allocation2 + $0xc8] sm:$0xff] %vm445_vm2, %v900_v50 }
 0x191   :  { %v902_v27 = vpop.permute.xlu1 %901  ;;  %1391 = vrot.lane.b32.xlu0 %v11575_v60, %s10855_s15 }
 0x192   :  { %942 = vst.msk [vmem:[#allocation2 + $0xd0] sm:$0xff] %vm445_vm2, %v902_v27 }
 0x193   :  { %1449 = vrot.lane.b32.xlu1 %v11555_v49, %s10854_s14  ;;  %v964_v43 = vpop.permute.xlu0 %963 }
 0x194   :  { %v11802_v63 = vld [vmem:[#allocation2 + $0x98] sm:$0xff]  ;;  %v11804_v45 = vld [vmem:[#allocation2 + $0xa0] sm:$0xff]  ;;  %v11827_v52 = vld [vmem:[#allocation2 + $0xa8] sm:$0xff] }
 0x195   :  { %v966_v21 = vpop.permute.xlu1 %965  ;;  %1455 = vrot.lane.b32.xlu0 %v11575_v60, %s10854_s14  ;;  %v2651_v40 = vpack.c.bf16 %v11804_v45, %v11802_v63 }
 0x196   :  { %1006 = vst.msk [vmem:[#allocation2 + $0xcf] sm:$0xff] %vm510_vm3, %v966_v21 }
 0x197   :  { %1397 = vrot.lane.b32.xlu1 %v11579_v22, %s10855_s15  ;;  %9580 = vmatprep.mubr.msk.bf16.mxu1 %vm27_vm1, %v2651_v40  ;;  %v960_v49 = vpop.permute.xlu0 %959 }
 0x198   :  { %1003 = vst.msk [vmem:[#allocation2 + $0xb7] sm:$0xff] %vm510_vm3, %v960_v49  ;;  %v11925_v49 = vld [vmem:[#allocation2 + $0x80] sm:$0xff] }
 0x199   :  { %v898_v38 = vpop.permute.xlu1 %897  ;;  %1467 = vrot.lane.b32.xlu0 %v11605_v3, %s10854_s14 }
 0x19a   :  { %940 = vst.msk [vmem:[#allocation2 + $0xc0] sm:$0xff] %vm445_vm2, %v898_v38 }
 0x19b   :  { %1005 = vst.msk [vmem:[#allocation2 + $0xc7] sm:$0xff] %vm510_vm3, %v964_v43  ;;  %1461 = vrot.lane.b32.xlu1 %v11579_v22, %s10854_s14  ;;  %v904_v60 = vpop.permute.xlu0 %903 }
 0x19c   :  { %943 = vst.msk [vmem:[#allocation2 + $0xd8] sm:$0xff] %vm445_vm2, %v904_v60  ;;  %v11930_v60 = vpack.c.bf16 %v11909_v31, %v11925_v49 }
 0x19d   :  { %v962_v54 = vpop.permute.xlu1 %961  ;;  %1399 = vrot.lane.b32.xlu0 %v11611_v8, %s10855_s15 }
 0x19e   :  { %1004 = vst.msk [vmem:[#allocation2 + $0xbf] sm:$0xff] %vm510_vm3, %v962_v54 }
 0x19f   :  { %1393 = vrot.lane.b32.xlu1 %v11585_v53, %s10855_s15  ;;  %v968_v25 = vpop.permute.xlu0 %967  ;;  %v11829_v24 = vld [vmem:[#allocation2 + $0xb0] sm:$0xff] }
 0x1a0   :  { %1007 = vst.msk [vmem:[#allocation2 + $0xd7] sm:$0xff] %vm510_vm3, %v968_v25  ;;  %v2652_v22 = vpack.c.bf16 %v11829_v24, %v11827_v52 }
 0x1a1   :  { %v908_v5 = vpop.permute.xlu1 %907  ;;  %1463 = vrot.lane.b32.xlu0 %v11611_v8, %s10854_s14 }
 0x1a2   :  { %945 = vst.msk [vmem:[#allocation2 + $0xe8] sm:$0xff] %vm445_vm2, %v908_v5  ;;  %9581 = vmatmul.mubr.msk.bf16.vlgmr.msra.gmra.mrb[16].mxu1 %vm27_vm1, %v2652_v22  ;;  %v11853_v29 = vld [vmem:[#allocation2 + $0xc8] sm:$0xff]  ;;  %v11938_v5 = vld [vmem:[#allocation2 + $0x90] sm:$0xff] }
 0x1a3   :  { %1457 = vrot.lane.b32.xlu1 %v11585_v53, %s10854_s14  ;;  %v910_v12 = vpop.permute.xlu0 %909  ;;  %9597 = vmatpush3.bf16.msra.mxu1 %v11601_v42 }
 0x1a4   :  { %946 = vst.msk [vmem:[#allocation2 + $0xf0] sm:$0xff] %vm445_vm2, %v910_v12  ;;  %9598 = vmatprep.subr.bf16.mxu1 %v11714_v36  ;;  %v11943_v12 = vpack.c.bf16 %v11802_v63, %v11938_v5 }
 0x1a5   :  { %v972_v10 = vpop.permute.xlu1 %971  ;;  %1405 = vrot.lane.b32.xlu0 %v11616_v57, %s10855_s15  ;;  %v11845_v61 = vld [vmem:[#allocation2 + $0xb8] sm:$0xff]  ;;  %v11847_v8 = vld [vmem:[#allocation2 + $0xc0] sm:$0xff] }
 0x1a6   :  { %v2653_v37 = vpack.c.bf16 %v11847_v8, %v11845_v61 }
 0x1a7   :  { %1403 = vrot.lane.b32.xlu1 %v11605_v3, %s10855_s15  ;;  %v974_v53 = vpop.permute.xlu0 %973  ;;  %v11855_v56 = vld [vmem:[#allocation2 + $0xd0] sm:$0xff]  ;;  %9599 = vmatpush3.bf16.msra.mxu1 %v11714_v36 }
 0x1a8   :  { %1010 = vst.msk [vmem:[#allocation2 + $0xef] sm:$0xff] %vm510_vm3, %v974_v53  ;;  %9584 = vmatprep.mubr.msk.bf16.mxu1 %vm27_vm1, %v2653_v37  ;;  %v2654_v58 = vpack.c.bf16 %v11855_v56, %v11853_v29  ;;  %9600 = vmatprep.subr.bf16.mxu1 %v11727_v35  ;;  %v11952_v53 = vpack.c.bf16 %v11827_v52, %v11804_v45  ;;  %v11972_v45 = vld [vmem:[%s14484_s3 + $0x70] sm:$0xff]  }
 0x1a9   :  { %v980_v41 = vpop.permute.xlu1 %979  ;;  %1401 = vrot.lane.b32.xlu0 %v11622_v59, %s10855_s15 }
 0x1aa   :  { %9585 = vmatmul.mubr.msk.bf16.gmra.mrb[20].mxu1 %vm27_vm1, %v2654_v58 }
 0x1ab   :  { %1465 = vrot.lane.b32.xlu1 %v11622_v59, %s10854_s14  ;;  %v906_v3 = vpop.permute.xlu0 %905  ;;  %9601 = vmatpush3.bf16.msra.mxu1 %v11727_v35 }
 0x1ac   :  { %944 = vst.msk [vmem:[#allocation2 + $0xe0] sm:$0xff] %vm445_vm2, %v906_v3  ;;  %9602 = vmatprep.subr.bf16.mxu1 %v11740_v1 }
 0x1ad   :  { %1009 = vst.msk [vmem:[#allocation2 + $0xe7] sm:$0xff] %vm510_vm3, %v972_v10  ;;  %v912_v17 = vpop.permute.xlu1 %911  ;;  %1469 = vrot.lane.b32.xlu0 %v11616_v57, %s10854_s14  ;;  %v11948_v10 = vld [vmem:[%s14484_s3 + $0x68] sm:$0xff]  }
 0x1ae   :  { %947 = vst.msk [vmem:[#allocation2 + $0xf8] sm:$0xff] %vm445_vm2, %v912_v17 }
 0x1af   :  { %1927 = vrot.lane.b32.xlu1 %v11276_v16, %s10854_s14  ;;  %v970_v18 = vpop.permute.xlu0 %969  ;;  %9603 = vmatpush3.bf16.msra.mxu1 %v11740_v1 }
 0x1b0   :  { %1008 = vst.msk [vmem:[#allocation2 + $0xdf] sm:$0xff] %vm510_vm3, %v970_v18  ;;  %9604 = vmatprep.subr.bf16.mxu1 %v11754_v26 }
 0x1b1   :  { %v976_v59 = vpop.permute.xlu1 %975 }
 0x1b2   :  { %1011 = vst.msk [vmem:[#allocation2 + $0xf7] sm:$0xff] %vm510_vm3, %v976_v59 }
 0x1b3   :  { %v916_v48 = vpop.permute.xlu0 %915  ;;  %9605 = vmatpush3.bf16.msra.mxu1 %v11754_v26 }
 0x1b4   :  { %949 = vst.msk [vmem:[#allocation2 + $0x108] sm:$0xff] %vm445_vm2, %v916_v48  ;;  %9606 = vmatprep.subr.bf16.mxu1 %v11766_v44  ;;  %v11893_v47 = vld [vmem:[#allocation2 + $0xe8] sm:$0xff] }
 0x1b5   :  { %v918_v57 = vpop.permute.xlu1 %917 }
 0x1b6   :  { %950 = vst.msk [vmem:[#allocation2 + $0x110] sm:$0xff] %vm445_vm2, %v918_v57  ;;  %v2643_v57 = vpack.c.bf16 %v11845_v61, %v11829_v24  ;;  %v12003_v24 = vld [vmem:[%s14484_s3 + $0x80] sm:$0xff]  }
 0x1b7   :  { %v978_v16 = vpop.permute.xlu0 %977  ;;  %v11885_v19 = vld [vmem:[#allocation2 + $0xd8] sm:$0xff]  ;;  %v11887_v6 = vld [vmem:[#allocation2 + $0xe0] sm:$0xff]  ;;  %9607 = vmatpush3.bf16.msra.mxu1 %v11766_v44 }
 0x1b8   :  { %v2655_v28 = vpack.c.bf16 %v11887_v6, %v11885_v19  ;;  %9624 = vmatprep.subr.bf16.mxu1 %v11778_v39 }
 0x1b9   :  { %v982_v30 = vpop.permute.xlu1 %981  ;;  %v11895_v34 = vld [vmem:[#allocation2 + $0xf0] sm:$0xff] }
 0x1ba   :  { %1014 = vst.msk [vmem:[#allocation2 + $0x10f] sm:$0xff] %vm510_vm3, %v982_v30  ;;  %9588 = vmatprep.mubr.msk.bf16.mxu1 %vm27_vm1, %v2655_v28  ;;  %v2656_v33 = vpack.c.bf16 %v11895_v34, %v11893_v47  ;;  %v2644_v30 = vpack.c.bf16 %v11853_v29, %v11847_v8 }
 0x1bb   :  { %v1376_v4 = vpop.permute.xlu0 %1375 }
 0x1bc   :  { %1423 = vst.msk [vmem:[#allocation2 + $0x118] sm:$0xff] %vm445_vm2, %v1376_v4  ;;  %9589 = vmatmul.mubr.msk.bf16.gmra.mrb[24].mxu1 %vm27_vm1, %v2656_v33 }
 0x1bd   :  { %v914_v7 = vpop.permute.xlu1 %913 }
 0x1be   :  { %948 = vst.msk [vmem:[#allocation2 + $0x100] sm:$0xff] %vm445_vm2, %v914_v7  ;;  %v2645_v7 = vpack.c.bf16 %v11885_v19, %v11855_v56 }
 0x1bf   :  { %1012 = vst.msk [vmem:[#allocation2 + $0xff] sm:$0xff] %vm510_vm3, %v978_v16  ;;  %1013 = vst.msk [vmem:[#allocation2 + $0x107] sm:$0xff] %vm510_vm3, %v980_v41  ;;  %v1440_v51 = vpop.permute.xlu0 %1439  ;;  %v11990_v16 = vld [vmem:[%s14484_s3 + $0x78] sm:$0xff]  }
 0x1c0   :  { %1487 = vst.msk [vmem:[#allocation2 + $0x117] sm:$0xff] %vm510_vm3, %v1440_v51  ;;  %v12019_v51 = vld [vmem:[%s14484_s3 + $0x88] sm:$0xff]  }
 0x1c1   :  { %v410_v46 = vpop.permute.xlu1 %409 }
 0x1c2   :  { %452 = vst.msk [vmem:[#allocation2 + $0x48] sm:$0xff] %vm445_vm2, %v410_v46  ;;  %v12023_v46 = vpack.c.bf16 %v11893_v47, %v11887_v6 }
 0x1c3   :  { %v412_v2 = vpop.permute.xlu0 %411 }
 0x1c4   :  { %453 = vst.msk [vmem:[#allocation2 + $0x50] sm:$0xff] %vm445_vm2, %v412_v2 }
 0x1c5   :  { %v414_v11 = vpop.permute.xlu1 %413 }
 0x1c6   :  { %454 = vst.msk [vmem:[#allocation2 + $0x58] sm:$0xff] %vm445_vm2, %v414_v11  ;;  %v11912_v13 = vld [vmem:[#allocation2 + $0xf8] sm:$0xff]  ;;  %v11914_v14 = vld [vmem:[#allocation2 + $0x100] sm:$0xff]  ;;  %v11916_v50 = vld [vmem:[#allocation2 + $0x108] sm:$0xff] }
 0x1c7   :  { %v473_v27 = vpop.permute.xlu0 %472  ;;  %v2657_v43 = vpack.c.bf16 %v11914_v14, %v11912_v13  ;;  %v11920_v21 = vld [vmem:[#allocation2 + $0x110] sm:$0xff]  ;;  %v2647_v47 = vpack.c.bf16 %v11912_v13, %v11895_v34 }
 0x1c8   :  { %516 = vst.msk [vmem:[#allocation2 + $0x3f] sm:$0xff] %vm510_vm3, %v473_v27  ;;  %v2658_v40 = vpack.c.bf16 %v11920_v21, %v11916_v50  ;;  %v1991_v27 = vld [vmem:[#allocation2] sm:$0xff] }
 0x1c9   :  { %v475_v38 = vpop.permute.xlu1 %474  ;;  %9592 = vmatprep.mubr.msk.bf16.mxu1 %vm27_vm1, %v2657_v43  ;;  %v1992_v43 = vld [vmem:[#allocation2 + $0x8] sm:$0xff] }
 0x1ca   :  { %517 = vst.msk [vmem:[#allocation2 + $0x47] sm:$0xff] %vm510_vm3, %v475_v38  ;;  %9593 = vmatmul.mubr.msk.bf16.gmra.mrb[28].mxu1 %vm27_vm1, %v2658_v40  ;;  %v10799_v40 = vld [vmem:[%s14484_s3 + $0x30] sm:$0xff]   ;;  %v2007_v13 = vpack.c.bf16 %v1992_v43, %v1991_v27  ;;  %v1724_v43 = vld [vmem:[%s14480_s5 + $0x1a8] sm:$0xff] }
 0x1cb   :  { %9608 = vmatprep.mubr.msk.bf16.mxu1 %vm27_vm1, %v11930_v60  ;;  %v477_v54 = vpop.permute.xlu0 %476 }
 0x1cc   :  { %518 = vst.msk [vmem:[#allocation2 + $0x4f] sm:$0xff] %vm510_vm3, %v477_v54 }
 0x1cd   :  { %v479_v25 = vpop.permute.xlu1 %478 }
 0x1ce   :  { %519 = vst.msk [vmem:[#allocation2 + $0x57] sm:$0xff] %vm510_vm3, %v479_v25  ;;  %v2037_v25 = vpack.c.bf16 %v11938_v5, %v11909_v31  ;;  %v1993_v31 = vld [vmem:[#allocation2 + $0x10] sm:$0xff] }
 0x1cf   :  { %v416_v22 = vpop.permute.xlu0 %415  ;;  %v11954_v58 = vld [vmem:[#allocation2 + $0x38] sm:$0xff]  ;;  %v2008_v5 = vpack.c.bf16 %v11688_v0, %v1993_v31 }
 0x1d0   :  { %455 = vst.msk [vmem:[#allocation2 + $0x60] sm:$0xff] %vm445_vm2, %v416_v22  ;;  %v1730_v31 = vld [vmem:[%s14480_s5 + $0x1d8] sm:$0xff] }
 0x1d1   :  { %v418_v37 = vpop.permute.xlu1 %417  ;;  %v11956_v41 = vld [vmem:[#allocation2 + $0x40] sm:$0xff] }
 0x1d2   :  { %456 = vst.msk [vmem:[#allocation2 + $0x68] sm:$0xff] %vm445_vm2, %v418_v37  ;;  %9609 = vmatmul.mubr.msk.bf16.vlgmr.msra.gmra.mrb[16].mxu1 %vm27_vm1, %v11943_v12  ;;  %v2032_v63 = vpack.c.bf16 %v11956_v41, %v11954_v58 }
 0x1d3   :  { %9612 = vmatprep.mubr.msk.bf16.mxu1 %vm27_vm1, %v11952_v53  ;;  %v420_v3 = vpop.permute.xlu0 %419  ;;  %9625 = vmatpush3.bf16.msra.mxu1 %v11778_v39  ;;  %v11974_v17 = vld [vmem:[#allocation2 + $0x48] sm:$0xff] }
 0x1d4   :  { %457 = vst.msk [vmem:[#allocation2 + $0x70] sm:$0xff] %vm445_vm2, %v420_v3  ;;  %9500 = vmatprep.mubr.msk.bf16.mxu0 %vm27_vm1, %v2032_v63  ;;  %9626 = vmatprep.subr.bf16.mxu1 %v11948_v10 }
 0x1d5   :  { %v481_v52 = vpop.permute.xlu1 %480  ;;  %v11976_v18 = vld [vmem:[#allocation2 + $0x50] sm:$0xff] }
 0x1d6   :  { %520 = vst.msk [vmem:[#allocation2 + $0x5f] sm:$0xff] %vm510_vm3, %v481_v52  ;;  %v2033_v59 = vpack.c.bf16 %v11976_v18, %v11974_v17 }
 0x1d7   :  { %v483_v48 = vpop.permute.xlu0 %482  ;;  %9627 = vmatpush3.bf16.msra.mxu1 %v11948_v10 }
 0x1d8   :  { %521 = vst.msk [vmem:[#allocation2 + $0x67] sm:$0xff] %vm510_vm3, %v483_v48  ;;  %9501 = vmatmul.mubr.msk.bf16.gmra.mrb[52].mxu0 %vm27_vm1, %v2033_v59  ;;  %9628 = vmatprep.subr.bf16.mxu1 %v11972_v45 }
 0x1d9   :  { %v485_v28 = vpop.permute.xlu1 %484 }
 0x1da   :  { %522 = vst.msk [vmem:[#allocation2 + $0x6f] sm:$0xff] %vm510_vm3, %v485_v28  ;;  %9613 = vmatmul.mubr.msk.bf16.gmra.mrb[20].mxu1 %vm27_vm1, %v2643_v57  ;;  %v12075_v28 = vpop.f32.mrb[4].mxu1 }
 0x1db   :  { %9616 = vmatprep.mubr.msk.bf16.mxu1 %vm27_vm1, %v2644_v30  ;;  %v487_v33 = vpop.permute.xlu0 %486  ;;  %9629 = vmatpush3.bf16.msra.mxu1 %v11972_v45 }
 0x1dc   :  { %523 = vst.msk [vmem:[#allocation2 + $0x77] sm:$0xff] %vm510_vm3, %v487_v33  ;;  %9630 = vmatprep.subr.bf16.mxu1 %v11990_v16  ;;  %v10801_v33 = vld [vmem:[%s14484_s3 + $0x38] sm:$0xff]  }
 0x1dd   :  { %v12005_v8 = vld [vmem:[#allocation2 + $0x58] sm:$0xff]  ;;  %v12056_v54 = vpop.permute.xlu1 %1443 }
 0x1df   :  { %v1380_v61 = vpop.permute.xlu0 %1379  ;;  %v12007_v29 = vld [vmem:[#allocation2 + $0x60] sm:$0xff]  ;;  %9631 = vmatpush3.bf16.msra.mxu1 %v11990_v16 }
 0x1e0   :  { %1425 = vst.msk [vmem:[#allocation2 + $0x128] sm:$0xff] %vm445_vm2, %v1380_v61  ;;  %v2034_v4 = vpack.c.bf16 %v12007_v29, %v12005_v8  ;;  %9632 = vmatprep.subr.bf16.mxu1 %v12003_v24  ;;  %v12084_v61 = vpop.f32.mrb[5].mxu1 }
 0x1e1   :  { %v12029_v2 = vld [vmem:[#allocation2 + $0x68] sm:$0xff]  ;;  %v12087_v0 = vpop.f32.mrb[6].mxu1 }
 0x1e2   :  { %9504 = vmatprep.mubr.msk.bf16.mxu0 %vm27_vm1, %v2034_v4  ;;  %9617 = vmatmul.mubr.msk.bf16.gmra.mrb[24].mxu1 %vm27_vm1, %v2645_v7 }
 0x1e3   :  { %9620 = vmatprep.mubr.msk.bf16.mxu1 %vm27_vm1, %v12023_v46  ;;  %v12031_v56 = vld [vmem:[#allocation2 + $0x70] sm:$0xff]  ;;  %v12033_v19 = vld [vmem:[#allocation2 + $0x78] sm:$0xff]  ;;  %9633 = vmatpush3.bf16.msra.mxu1 %v12003_v24 }
 0x1e4   :  { %v2035_v11 = vpack.c.bf16 %v12031_v56, %v12029_v2  ;;  %v2036_v6 = vpack.c.bf16 %v11925_v49, %v12033_v19  ;;  %9634 = vmatprep.subr.bf16.mxu1 %v12019_v51  ;;  %v12052_v49 = vld [vmem:[%s14483_s2] ss:$0 sm:$0xff] }
 0x1e5   :  { %v1644_v38 = vadd.f32 %v12052_v49, %v11359_v15  ;;  %v1649_v34 = vadd.f32 %v12052_v49, %v11266_v62  ;;  %v1652_v22 = vadd.f32 %v12052_v49, %v11350_v9 }
 0x1e6   :  { %9505 = vmatmul.mubr.msk.bf16.gmra.mrb[56].mxu0 %vm27_vm1, %v2035_v11  ;;  %v1723_v11 = vld [vmem:[%s14480_s5 + $0x1a0] sm:$0xff] }
 0x1e7   :  { %9508 = vmatprep.mubr.msk.bf16.mxu0 %vm27_vm1, %v2036_v6  ;;  %9635 = vmatpush3.bf16.msra.mxu1 %v12019_v51  ;;  %v1704_v37 = vmax.f32 %v1644_v38, 0.0  ;;  %v1705_v15 = vmax.f32 %v1649_v34, 0.0  ;;  %v1706_v59 = vmax.f32 %v1652_v22, 0.0  ;;  %v10802_v6 = vld [vmem:[%s14484_s3 + $0x40] sm:$0xff]   ;;  %v1726_v38 = vld [vmem:[%s14480_s5 + $0x1b8] sm:$0xff] }
 0x1e8   :  { %9692 = vmatprep.subr.bf16.mxu1 %v10799_v40 }
 0x1ea   :  { %9621 = vmatmul.mubr.msk.bf16.gmra.mrb[28].mxu1 %vm27_vm1, %v2647_v47 }
 0x1eb   :  { %9636 = vmatprep.mubr.msk.bf16.mxu1 %vm27_vm1, %v2643_v57 }
 0x1ee   :  { %v1743_v63 = vpop.permute.xlu1 %1742  ;;  %9509 = vmatmul.mubr.msk.bf16.gmra.mrb[60].mxu0 %vm27_vm1, %v2037_v25 }
 0x1ef   :  { %v1816_v3 = vmul.f32 %v1743_v63, %v1704_v37  ;;  %9524 = vmatprep.mubr.msk.bf16.mxu0 %vm27_vm1, %v2007_v13  ;;  %v12167_v63 = vpack.c.bf16 %v12005_v8, %v11976_v18  ;;  %v1729_v18 = vld [vmem:[%s14480_s5 + $0x1d0] sm:$0xff]  ;;  %v10805_v8 = vld [vmem:[%s14484_s3 + $0x58] sm:$0xff]  }
 0x1f0   :  { %v1748_v52 = vpop.permute.xlu0 %1747 }
 0x1f1   :  { %1832 = vst.msk [vmem:[#allocation2 + $0x1a1] sm:$0xff] %vm115_vm0, %v1816_v3  ;;  %v1817_v62 = vmul.f32 %v1748_v52, %v1705_v15  ;;  %1865 = vrot.lane.b32.xlu0 %v1816_v3, %s10855_s15  ;;  %v1728_v15 = vld [vmem:[%s14480_s5 + $0x1c8] sm:$0xff] }
 0x1f2   :  { %v1753_v48 = vpop.permute.xlu1 %1752  ;;  %9637 = vmatmul.mubr.msk.bf16.vlgmr.msra.gmra.mrb[16].mxu1 %vm27_vm1, %v2644_v30  ;;  %v2009_v30 = vpack.c.bf16 %v11704_v23, %v11690_v32  ;;  %v12095_v32 = vpop.f32.mrb[7].mxu1 }
 0x1f3   :  { %1833 = vst.msk [vmem:[#allocation2 + $0x1a9] sm:$0xff] %vm115_vm0, %v1817_v62  ;;  %v1818_v9 = vmul.f32 %v1753_v48, %v1706_v59  ;;  %9640 = vmatprep.mubr.msk.bf16.mxu1 %vm27_vm1, %v2645_v7  ;;  %1867 = vrot.lane.b32.xlu1 %v1817_v62, %s10855_s15  ;;  %v12147_v34 = vpop.f32.mrb[8].mxu1 }
 0x1f4   :  { %v1446_v57 = vpop.permute.xlu0 %1445  ;;  %9693 = vmatpush3.bf16.msra.mxu1 %v10799_v40  ;;  %v12150_v13 = vpop.f32.mrb[9].mxu1 }
 0x1f5   :  { %1834 = vst.msk [vmem:[#allocation2 + $0x1b1] sm:$0xff] %vm115_vm0, %v1818_v9  ;;  %1869 = vrot.lane.b32.xlu0 %v1818_v9, %s10855_s15  ;;  %9694 = vmatprep.subr.bf16.mxu1 %v10801_v33  ;;  %v12160_v25 = vpop.f32.mrb[10].mxu1 }
 0x1f6   :  { %v1864_v4 = vpop.permute.xlu1 %1863  ;;  %9525 = vmatmul.mubr.msk.bf16.vlgmr.msra.gmra.mrb[48].mxu0 %vm27_vm1, %v2008_v5  ;;  %v12163_v22 = vpop.f32.mrb[11].mxu1 }
 0x1f7   :  { %1911 = vst.msk [vmem:[#allocation2 + $0x198] sm:$0xff] %vm445_vm2, %v1864_v4  ;;  %1929 = vrot.lane.b32.xlu1 %v1816_v3, %s10854_s14  ;;  %9528 = vmatprep.mubr.msk.bf16.mxu0 %vm27_vm1, %v2009_v30  ;;  %v12176_v3 = vpack.c.bf16 %v12029_v2, %v12007_v29  ;;  %v12199_v5 = vpop.f32.mrb[12].mxu1 }
 0x1f8   :  { %v1442_v7 = vpop.permute.xlu0 %1441  ;;  %9541 = vmatpush3.bf16.msra.mxu0 %v11778_v39  ;;  %9695 = vmatpush3.bf16.msra.mxu1 %v10801_v33  ;;  %v1731_v33 = vld [vmem:[%s14480_s5 + $0x1e0] sm:$0xff] }
 0x1f9   :  { %1931 = vrot.lane.b32.xlu0 %v1817_v62, %s10854_s14  ;;  %9542 = vmatprep.subr.bf16.mxu0 %v11948_v10 }
 0x1fa   :  { %v1382_v23 = vpop.permute.xlu1 %1381  ;;  %9641 = vmatmul.mubr.msk.bf16.gmra.mrb[20].mxu1 %vm27_vm1, %v12023_v46  ;;  %9696 = vmatprep.subr.bf16.mxu1 %v10802_v6  ;;  %v12111_v46 = vpack.c.bf16 %v11954_v58, %v11706_v55  ;;  %v1725_v55 = vld [vmem:[%s14480_s5 + $0x1b0] sm:$0xff]  ;;  %v10803_v58 = vld [vmem:[%s14484_s3 + $0x48] sm:$0xff]  }
 0x1fb   :  { %1426 = vst.msk [vmem:[#allocation2 + $0x130] sm:$0xff] %vm445_vm2, %v1382_v23  ;;  %9644 = vmatprep.mubr.msk.bf16.mxu1 %vm27_vm1, %v2647_v47  ;;  %1933 = vrot.lane.b32.xlu1 %v1818_v9, %s10854_s14  ;;  %v12120_v47 = vpack.c.bf16 %v11974_v17, %v11956_v41  ;;  %v12141_v17 = vpack.c.bf16 %v11916_v50, %v11914_v14  ;;  %v1727_v14 = vld [vmem:[%s14480_s5 + $0x1c0] sm:$0xff]  ;;  %v10804_v50 = vld [vmem:[%s14484_s3 + $0x50] sm:$0xff]  }
 0x1fc   :  { %1490 = vst.msk [vmem:[#allocation2 + $0x12f] sm:$0xff] %vm510_vm3, %v1446_v57  ;;  %v1388_v27 = vpop.permute.xlu0 %1387  ;;  %9543 = vmatpush3.bf16.msra.mxu0 %v11948_v10  ;;  %9697 = vmatpush3.bf16.msra.mxu1 %v10802_v6  ;;  %v12203_v57 = vpop.f32.mrb[13].mxu1  ;;  %v1732_v6 = vld [vmem:[%s14480_s5 + $0x1e8] sm:$0xff] }
 0x1fd   :  { %1429 = vst.msk [vmem:[#allocation2 + $0x148] sm:$0xff] %vm445_vm2, %v1388_v27  ;;  %1757 = vperm.xlu0 %10681, %v1723_v11   ;;  %9544 = vmatprep.subr.bf16.mxu0 %v11972_v45  ;;  %v12211_v4 = vpop.f32.mrb[14].mxu1  ;;  %v2014_v11 = vpack.c.bf16 %v12033_v19, %v12031_v56  ;;  %v1734_v19 = vld [vmem:[%s14480_s5 + $0x1f8] sm:$0xff] }
 0x1fe   :  { %v1378_v40 = vpop.permute.xlu1 %1377  ;;  %9529 = vmatmul.mubr.msk.bf16.gmra.mrb[52].mxu0 %vm27_vm1, %v12111_v46  ;;  %9698 = vmatprep.subr.bf16.mxu1 %v10803_v58 }
 0x1ff   :  { %1424 = vst.msk [vmem:[#allocation2 + $0x120] sm:$0xff] %vm445_vm2, %v1378_v40  ;;  %1762 = vperm.xlu1 %10682, %v1724_v43   ;;  %9532 = vmatprep.mubr.msk.bf16.mxu0 %vm27_vm1, %v12120_v47  ;;  %v1733_v43 = vld [vmem:[%s14480_s5 + $0x1f0] sm:$0xff] }
 0x200   :  { %1488 = vst.msk [vmem:[#allocation2 + $0x11f] sm:$0xff] %vm510_vm3, %v1442_v7  ;;  %1489 = vst.msk [vmem:[#allocation2 + $0x127] sm:$0xff] %vm510_vm3, %v12056_v54  ;;  %v12137_v41 = vpop.permute.xlu0 %1451  ;;  %9545 = vmatpush3.bf16.msra.mxu0 %v11972_v45  ;;  %9699 = vmatpush3.bf16.msra.mxu1 %v10803_v58  ;;  %v12216_v7 = vpop.f32.mrb[15].mxu1 }
 0x201   :  { %1767 = vperm.xlu0 %10681, %v1725_v55   ;;  %9546 = vmatprep.subr.bf16.mxu0 %v11990_v16 }
 0x202   :  { %v1384_v54 = vpop.permute.xlu1 %1383  ;;  %9645 = vmatmul.mubr.msk.bf16.gmra.mrb[24].mxu1 %vm27_vm1, %v12141_v17  ;;  %9700 = vmatprep.subr.bf16.mxu1 %v10804_v50 }
 0x203   :  { %1427 = vst.msk [vmem:[#allocation2 + $0x138] sm:$0xff] %vm445_vm2, %v1384_v54  ;;  %1772 = vperm.xlu1 %10682, %v1726_v38  }
 0x204   :  { %v1448_v37 = vpop.permute.xlu0 %1447  ;;  %9547 = vmatpush3.bf16.msra.mxu0 %v11990_v16  ;;  %9701 = vmatpush3.bf16.msra.mxu1 %v10804_v50 }
 0x205   :  { %1491 = vst.msk [vmem:[#allocation2 + $0x137] sm:$0xff] %vm510_vm3, %v1448_v37  ;;  %1777 = vperm.xlu0 %10681, %v1727_v14   ;;  %9548 = vmatprep.subr.bf16.mxu0 %v12003_v24 }
 0x206   :  { %v1390_v52 = vpop.permute.xlu1 %1389  ;;  %9533 = vmatmul.mubr.msk.bf16.gmra.mrb[56].mxu0 %vm27_vm1, %v12167_v63  ;;  %9702 = vmatprep.subr.bf16.mxu1 %v10805_v8 }
 0x207   :  { %1430 = vst.msk [vmem:[#allocation2 + $0x150] sm:$0xff] %vm445_vm2, %v1390_v52  ;;  %1782 = vperm.xlu1 %10682, %v1728_v15   ;;  %9536 = vmatprep.mubr.msk.bf16.mxu0 %vm27_vm1, %v12176_v3  ;;  %v2914_v29 = vld [vmem:[#allocation2 + $0x118] sm:$0xff]  ;;  %v2915_v2 = vld [vmem:[#allocation2 + $0x120] sm:$0xff]  ;;  %v2916_v59 = vld [vmem:[#allocation2 + $0x128] sm:$0xff] }
 0x208   :  { %v1396_v62 = vpop.permute.xlu0 %1395  ;;  %v12191_v48 = vpack.c.bf16 %v2914_v29, %v11920_v21  ;;  %v12196_v9 = vpack.c.bf16 %v2916_v59, %v2915_v2  ;;  %9549 = vmatpush3.bf16.msra.mxu0 %v12003_v24  ;;  %9703 = vmatpush3.bf16.msra.mxu1 %v10805_v8  ;;  %v3211_v30 = vpack.c.bf16 %v2915_v2, %v2914_v29 }
 0x209   :  { %1433 = vst.msk [vmem:[#allocation2 + $0x168] sm:$0xff] %vm445_vm2, %v1396_v62  ;;  %1787 = vperm.xlu0 %10681, %v1729_v18   ;;  %9550 = vmatprep.subr.bf16.mxu0 %v12019_v51 }
 0x20a   :  { %v1454_v21 = vpop.permute.xlu1 %1453  ;;  %9648 = vmatprep.mubr.msk.bf16.mxu1 %vm27_vm1, %v12191_v48  ;;  %9720 = vmatprep.subr.bf16.mxu1 %v11601_v42 }
 0x20b   :  { %1494 = vst.msk [vmem:[#allocation2 + $0x14f] sm:$0xff] %vm510_vm3, %v1454_v21  ;;  %1792 = vperm.xlu1 %10682, %v1730_v31   ;;  %9649 = vmatmul.mubr.msk.bf16.gmra.mrb[28].mxu1 %vm27_vm1, %v12196_v9 }
 0x20c   :  { %9704 = vmatprep.mubr.msk.bf16.mxu1 %vm27_vm1, %v3211_v30  ;;  %v1460_v23 = vpop.permute.xlu0 %1459  ;;  %9551 = vmatpush3.bf16.msra.mxu0 %v12019_v51  ;;  %v12230_v40 = vld [vmem:[#allocation2 + $0x130] sm:$0xff] }
 0x20d   :  { %1797 = vperm.xlu0 %10681, %v1731_v33   ;;  %9652 = vmatprep.subr.bf16.mxu0 %v10853_v20  ;;  %v3212_v55 = vpack.c.bf16 %v12230_v40, %v2916_v59 }
 0x20e   :  { %v1386_v27 = vpop.permute.xlu1 %1385  ;;  %9537 = vmatmul.mubr.msk.bf16.gmra.mrb[60].mxu0 %vm27_vm1, %v2014_v11 }
 0x20f   :  { %1428 = vst.msk [vmem:[#allocation2 + $0x140] sm:$0xff] %vm445_vm2, %v1386_v27  ;;  %1802 = vperm.xlu1 %10682, %v1732_v6   ;;  %9552 = vmatprep.mubr.msk.bf16.mxu0 %vm27_vm1, %v12111_v46 }
 0x210   :  { %1493 = vst.msk [vmem:[#allocation2 + $0x147] sm:$0xff] %vm510_vm3, %v12137_v41  ;;  %v1392_v56 = vpop.permute.xlu0 %1391 }
 0x211   :  { %1431 = vst.msk [vmem:[#allocation2 + $0x158] sm:$0xff] %vm445_vm2, %v1392_v56  ;;  %1807 = vperm.xlu0 %10681, %v1733_v43  }
 0x212   :  { %v1450_v58 = vpop.permute.xlu1 %1449 }
 0x213   :  { %1492 = vst.msk [vmem:[#allocation2 + $0x13f] sm:$0xff] %vm510_vm3, %v1450_v58  ;;  %1812 = vperm.xlu1 %10682, %v1734_v19   ;;  %9705 = vmatmul.mubr.msk.bf16.vlgmr.msra.gmra.mrb[32].mxu1 %vm27_vm1, %v3212_v55  ;;  %v1657_v58 = vadd.f32 %v12052_v49, %v12084_v61 }
 0x214   :  { %v1456_v46 = vpop.permute.xlu0 %1455  ;;  %9721 = vmatpush3.bf16.msra.mxu1 %v11601_v42 }
 0x215   :  { %1495 = vst.msk [vmem:[#allocation2 + $0x157] sm:$0xff] %vm510_vm3, %v1456_v46  ;;  %9722 = vmatprep.subr.bf16.mxu1 %v11714_v36 }
 0x216   :  { %v1398_v41 = vpop.permute.xlu1 %1397  ;;  %9553 = vmatmul.mubr.msk.bf16.vlgmr.msra.gmra.mrb[48].mxu0 %vm27_vm1, %v12120_v47 }
 0x217   :  { %1434 = vst.msk [vmem:[#allocation2 + $0x170] sm:$0xff] %vm445_vm2, %v1398_v41  ;;  %9556 = vmatprep.mubr.msk.bf16.mxu0 %vm27_vm1, %v12167_v63  ;;  %v12261_v37 = vld [vmem:[#allocation2 + $0x148] sm:$0xff] }
 0x218   :  { %v1468_v38 = vpop.permute.xlu0 %1467  ;;  %9723 = vmatpush3.bf16.msra.mxu1 %v11714_v36 }
 0x219   :  { %9724 = vmatprep.subr.bf16.mxu1 %v11727_v35 }
 0x21a   :  { %v1462_v54 = vpop.permute.xlu1 %1461  ;;  %v12254_v42 = vld [vmem:[#allocation2 + $0x138] sm:$0xff]  ;;  %v12256_v14 = vld [vmem:[#allocation2 + $0x140] sm:$0xff] }
 0x21b   :  { %1498 = vst.msk [vmem:[#allocation2 + $0x16f] sm:$0xff] %vm510_vm3, %v1462_v54  ;;  %v3213_v47 = vpack.c.bf16 %v12256_v14, %v12254_v42  ;;  %v10743_v54 = vld [vmem:[%s14482_s0 + $0x100] sm:$0xff]  }
 0x21c   :  { %v1400_v50 = vpop.permute.xlu0 %1399  ;;  %v12263_v15 = vld [vmem:[#allocation2 + $0x150] sm:$0xff]  ;;  %9725 = vmatpush3.bf16.msra.mxu1 %v11727_v35 }
 0x21d   :  { %1435 = vst.msk [vmem:[#allocation2 + $0x178] sm:$0xff] %vm445_vm2, %v1400_v50  ;;  %9708 = vmatprep.mubr.msk.bf16.mxu1 %vm27_vm1, %v3213_v47  ;;  %v3214_v36 = vpack.c.bf16 %v12263_v15, %v12261_v37  ;;  %9726 = vmatprep.subr.bf16.mxu1 %v11740_v1  ;;  %v1707_v47 = vmax.f32 %v1657_v58, 0.0  ;;  %v10755_v58 = vld [vmem:[%s14482_s0 + $0x150] sm:$0xff]  }
 0x21e   :  { %v1394_v63 = vpop.permute.xlu1 %1393  ;;  %9557 = vmatmul.mubr.msk.bf16.gmra.mrb[52].mxu0 %vm27_vm1, %v12176_v3 }
 0x21f   :  { %1432 = vst.msk [vmem:[#allocation2 + $0x160] sm:$0xff] %vm445_vm2, %v1394_v63  ;;  %9560 = vmatprep.mubr.msk.bf16.mxu0 %vm27_vm1, %v2014_v11  ;;  %9709 = vmatmul.mubr.msk.bf16.gmra.mrb[36].mxu1 %vm27_vm1, %v3214_v36  ;;  %v1673_v63 = vadd.f32 %v12052_v49, %v12150_v13 }
 0x220   :  { %1497 = vst.msk [vmem:[#allocation2 + $0x167] sm:$0xff] %vm510_vm3, %v1460_v23  ;;  %v1464_v35 = vpop.permute.xlu0 %1463  ;;  %9727 = vmatpush3.bf16.msra.mxu1 %v11740_v1 }
 0x221   :  { %1499 = vst.msk [vmem:[#allocation2 + $0x177] sm:$0xff] %vm510_vm3, %v1464_v35  ;;  %9728 = vmatprep.subr.bf16.mxu1 %v11754_v26  ;;  %v10745_v35 = vld [vmem:[%s14482_s0 + $0x110] sm:$0xff]  }
 0x222   :  { %v1458_v52 = vpop.permute.xlu1 %1457 }
 0x223   :  { %1496 = vst.msk [vmem:[#allocation2 + $0x15f] sm:$0xff] %vm510_vm3, %v1458_v52 }
 0x224   :  { %v1406_v18 = vpop.permute.xlu0 %1405  ;;  %9729 = vmatpush3.bf16.msra.mxu1 %v11754_v26 }
 0x225   :  { %1438 = vst.msk [vmem:[#allocation2 + $0x190] sm:$0xff] %vm445_vm2, %v1406_v18  ;;  %9730 = vmatprep.subr.bf16.mxu1 %v11766_v44  ;;  %v10752_v18 = vld [vmem:[%s14481_s1 + $0x8] sm:$0xff]  }
 0x226   :  { %v1404_v3 = vpop.permute.xlu1 %1403  ;;  %9561 = vmatmul.mubr.msk.bf16.gmra.mrb[56].mxu0 %vm27_vm1, %v11930_v60 }
 0x227   :  { %1437 = vst.msk [vmem:[#allocation2 + $0x188] sm:$0xff] %vm445_vm2, %v1404_v3  ;;  %9564 = vmatprep.mubr.msk.bf16.mxu0 %vm27_vm1, %v11943_v12  ;;  %v3197_v8 = vld [vmem:[#allocation2 + $0x168] sm:$0xff] }
 0x228   :  { %v1402_v1 = vpop.permute.xlu0 %1401  ;;  %9731 = vmatpush3.bf16.msra.mxu1 %v11766_v44  ;;  %v3198_v26 = vld [vmem:[#allocation2 + $0x170] sm:$0xff] }
 0x229   :  { %1436 = vst.msk [vmem:[#allocation2 + $0x180] sm:$0xff] %vm445_vm2, %v1402_v1  ;;  %9748 = vmatprep.subr.bf16.mxu1 %v11778_v39  ;;  %v3216_v31 = vpack.c.bf16 %v3198_v26, %v3197_v8  ;;  %v1681_v1 = vadd.f32 %v12052_v49, %v12147_v34  ;;  %v12393_v34 = vld [vmem:[%s14481_s1] sm:$0xff]  }
 0x22a   :  { %1501 = vst.msk [vmem:[#allocation2 + $0x187] sm:$0xff] %vm510_vm3, %v1468_v38  ;;  %v1466_v29 = vpop.permute.xlu1 %1465  ;;  %v3195_v2 = vld [vmem:[#allocation2 + $0x158] sm:$0xff]  ;;  %v3196_v59 = vld [vmem:[#allocation2 + $0x160] sm:$0xff] }
 0x22b   :  { %1500 = vst.msk [vmem:[#allocation2 + $0x17f] sm:$0xff] %vm510_vm3, %v1466_v29  ;;  %v3215_v60 = vpack.c.bf16 %v3196_v59, %v3195_v2 }
 0x22c   :  { %v1470_v62 = vpop.permute.xlu0 %1469 }
 0x22d   :  { %1502 = vst.msk [vmem:[#allocation2 + $0x18f] sm:$0xff] %vm510_vm3, %v1470_v62  ;;  %9712 = vmatprep.mubr.msk.bf16.mxu1 %vm27_vm1, %v3215_v60  ;;  %v1713_v60 = vmax.f32 %v1681_v1, 0.0  ;;  %v1684_v62 = vadd.f32 %v12052_v49, %v12160_v25  ;;  %v1692_v25 = vadd.f32 %v12052_v49, %v12216_v7  ;;  %v12542_v1 = vld [vmem:[%s14485_s4] ss:$0 sm:$0xff] }
 0x22e   :  { %v1928_v44 = vpop.permute.xlu1 %1927  ;;  %9565 = vmatmul.mubr.msk.bf16.gmra.mrb[60].mxu0 %vm27_vm1, %v11952_v53  ;;  %9713 = vmatmul.mubr.msk.bf16.gmra.mrb[40].mxu1 %vm27_vm1, %v3216_v31  ;;  %v3203_v53 = vpack.c.bf16 %v12254_v42, %v12230_v40  ;;  %v1660_v42 = vadd.f32 %v12052_v49, %v12095_v32  ;;  %v10744_v32 = vld [vmem:[%s14482_s0 + $0x108] sm:$0xff]  }
 0x22f   :  { %1975 = vst.msk [vmem:[#allocation2 + $0x197] sm:$0xff] %vm510_vm3, %v1928_v44  ;;  %9668 = vmatprep.mubr.msk.bf16.mxu0 %vm10856_vm4, %v10853_v20  ;;  %v1689_v44 = vadd.f32 %v12052_v49, %v12203_v57 }
 0x230   :  { %v1708_v50 = vmax.f32 %v1660_v42, 0.0  ;;  %v4933_v42 = vld [vmem:[%s14480_s5 + $0x80] sm:$0xff] }
 0x232   :  { %v3199_v12 = vld [vmem:[#allocation2 + $0x178] sm:$0xff]  ;;  %v3208_v21 = vld [vmem:[#allocation2 + $0x180] sm:$0xff] }
 0x233   :  { %v3217_v30 = vpack.c.bf16 %v3208_v21, %v3199_v12 }
 0x234   :  { %v3209_v33 = vld [vmem:[#allocation2 + $0x188] sm:$0xff] }
 0x235   :  { %9716 = vmatprep.mubr.msk.bf16.mxu1 %vm27_vm1, %v3217_v30  ;;  %v3482_v56 = vpack.c.bf16 %v3209_v33, %v3208_v21  ;;  %v10747_v30 = vld [vmem:[%s14482_s0 + $0x120] sm:$0xff]  }
 0x236   :  { %v3210_v23 = vld [vmem:[#allocation2 + $0x190] sm:$0xff] }
 0x237   :  { %v3218_v11 = vpack.c.bf16 %v3210_v23, %v3209_v33 }
 0x239   :  { %9717 = vmatmul.mubr.msk.bf16.gmra.mrb[44].mxu1 %vm27_vm1, %v3218_v11  ;;  %v1697_v11 = vadd.f32 %v12052_v49, %v12199_v5  ;;  %v1700_v5 = vadd.f32 %v12052_v49, %v12211_v4 }
 0x23a   :  { %9732 = vmatprep.mubr.msk.bf16.mxu1 %vm27_vm1, %v12141_v17  ;;  %v3204_v17 = vpack.c.bf16 %v12261_v37, %v12256_v14  ;;  %v1665_v14 = vadd.f32 %v12052_v49, %v12075_v28 }
 0x23b   :  { %v1718_v4 = vmax.f32 %v1700_v5, 0.0  ;;  %v10769_v5 = vld [vmem:[%s14482_s0 + $0x1b0] sm:$0xff]  }
 0x23c   :  { %v1709_v37 = vmax.f32 %v1665_v14, 0.0  ;;  %v10758_v14 = vld [vmem:[%s14482_s0 + $0x168] sm:$0xff]  }
 0x241   :  { %9733 = vmatmul.mubr.msk.bf16.vlgmr.msra.gmra.mrb[32].mxu1 %vm27_vm1, %v12191_v48  ;;  %v10742_v48 = vld [vmem:[%s14481_s1 + $0x8] sm:$0xff]  }
 0x242   :  { %9736 = vmatprep.mubr.msk.bf16.mxu1 %vm27_vm1, %v12196_v9  ;;  %9749 = vmatpush3.bf16.msra.mxu1 %v11778_v39  ;;  %v3205_v39 = vpack.c.bf16 %v3195_v2, %v12263_v15  ;;  %v1668_v15 = vadd.f32 %v12052_v49, %v12087_v0  ;;  %v1676_v0 = vadd.f32 %v12052_v49, %v12163_v22 }
 0x243   :  { %9750 = vmatprep.subr.bf16.mxu1 %v11948_v10 }
 0x244   :  { %v1710_v3 = vmax.f32 %v1668_v15, 0.0  ;;  %v1712_v22 = vmax.f32 %v1676_v0, 0.0  ;;  %v4937_v15 = vld [vmem:[%s14480_s5 + $0xa0] sm:$0xff]  ;;  %v10764_v0 = vld [vmem:[%s14482_s0 + $0x188] sm:$0xff]  }
 0x246   :  { %9751 = vmatpush3.bf16.msra.mxu1 %v11948_v10  ;;  %v3206_v10 = vpack.c.bf16 %v3197_v8, %v3196_v59  ;;  %v1711_v8 = vmax.f32 %v1673_v63, 0.0  ;;  %v10763_v63 = vld [vmem:[%s14482_s0 + $0x180] sm:$0xff]  }
 0x247   :  { %9752 = vmatprep.subr.bf16.mxu1 %v11972_v45 }
 0x249   :  { %9737 = vmatmul.mubr.msk.bf16.gmra.mrb[36].mxu1 %vm27_vm1, %v3203_v53 }
 0x24a   :  { %9740 = vmatprep.mubr.msk.bf16.mxu1 %vm27_vm1, %v3204_v17  ;;  %9753 = vmatpush3.bf16.msra.mxu1 %v11972_v45  ;;  %v10741_v45 = vld [vmem:[%s14481_s1] sm:$0xff]  }
 0x24b   :  { %9754 = vmatprep.subr.bf16.mxu1 %v11990_v16 }
 0x24e   :  { %9755 = vmatpush3.bf16.msra.mxu1 %v11990_v16  ;;  %v3207_v16 = vpack.c.bf16 %v3199_v12, %v3198_v26  ;;  %v10746_v12 = vld [vmem:[%s14482_s0 + $0x118] sm:$0xff]  }
 0x24f   :  { %9756 = vmatprep.subr.bf16.mxu1 %v12003_v24 }
 0x251   :  { %9741 = vmatmul.mubr.msk.bf16.gmra.mrb[40].mxu1 %vm27_vm1, %v3205_v39 }
 0x252   :  { %9744 = vmatprep.mubr.msk.bf16.mxu1 %vm27_vm1, %v3206_v10  ;;  %9757 = vmatpush3.bf16.msra.mxu1 %v12003_v24 }
 0x253   :  { %9758 = vmatprep.subr.bf16.mxu1 %v12019_v51 }
 0x256   :  { %9759 = vmatpush3.bf16.msra.mxu1 %v12019_v51  ;;  %v10751_v51 = vld [vmem:[%s14481_s1] sm:$0xff]  }
 0x257   :  { %9900 = vmatprep.subr.bf16.mxu1 %v10741_v45 }
 0x259   :  { %9745 = vmatmul.mubr.msk.bf16.gmra.mrb[44].mxu1 %vm27_vm1, %v3207_v16 }
 0x25a   :  { %9760 = vmatprep.mubr.msk.bf16.mxu1 %vm27_vm1, %v3203_v53  ;;  %v1715_v53 = vmax.f32 %v1689_v44, 0.0 }
 0x261   :  { %9761 = vmatmul.mubr.msk.bf16.vlgmr.msra.gmra.mrb[32].mxu1 %vm27_vm1, %v3204_v17 }
 0x262   :  { %9764 = vmatprep.mubr.msk.bf16.mxu1 %vm27_vm1, %v3205_v39  ;;  %9901 = vmatpush3.bf16.msra.mxu1 %v10741_v45 }
 0x263   :  { %v1866_v24 = vpop.permute.xlu0 %1865  ;;  %9902 = vmatprep.subr.bf16.mxu1 %v10742_v48 }
 0x264   :  { %1912 = vst.msk [vmem:[#allocation2 + $0x1a0] sm:$0xff] %vm445_vm2, %v1866_v24  ;;  %v10748_v24 = vld [vmem:[%s14482_s0 + $0x128] sm:$0xff]  }
 0x265   :  { %v1868_v9 = vpop.permute.xlu1 %1867 }
 0x266   :  { %1913 = vst.msk [vmem:[#allocation2 + $0x1a8] sm:$0xff] %vm445_vm2, %v1868_v9  ;;  %9903 = vmatpush3.bf16.msra.mxu1 %v10742_v48  ;;  %v10749_v9 = vld [vmem:[%s14482_s0 + $0x130] sm:$0xff]  }
 0x267   :  { %v1870_v6 = vpop.permute.xlu0 %1869  ;;  %9920 = vmatprep.subr.bf16.mxu1 %v10751_v51 }
 0x268   :  { %1914 = vst.msk [vmem:[#allocation2 + $0x1b0] sm:$0xff] %vm445_vm2, %v1870_v6 }
 0x269   :  { %v1930_v27 = vpop.permute.xlu1 %1929  ;;  %9765 = vmatmul.mubr.msk.bf16.gmra.mrb[36].mxu1 %vm27_vm1, %v3206_v10  ;;  %v1716_v10 = vmax.f32 %v1692_v25, 0.0 }
 0x26a   :  { %1976 = vst.msk [vmem:[#allocation2 + $0x19f] sm:$0xff] %vm510_vm3, %v1930_v27  ;;  %9768 = vmatprep.mubr.msk.bf16.mxu1 %vm27_vm1, %v3207_v16  ;;  %v1717_v16 = vmax.f32 %v1697_v11, 0.0 }
 0x26b   :  { %v1932_v43 = vpop.permute.xlu0 %1931 }
 0x26c   :  { %1977 = vst.msk [vmem:[#allocation2 + $0x1a7] sm:$0xff] %vm510_vm3, %v1932_v43 }
 0x26d   :  { %v1934_v40 = vpop.permute.xlu1 %1933 }
 0x26e   :  { %1978 = vst.msk [vmem:[#allocation2 + $0x1af] sm:$0xff] %vm510_vm3, %v1934_v40 }
 0x271   :  { %9769 = vmatmul.mubr.msk.bf16.gmra.mrb[40].mxu1 %vm27_vm1, %v3482_v56  ;;  %v3474_v19 = vld [vmem:[#allocation2 + $0x198] sm:$0xff] }
 0x272   :  { %v3483_v55 = vpack.c.bf16 %v3474_v19, %v3210_v23  ;;  %v1714_v23 = vmax.f32 %v1684_v62, 0.0  ;;  %v10750_v56 = vld [vmem:[%s14482_s0 + $0x138] sm:$0xff]   ;;  %v10753_v19 = vld [vmem:[%s14482_s0 + $0x140] sm:$0xff]  }
 0x273   :  { %v3475_v46 = vld [vmem:[#allocation2 + $0x1a0] sm:$0xff] }
 0x274   :  { %9772 = vmatprep.mubr.msk.bf16.mxu1 %vm27_vm1, %v3483_v55  ;;  %v10754_v55 = vld [vmem:[%s14482_s0 + $0x148] sm:$0xff]  }
 0x275   :  { %v3476_v41 = vld [vmem:[#allocation2 + $0x1a8] sm:$0xff] }
 0x276   :  { %v3484_v38 = vpack.c.bf16 %v3476_v41, %v3475_v46  ;;  %v10762_v46 = vld [vmem:[%s14481_s1 + $0x8] sm:$0xff]   ;;  %v10756_v41 = vld [vmem:[%s14482_s0 + $0x158] sm:$0xff]  }
 0x279   :  { %9773 = vmatmul.mubr.msk.bf16.gmra.mrb[44].mxu1 %vm27_vm1, %v3484_v38  ;;  %v10757_v38 = vld [vmem:[%s14482_s0 + $0x160] sm:$0xff]  }
 0x27a   :  { %9904 = vmatprep.mubr.msk.bf16.mxu1 %vm115_vm0, %v10743_v54  ;;  %v4460_v54 = vld [vmem:[%s14480_s5 + $0x78] sm:$0xff] }
 0x27c   :  { %v1758_v61 = vpop.permute.xlu0 %1757 }
 0x27d   :  { %v1819_v36 = vmul.f32 %v1758_v61, %v1707_v47  ;;  %v10759_v47 = vld [vmem:[%s14482_s0 + $0x170] sm:$0xff]  }
 0x27e   :  { %v1763_v28 = vpop.permute.xlu1 %1762  ;;  %v4935_v61 = vld [vmem:[%s14480_s5 + $0x90] sm:$0xff] }
 0x27f   :  { %1835 = vst.msk [vmem:[#allocation2 + $0x1b9] sm:$0xff] %vm115_vm0, %v1819_v36  ;;  %v1820_v52 = vmul.f32 %v1763_v28, %v1708_v50  ;;  %1935 = vrot.lane.b32.xlu1 %v1819_v36, %s10854_s14  ;;  %1871 = vrot.lane.b32.xlu0 %v1819_v36, %s10855_s15  ;;  %v4934_v50 = vld [vmem:[%s14480_s5 + $0x88] sm:$0xff]  ;;  %v10760_v36 = vld [vmem:[%s14482_s0 + $0x178] sm:$0xff]  }
 0x280   :  { %v1768_v13 = vpop.permute.xlu0 %1767  ;;  %v4939_v28 = vld [vmem:[%s14480_s5 + $0xb0] sm:$0xff] }
 0x281   :  { %1836 = vst.msk [vmem:[#allocation2 + $0x1c1] sm:$0xff] %vm115_vm0, %v1820_v52  ;;  %v1821_v26 = vmul.f32 %v1768_v13, %v1709_v37  ;;  %9905 = vmatmul.mubr.msk.bf16.vlgmr.msra.gmra.mrb[48].mxu1 %vm115_vm0, %v10744_v32  ;;  %v4936_v37 = vld [vmem:[%s14480_s5 + $0x98] sm:$0xff]  ;;  %v4938_v32 = vld [vmem:[%s14480_s5 + $0xa8] sm:$0xff]  ;;  %v10765_v13 = vld [vmem:[%s14482_s0 + $0x190] sm:$0xff]  }
 0x282   :  { %v1773_v29 = vpop.permute.xlu1 %1772  ;;  %9908 = vmatprep.mubr.msk.bf16.mxu1 %vm115_vm0, %v10745_v35  ;;  %9921 = vmatpush3.bf16.msra.mxu1 %v10751_v51  ;;  %v4940_v35 = vld [vmem:[%s14480_s5 + $0xb8] sm:$0xff] }
 0x283   :  { %1837 = vst.msk [vmem:[#allocation2 + $0x1c9] sm:$0xff] %vm115_vm0, %v1821_v26  ;;  %v1822_v2 = vmul.f32 %v1773_v29, %v1710_v3  ;;  %1873 = vrot.lane.b32.xlu0 %v1820_v52, %s10855_s15  ;;  %1875 = vrot.lane.b32.xlu1 %v1821_v26, %s10855_s15  ;;  %v4943_v3 = vld [vmem:[%s14480_s5 + $0xd0] sm:$0xff] }
 0x284   :  { %v1778_v59 = vpop.permute.xlu0 %1777  ;;  %9922 = vmatprep.subr.bf16.mxu1 %v10752_v18 }
 0x285   :  { %1838 = vst.msk [vmem:[#allocation2 + $0x1d1] sm:$0xff] %vm115_vm0, %v1822_v2  ;;  %v1823_v31 = vmul.f32 %v1778_v59, %v1711_v8  ;;  %v4944_v8 = vld [vmem:[%s14480_s5 + $0xd8] sm:$0xff] }
 0x286   :  { %v1783_v21 = vpop.permute.xlu1 %1782  ;;  %9923 = vmatpush3.bf16.msra.mxu1 %v10752_v18  ;;  %v4942_v18 = vld [vmem:[%s14480_s5 + $0xc8] sm:$0xff] }
 0x287   :  { %1839 = vst.msk [vmem:[#allocation2 + $0x1d9] sm:$0xff] %vm115_vm0, %v1823_v31  ;;  %v1824_v33 = vmul.f32 %v1783_v21, %v1712_v22  ;;  %1877 = vrot.lane.b32.xlu0 %v1822_v2, %s10855_s15  ;;  %1879 = vrot.lane.b32.xlu1 %v1823_v31, %s10855_s15  ;;  %v10766_v22 = vld [vmem:[%s14482_s0 + $0x198] sm:$0xff]   ;;  %v4947_v21 = vld [vmem:[%s14480_s5 + $0xf0] sm:$0xff] }
 0x288   :  { %v1788_v57 = vpop.permute.xlu0 %1787  ;;  %9940 = vmatprep.subr.bf16.mxu1 %v12393_v34 }
 0x289   :  { %1840 = vst.msk [vmem:[#allocation2 + $0x1e1] sm:$0xff] %vm115_vm0, %v1824_v33  ;;  %v1825_v17 = vmul.f32 %v1788_v57, %v1713_v60  ;;  %9909 = vmatmul.mubr.msk.bf16.gmra.mrb[52].mxu1 %vm115_vm0, %v10746_v12  ;;  %v4946_v12 = vld [vmem:[%s14480_s5 + $0xe8] sm:$0xff] }
 0x28a   :  { %v1793_v39 = vpop.permute.xlu1 %1792  ;;  %9912 = vmatprep.mubr.msk.bf16.mxu1 %vm115_vm0, %v10747_v30 }
 0x28b   :  { %1841 = vst.msk [vmem:[#allocation2 + $0x1e9] sm:$0xff] %vm115_vm0, %v1825_v17  ;;  %v1826_v7 = vmul.f32 %v1793_v39, %v1714_v23  ;;  %1937 = vrot.lane.b32.xlu0 %v1820_v52, %s10854_s14  ;;  %1939 = vrot.lane.b32.xlu1 %v1821_v26, %s10854_s14  ;;  %v4941_v52 = vld [vmem:[%s14480_s5 + $0xc0] sm:$0xff] }
 0x28c   :  { %v1798_v45 = vpop.permute.xlu0 %1797  ;;  %v4945_v26 = vld [vmem:[%s14480_s5 + $0xe0] sm:$0xff] }
 0x28d   :  { %1842 = vst.msk [vmem:[#allocation2 + $0x1f1] sm:$0xff] %vm115_vm0, %v1826_v7  ;;  %v1827_v48 = vmul.f32 %v1798_v45, %v1715_v53  ;;  %v4948_v53 = vld [vmem:[%s14480_s5 + $0xf8] sm:$0xff] }
 0x28e   :  { %v1803_v51 = vpop.permute.xlu1 %1802 }
 0x28f   :  { %1843 = vst.msk [vmem:[#allocation2 + $0x1f9] sm:$0xff] %vm115_vm0, %v1827_v48  ;;  %v1828_v6 = vmul.f32 %v1803_v51, %v1716_v10  ;;  %1941 = vrot.lane.b32.xlu0 %v1822_v2, %s10854_s14  ;;  %1943 = vrot.lane.b32.xlu1 %v1823_v31, %s10854_s14 }
 0x290   :  { %v1808_v49 = vpop.permute.xlu0 %1807 }
 0x291   :  { %1844 = vst.msk [vmem:[#allocation2 + $0x201] sm:$0xff] %vm115_vm0, %v1828_v6  ;;  %v1829_v27 = vmul.f32 %v1808_v49, %v1717_v16  ;;  %9913 = vmatmul.mubr.msk.bf16.gmra.mrb[56].mxu1 %vm115_vm0, %v10748_v24  ;;  %v4458_v49 = vld [vmem:[%s14480_s5 + $0x68] sm:$0xff] }
 0x292   :  { %v1813_v43 = vpop.permute.xlu1 %1812  ;;  %9916 = vmatprep.mubr.msk.bf16.mxu1 %vm115_vm0, %v10749_v9 }
 0x293   :  { %1845 = vst.msk [vmem:[#allocation2 + $0x209] sm:$0xff] %vm115_vm0, %v1829_v27  ;;  %v1830_v40 = vmul.f32 %v1813_v43, %v1718_v4  ;;  %1881 = vrot.lane.b32.xlu0 %v1824_v33, %s10855_s15  ;;  %1883 = vrot.lane.b32.xlu1 %v1825_v17, %s10855_s15 }
 0x295   :  { %1846 = vst.msk [vmem:[#allocation2 + $0x211] sm:$0xff] %vm115_vm0, %v1830_v40 }
 0x297   :  { %1885 = vrot.lane.b32.xlu0 %v1826_v7, %s10855_s15  ;;  %1887 = vrot.lane.b32.xlu1 %v1827_v48, %s10855_s15 }
 0x299   :  { %9917 = vmatmul.mubr.msk.bf16.gmra.mrb[60].mxu1 %vm115_vm0, %v10750_v56 }
 0x29a   :  { %9924 = vmatprep.mubr.msk.bf16.mxu1 %vm115_vm0, %v10753_v19 }
 0x29b   :  { %1945 = vrot.lane.b32.xlu0 %v1824_v33, %s10854_s14  ;;  %1947 = vrot.lane.b32.xlu1 %v1825_v17, %s10854_s14  ;;  %v5421_v17 = vld [vmem:[%s14480_s5 + $0x100] sm:$0xff] }
 0x29f   :  { %1949 = vrot.lane.b32.xlu0 %v1826_v7, %s10854_s14  ;;  %1951 = vrot.lane.b32.xlu1 %v1827_v48, %s10854_s14  ;;  %v10768_v7 = vld [vmem:[%s14482_s0 + $0x1a8] sm:$0xff]  }
 0x2a1   :  { %9925 = vmatmul.mubr.msk.bf16.vlgmr.msra.gmra.mrb[64].mxu1 %vm115_vm0, %v10754_v55  ;;  %v4459_v55 = vld [vmem:[%s14480_s5 + $0x70] sm:$0xff] }
 0x2a2   :  { %9928 = vmatprep.mubr.msk.bf16.mxu1 %vm115_vm0, %v10755_v58  ;;  %9941 = vmatpush3.bf16.msra.mxu1 %v12393_v34  ;;  %v10767_v34 = vld [vmem:[%s14482_s0 + $0x1a0] sm:$0xff]  }
 0x2a3   :  { %1889 = vrot.lane.b32.xlu0 %v1828_v6, %s10855_s15  ;;  %1891 = vrot.lane.b32.xlu1 %v1829_v27, %s10855_s15  ;;  %v4445_v58 = vld [vmem:[%s14480_s5] sm:$0xff] }
 0x2a4   :  { %9942 = vmatprep.subr.bf16.mxu1 %v10762_v46 }
 0x2a6   :  { %9943 = vmatpush3.bf16.msra.mxu1 %v10762_v46 }
 0x2a7   :  { %1893 = vrot.lane.b32.xlu0 %v1830_v40, %s10855_s15  ;;  %1953 = vrot.lane.b32.xlu1 %v1828_v6, %s10854_s14  ;;  %v4457_v6 = vld [vmem:[%s14480_s5 + $0x60] sm:$0xff] }
 0x2a9   :  { %9929 = vmatmul.mubr.msk.bf16.gmra.mrb[68].mxu1 %vm115_vm0, %v10756_v41 }
 0x2aa   :  { %9932 = vmatprep.mubr.msk.bf16.mxu1 %vm115_vm0, %v10757_v38  ;;  %v10770_v38 = vld [vmem:[%s14482_s0 + $0x1b8] sm:$0xff]  }
 0x2ab   :  { %1955 = vrot.lane.b32.xlu0 %v1829_v27, %s10854_s14  ;;  %1957 = vrot.lane.b32.xlu1 %v1830_v40, %s10854_s14 }
 0x2af   :  { %4538 = vperm.xlu0 %10681, %v4460_v54   ;;  %4951 = vperm.xlu1 %10682, %v4933_v42  }
 0x2b1   :  { %9933 = vmatmul.mubr.msk.bf16.gmra.mrb[72].mxu1 %vm115_vm0, %v10758_v14 }
 0x2b2   :  { %9936 = vmatprep.mubr.msk.bf16.mxu1 %vm115_vm0, %v10759_v47 }
 0x2b3   :  { %4956 = vperm.xlu0 %10681, %v4934_v50   ;;  %4961 = vperm.xlu1 %10682, %v4935_v61  }
 0x2b7   :  { %4966 = vperm.xlu0 %10681, %v4936_v37   ;;  %4971 = vperm.xlu1 %10682, %v4937_v15   ;;  %v4446_v37 = vld [vmem:[%s14480_s5 + $0x8] sm:$0xff]  ;;  %v4447_v15 = vld [vmem:[%s14480_s5 + $0x10] sm:$0xff] }
 0x2b9   :  { %9937 = vmatmul.mubr.msk.bf16.gmra.mrb[76].mxu1 %vm115_vm0, %v10760_v36 }
 0x2ba   :  { %9944 = vmatprep.mubr.msk.bf16.mxu1 %vm115_vm0, %v10763_v63 }
 0x2bb   :  { %4976 = vperm.xlu0 %10681, %v4938_v32   ;;  %4981 = vperm.xlu1 %10682, %v4939_v28  }
 0x2bf   :  { %4986 = vperm.xlu0 %10681, %v4940_v35   ;;  %4991 = vperm.xlu1 %10682, %v4941_v52  }
 0x2c1   :  { %9945 = vmatmul.mubr.msk.bf16.vlgmr.msra.gmra.mrb[80].mxu1 %vm115_vm0, %v10764_v0  ;;  %v4448_v0 = vld [vmem:[%s14480_s5 + $0x18] sm:$0xff] }
 0x2c2   :  { %9948 = vmatprep.mubr.msk.bf16.mxu1 %vm115_vm0, %v10765_v13  ;;  %v4449_v13 = vld [vmem:[%s14480_s5 + $0x20] sm:$0xff] }
 0x2c3   :  { %4996 = vperm.xlu0 %10681, %v4942_v18   ;;  %5001 = vperm.xlu1 %10682, %v4943_v3  }
 0x2c5   :  { %v9638_v29 = vpop.f32.mrb[16].mxu1 }
 0x2c6   :  { %v3064_v2 = vadd.f32 %v9638_v29, %v12542_v1  ;;  %v2983_v59 = vpop.f32.mrb[17].mxu1 }
 0x2c7   :  { %v3062_v60 = vadd.f32 %v12542_v1, %v2983_v59  ;;  %v9639_v62 = vpop.f32.mrb[18].mxu1  ;;  %5006 = vperm.xlu0 %10681, %v4944_v8   ;;  %5011 = vperm.xlu1 %10682, %v4945_v26   ;;  %v4450_v59 = vld [vmem:[%s14480_s5 + $0x28] sm:$0xff] }
 0x2c8   :  { %v3065_v31 = vadd.f32 %v9639_v62, %v12542_v1  ;;  %v2986_v44 = vpop.f32.mrb[19].mxu1  ;;  %v3080_v33 = vmax.f32 %v3064_v2, 0.0  ;;  %v4451_v2 = vld [vmem:[%s14480_s5 + $0x30] sm:$0xff] }
 0x2c9   :  { %v3063_v30 = vadd.f32 %v12542_v1, %v2986_v44  ;;  %9949 = vmatmul.mubr.msk.bf16.gmra.mrb[84].mxu1 %vm115_vm0, %v10766_v22  ;;  %v3078_v57 = vmax.f32 %v3062_v60, 0.0 }
 0x2ca   :  { %v3081_v25 = vmax.f32 %v3065_v31, 0.0  ;;  %9952 = vmatprep.mubr.msk.bf16.mxu1 %vm115_vm0, %v10767_v34 }
 0x2cb   :  { %v3079_v23 = vmax.f32 %v3063_v30, 0.0  ;;  %5016 = vperm.xlu0 %10681, %v4946_v12   ;;  %5021 = vperm.xlu1 %10682, %v4947_v21   ;;  %v4453_v30 = vld [vmem:[%s14480_s5 + $0x40] sm:$0xff] }
 0x2cc   :  { %v3097_v11 = vpack.c.bf16 %v3081_v25, %v3080_v33  ;;  %v4452_v33 = vld [vmem:[%s14480_s5 + $0x38] sm:$0xff] }
 0x2cd   :  { %v3096_v39 = vpack.c.bf16 %v3079_v23, %v3078_v57  ;;  %v9642_v10 = vpop.f32.mrb[20].mxu1  ;;  %v4455_v23 = vld [vmem:[%s14480_s5 + $0x50] sm:$0xff] }
 0x2ce   :  { %v3068_v45 = vadd.f32 %v9642_v10, %v12542_v1  ;;  %v2999_v16 = vpop.f32.mrb[21].mxu1 }
 0x2cf   :  { %v3066_v48 = vadd.f32 %v12542_v1, %v2999_v16  ;;  %v9643_v24 = vpop.f32.mrb[22].mxu1  ;;  %5026 = vperm.xlu0 %10681, %v4948_v53   ;;  %5439 = vperm.xlu1 %10682, %v5421_v17   ;;  %v3094_v17 = vld [vmem:[%s14486_s6 + $0x1] sm:$0x1] }
 0x2d0   :  { %v3069_v51 = vadd.f32 %v9643_v24, %v12542_v1  ;;  %9653 = vmatpush3.bf16.msra.mxu0 %v3096_v39  ;;  %v3002_v9 = vpop.f32.mrb[23].mxu1  ;;  %v3084_v27 = vmax.f32 %v3068_v45, 0.0  ;;  %v4456_v24 = vld [vmem:[%s14480_s5 + $0x58] sm:$0xff] }
 0x2d1   :  { %v3067_v4 = vadd.f32 %v12542_v1, %v3002_v9  ;;  %9953 = vmatmul.mubr.msk.bf16.gmra.mrb[88].mxu1 %vm115_vm0, %v10768_v7  ;;  %9654 = vmatprep.subr.bf16.mxu0 %v10853_v20  ;;  %v3082_v40 = vmax.f32 %v3066_v48, 0.0  ;;  %v5422_v48 = vld [vmem:[%s14480_s5 + $0x108] sm:$0xff] }
 0x2d2   :  { %v3085_v43 = vmax.f32 %v3069_v51, 0.0  ;;  %9956 = vmatprep.mubr.msk.bf16.mxu1 %vm115_vm0, %v10769_v5  ;;  %v3095_v51 = vpack.c.bf16 %v3094_v17, %v3094_v17 }
 0x2d3   :  { %v3083_v56 = vmax.f32 %v3067_v4, 0.0  ;;  %4523 = vperm.xlu0 %10681, %v4457_v6   ;;  %4528 = vperm.xlu1 %10682, %v4458_v49  }
 0x2d4   :  { %v3099_v19 = vpack.c.bf16 %v3085_v43, %v3084_v27  ;;  %9655 = vmatpush3.bf16.msra.mxu0 %v3097_v11  ;;  %v4454_v11 = vld [vmem:[%s14480_s5 + $0x48] sm:$0xff] }
 0x2d5   :  { %v3098_v46 = vpack.c.bf16 %v3083_v56, %v3082_v40  ;;  %v9646_v41 = vpop.f32.mrb[24].mxu1  ;;  %9656 = vmatprep.subr.bf16.mxu0 %v10853_v20  ;;  %v5424_v40 = vld [vmem:[%s14480_s5 + $0x118] sm:$0xff]  ;;  %v5423_v56 = vld [vmem:[%s14480_s5 + $0x110] sm:$0xff] }
 0x2d6   :  { %v3072_v54 = vadd.f32 %v9646_v41, %v12542_v1  ;;  %v3015_v42 = vpop.f32.mrb[25].mxu1 }
 0x2d7   :  { %v3070_v14 = vadd.f32 %v12542_v1, %v3015_v42  ;;  %v9647_v47 = vpop.f32.mrb[26].mxu1  ;;  %4533 = vperm.xlu0 %10681, %v4459_v55   ;;  %4463 = vperm.xlu1 %10682, %v4445_v58  }
 0x2d8   :  { %v3073_v50 = vadd.f32 %v9647_v47, %v12542_v1  ;;  %9657 = vmatpush3.bf16.msra.mxu0 %v3098_v46  ;;  %v3018_v61 = vpop.f32.mrb[27].mxu1  ;;  %v3088_v63 = vmax.f32 %v3072_v54, 0.0  ;;  %v5425_v47 = vld [vmem:[%s14480_s5 + $0x120] sm:$0xff] }
 0x2d9   :  { %v3071_v36 = vadd.f32 %v12542_v1, %v3018_v61  ;;  %9957 = vmatmul.mubr.msk.bf16.gmra.mrb[92].mxu1 %vm115_vm0, %v10770_v38  ;;  %9658 = vmatprep.subr.bf16.mxu0 %v10853_v20  ;;  %v3086_v28 = vmax.f32 %v3070_v14, 0.0  ;;  %v5426_v14 = vld [vmem:[%s14480_s5 + $0x128] sm:$0xff] }
 0x2da   :  { %v3089_v32 = vmax.f32 %v3073_v50, 0.0 }
 0x2db   :  { %v3087_v35 = vmax.f32 %v3071_v36, 0.0  ;;  %4468 = vperm.xlu0 %10681, %v4446_v37   ;;  %4473 = vperm.xlu1 %10682, %v4447_v15  }
 0x2dc   :  { %v3101_v52 = vpack.c.bf16 %v3089_v32, %v3088_v63  ;;  %9659 = vmatpush3.bf16.msra.mxu0 %v3099_v19 }
 0x2dd   :  { %v3100_v18 = vpack.c.bf16 %v3087_v35, %v3086_v28  ;;  %9660 = vmatprep.subr.bf16.mxu0 %v10853_v20 }
 0x2de   :  { %v9650_v3 = vpop.f32.mrb[28].mxu1 }
 0x2df   :  { %v3076_v8 = vadd.f32 %v9650_v3, %v12542_v1  ;;  %v3031_v26 = vpop.f32.mrb[29].mxu1  ;;  %4478 = vperm.xlu0 %10681, %v4448_v0   ;;  %4483 = vperm.xlu1 %10682, %v4449_v13   ;;  %v5427_v0 = vld [vmem:[%s14480_s5 + $0x130] sm:$0xff] }
 0x2e0   :  { %v3074_v29 = vadd.f32 %v12542_v1, %v3031_v26  ;;  %9661 = vmatpush3.bf16.msra.mxu0 %v3100_v18  ;;  %v9651_v22 = vpop.f32.mrb[30].mxu1 }
 0x2e1   :  { %v3077_v34 = vadd.f32 %v9651_v22, %v12542_v1  ;;  %v3034_v60 = vpop.f32.mrb[31].mxu1  ;;  %9662 = vmatprep.subr.bf16.mxu0 %v10853_v20  ;;  %v3092_v31 = vmax.f32 %v3076_v8, 0.0 }
 0x2e2   :  { %v3075_v62 = vadd.f32 %v12542_v1, %v3034_v60  ;;  %v3090_v12 = vmax.f32 %v3074_v29, 0.0 }
 0x2e3   :  { %v3093_v44 = vmax.f32 %v3077_v34, 0.0  ;;  %4493 = vperm.xlu0 %10681, %v4451_v2   ;;  %4488 = vperm.xlu1 %10682, %v4450_v59  }
 0x2e4   :  { %v3091_v21 = vmax.f32 %v3075_v62, 0.0  ;;  %9663 = vmatpush3.bf16.msra.mxu0 %v3101_v52  ;;  %v5428_v52 = vld [vmem:[%s14480_s5 + $0x138] sm:$0xff]  ;;  %v5430_v62 = vld [vmem:[%s14480_s5 + $0x148] sm:$0xff] }
 0x2e5   :  { %v3103_v25 = vpack.c.bf16 %v3093_v44, %v3092_v31  ;;  %9664 = vmatprep.subr.bf16.mxu0 %v10853_v20  ;;  %v5429_v31 = vld [vmem:[%s14480_s5 + $0x140] sm:$0xff] }
 0x2e6   :  { %v3102_v57 = vpack.c.bf16 %v3091_v21, %v3090_v12 }
 0x2e7   :  { %4503 = vperm.xlu0 %10681, %v4453_v30   ;;  %4498 = vperm.xlu1 %10682, %v4452_v33  }
 0x2e8   :  { %9665 = vmatpush3.bf16.msra.mxu0 %v3102_v57 }
 0x2e9   :  { %v9554_v53 = vpop.f32.mrb[48].mxu0  ;;  %9666 = vmatprep.subr.bf16.mxu0 %v10853_v20 }
 0x2ea   :  { %v2584_v39 = vadd.f32 %v9554_v53, %v12542_v1  ;;  %v2496_v10 = vpop.f32.mrb[49].mxu0  ;;  %v5431_v53 = vld [vmem:[%s14480_s5 + $0x150] sm:$0xff] }
 0x2eb   :  { %v2582_v7 = vadd.f32 %v12542_v1, %v2496_v10  ;;  %4513 = vperm.xlu0 %10681, %v4455_v23   ;;  %4508 = vperm.xlu1 %10682, %v4454_v11   ;;  %v9555_v45 = vpop.f32.mrb[50].mxu0  ;;  %v5432_v11 = vld [vmem:[%s14480_s5 + $0x158] sm:$0xff] }
 0x2ec   :  { %v2585_v16 = vadd.f32 %v9555_v45, %v12542_v1  ;;  %v2499_v5 = vpop.f32.mrb[51].mxu0  ;;  %9667 = vmatpush3.bf16.msra.mxu0 %v3103_v25  ;;  %v2600_v6 = vmax.f32 %v2584_v39, 0.0 }
 0x2ed   :  { %v2583_v9 = vadd.f32 %v12542_v1, %v2499_v5  ;;  %9672 = vmatprep.subr.bf16.mxu0 %v10853_v20  ;;  %v2598_v4 = vmax.f32 %v2582_v7, 0.0 }
 0x2ee   :  { %v2601_v49 = vmax.f32 %v2585_v16, 0.0 }
 0x2ef   :  { %v2599_v27 = vmax.f32 %v2583_v9, 0.0  ;;  %5444 = vperm.xlu0 %10681, %v5422_v48   ;;  %4518 = vperm.xlu1 %10682, %v4456_v24   ;;  %v5434_v9 = vld [vmem:[%s14480_s5 + $0x168] sm:$0xff] }
 0x2f0   :  { %v2617_v43 = vpack.c.bf16 %v2601_v49, %v2600_v6  ;;  %9669 = vmatmul.mubr.bf16.vlgmr.msra.gmra.mrb[64].mxu0 %v3095_v51  ;;  %v5433_v6 = vld [vmem:[%s14480_s5 + $0x160] sm:$0xff] }
 0x2f1   :  { %v2616_v19 = vpack.c.bf16 %v2599_v27, %v2598_v4  ;;  %v1936_v55 = vpop.permute.xlu1 %1935  ;;  %v1872_v58 = vpop.permute.xlu0 %1871  ;;  %9688 = vmatprep.mubr.msk.bf16.mxu0 %vm10856_vm4, %v10853_v20 }
 0x2f2   :  { %1915 = vst.msk [vmem:[#allocation2 + $0x1b8] sm:$0xff] %vm445_vm2, %v1872_v58  ;;  %v9558_v46 = vpop.f32.mrb[52].mxu0  ;;  %v5436_v58 = vld [vmem:[%s14480_s5 + $0x178] sm:$0xff] }
 0x2f3   :  { %1979 = vst.msk [vmem:[#allocation2 + $0x1b7] sm:$0xff] %vm510_vm3, %v1936_v55  ;;  %v2588_v41 = vadd.f32 %v9558_v46, %v12542_v1  ;;  %v2512_v38 = vpop.f32.mrb[53].mxu0  ;;  %5454 = vperm.xlu0 %10681, %v5424_v40   ;;  %5449 = vperm.xlu1 %10682, %v5423_v56   ;;  %v5435_v46 = vld [vmem:[%s14480_s5 + $0x170] sm:$0xff] }
 0x2f4   :  { %v2586_v54 = vadd.f32 %v12542_v1, %v2512_v38  ;;  %v9559_v42 = vpop.f32.mrb[54].mxu0  ;;  %9673 = vmatpush3.bf16.msra.mxu0 %v2616_v19 }
 0x2f5   :  { %v2589_v50 = vadd.f32 %v9559_v42, %v12542_v1  ;;  %v2515_v61 = vpop.f32.mrb[55].mxu0  ;;  %v1876_v37 = vpop.permute.xlu1 %1875  ;;  %9674 = vmatprep.subr.bf16.mxu0 %v10853_v20  ;;  %v2604_v63 = vmax.f32 %v2588_v41, 0.0  ;;  %v5909_v42 = vld [vmem:[%s14480_s5 + $0x180] sm:$0xff] }
 0x2f6   :  { %v2587_v15 = vadd.f32 %v12542_v1, %v2515_v61  ;;  %1917 = vst.msk [vmem:[#allocation2 + $0x1c8] sm:$0xff] %vm445_vm2, %v1876_v37  ;;  %v1874_v36 = vpop.permute.xlu0 %1873  ;;  %v2602_v28 = vmax.f32 %v2586_v54, 0.0 }
 0x2f7   :  { %v2605_v32 = vmax.f32 %v2589_v50, 0.0  ;;  %1916 = vst.msk [vmem:[#allocation2 + $0x1c0] sm:$0xff] %vm445_vm2, %v1874_v36  ;;  %5464 = vperm.xlu0 %10681, %v5426_v14   ;;  %5459 = vperm.xlu1 %10682, %v5425_v47   ;;  %v2614_v14 = vld [vmem:[%s14486_s6] sm:$0x1] }
 0x2f8   :  { %v2603_v35 = vmax.f32 %v2587_v15, 0.0  ;;  %9675 = vmatpush3.bf16.msra.mxu0 %v2617_v43  ;;  %v2615_v61 = vpack.c.bf16 %v2614_v14, %v2614_v14 }
 0x2f9   :  { %v2619_v13 = vpack.c.bf16 %v2605_v32, %v2604_v63  ;;  %v1880_v18 = vpop.permute.xlu1 %1879  ;;  %v9562_v3 = vpop.f32.mrb[56].mxu0  ;;  %9676 = vmatprep.subr.bf16.mxu0 %v10853_v20 }
 0x2fa   :  { %v2618_v8 = vpack.c.bf16 %v2603_v35, %v2602_v28  ;;  %1919 = vst.msk [vmem:[#allocation2 + $0x1d8] sm:$0xff] %vm445_vm2, %v1880_v18  ;;  %v1878_v26 = vpop.permute.xlu0 %1877  ;;  %v2592_v29 = vadd.f32 %v9562_v3, %v12542_v1  ;;  %v2528_v22 = vpop.f32.mrb[57].mxu0 }
 0x2fb   :  { %1918 = vst.msk [vmem:[#allocation2 + $0x1d0] sm:$0xff] %vm445_vm2, %v1878_v26  ;;  %v2590_v2 = vadd.f32 %v12542_v1, %v2528_v22  ;;  %5474 = vperm.xlu0 %10681, %v5428_v52   ;;  %5469 = vperm.xlu1 %10682, %v5427_v0   ;;  %v9563_v59 = vpop.f32.mrb[58].mxu0 }
 0x2fc   :  { %v2593_v34 = vadd.f32 %v9563_v59, %v12542_v1  ;;  %9677 = vmatpush3.bf16.msra.mxu0 %v2618_v8  ;;  %v2531_v60 = vpop.f32.mrb[59].mxu0  ;;  %v2608_v21 = vmax.f32 %v2592_v29, 0.0 }
 0x2fd   :  { %v2591_v44 = vadd.f32 %v12542_v1, %v2531_v60  ;;  %v1940_v12 = vpop.permute.xlu1 %1939  ;;  %9678 = vmatprep.subr.bf16.mxu0 %v10853_v20  ;;  %v2606_v25 = vmax.f32 %v2590_v2, 0.0 }
 0x2fe   :  { %v2609_v30 = vmax.f32 %v2593_v34, 0.0  ;;  %1981 = vst.msk [vmem:[#allocation2 + $0x1c7] sm:$0xff] %vm510_vm3, %v1940_v12  ;;  %v1938_v33 = vpop.permute.xlu0 %1937 }
 0x2ff   :  { %v2607_v57 = vmax.f32 %v2591_v44, 0.0  ;;  %1980 = vst.msk [vmem:[#allocation2 + $0x1bf] sm:$0xff] %vm510_vm3, %v1938_v33  ;;  %5484 = vperm.xlu0 %10681, %v5430_v62   ;;  %5479 = vperm.xlu1 %10682, %v5429_v31  }
 0x300   :  { %v2621_v23 = vpack.c.bf16 %v2609_v30, %v2608_v21  ;;  %9679 = vmatpush3.bf16.msra.mxu0 %v2619_v13 }
 0x301   :  { %v2620_v17 = vpack.c.bf16 %v2607_v57, %v2606_v25  ;;  %v1944_v39 = vpop.permute.xlu1 %1943  ;;  %v9566_v10 = vpop.f32.mrb[60].mxu0  ;;  %9680 = vmatprep.subr.bf16.mxu0 %v10853_v20 }
 0x302   :  { %1983 = vst.msk [vmem:[#allocation2 + $0x1d7] sm:$0xff] %vm510_vm3, %v1944_v39  ;;  %v1942_v7 = vpop.permute.xlu0 %1941  ;;  %v2596_v45 = vadd.f32 %v9566_v10, %v12542_v1  ;;  %v2544_v16 = vpop.f32.mrb[61].mxu0 }
 0x303   :  { %1982 = vst.msk [vmem:[#allocation2 + $0x1cf] sm:$0xff] %vm510_vm3, %v1942_v7  ;;  %v2594_v5 = vadd.f32 %v12542_v1, %v2544_v16  ;;  %5494 = vperm.xlu0 %10681, %v5432_v11   ;;  %5489 = vperm.xlu1 %10682, %v5431_v53   ;;  %v9567_v48 = vpop.f32.mrb[62].mxu0 }
 0x304   :  { %v2597_v24 = vadd.f32 %v9567_v48, %v12542_v1  ;;  %9681 = vmatpush3.bf16.msra.mxu0 %v2620_v17  ;;  %v2547_v51 = vpop.f32.mrb[63].mxu0  ;;  %v2612_v27 = vmax.f32 %v2596_v45, 0.0 }
 0x305   :  { %v2595_v49 = vadd.f32 %v12542_v1, %v2547_v51  ;;  %v1884_v4 = vpop.permute.xlu1 %1883  ;;  %9682 = vmatprep.subr.bf16.mxu0 %v10853_v20  ;;  %v2610_v56 = vmax.f32 %v2594_v5, 0.0 }
 0x306   :  { %v2613_v43 = vmax.f32 %v2597_v24, 0.0  ;;  %1921 = vst.msk [vmem:[#allocation2 + $0x1e8] sm:$0xff] %vm445_vm2, %v1884_v4  ;;  %v1882_v40 = vpop.permute.xlu0 %1881 }
 0x307   :  { %v2611_v19 = vmax.f32 %v2595_v49, 0.0  ;;  %1920 = vst.msk [vmem:[#allocation2 + $0x1e0] sm:$0xff] %vm445_vm2, %v1882_v40  ;;  %5504 = vperm.xlu0 %10681, %v5434_v9   ;;  %5499 = vperm.xlu1 %10682, %v5433_v6  }
 0x308   :  { %v2623_v55 = vpack.c.bf16 %v2613_v43, %v2612_v27  ;;  %9683 = vmatpush3.bf16.msra.mxu0 %v2621_v23 }
 0x309   :  { %v2622_v41 = vpack.c.bf16 %v2611_v19, %v2610_v56  ;;  %v1888_v38 = vpop.permute.xlu1 %1887  ;;  %9684 = vmatprep.subr.bf16.mxu0 %v10853_v20 }
 0x30a   :  { %1923 = vst.msk [vmem:[#allocation2 + $0x1f8] sm:$0xff] %vm445_vm2, %v1888_v38  ;;  %v1886_v54 = vpop.permute.xlu0 %1885 }
 0x30b   :  { %1922 = vst.msk [vmem:[#allocation2 + $0x1f0] sm:$0xff] %vm445_vm2, %v1886_v54  ;;  %5514 = vperm.xlu0 %10681, %v5436_v58   ;;  %5509 = vperm.xlu1 %10682, %v5435_v46  }
 0x30c   :  { %9685 = vmatpush3.bf16.msra.mxu0 %v2622_v41 }
 0x30d   :  { %v1948_v47 = vpop.permute.xlu1 %1947  ;;  %9686 = vmatprep.subr.bf16.mxu0 %v10853_v20 }
 0x30e   :  { %1985 = vst.msk [vmem:[#allocation2 + $0x1e7] sm:$0xff] %vm510_vm3, %v1948_v47  ;;  %v1946_v50 = vpop.permute.xlu0 %1945 }
 0x30f   :  { %1984 = vst.msk [vmem:[#allocation2 + $0x1df] sm:$0xff] %vm510_vm3, %v1946_v50  ;;  %5927 = vperm.xlu1 %10682, %v5909_v42  }
 0x310   :  { %9687 = vmatpush3.bf16.msra.mxu0 %v2623_v55 }
 0x311   :  { %v1952_v37 = vpop.permute.xlu1 %1951  ;;  %9776 = vmatprep.subr.bf16.mxu0 %v10853_v20 }
 0x312   :  { %1987 = vst.msk [vmem:[#allocation2 + $0x1f7] sm:$0xff] %vm510_vm3, %v1952_v37  ;;  %v1950_v15 = vpop.permute.xlu0 %1949 }
 0x313   :  { %1986 = vst.msk [vmem:[#allocation2 + $0x1ef] sm:$0xff] %vm510_vm3, %v1950_v15  ;;  %9689 = vmatmul.mubr.bf16.vlgmr.msra.gmra.mrb[64].mxu0 %v2615_v61 }
 0x314   :  { %9792 = vmatprep.mubr.msk.bf16.mxu0 %vm10856_vm4, %v10853_v20 }
 0x315   :  { %v1892_v36 = vpop.permute.xlu1 %1891 }
 0x316   :  { %1925 = vst.msk [vmem:[#allocation2 + $0x208] sm:$0xff] %vm445_vm2, %v1892_v36  ;;  %v1890_v63 = vpop.permute.xlu0 %1889 }
 0x317   :  { %1924 = vst.msk [vmem:[#allocation2 + $0x200] sm:$0xff] %vm445_vm2, %v1890_v63 }
 0x319   :  { %v1954_v32 = vpop.permute.xlu1 %1953 }
 0x31a   :  { %1988 = vst.msk [vmem:[#allocation2 + $0x1ff] sm:$0xff] %vm510_vm3, %v1954_v32  ;;  %v1894_v28 = vpop.permute.xlu0 %1893 }
 0x31b   :  { %1926 = vst.msk [vmem:[#allocation2 + $0x210] sm:$0xff] %vm445_vm2, %v1894_v28 }
 0x31d   :  { %v1958_v35 = vpop.permute.xlu1 %1957 }
 0x31e   :  { %1990 = vst.msk [vmem:[#allocation2 + $0x20f] sm:$0xff] %vm510_vm3, %v1958_v35  ;;  %v1956_v52 = vpop.permute.xlu0 %1955 }
 0x31f   :  { %1989 = vst.msk [vmem:[#allocation2 + $0x207] sm:$0xff] %vm510_vm3, %v1956_v52 }
 0x32e   :  { %v12757_v0 = vpop.permute.xlu1 %4951  ;;  %v12759_v13 = vpop.permute.xlu0 %4538 }
 0x332   :  { %v12761_v18 = vpop.permute.xlu1 %4961  ;;  %v12763_v3 = vpop.permute.xlu0 %4956 }
 0x334   :  { %v9762_v8 = vpop.f32.mrb[32].mxu1 }
 0x335   :  { %v3624_v26 = vadd.f32 %v9762_v8, %v12542_v1  ;;  %v3543_v29 = vpop.f32.mrb[33].mxu1 }
 0x336   :  { %v3622_v22 = vadd.f32 %v12542_v1, %v3543_v29  ;;  %v9763_v2 = vpop.f32.mrb[34].mxu1  ;;  %v12767_v59 = vpop.permute.xlu1 %4971 }
 0x337   :  { %v3625_v34 = vadd.f32 %v9763_v2, %v12542_v1  ;;  %v12770_v60 = vpop.permute.xlu0 %4966  ;;  %v3546_v62 = vpop.f32.mrb[35].mxu1  ;;  %v3640_v44 = vmax.f32 %v3624_v26, 0.0 }
 0x338   :  { %v3623_v31 = vadd.f32 %v12542_v1, %v3546_v62  ;;  %v3638_v21 = vmax.f32 %v3622_v22, 0.0 }
 0x339   :  { %v3641_v12 = vmax.f32 %v3625_v34, 0.0 }
 0x33a   :  { %v3639_v30 = vmax.f32 %v3623_v31, 0.0  ;;  %v12773_v33 = vpop.permute.xlu1 %4981 }
 0x33b   :  { %v3657_v25 = vpack.c.bf16 %v3641_v12, %v3640_v44  ;;  %v12775_v57 = vpop.permute.xlu0 %4976  ;;  %v10771_v44 = vld [vmem:[%s14484_s3 + $0x30] sm:$0xff]  }
 0x33c   :  { %v3656_v23 = vpack.c.bf16 %v3639_v30, %v3638_v21  ;;  %v9766_v11 = vpop.f32.mrb[36].mxu1  ;;  %9980 = vmatprep.subr.bf16.mxu1 %v10771_v44 }
 0x33d   :  { %v3628_v53 = vadd.f32 %v9766_v11, %v12542_v1  ;;  %v3559_v17 = vpop.f32.mrb[37].mxu1  ;;  %9981 = vmatpush3.bf16.msra.mxu1 %v10771_v44 }
 0x33e   :  { %v3626_v39 = vadd.f32 %v12542_v1, %v3559_v17  ;;  %v9767_v10 = vpop.f32.mrb[38].mxu1  ;;  %v12779_v7 = vpop.permute.xlu1 %4991  ;;  %9777 = vmatpush3.bf16.msra.mxu0 %v3656_v23 }
 0x33f   :  { %v3629_v45 = vadd.f32 %v9767_v10, %v12542_v1  ;;  %v12782_v16 = vpop.permute.xlu0 %4986  ;;  %v3562_v5 = vpop.f32.mrb[39].mxu1  ;;  %9778 = vmatprep.subr.bf16.mxu0 %v10853_v20  ;;  %v3644_v24 = vmax.f32 %v3628_v53, 0.0  ;;  %v10772_v10 = vld [vmem:[%s14484_s3 + $0x38] sm:$0xff]  }
 0x340   :  { %v3627_v48 = vadd.f32 %v12542_v1, %v3562_v5  ;;  %v3642_v9 = vmax.f32 %v3626_v39, 0.0  ;;  %9982 = vmatprep.subr.bf16.mxu1 %v10772_v10 }
 0x341   :  { %v3645_v51 = vmax.f32 %v3629_v45, 0.0  ;;  %9983 = vmatpush3.bf16.msra.mxu1 %v10772_v10 }
 0x342   :  { %v3643_v6 = vmax.f32 %v3627_v48, 0.0  ;;  %v12786_v49 = vpop.permute.xlu1 %5001  ;;  %9779 = vmatpush3.bf16.msra.mxu0 %v3657_v25  ;;  %v12822_v25 = vld [vmem:[%s14483_s2] ss:$0 sm:$0xff] }
 0x343   :  { %v3659_v4 = vpack.c.bf16 %v3645_v51, %v3644_v24  ;;  %v12788_v27 = vpop.permute.xlu0 %4996  ;;  %9780 = vmatprep.subr.bf16.mxu0 %v10853_v20 }
 0x344   :  { %v3658_v43 = vpack.c.bf16 %v3643_v6, %v3642_v9  ;;  %v9770_v40 = vpop.f32.mrb[40].mxu1  ;;  %v3654_v6 = vld [vmem:[%s14486_s6 + $0x2] sm:$0x1] }
 0x345   :  { %v3632_v56 = vadd.f32 %v9770_v40, %v12542_v1  ;;  %v3575_v19 = vpop.f32.mrb[41].mxu1 }
 0x346   :  { %v3630_v55 = vadd.f32 %v12542_v1, %v3575_v19  ;;  %v9771_v58 = vpop.f32.mrb[42].mxu1  ;;  %v12793_v46 = vpop.permute.xlu1 %5011  ;;  %9781 = vmatpush3.bf16.msra.mxu0 %v3658_v43 }
 0x347   :  { %v3633_v41 = vadd.f32 %v9771_v58, %v12542_v1  ;;  %v12796_v38 = vpop.permute.xlu0 %5006  ;;  %v3578_v54 = vpop.f32.mrb[43].mxu1  ;;  %9782 = vmatprep.subr.bf16.mxu0 %v10853_v20  ;;  %v3648_v14 = vmax.f32 %v3632_v56, 0.0  ;;  %v10773_v56 = vld [vmem:[%s14484_s3 + $0x40] sm:$0xff]  }
 0x348   :  { %v3631_v42 = vadd.f32 %v12542_v1, %v3578_v54  ;;  %v3646_v50 = vmax.f32 %v3630_v55, 0.0  ;;  %v12843_v54 = vld [vmem:[#allocation2 + $0x1a0] sm:$0xff]  ;;  %9984 = vmatprep.subr.bf16.mxu1 %v10773_v56 }
 0x349   :  { %v3649_v47 = vmax.f32 %v3633_v41, 0.0  ;;  %v3655_v41 = vpack.c.bf16 %v3654_v6, %v3654_v6  ;;  %9985 = vmatpush3.bf16.msra.mxu1 %v10773_v56  ;;  %v10808_v6 = vld [vmem:[%s14484_s3 + $0x40] sm:$0xff]  }
 0x34a   :  { %v3647_v61 = vmax.f32 %v3631_v42, 0.0  ;;  %v12800_v37 = vpop.permute.xlu1 %5021  ;;  %9783 = vmatpush3.bf16.msra.mxu0 %v3659_v4 }
 0x34b   :  { %v3661_v15 = vpack.c.bf16 %v3649_v47, %v3648_v14  ;;  %v12802_v36 = vpop.permute.xlu0 %5016  ;;  %9784 = vmatprep.subr.bf16.mxu0 %v10853_v20  ;;  %v10806_v47 = vld [vmem:[%s14484_s3 + $0x30] sm:$0xff]  }
 0x34c   :  { %v3660_v63 = vpack.c.bf16 %v3647_v61, %v3646_v50  ;;  %v9774_v32 = vpop.f32.mrb[44].mxu1 }
 0x34d   :  { %v3636_v28 = vadd.f32 %v9774_v32, %v12542_v1  ;;  %v3591_v35 = vpop.f32.mrb[45].mxu1 }
 0x34e   :  { %v3634_v52 = vadd.f32 %v12542_v1, %v3591_v35  ;;  %v9775_v8 = vpop.f32.mrb[46].mxu1  ;;  %v12807_v26 = vpop.permute.xlu1 %5439  ;;  %9785 = vmatpush3.bf16.msra.mxu0 %v3660_v63  ;;  %v12851_v63 = vld [vmem:[#allocation2 + $0x198] sm:$0xff] }
 0x34f   :  { %v3637_v29 = vadd.f32 %v9775_v8, %v12542_v1  ;;  %v12810_v22 = vpop.permute.xlu0 %5026  ;;  %v3594_v2 = vpop.f32.mrb[47].mxu1  ;;  %9786 = vmatprep.subr.bf16.mxu0 %v10853_v20  ;;  %v3652_v62 = vmax.f32 %v3636_v28, 0.0  ;;  %v3732_v35 = vpack.c.bf16 %v12843_v54, %v12851_v63 }
 0x350   :  { %v3635_v34 = vadd.f32 %v12542_v1, %v3594_v2  ;;  %v3650_v12 = vmax.f32 %v3634_v52, 0.0  ;;  %v10774_v52 = vld [vmem:[%s14484_s3 + $0x48] sm:$0xff]  }
 0x351   :  { %v3653_v31 = vmax.f32 %v3637_v29, 0.0  ;;  %9986 = vmatprep.subr.bf16.mxu1 %v10774_v52 }
 0x352   :  { %v3651_v21 = vmax.f32 %v3635_v34, 0.0  ;;  %v12817_v30 = vpop.permute.xlu1 %4528  ;;  %9787 = vmatpush3.bf16.msra.mxu0 %v3661_v15  ;;  %9987 = vmatpush3.bf16.msra.mxu1 %v10774_v52 }
 0x353   :  { %v3663_v23 = vpack.c.bf16 %v3653_v31, %v3652_v62  ;;  %v12824_v11 = vpop.permute.xlu0 %4523  ;;  %9788 = vmatprep.subr.bf16.mxu0 %v10853_v20 }
 0x354   :  { %v3662_v1 = vpack.c.bf16 %v3651_v21, %v3650_v12  ;;  %v9906_v53 = vpop.f32.mrb[48].mxu1 }
 0x355   :  { %v4375_v17 = vadd.f32 %v9906_v53, %v12822_v25  ;;  %v4366_v39 = vpop.f32.mrb[49].mxu1  ;;  %v10775_v53 = vld [vmem:[%s14484_s3 + $0x50] sm:$0xff]  }
 0x356   :  { %v4367_v45 = vadd.f32 %v12822_v25, %v4366_v39  ;;  %v9907_v5 = vpop.f32.mrb[50].mxu1  ;;  %v4464_v48 = vpop.permute.xlu1 %4463  ;;  %9789 = vmatpush3.bf16.msra.mxu0 %v3662_v1  ;;  %v10807_v1 = vld [vmem:[%s14484_s3 + $0x38] sm:$0xff]   ;;  %9988 = vmatprep.subr.bf16.mxu1 %v10775_v53 }
 0x357   :  { %v4431_v24 = vmax.f32 %v4375_v17, 0.0  ;;  %v12832_v51 = vpop.permute.xlu0 %4533  ;;  %v4369_v9 = vpop.f32.mrb[51].mxu1  ;;  %9790 = vmatprep.subr.bf16.mxu0 %v10853_v20  ;;  %v4378_v43 = vadd.f32 %v9907_v5, %v12822_v25  ;;  %9989 = vmatpush3.bf16.msra.mxu1 %v10775_v53 }
 0x358   :  { %v4429_v4 = vmax.f32 %v4367_v45, 0.0  ;;  %v4370_v40 = vadd.f32 %v12822_v25, %v4369_v9 }
 0x359   :  { %v4432_v50 = vmax.f32 %v4378_v43, 0.0 }
 0x35a   :  { %v4541_v19 = vmul.f32 %v4464_v48, %v4429_v4  ;;  %v4430_v55 = vmax.f32 %v4370_v40, 0.0  ;;  %v4474_v58 = vpop.permute.xlu1 %4473  ;;  %9791 = vmatpush3.bf16.msra.mxu0 %v3663_v23  ;;  %v10776_v40 = vld [vmem:[%s14484_s3 + $0x58] sm:$0xff]  }
 0x35b   :  { %v4543_v42 = vmul.f32 %v4474_v58, %v4431_v24  ;;  %v4469_v14 = vpop.permute.xlu0 %4468  ;;  %9796 = vmatprep.subr.bf16.mxu0 %v10806_v47  ;;  %9990 = vmatprep.subr.bf16.mxu1 %v10776_v40 }
 0x35c   :  { %4557 = vst.msk [vmem:[#allocation2 + $0x19] sm:$0xff] %vm115_vm0, %v4541_v19  ;;  %v12849_v61 = vmul.f32 %v4469_v14, %v4430_v55  ;;  %v9910_v15 = vpop.f32.mrb[52].mxu1  ;;  %9991 = vmatpush3.bf16.msra.mxu1 %v10776_v40 }
 0x35d   :  { %4559 = vst.msk [vmem:[#allocation2 + $0x29] sm:$0xff] %vm115_vm0, %v4543_v42  ;;  %v4391_v32 = vadd.f32 %v9910_v15, %v12822_v25  ;;  %v4382_v28 = vpop.f32.mrb[53].mxu1  ;;  %4657 = vrot.lane.b32.xlu1 %v4543_v42, %s10854_s14  ;;  %4593 = vrot.lane.b32.xlu0 %v4543_v42, %s10855_s15 }
 0x35e   :  { %4558 = vst.msk [vmem:[#allocation2 + $0x21] sm:$0xff] %vm115_vm0, %v12849_v61  ;;  %v4383_v8 = vadd.f32 %v12822_v25, %v4382_v28  ;;  %9793 = vmatmul.mubr.bf16.vlgmr.msra.gmra.mrb[64].mxu0 %v3655_v41  ;;  %v9911_v29 = vpop.f32.mrb[54].mxu1  ;;  %v4484_v2 = vpop.permute.xlu1 %4483 }
 0x35f   :  { %v4394_v34 = vadd.f32 %v9911_v29, %v12822_v25  ;;  %v4479_v62 = vpop.permute.xlu0 %4478  ;;  %9797 = vmatpush3.bf16.msra.mxu0 %v10806_v47  ;;  %9808 = vmatprep.mubr.msk.bf16.mxu0 %vm27_vm1, %v3732_v35  ;;  %v4385_v31 = vpop.f32.mrb[55].mxu1  ;;  %v4435_v44 = vmax.f32 %v4391_v32, 0.0  ;;  %v10809_v32 = vld [vmem:[%s14484_s3 + $0x48] sm:$0xff]  }
 0x360   :  { %v4433_v12 = vmax.f32 %v4383_v8, 0.0  ;;  %v4544_v21 = vmul.f32 %v4479_v62, %v4432_v50  ;;  %v4386_v23 = vadd.f32 %v12822_v25, %v4385_v31  ;;  %9798 = vmatprep.subr.bf16.mxu0 %v10807_v1 }
 0x361   :  { %4653 = vrot.lane.b32.xlu1 %v4541_v19, %s10854_s14  ;;  %4589 = vrot.lane.b32.xlu0 %v4541_v19, %s10855_s15  ;;  %v4436_v45 = vmax.f32 %v4394_v34, 0.0 }
 0x362   :  { %v4545_v17 = vmul.f32 %v4484_v2, %v4433_v12  ;;  %4560 = vst.msk [vmem:[#allocation2 + $0x31] sm:$0xff] %vm115_vm0, %v4544_v21  ;;  %v4434_v39 = vmax.f32 %v4386_v23, 0.0  ;;  %v4489_v10 = vpop.permute.xlu1 %4488 }
 0x363   :  { %v4494_v5 = vpop.permute.xlu0 %4493  ;;  %9799 = vmatpush3.bf16.msra.mxu0 %v10807_v1 }
 0x364   :  { %4561 = vst.msk [vmem:[#allocation2 + $0x39] sm:$0xff] %vm115_vm0, %v4545_v17  ;;  %v12878_v48 = vmul.f32 %v4489_v10, %v4434_v39  ;;  %v12880_v24 = vmul.f32 %v4494_v5, %v4435_v44  ;;  %v9914_v9 = vpop.f32.mrb[56].mxu1  ;;  %9800 = vmatprep.subr.bf16.mxu0 %v10808_v6  ;;  %v10811_v5 = vld [vmem:[%s14484_s3 + $0x58] sm:$0xff]  }
 0x365   :  { %v4407_v4 = vadd.f32 %v9914_v9, %v12822_v25  ;;  %v4398_v43 = vpop.f32.mrb[57].mxu1  ;;  %4659 = vrot.lane.b32.xlu0 %v4544_v21, %s10854_s14  ;;  %4595 = vrot.lane.b32.xlu1 %v4544_v21, %s10855_s15 }
 0x366   :  { %4562 = vst.msk [vmem:[#allocation2 + $0x41] sm:$0xff] %vm115_vm0, %v12878_v48  ;;  %4563 = vst.msk [vmem:[#allocation2 + $0x49] sm:$0xff] %vm115_vm0, %v12880_v24  ;;  %v4399_v56 = vadd.f32 %v12822_v25, %v4398_v43  ;;  %v9915_v19 = vpop.f32.mrb[58].mxu1  ;;  %v4499_v55 = vpop.permute.xlu1 %4498 }
 0x367   :  { %v4410_v58 = vadd.f32 %v9915_v19, %v12822_v25  ;;  %v12897_v41 = vmul.f32 %v4499_v55, %v4436_v45  ;;  %v4504_v42 = vpop.permute.xlu0 %4503  ;;  %9801 = vmatpush3.bf16.msra.mxu0 %v10808_v6  ;;  %v4401_v14 = vpop.f32.mrb[59].mxu1  ;;  %v4439_v47 = vmax.f32 %v4407_v4, 0.0  ;;  %v12940_v4 = vld [vmem:[#allocation2 + $0x1b0] sm:$0xff]  ;;  %v12947_v19 = vld [vmem:[#allocation2 + $0x1c0] sm:$0xff]  ;;  %v12953_v55 = vld [vmem:[#allocation2 + $0x1a8] sm:$0xff] }
 0x368   :  { %v4437_v50 = vmax.f32 %v4399_v56, 0.0  ;;  %v4402_v15 = vadd.f32 %v12822_v25, %v4401_v14  ;;  %9802 = vmatprep.subr.bf16.mxu0 %v10809_v32  ;;  %v12945_v56 = vld [vmem:[#allocation2 + $0x1b8] sm:$0xff]  ;;  %v10812_v14 = vld [vmem:[%s14484_s3] sm:$0xff]  }
 0x369   :  { %4564 = vst.msk [vmem:[#allocation2 + $0x51] sm:$0xff] %vm115_vm0, %v12897_v41  ;;  %4655 = vrot.lane.b32.xlu0 %v12849_v61, %s10854_s14  ;;  %4591 = vrot.lane.b32.xlu1 %v12849_v61, %s10855_s15  ;;  %v4440_v8 = vmax.f32 %v4410_v58, 0.0  ;;  %v10810_v61 = vld [vmem:[%s14484_s3 + $0x50] sm:$0xff]  }
 0x36a   :  { %v12909_v28 = vmul.f32 %v4504_v42, %v4437_v50  ;;  %v4438_v35 = vmax.f32 %v4402_v15, 0.0  ;;  %v4509_v52 = vpop.permute.xlu1 %4508  ;;  %v3733_v42 = vpack.c.bf16 %v12940_v4, %v12953_v55 }
 0x36b   :  { %v4514_v29 = vpop.permute.xlu0 %4513  ;;  %9803 = vmatpush3.bf16.msra.mxu0 %v10809_v32 }
 0x36c   :  { %4565 = vst.msk [vmem:[#allocation2 + $0x59] sm:$0xff] %vm115_vm0, %v12909_v28  ;;  %v12913_v2 = vmul.f32 %v4509_v52, %v4438_v35  ;;  %v12915_v34 = vmul.f32 %v4514_v29, %v4439_v47  ;;  %v9918_v62 = vpop.f32.mrb[60].mxu1  ;;  %9804 = vmatprep.subr.bf16.mxu0 %v10810_v61 }
 0x36d   :  { %v4423_v31 = vadd.f32 %v9918_v62, %v12822_v25  ;;  %v4414_v44 = vpop.f32.mrb[61].mxu1  ;;  %4597 = vrot.lane.b32.xlu0 %v4545_v17, %s10855_s15  ;;  %4661 = vrot.lane.b32.xlu1 %v4545_v17, %s10854_s14  ;;  %v10813_v62 = vld [vmem:[%s14484_s3 + $0x8] sm:$0xff]  }
 0x36e   :  { %4566 = vst.msk [vmem:[#allocation2 + $0x61] sm:$0xff] %vm115_vm0, %v12913_v2  ;;  %4567 = vst.msk [vmem:[#allocation2 + $0x69] sm:$0xff] %vm115_vm0, %v12915_v34  ;;  %v4415_v12 = vadd.f32 %v12822_v25, %v4414_v44  ;;  %v9919_v21 = vpop.f32.mrb[62].mxu1  ;;  %v4519_v23 = vpop.permute.xlu1 %4518  ;;  %v12983_v44 = vld [vmem:[#allocation2 + $0x1c8] sm:$0xff] }
 0x36f   :  { %v4443_v1 = vmax.f32 %v4423_v31, 0.0  ;;  %v4426_v53 = vadd.f32 %v9919_v21, %v12822_v25  ;;  %v12929_v39 = vmul.f32 %v4519_v23, %v4440_v8  ;;  %9805 = vmatpush3.bf16.msra.mxu0 %v10810_v61  ;;  %v4417_v10 = vpop.f32.mrb[63].mxu1 }
 0x370   :  { %v4441_v45 = vmax.f32 %v4415_v12, 0.0  ;;  %v4418_v17 = vadd.f32 %v12822_v25, %v4417_v10  ;;  %9806 = vmatprep.subr.bf16.mxu0 %v10811_v5  ;;  %v12985_v12 = vld [vmem:[#allocation2 + $0x1d0] sm:$0xff] }
 0x371   :  { %v4555_v9 = vmul.f32 %v12832_v51, %v4443_v1  ;;  %v4444_v6 = vmax.f32 %v4426_v53, 0.0  ;;  %4568 = vst.msk [vmem:[#allocation2 + $0x71] sm:$0xff] %vm115_vm0, %v12929_v39  ;;  %4599 = vrot.lane.b32.xlu0 %v12878_v48, %s10855_s15  ;;  %v12990_v1 = vld [vmem:[#allocation2 + $0x1d8] sm:$0xff]  ;;  %v12992_v53 = vld [vmem:[#allocation2 + $0x1e0] sm:$0xff] }
 0x372   :  { %v12943_v43 = vmul.f32 %v12824_v11, %v4441_v45  ;;  %v4442_v40 = vmax.f32 %v4418_v17, 0.0  ;;  %v10814_v17 = vld [vmem:[%s14484_s3 + $0x10] sm:$0xff]  }
 0x373   :  { %4571 = vst.msk [vmem:[#allocation2 + $0x89] sm:$0xff] %vm115_vm0, %v4555_v9  ;;  %v12951_v51 = vmul.f32 %v12759_v13, %v4444_v6  ;;  %9807 = vmatpush3.bf16.msra.mxu0 %v10811_v5 }
 0x374   :  { %4569 = vst.msk [vmem:[#allocation2 + $0x79] sm:$0xff] %vm115_vm0, %v12943_v43  ;;  %v4554_v58 = vmul.f32 %v12817_v30, %v4442_v40  ;;  %v9926_v11 = vpop.f32.mrb[64].mxu1  ;;  %9824 = vmatprep.subr.bf16.mxu0 %v10812_v14  ;;  %v3734_v30 = vpack.c.bf16 %v12947_v19, %v12945_v56 }
 0x375   :  { %4572 = vst.msk [vmem:[#allocation2 + $0x91] sm:$0xff] %vm115_vm0, %v12951_v51  ;;  %v4863_v13 = vadd.f32 %v9926_v11, %v12822_v25  ;;  %v4854_v47 = vpop.f32.mrb[65].mxu1  ;;  %4617 = vrot.lane.b32.xlu0 %v4555_v9, %s10855_s15  ;;  %4683 = vrot.lane.b32.xlu1 %v12951_v51, %s10854_s14 }
 0x376   :  { %4570 = vst.msk [vmem:[#allocation2 + $0x81] sm:$0xff] %vm115_vm0, %v4554_v58  ;;  %v4855_v50 = vadd.f32 %v12822_v25, %v4854_v47  ;;  %9809 = vmatmul.mubr.msk.bf16.vlgmr.msra.gmra.mrb[68].mxu0 %vm27_vm1, %v3733_v42  ;;  %v9927_v15 = vpop.f32.mrb[66].mxu1 }
 0x377   :  { %v4919_v32 = vmax.f32 %v4863_v13, 0.0  ;;  %v4866_v35 = vadd.f32 %v9927_v15, %v12822_v25  ;;  %9812 = vmatprep.mubr.msk.bf16.mxu0 %vm27_vm1, %v3734_v30  ;;  %9825 = vmatpush3.bf16.msra.mxu0 %v10812_v14  ;;  %v4857_v52 = vpop.f32.mrb[67].mxu1  ;;  %v10815_v13 = vld [vmem:[%s14484_s3 + $0x18] sm:$0xff]   ;;  %v13034_v15 = vld [vmem:[#allocation2 + $0x1f0] sm:$0xff] }
 0x378   :  { %v4917_v8 = vmax.f32 %v4855_v50, 0.0  ;;  %v4858_v29 = vadd.f32 %v12822_v25, %v4857_v52  ;;  %9826 = vmatprep.subr.bf16.mxu0 %v10813_v62  ;;  %v13032_v50 = vld [vmem:[#allocation2 + $0x1e8] sm:$0xff]  ;;  %v13039_v52 = vld [vmem:[#allocation2 + $0x200] sm:$0xff] }
 0x379   :  { %v5031_v61 = vmul.f32 %v12761_v18, %v4919_v32  ;;  %v4920_v31 = vmax.f32 %v4866_v35, 0.0  ;;  %4681 = vrot.lane.b32.xlu0 %v4555_v9, %s10854_s14  ;;  %4615 = vrot.lane.b32.xlu1 %v4554_v58, %s10855_s15 }
 0x37a   :  { %v12988_v21 = vmul.f32 %v12757_v0, %v4917_v8  ;;  %v4918_v23 = vmax.f32 %v4858_v29, 0.0  ;;  %v3735_v0 = vpack.c.bf16 %v12985_v12, %v12983_v44  ;;  %v13053_v29 = vld [vmem:[#allocation2 + $0x1f8] sm:$0xff] }
 0x37b   :  { %5047 = vst.msk [vmem:[#allocation2 + $0xa9] sm:$0xff] %vm115_vm0, %v5031_v61  ;;  %v12996_v18 = vmul.f32 %v12770_v60, %v4920_v31  ;;  %9827 = vmatpush3.bf16.msra.mxu0 %v10813_v62  ;;  %v10816_v62 = vld [vmem:[%s14484_s3 + $0x20] sm:$0xff]  }
 0x37c   :  { %5045 = vst.msk [vmem:[#allocation2 + $0x99] sm:$0xff] %vm115_vm0, %v12988_v21  ;;  %v13001_v10 = vmul.f32 %v12763_v3, %v4918_v23  ;;  %v9930_v45 = vpop.f32.mrb[68].mxu1  ;;  %9828 = vmatprep.subr.bf16.mxu0 %v10814_v17  ;;  %v3736_v3 = vpack.c.bf16 %v12992_v53, %v12990_v1 }
 0x37d   :  { %5048 = vst.msk [vmem:[#allocation2 + $0xb1] sm:$0xff] %vm115_vm0, %v12996_v18  ;;  %v4879_v60 = vadd.f32 %v9930_v45, %v12822_v25  ;;  %v4870_v5 = vpop.f32.mrb[69].mxu1  ;;  %4613 = vrot.lane.b32.xlu0 %v12943_v43, %s10855_s15  ;;  %4679 = vrot.lane.b32.xlu1 %v4554_v58, %s10854_s14 }
 0x37e   :  { %5046 = vst.msk [vmem:[#allocation2 + $0xa1] sm:$0xff] %vm115_vm0, %v13001_v10  ;;  %v4871_v9 = vadd.f32 %v12822_v25, %v4870_v5  ;;  %9813 = vmatmul.mubr.msk.bf16.gmra.mrb[72].mxu0 %vm27_vm1, %v3735_v0  ;;  %v9931_v6 = vpop.f32.mrb[70].mxu1 }
 0x37f   :  { %v4923_v40 = vmax.f32 %v4879_v60, 0.0  ;;  %v4882_v11 = vadd.f32 %v9931_v6, %v12822_v25  ;;  %9816 = vmatprep.mubr.msk.bf16.mxu0 %vm27_vm1, %v3736_v3  ;;  %v4873_v42 = vpop.f32.mrb[71].mxu1  ;;  %9829 = vmatpush3.bf16.msra.mxu0 %v10814_v17  ;;  %v13072_v60 = vpop.permute.xlu0 %5444 }
 0x380   :  { %v4921_v14 = vmax.f32 %v4871_v9, 0.0  ;;  %v4874_v58 = vadd.f32 %v12822_v25, %v4873_v42  ;;  %9830 = vmatprep.subr.bf16.mxu0 %v10815_v13  ;;  %v10817_v9 = vld [vmem:[%s14484_s3 + $0x28] sm:$0xff]   ;;  %v13087_v42 = vld [vmem:[#allocation2 + $0x210] sm:$0xff] }
 0x381   :  { %v13027_v47 = vmul.f32 %v12773_v33, %v4923_v40  ;;  %v4924_v30 = vmax.f32 %v4882_v11, 0.0  ;;  %4619 = vrot.lane.b32.xlu0 %v12951_v51, %s10855_s15  ;;  %5081 = vrot.lane.b32.xlu1 %v5031_v61, %s10855_s15  ;;  %v13085_v11 = vld [vmem:[#allocation2 + $0x208] sm:$0xff] }
 0x382   :  { %v13037_v32 = vmul.f32 %v12767_v59, %v4921_v14  ;;  %v4922_v35 = vmax.f32 %v4874_v58, 0.0  ;;  %v3737_v59 = vpack.c.bf16 %v13034_v15, %v13032_v50 }
 0x383   :  { %5051 = vst.msk [vmem:[#allocation2 + $0xc9] sm:$0xff] %vm115_vm0, %v13027_v47  ;;  %v13044_v33 = vmul.f32 %v12782_v16, %v4924_v30  ;;  %9831 = vmatpush3.bf16.msra.mxu0 %v10815_v13  ;;  %v3706_v13 = vld [vmem:[#allocation2 + $0x188] sm:$0xff] }
 0x384   :  { %5049 = vst.msk [vmem:[#allocation2 + $0xb9] sm:$0xff] %vm115_vm0, %v13037_v32  ;;  %v13049_v51 = vmul.f32 %v12775_v57, %v4922_v35  ;;  %v9934_v8 = vpop.f32.mrb[72].mxu1  ;;  %9832 = vmatprep.subr.bf16.mxu0 %v10816_v62  ;;  %v3738_v57 = vpack.c.bf16 %v13039_v52, %v13053_v29 }
 0x385   :  { %5052 = vst.msk [vmem:[#allocation2 + $0xd1] sm:$0xff] %vm115_vm0, %v13044_v33  ;;  %v4895_v16 = vadd.f32 %v9934_v8, %v12822_v25  ;;  %v4886_v31 = vpop.f32.mrb[73].mxu1  ;;  %5145 = vrot.lane.b32.xlu0 %v5031_v61, %s10854_s14  ;;  %5077 = vrot.lane.b32.xlu1 %v12988_v21, %s10855_s15  ;;  %v3705_v8 = vld [vmem:[#allocation2 + $0x180] sm:$0xff] }
 0x386   :  { %5050 = vst.msk [vmem:[#allocation2 + $0xc1] sm:$0xff] %vm115_vm0, %v13049_v51  ;;  %v4887_v23 = vadd.f32 %v12822_v25, %v4886_v31  ;;  %9817 = vmatmul.mubr.msk.bf16.gmra.mrb[76].mxu0 %vm27_vm1, %v3737_v59  ;;  %v9935_v45 = vpop.f32.mrb[74].mxu1  ;;  %v10818_v59 = vld [vmem:[%s14484_s3 + $0x60] sm:$0xff]  }
 0x387   :  { %v4927_v0 = vmax.f32 %v4895_v16, 0.0  ;;  %v4898_v17 = vadd.f32 %v9935_v45, %v12822_v25  ;;  %9820 = vmatprep.mubr.msk.bf16.mxu0 %vm27_vm1, %v3738_v57  ;;  %v4889_v61 = vpop.f32.mrb[75].mxu1  ;;  %9833 = vmatpush3.bf16.msra.mxu0 %v10816_v62  ;;  %v5455_v16 = vpop.permute.xlu0 %5454 }
 0x388   :  { %v4925_v5 = vmax.f32 %v4887_v23, 0.0  ;;  %v4890_v3 = vadd.f32 %v12822_v25, %v4889_v61  ;;  %9834 = vmatprep.subr.bf16.mxu0 %v10817_v9 }
 0x389   :  { %v13079_v6 = vmul.f32 %v12786_v49, %v4927_v0  ;;  %v4928_v40 = vmax.f32 %v4898_v17, 0.0  ;;  %5141 = vrot.lane.b32.xlu0 %v12988_v21, %s10854_s14  ;;  %5147 = vrot.lane.b32.xlu1 %v12996_v18, %s10854_s14  ;;  %v5450_v21 = vpop.permute.xlu1 %5449 }
 0x38a   :  { %v13090_v14 = vmul.f32 %v12779_v7, %v4925_v5  ;;  %v4926_v58 = vmax.f32 %v4890_v3, 0.0  ;;  %v3739_v7 = vpack.c.bf16 %v13087_v42, %v13085_v11 }
 0x38b   :  { %5055 = vst.msk [vmem:[#allocation2 + $0xe9] sm:$0xff] %vm115_vm0, %v13079_v6  ;;  %v13095_v49 = vmul.f32 %v12796_v38, %v4928_v40  ;;  %9835 = vmatpush3.bf16.msra.mxu0 %v10817_v9 }
 0x38c   :  { %5053 = vst.msk [vmem:[#allocation2 + $0xd9] sm:$0xff] %vm115_vm0, %v13090_v14  ;;  %v13100_v30 = vmul.f32 %v12788_v27, %v4926_v58  ;;  %v9938_v35 = vpop.f32.mrb[76].mxu1  ;;  %9852 = vmatprep.subr.bf16.mxu0 %v10818_v59  ;;  %v3721_v27 = vpack.c.bf16 %v3706_v13, %v3705_v8  ;;  %v13138_v13 = vpop.permute.xlu0 %5464 }
 0x38d   :  { %5056 = vst.msk [vmem:[#allocation2 + $0xf1] sm:$0xff] %vm115_vm0, %v13095_v49  ;;  %v4911_v38 = vadd.f32 %v9938_v35, %v12822_v25  ;;  %v4902_v62 = vpop.f32.mrb[77].mxu1  ;;  %5083 = vrot.lane.b32.xlu0 %v12996_v18, %s10855_s15  ;;  %5143 = vrot.lane.b32.xlu1 %v13001_v10, %s10854_s14  ;;  %v13128_v3 = vpop.permute.xlu1 %5459 }
 0x38e   :  { %5054 = vst.msk [vmem:[#allocation2 + $0xe1] sm:$0xff] %vm115_vm0, %v13100_v30  ;;  %v4903_v31 = vadd.f32 %v12822_v25, %v4902_v62  ;;  %9821 = vmatmul.mubr.msk.bf16.gmra.mrb[80].mxu0 %vm27_vm1, %v3739_v7  ;;  %v9939_v57 = vpop.f32.mrb[78].mxu1 }
 0x38f   :  { %v4931_v23 = vmax.f32 %v4911_v38, 0.0  ;;  %v4914_v45 = vadd.f32 %v9939_v57, %v12822_v25  ;;  %9836 = vmatprep.mubr.msk.bf16.mxu0 %vm27_vm1, %v3721_v27  ;;  %v4905_v0 = vpop.f32.mrb[79].mxu1 }
 0x390   :  { %v4929_v18 = vmax.f32 %v4903_v31, 0.0  ;;  %v4906_v17 = vadd.f32 %v12822_v25, %v4905_v0 }
 0x391   :  { %v13122_v61 = vmul.f32 %v12800_v37, %v4931_v23  ;;  %v4932_v5 = vmax.f32 %v4914_v45, 0.0  ;;  %5079 = vrot.lane.b32.xlu0 %v13001_v10, %s10855_s15  ;;  %5085 = vrot.lane.b32.xlu1 %v13037_v32, %s10855_s15  ;;  %v3707_v37 = vld [vmem:[#allocation2 + $0x190] sm:$0xff]  ;;  %v5470_v31 = vpop.permute.xlu1 %5469 }
 0x392   :  { %v13131_v9 = vmul.f32 %v12793_v46, %v4929_v18  ;;  %v4930_v40 = vmax.f32 %v4906_v17, 0.0  ;;  %v3722_v46 = vpack.c.bf16 %v12851_v63, %v3707_v37 }
 0x393   :  { %5059 = vst.msk [vmem:[#allocation2 + $0x109] sm:$0xff] %vm115_vm0, %v13122_v61  ;;  %v13136_v58 = vmul.f32 %v12810_v22, %v4932_v5  ;;  %v3723_v22 = vpack.c.bf16 %v12953_v55, %v12843_v54  ;;  %v10819_v54 = vld [vmem:[%s14484_s3 + $0x68] sm:$0xff]  }
 0x394   :  { %5057 = vst.msk [vmem:[#allocation2 + $0xf9] sm:$0xff] %vm115_vm0, %v13131_v9  ;;  %v13143_v10 = vmul.f32 %v12802_v36, %v4930_v40  ;;  %v9946_v35 = vpop.f32.mrb[80].mxu1 }
 0x395   :  { %5060 = vst.msk [vmem:[#allocation2 + $0x111] sm:$0xff] %vm115_vm0, %v13136_v58  ;;  %v5351_v7 = vadd.f32 %v9946_v35, %v12822_v25  ;;  %v5342_v8 = vpop.f32.mrb[81].mxu1  ;;  %5089 = vrot.lane.b32.xlu0 %v13027_v47, %s10855_s15  ;;  %5091 = vrot.lane.b32.xlu1 %v13044_v33, %s10855_s15 }
 0x396   :  { %5058 = vst.msk [vmem:[#allocation2 + $0x101] sm:$0xff] %vm115_vm0, %v13143_v10  ;;  %v5343_v36 = vadd.f32 %v12822_v25, %v5342_v8  ;;  %9837 = vmatmul.mubr.msk.bf16.vlgmr.msra.gmra.mrb[68].mxu0 %vm27_vm1, %v3722_v46  ;;  %v9947_v63 = vpop.f32.mrb[82].mxu1 }
 0x397   :  { %v5407_v38 = vmax.f32 %v5351_v7, 0.0  ;;  %9840 = vmatprep.mubr.msk.bf16.mxu0 %vm27_vm1, %v3723_v22  ;;  %9853 = vmatpush3.bf16.msra.mxu0 %v10818_v59  ;;  %v5354_v62 = vadd.f32 %v9947_v63, %v12822_v25  ;;  %v5345_v27 = vpop.f32.mrb[83].mxu1  ;;  %v5475_v59 = vpop.permute.xlu0 %5474  ;;  %v10821_v7 = vld [vmem:[%s14484_s3 + $0x78] sm:$0xff]  }
 0x398   :  { %v5405_v57 = vmax.f32 %v5343_v36, 0.0  ;;  %v5346_v23 = vadd.f32 %v12822_v25, %v5345_v27  ;;  %9854 = vmatprep.subr.bf16.mxu0 %v10819_v54 }
 0x399   :  { %v13165_v55 = vmul.f32 %v5450_v21, %v5407_v38  ;;  %v5408_v45 = vmax.f32 %v5354_v62, 0.0  ;;  %5153 = vrot.lane.b32.xlu0 %v13027_v47, %s10854_s14  ;;  %5155 = vrot.lane.b32.xlu1 %v13044_v33, %s10854_s14  ;;  %v13185_v33 = vpack.c.bf16 %v12945_v56, %v12940_v4  ;;  %v13199_v4 = vpack.c.bf16 %v12983_v44, %v12947_v19  ;;  %v5480_v56 = vpop.permute.xlu1 %5479 }
 0x39a   :  { %v13172_v0 = vmul.f32 %v12807_v26, %v5405_v57  ;;  %v5406_v18 = vmax.f32 %v5346_v23, 0.0  ;;  %v10820_v26 = vld [vmem:[%s14484_s3 + $0x70] sm:$0xff]  }
 0x39b   :  { %5535 = vst.msk [vmem:[#allocation2 + $0x129] sm:$0xff] %vm115_vm0, %v13165_v55  ;;  %v13176_v17 = vmul.f32 %v5455_v16, %v5408_v45  ;;  %9855 = vmatpush3.bf16.msra.mxu0 %v10819_v54  ;;  %v5485_v19 = vpop.permute.xlu0 %5484 }
 0x39c   :  { %5533 = vst.msk [vmem:[#allocation2 + $0x119] sm:$0xff] %vm115_vm0, %v13172_v0  ;;  %v13181_v21 = vmul.f32 %v13072_v60, %v5406_v18  ;;  %v9950_v47 = vpop.f32.mrb[84].mxu1  ;;  %9856 = vmatprep.subr.bf16.mxu0 %v10820_v26  ;;  %v10823_v18 = vld [vmem:[%s14484_s3 + $0x88] sm:$0xff]  }
 0x39d   :  { %5536 = vst.msk [vmem:[#allocation2 + $0x131] sm:$0xff] %vm115_vm0, %v13176_v17  ;;  %v5367_v16 = vadd.f32 %v9950_v47, %v12822_v25  ;;  %v5358_v5 = vpop.f32.mrb[85].mxu1  ;;  %5149 = vrot.lane.b32.xlu0 %v13037_v32, %s10854_s14  ;;  %5087 = vrot.lane.b32.xlu1 %v13049_v51, %s10855_s15  ;;  %v5490_v62 = vpop.permute.xlu1 %5489 }
 0x39e   :  { %5534 = vst.msk [vmem:[#allocation2 + $0x121] sm:$0xff] %vm115_vm0, %v13181_v21  ;;  %v5359_v60 = vadd.f32 %v12822_v25, %v5358_v5  ;;  %9841 = vmatmul.mubr.msk.bf16.gmra.mrb[72].mxu0 %vm27_vm1, %v13185_v33  ;;  %v9951_v40 = vpop.f32.mrb[86].mxu1 }
 0x39f   :  { %v5411_v37 = vmax.f32 %v5367_v16, 0.0  ;;  %9844 = vmatprep.mubr.msk.bf16.mxu0 %vm27_vm1, %v13199_v4  ;;  %v5370_v32 = vadd.f32 %v9951_v40, %v12822_v25  ;;  %v5361_v35 = vpop.f32.mrb[87].mxu1  ;;  %9857 = vmatpush3.bf16.msra.mxu0 %v10820_v26 }
 0x3a0   :  { %v5409_v44 = vmax.f32 %v5359_v60, 0.0  ;;  %v5362_v46 = vadd.f32 %v12822_v25, %v5361_v35  ;;  %9858 = vmatprep.subr.bf16.mxu0 %v10821_v7 }
 0x3a1   :  { %v13213_v8 = vmul.f32 %v5470_v31, %v5411_v37  ;;  %v5412_v22 = vmax.f32 %v5370_v32, 0.0  ;;  %5093 = vrot.lane.b32.xlu0 %v13090_v14, %s10855_s15  ;;  %5151 = vrot.lane.b32.xlu1 %v13049_v51, %s10854_s14  ;;  %v13233_v51 = vpack.c.bf16 %v12990_v1, %v12985_v12  ;;  %v13247_v12 = vpack.c.bf16 %v13032_v50, %v12992_v53  ;;  %v5495_v1 = vpop.permute.xlu0 %5494  ;;  %v5500_v16 = vpop.permute.xlu1 %5499 }
 0x3a2   :  { %v13220_v36 = vmul.f32 %v13128_v3, %v5409_v44  ;;  %v5410_v63 = vmax.f32 %v5362_v46, 0.0  ;;  %v10822_v3 = vld [vmem:[%s14484_s3 + $0x80] sm:$0xff]  }
 0x3a3   :  { %5539 = vst.msk [vmem:[#allocation2 + $0x149] sm:$0xff] %vm115_vm0, %v13213_v8  ;;  %v13224_v38 = vmul.f32 %v5475_v59, %v5412_v22  ;;  %9859 = vmatpush3.bf16.msra.mxu0 %v10821_v7 }
 0x3a4   :  { %5537 = vst.msk [vmem:[#allocation2 + $0x139] sm:$0xff] %vm115_vm0, %v13220_v36  ;;  %v13229_v27 = vmul.f32 %v13138_v13, %v5410_v63  ;;  %v9954_v31 = vpop.f32.mrb[88].mxu1  ;;  %9860 = vmatprep.subr.bf16.mxu0 %v10822_v3 }
 0x3a5   :  { %5540 = vst.msk [vmem:[#allocation2 + $0x151] sm:$0xff] %vm115_vm0, %v13224_v38  ;;  %v5383_v57 = vadd.f32 %v9954_v31, %v12822_v25  ;;  %v5374_v23 = vpop.f32.mrb[89].mxu1  ;;  %5157 = vrot.lane.b32.xlu0 %v13090_v14, %s10854_s14  ;;  %5097 = vrot.lane.b32.xlu1 %v13079_v6, %s10855_s15  ;;  %v5505_v37 = vpop.permute.xlu0 %5504 }
 0x3a6   :  { %5538 = vst.msk [vmem:[#allocation2 + $0x141] sm:$0xff] %vm115_vm0, %v13229_v27  ;;  %v5375_v13 = vadd.f32 %v12822_v25, %v5374_v23  ;;  %9845 = vmatmul.mubr.msk.bf16.gmra.mrb[76].mxu0 %vm27_vm1, %v13233_v51  ;;  %v9955_v54 = vpop.f32.mrb[90].mxu1  ;;  %v5510_v22 = vpop.permute.xlu1 %5509 }
 0x3a7   :  { %v5415_v45 = vmax.f32 %v5383_v57, 0.0  ;;  %9848 = vmatprep.mubr.msk.bf16.mxu0 %vm27_vm1, %v13247_v12  ;;  %v5386_v14 = vadd.f32 %v9955_v54, %v12822_v25  ;;  %v5377_v59 = vpop.f32.mrb[91].mxu1  ;;  %9861 = vmatpush3.bf16.msra.mxu0 %v10822_v3 }
 0x3a8   :  { %v5413_v53 = vmax.f32 %v5375_v13, 0.0  ;;  %v5378_v50 = vadd.f32 %v12822_v25, %v5377_v59  ;;  %9862 = vmatprep.subr.bf16.mxu0 %v10823_v18  ;;  %v5911_v59 = vld [vmem:[%s14480_s5 + $0x190] sm:$0xff] }
 0x3a9   :  { %v13261_v47 = vmul.f32 %v5490_v62, %v5415_v45  ;;  %v5416_v26 = vmax.f32 %v5386_v14, 0.0  ;;  %5099 = vrot.lane.b32.xlu0 %v13095_v49, %s10855_s15  ;;  %5161 = vrot.lane.b32.xlu1 %v13079_v6, %s10854_s14  ;;  %v3728_v6 = vpack.c.bf16 %v13053_v29, %v13034_v15  ;;  %v5515_v3 = vpop.permute.xlu0 %5514 }
 0x3aa   :  { %v13267_v5 = vmul.f32 %v5480_v56, %v5413_v53  ;;  %v5414_v60 = vmax.f32 %v5378_v50, 0.0  ;;  %v5912_v53 = vld [vmem:[%s14480_s5 + $0x198] sm:$0xff] }
 0x3ab   :  { %5543 = vst.msk [vmem:[#allocation2 + $0x169] sm:$0xff] %vm115_vm0, %v13261_v47  ;;  %v13271_v40 = vmul.f32 %v5495_v1, %v5416_v26  ;;  %9863 = vmatpush3.bf16.msra.mxu0 %v10823_v18 }
 0x3ac   :  { %5541 = vst.msk [vmem:[#allocation2 + $0x159] sm:$0xff] %vm115_vm0, %v13267_v5  ;;  %v13275_v32 = vmul.f32 %v5485_v19, %v5414_v60  ;;  %v9958_v35 = vpop.f32.mrb[92].mxu1  ;;  %9880 = vmatprep.subr.bf16.mxu0 %v10853_v20 }
 0x3ad   :  { %5544 = vst.msk [vmem:[#allocation2 + $0x171] sm:$0xff] %vm115_vm0, %v13271_v40  ;;  %v5399_v56 = vadd.f32 %v9958_v35, %v12822_v25  ;;  %v5390_v44 = vpop.f32.mrb[93].mxu1  ;;  %5163 = vrot.lane.b32.xlu0 %v13095_v49, %s10854_s14  ;;  %5169 = vrot.lane.b32.xlu1 %v13122_v61, %s10854_s14  ;;  %v13441_v35 = vld [vmem:[%s14484_s3 + $0x10] sm:$0xff]  }
 0x3ae   :  { %5542 = vst.msk [vmem:[#allocation2 + $0x161] sm:$0xff] %vm115_vm0, %v13275_v32  ;;  %v5391_v19 = vadd.f32 %v12822_v25, %v5390_v44  ;;  %9849 = vmatmul.mubr.msk.bf16.gmra.mrb[80].mxu0 %vm27_vm1, %v3728_v6  ;;  %v9959_v15 = vpop.f32.mrb[94].mxu1 }
 0x3af   :  { %v5419_v29 = vmax.f32 %v5399_v56, 0.0  ;;  %9864 = vmatprep.mubr.msk.bf16.mxu0 %vm27_vm1, %v13185_v33  ;;  %v5402_v46 = vadd.f32 %v9959_v15, %v12822_v25  ;;  %v5393_v7 = vpop.f32.mrb[95].mxu1 }
 0x3b0   :  { %v5417_v49 = vmax.f32 %v5391_v19, 0.0  ;;  %v5394_v63 = vadd.f32 %v12822_v25, %v5393_v7 }
 0x3b1   :  { %v13295_v62 = vmul.f32 %v5510_v22, %v5419_v29  ;;  %v5420_v31 = vmax.f32 %v5402_v46, 0.0  ;;  %5095 = vrot.lane.b32.xlu0 %v13100_v30, %s10855_s15  ;;  %5101 = vrot.lane.b32.xlu1 %v13131_v9, %s10855_s15  ;;  %v13480_v46 = vld [vmem:[%s14484_s3 + $0x28] sm:$0xff]  }
 0x3b2   :  { %v13301_v57 = vmul.f32 %v5500_v16, %v5417_v49  ;;  %v5418_v33 = vmax.f32 %v5394_v63, 0.0  ;;  %v13427_v16 = vld [vmem:[%s14484_s3 + $0x8] sm:$0xff]  }
 0x3b3   :  { %5547 = vst.msk [vmem:[#allocation2 + $0x189] sm:$0xff] %vm115_vm0, %v13295_v62  ;;  %v13305_v23 = vmul.f32 %v5515_v3, %v5420_v31 }
 0x3b4   :  { %5545 = vst.msk [vmem:[#allocation2 + $0x179] sm:$0xff] %vm115_vm0, %v13301_v57  ;;  %v13309_v25 = vmul.f32 %v5505_v37, %v5418_v33 }
 0x3b5   :  { %5548 = vst.msk [vmem:[#allocation2 + $0x191] sm:$0xff] %vm115_vm0, %v13305_v23  ;;  %5159 = vrot.lane.b32.xlu0 %v13100_v30, %s10854_s14  ;;  %5165 = vrot.lane.b32.xlu1 %v13131_v9, %s10854_s14  ;;  %v4003_v30 = vpack.c.bf16 %v13085_v11, %v13039_v52  ;;  %v13351_v11 = vpop.permute.xlu1 %5927 }
 0x3b6   :  { %5546 = vst.msk [vmem:[#allocation2 + $0x181] sm:$0xff] %vm115_vm0, %v13309_v25  ;;  %9865 = vmatmul.mubr.msk.bf16.vlgmr.msra.gmra.mrb[68].mxu0 %vm27_vm1, %v13199_v4  ;;  %v3997_v4 = vld [vmem:[#allocation2 + $0x228] sm:$0xff] }
 0x3b7   :  { %9868 = vmatprep.mubr.msk.bf16.mxu0 %vm27_vm1, %v13233_v51 }
 0x3b9   :  { %5105 = vrot.lane.b32.xlu0 %v13122_v61, %s10855_s15  ;;  %5107 = vrot.lane.b32.xlu1 %v13136_v58, %s10855_s15  ;;  %v3995_v61 = vld [vmem:[#allocation2 + $0x218] sm:$0xff] }
 0x3ba   :  { %v4004_v9 = vpack.c.bf16 %v3995_v61, %v13087_v42 }
 0x3bd   :  { %5167 = vrot.lane.b32.xlu0 %v13143_v10, %s10854_s14  ;;  %5171 = vrot.lane.b32.xlu1 %v13136_v58, %s10854_s14  ;;  %v3996_v58 = vld [vmem:[#allocation2 + $0x220] sm:$0xff] }
 0x3be   :  { %9869 = vmatmul.mubr.msk.bf16.gmra.mrb[72].mxu0 %vm27_vm1, %v13247_v12  ;;  %v4005_v52 = vpack.c.bf16 %v3997_v4, %v3996_v58 }
 0x3bf   :  { %9872 = vmatprep.mubr.msk.bf16.mxu0 %vm27_vm1, %v3728_v6 }
 0x3c1   :  { %5565 = vrot.lane.b32.xlu0 %v13172_v0, %s10855_s15  ;;  %5103 = vrot.lane.b32.xlu1 %v13143_v10, %s10855_s15 }
 0x3c5   :  { %5629 = vrot.lane.b32.xlu0 %v13172_v0, %s10854_s14  ;;  %4601 = vrot.lane.b32.xlu1 %v12880_v24, %s10855_s15 }
 0x3c6   :  { %9873 = vmatmul.mubr.msk.bf16.gmra.mrb[76].mxu0 %vm27_vm1, %v4003_v30 }
 0x3c7   :  { %9876 = vmatprep.mubr.msk.bf16.mxu0 %vm27_vm1, %v4004_v9 }
 0x3c9   :  { %4603 = vrot.lane.b32.xlu0 %v12897_v41, %s10855_s15  ;;  %4605 = vrot.lane.b32.xlu1 %v12909_v28, %s10855_s15 }
 0x3cd   :  { %4663 = vrot.lane.b32.xlu0 %v12878_v48, %s10854_s14  ;;  %4665 = vrot.lane.b32.xlu1 %v12880_v24, %s10854_s14  ;;  %v13369_v24 = vld [vmem:[%s14484_s3] sm:$0xff]  }
 0x3ce   :  { %9877 = vmatmul.mubr.msk.bf16.gmra.mrb[80].mxu0 %vm27_vm1, %v4005_v52  ;;  %10008 = vmatprep.subr.bf16.mxu1 %v13369_v24 }
 0x3cf   :  { %v4658_v42 = vpop.permute.xlu1 %4657  ;;  %v4594_v10 = vpop.permute.xlu0 %4593  ;;  %9896 = vmatprep.mubr.msk.bf16.mxu0 %vm10856_vm4, %v10853_v20 }
 0x3d0   :  { %4639 = vst.msk [vmem:[#allocation2 + $0x28] sm:$0xff] %vm445_vm2, %v4594_v10 }
 0x3d1   :  { %4667 = vrot.lane.b32.xlu0 %v12897_v41, %s10854_s14  ;;  %4669 = vrot.lane.b32.xlu1 %v12909_v28, %s10854_s14 }
 0x3d3   :  { %v4654_v0 = vpop.permute.xlu1 %4653  ;;  %v4590_v48 = vpop.permute.xlu0 %4589 }
 0x3d4   :  { %4637 = vst.msk [vmem:[#allocation2 + $0x18] sm:$0xff] %vm445_vm2, %v4590_v48 }
 0x3d5   :  { %4701 = vst.msk [vmem:[#allocation2 + $0x17] sm:$0xff] %vm510_vm3, %v4654_v0  ;;  %4607 = vrot.lane.b32.xlu0 %v12913_v2, %s10855_s15  ;;  %4609 = vrot.lane.b32.xlu1 %v12915_v34, %s10855_s15 }
 0x3d7   :  { %v4596_v41 = vpop.permute.xlu1 %4595  ;;  %v4660_v28 = vpop.permute.xlu0 %4659 }
 0x3d8   :  { %4640 = vst.msk [vmem:[#allocation2 + $0x30] sm:$0xff] %vm445_vm2, %v4596_v41 }
 0x3d9   :  { %4704 = vst.msk [vmem:[#allocation2 + $0x2f] sm:$0xff] %vm510_vm3, %v4660_v28  ;;  %4611 = vrot.lane.b32.xlu0 %v12929_v39, %s10855_s15  ;;  %4671 = vrot.lane.b32.xlu1 %v12913_v2, %s10854_s14  ;;  %v5910_v2 = vld [vmem:[%s14480_s5 + $0x188] sm:$0xff] }
 0x3db   :  { %v4592_v51 = vpop.permute.xlu1 %4591  ;;  %v4656_v12 = vpop.permute.xlu0 %4655 }
 0x3dc   :  { %4638 = vst.msk [vmem:[#allocation2 + $0x20] sm:$0xff] %vm445_vm2, %v4592_v51 }
 0x3dd   :  { %4703 = vst.msk [vmem:[#allocation2 + $0x27] sm:$0xff] %vm510_vm3, %v4658_v42  ;;  %4702 = vst.msk [vmem:[#allocation2 + $0x1f] sm:$0xff] %vm510_vm3, %v4656_v12  ;;  %4673 = vrot.lane.b32.xlu0 %v12915_v34, %s10854_s14  ;;  %4675 = vrot.lane.b32.xlu1 %v12929_v39, %s10854_s14 }
 0x3df   :  { %v4662_v1 = vpop.permute.xlu1 %4661  ;;  %v4598_v13 = vpop.permute.xlu0 %4597 }
 0x3e0   :  { %4641 = vst.msk [vmem:[#allocation2 + $0x38] sm:$0xff] %vm445_vm2, %v4598_v13 }
 0x3e1   :  { %4705 = vst.msk [vmem:[#allocation2 + $0x37] sm:$0xff] %vm510_vm3, %v4662_v1  ;;  %4677 = vrot.lane.b32.xlu0 %v12943_v43, %s10854_s14  ;;  %5633 = vrot.lane.b32.xlu1 %v13165_v55, %s10854_s14 }
 0x3e3   :  { %v4600_v34 = vpop.permute.xlu0 %4599 }
 0x3e4   :  { %4642 = vst.msk [vmem:[#allocation2 + $0x40] sm:$0xff] %vm445_vm2, %v4600_v34  ;;  %v13400_v39 = vld [vmem:[#allocation2 + $0x18] sm:$0xff]  ;;  %v13402_v54 = vld [vmem:[#allocation2 + $0x20] sm:$0xff]  ;;  %v13404_v45 = vld [vmem:[#allocation2 + $0x28] sm:$0xff] }
 0x3e5   :  { %5569 = vrot.lane.b32.xlu0 %v13165_v55, %s10855_s15  ;;  %5932 = vperm.xlu1 %10682, %v5910_v2   ;;  %v6220_v43 = vpack.c.bf16 %v13402_v54, %v13400_v39  ;;  %v6199_v14 = vpack.c.bf16 %v13404_v45, %v13402_v54 }
 0x3e7   :  { %v4684_v50 = vpop.permute.xlu1 %4683  ;;  %v4618_v18 = vpop.permute.xlu0 %4617  ;;  %9992 = vmatprep.mubr.msk.bf16.mxu1 %vm27_vm1, %v6220_v43 }
 0x3e8   :  { %4651 = vst.msk [vmem:[#allocation2 + $0x88] sm:$0xff] %vm445_vm2, %v4618_v18  ;;  %v13420_v55 = vld [vmem:[#allocation2 + $0x30] sm:$0xff] }
 0x3e9   :  { %5937 = vperm.xlu0 %10681, %v5911_v59   ;;  %5942 = vperm.xlu1 %10682, %v5912_v53   ;;  %v6221_v26 = vpack.c.bf16 %v13420_v55, %v13404_v45 }
 0x3eb   :  { %v4616_v60 = vpop.permute.xlu1 %4615  ;;  %v4682_v37 = vpop.permute.xlu0 %4681  ;;  %9993 = vmatmul.mubr.msk.bf16.vlgmr.msra.gmra.mrb[96].mxu1 %vm27_vm1, %v6221_v26 }
 0x3ec   :  { %4650 = vst.msk [vmem:[#allocation2 + $0x80] sm:$0xff] %vm445_vm2, %v4616_v60  ;;  %10009 = vmatpush3.bf16.msra.mxu1 %v13369_v24 }
 0x3ed   :  { %4715 = vst.msk [vmem:[#allocation2 + $0x87] sm:$0xff] %vm510_vm3, %v4682_v37  ;;  %5635 = vrot.lane.b32.xlu0 %v13176_v17, %s10854_s14  ;;  %5571 = vrot.lane.b32.xlu1 %v13176_v17, %s10855_s15  ;;  %v13454_v17 = vld [vmem:[%s14484_s3 + $0x18] sm:$0xff]  }
 0x3ee   :  { %10010 = vmatprep.subr.bf16.mxu1 %v13427_v16 }
 0x3ef   :  { %v4680_v6 = vpop.permute.xlu1 %4679  ;;  %v4614_v56 = vpop.permute.xlu0 %4613 }
 0x3f0   :  { %4649 = vst.msk [vmem:[#allocation2 + $0x78] sm:$0xff] %vm445_vm2, %v4614_v56  ;;  %10011 = vmatpush3.bf16.msra.mxu1 %v13427_v16 }
 0x3f1   :  { %5631 = vrot.lane.b32.xlu0 %v13181_v21, %s10854_s14  ;;  %4714 = vst.msk [vmem:[#allocation2 + $0x7f] sm:$0xff] %vm510_vm3, %v4680_v6  ;;  %5567 = vrot.lane.b32.xlu1 %v13181_v21, %s10855_s15  ;;  %v13468_v21 = vld [vmem:[%s14484_s3 + $0x20] sm:$0xff]  }
 0x3f2   :  { %10012 = vmatprep.subr.bf16.mxu1 %v13441_v35 }
 0x3f3   :  { %v5082_v44 = vpop.permute.xlu1 %5081  ;;  %v4620_v19 = vpop.permute.xlu0 %4619 }
 0x3f4   :  { %5127 = vst.msk [vmem:[#allocation2 + $0xa8] sm:$0xff] %vm445_vm2, %v5082_v44  ;;  %4652 = vst.msk [vmem:[#allocation2 + $0x90] sm:$0xff] %vm445_vm2, %v4620_v19  ;;  %10013 = vmatpush3.bf16.msra.mxu1 %v13441_v35 }
 0x3f5   :  { %5577 = vrot.lane.b32.xlu0 %v13213_v8, %s10855_s15  ;;  %4716 = vst.msk [vmem:[#allocation2 + $0x8f] sm:$0xff] %vm510_vm3, %v4684_v50  ;;  %5573 = vrot.lane.b32.xlu1 %v13220_v36, %s10855_s15 }
 0x3f6   :  { %10014 = vmatprep.subr.bf16.mxu1 %v13454_v17 }
 0x3f7   :  { %v5078_v15 = vpop.permute.xlu1 %5077  ;;  %v5146_v29 = vpop.permute.xlu0 %5145 }
 0x3f8   :  { %5125 = vst.msk [vmem:[#allocation2 + $0x98] sm:$0xff] %vm445_vm2, %v5078_v15  ;;  %10015 = vmatpush3.bf16.msra.mxu1 %v13454_v17 }
 0x3f9   :  { %5641 = vrot.lane.b32.xlu0 %v13213_v8, %s10854_s14  ;;  %5579 = vrot.lane.b32.xlu1 %v13224_v38, %s10855_s15  ;;  %v13492_v8 = vld [vmem:[%s14484_s3 + $0x60] sm:$0xff]  }
 0x3fa   :  { %10016 = vmatprep.subr.bf16.mxu1 %v13468_v21 }
 0x3fb   :  { %v5148_v7 = vpop.permute.xlu1 %5147  ;;  %v5142_v22 = vpop.permute.xlu0 %5141 }
 0x3fc   :  { %5189 = vst.msk [vmem:[#allocation2 + $0x97] sm:$0xff] %vm510_vm3, %v5142_v22  ;;  %10017 = vmatpush3.bf16.msra.mxu1 %v13468_v21 }
 0x3fd   :  { %5637 = vrot.lane.b32.xlu0 %v13220_v36, %s10854_s14  ;;  %5643 = vrot.lane.b32.xlu1 %v13224_v38, %s10854_s14 }
 0x3fe   :  { %10018 = vmatprep.subr.bf16.mxu1 %v13480_v46 }
 0x3ff   :  { %v5144_v49 = vpop.permute.xlu1 %5143  ;;  %v5084_v63 = vpop.permute.xlu0 %5083 }
 0x400   :  { %5128 = vst.msk [vmem:[#allocation2 + $0xb0] sm:$0xff] %vm445_vm2, %v5084_v63  ;;  %10019 = vmatpush3.bf16.msra.mxu1 %v13480_v46 }
 0x401   :  { %5585 = vrot.lane.b32.xlu0 %v13261_v47, %s10855_s15  ;;  %5192 = vst.msk [vmem:[#allocation2 + $0xaf] sm:$0xff] %vm510_vm3, %v5148_v7  ;;  %5575 = vrot.lane.b32.xlu1 %v13229_v27, %s10855_s15 }
 0x402   :  { %10036 = vmatprep.subr.bf16.mxu1 %v13492_v8 }
 0x403   :  { %v5086_v36 = vpop.permute.xlu1 %5085  ;;  %v5080_v38 = vpop.permute.xlu0 %5079 }
 0x404   :  { %5129 = vst.msk [vmem:[#allocation2 + $0xb8] sm:$0xff] %vm445_vm2, %v5086_v36  ;;  %5126 = vst.msk [vmem:[#allocation2 + $0xa0] sm:$0xff] %vm445_vm2, %v5080_v38  ;;  %v13596_v38 = vld [vmem:[#allocation2 + $0x80] sm:$0xff] }
 0x405   :  { %5190 = vst.msk [vmem:[#allocation2 + $0x9f] sm:$0xff] %vm510_vm3, %v5144_v49  ;;  %5191 = vst.msk [vmem:[#allocation2 + $0xa7] sm:$0xff] %vm510_vm3, %v5146_v29  ;;  %5649 = vrot.lane.b32.xlu0 %v13261_v47, %s10854_s14  ;;  %5639 = vrot.lane.b32.xlu1 %v13229_v27, %s10854_s14 }
 0x407   :  { %v5092_v31 = vpop.permute.xlu1 %5091  ;;  %v5090_v3 = vpop.permute.xlu0 %5089 }
 0x408   :  { %5132 = vst.msk [vmem:[#allocation2 + $0xd0] sm:$0xff] %vm445_vm2, %v5092_v31  ;;  %5131 = vst.msk [vmem:[#allocation2 + $0xc8] sm:$0xff] %vm445_vm2, %v5090_v3 }
 0x409   :  { %5581 = vrot.lane.b32.xlu0 %v13267_v5, %s10855_s15  ;;  %5587 = vrot.lane.b32.xlu1 %v13271_v40, %s10855_s15 }
 0x40b   :  { %v5156_v33 = vpop.permute.xlu1 %5155  ;;  %v5154_v30 = vpop.permute.xlu0 %5153 }
 0x40c   :  { %5196 = vst.msk [vmem:[#allocation2 + $0xcf] sm:$0xff] %vm510_vm3, %v5156_v33 }
 0x40d   :  { %5645 = vrot.lane.b32.xlu0 %v13267_v5, %s10854_s14  ;;  %5651 = vrot.lane.b32.xlu1 %v13271_v40, %s10854_s14 }
 0x40f   :  { %v5088_v27 = vpop.permute.xlu1 %5087  ;;  %v5150_v47 = vpop.permute.xlu0 %5149 }
 0x410   :  { %5130 = vst.msk [vmem:[#allocation2 + $0xc0] sm:$0xff] %vm445_vm2, %v5088_v27 }
 0x411   :  { %5193 = vst.msk [vmem:[#allocation2 + $0xb7] sm:$0xff] %vm510_vm3, %v5150_v47  ;;  %5195 = vst.msk [vmem:[#allocation2 + $0xc7] sm:$0xff] %vm510_vm3, %v5154_v30  ;;  %5657 = vrot.lane.b32.xlu0 %v13295_v62, %s10854_s14  ;;  %5583 = vrot.lane.b32.xlu1 %v13275_v32, %s10855_s15 }
 0x413   :  { %v5152_v61 = vpop.permute.xlu1 %5151  ;;  %v5094_v9 = vpop.permute.xlu0 %5093 }
 0x414   :  { %5194 = vst.msk [vmem:[#allocation2 + $0xbf] sm:$0xff] %vm510_vm3, %v5152_v61  ;;  %v6181_v61 = vld [vmem:[#allocation2] sm:$0xff] }
 0x415   :  { %5133 = vst.msk [vmem:[#allocation2 + $0xd8] sm:$0xff] %vm445_vm2, %v5094_v9  ;;  %5647 = vrot.lane.b32.xlu1 %v13275_v32, %s10854_s14  ;;  %5589 = vrot.lane.b32.xlu0 %v13301_v57, %s10855_s15  ;;  %v6182_v9 = vld [vmem:[#allocation2 + $0x8] sm:$0xff] }
 0x417   :  { %v5098_v5 = vpop.permute.xlu1 %5097  ;;  %v5158_v40 = vpop.permute.xlu0 %5157 }
 0x418   :  { %5135 = vst.msk [vmem:[#allocation2 + $0xe8] sm:$0xff] %vm445_vm2, %v5098_v5  ;;  %v13607_v5 = vld [vmem:[#allocation2 + $0x90] sm:$0xff] }
 0x419   :  { %5197 = vst.msk [vmem:[#allocation2 + $0xd7] sm:$0xff] %vm510_vm3, %v5158_v40  ;;  %5593 = vrot.lane.b32.xlu1 %v13295_v62, %s10855_s15  ;;  %5653 = vrot.lane.b32.xlu0 %v13301_v57, %s10854_s14  ;;  %v13609_v40 = vld [vmem:[#allocation2 + $0x88] sm:$0xff] }
 0x41b   :  { %v5162_v58 = vpop.permute.xlu1 %5161  ;;  %v5100_v4 = vpop.permute.xlu0 %5099 }
 0x41c   :  { %5136 = vst.msk [vmem:[#allocation2 + $0xf0] sm:$0xff] %vm445_vm2, %v5100_v4 }
 0x41d   :  { %5655 = vrot.lane.b32.xlu1 %v13309_v25, %s10854_s14  ;;  %5595 = vrot.lane.b32.xlu0 %v13305_v23, %s10855_s15 }
 0x41f   :  { %v5170_v32 = vpop.permute.xlu1 %5169  ;;  %v5164_v52 = vpop.permute.xlu0 %5163 }
 0x420   :  { %5200 = vst.msk [vmem:[#allocation2 + $0xef] sm:$0xff] %vm510_vm3, %v5164_v52 }
 0x421   :  { %5591 = vrot.lane.b32.xlu0 %v13309_v25, %s10855_s15 }
 0x423   :  { %v5102_v62 = vpop.permute.xlu1 %5101  ;;  %v5096_v42 = vpop.permute.xlu0 %5095 }
 0x424   :  { %5137 = vst.msk [vmem:[#allocation2 + $0xf8] sm:$0xff] %vm445_vm2, %v5102_v62  ;;  %5134 = vst.msk [vmem:[#allocation2 + $0xe0] sm:$0xff] %vm445_vm2, %v5096_v42  ;;  %v6183_v42 = vld [vmem:[#allocation2 + $0x10] sm:$0xff] }
 0x425   :  { %5659 = vrot.lane.b32.xlu0 %v13305_v23, %s10854_s14  ;;  %5199 = vst.msk [vmem:[#allocation2 + $0xe7] sm:$0xff] %vm510_vm3, %v5162_v58  ;;  %v6197_v58 = vpack.c.bf16 %v6182_v9, %v6181_v61 }
 0x427   :  { %v5166_v57 = vpop.permute.xlu1 %5165  ;;  %v5160_v10 = vpop.permute.xlu0 %5159 }
 0x428   :  { %5201 = vst.msk [vmem:[#allocation2 + $0xf7] sm:$0xff] %vm510_vm3, %v5166_v57  ;;  %5198 = vst.msk [vmem:[#allocation2 + $0xdf] sm:$0xff] %vm510_vm3, %v5160_v10  ;;  %v6198_v57 = vpack.c.bf16 %v13400_v39, %v6183_v42 }
 0x42b   :  { %v5108_v0 = vpop.permute.xlu1 %5107  ;;  %v5106_v48 = vpop.permute.xlu0 %5105 }
 0x42c   :  { %5140 = vst.msk [vmem:[#allocation2 + $0x110] sm:$0xff] %vm445_vm2, %v5108_v0  ;;  %5139 = vst.msk [vmem:[#allocation2 + $0x108] sm:$0xff] %vm445_vm2, %v5106_v48  ;;  %v13625_v48 = vld [vmem:[%s14484_s3 + $0x68] sm:$0xff]  }
 0x42f   :  { %v5172_v25 = vpop.permute.xlu1 %5171  ;;  %v5168_v41 = vpop.permute.xlu0 %5167 }
 0x430   :  { %5204 = vst.msk [vmem:[#allocation2 + $0x10f] sm:$0xff] %vm510_vm3, %v5172_v25 }
 0x433   :  { %v5104_v28 = vpop.permute.xlu1 %5103  ;;  %v5566_v23 = vpop.permute.xlu0 %5565 }
 0x434   :  { %5138 = vst.msk [vmem:[#allocation2 + $0x100] sm:$0xff] %vm445_vm2, %v5104_v28  ;;  %5613 = vst.msk [vmem:[#allocation2 + $0x118] sm:$0xff] %vm445_vm2, %v5566_v23  ;;  %v13651_v28 = vld [vmem:[%s14484_s3 + $0x78] sm:$0xff]  }
 0x435   :  { %5202 = vst.msk [vmem:[#allocation2 + $0xff] sm:$0xff] %vm510_vm3, %v5168_v41  ;;  %5203 = vst.msk [vmem:[#allocation2 + $0x107] sm:$0xff] %vm510_vm3, %v5170_v32  ;;  %v6227_v32 = vpack.c.bf16 %v13607_v5, %v13609_v40  ;;  %v13639_v41 = vld [vmem:[%s14484_s3 + $0x70] sm:$0xff]  }
 0x437   :  { %v4602_v51 = vpop.permute.xlu1 %4601  ;;  %v5630_v12 = vpop.permute.xlu0 %5629 }
 0x438   :  { %4643 = vst.msk [vmem:[#allocation2 + $0x48] sm:$0xff] %vm445_vm2, %v4602_v51 }
 0x439   :  { %5677 = vst.msk [vmem:[#allocation2 + $0x117] sm:$0xff] %vm510_vm3, %v5630_v12  ;;  %v13664_v12 = vld [vmem:[%s14484_s3 + $0x80] sm:$0xff]  }
 0x43b   :  { %v4606_v1 = vpop.permute.xlu1 %4605  ;;  %v4604_v13 = vpop.permute.xlu0 %4603 }
 0x43c   :  { %4645 = vst.msk [vmem:[#allocation2 + $0x58] sm:$0xff] %vm445_vm2, %v4606_v1  ;;  %4644 = vst.msk [vmem:[#allocation2 + $0x50] sm:$0xff] %vm445_vm2, %v4604_v13 }
 0x43f   :  { %v4666_v2 = vpop.permute.xlu1 %4665  ;;  %v4664_v34 = vpop.permute.xlu0 %4663 }
 0x440   :  { %4707 = vst.msk [vmem:[#allocation2 + $0x47] sm:$0xff] %vm510_vm3, %v4666_v2  ;;  %4706 = vst.msk [vmem:[#allocation2 + $0x3f] sm:$0xff] %vm510_vm3, %v4664_v34  ;;  %v13673_v34 = vld [vmem:[%s14484_s3 + $0x88] sm:$0xff]  }
 0x443   :  { %v4670_v43 = vpop.permute.xlu1 %4669  ;;  %v4668_v59 = vpop.permute.xlu0 %4667 }
 0x444   :  { %4709 = vst.msk [vmem:[#allocation2 + $0x57] sm:$0xff] %vm510_vm3, %v4670_v43  ;;  %4708 = vst.msk [vmem:[#allocation2 + $0x4f] sm:$0xff] %vm510_vm3, %v4668_v59 }
 0x447   :  { %v4610_v53 = vpop.permute.xlu1 %4609  ;;  %v4608_v50 = vpop.permute.xlu0 %4607  ;;  %v13570_v18 = vld [vmem:[#allocation2 + $0x38] sm:$0xff]  ;;  %v13572_v26 = vld [vmem:[#allocation2 + $0x40] sm:$0xff] }
 0x448   :  { %4647 = vst.msk [vmem:[#allocation2 + $0x68] sm:$0xff] %vm445_vm2, %v4610_v53  ;;  %4646 = vst.msk [vmem:[#allocation2 + $0x60] sm:$0xff] %vm445_vm2, %v4608_v50  ;;  %v6222_v60 = vpack.c.bf16 %v13572_v26, %v13570_v18 }
 0x44a   :  { %9996 = vmatprep.mubr.msk.bf16.mxu1 %vm27_vm1, %v6222_v60 }
 0x44b   :  { %v4672_v37 = vpop.permute.xlu1 %4671  ;;  %v4612_v6 = vpop.permute.xlu0 %4611  ;;  %v13579_v56 = vld [vmem:[#allocation2 + $0x48] sm:$0xff]  ;;  %v13581_v44 = vld [vmem:[#allocation2 + $0x50] sm:$0xff] }
 0x44c   :  { %4710 = vst.msk [vmem:[#allocation2 + $0x5f] sm:$0xff] %vm510_vm3, %v4672_v37  ;;  %v6223_v19 = vpack.c.bf16 %v13581_v44, %v13579_v56  ;;  %v6201_v23 = vpack.c.bf16 %v13579_v56, %v13572_v26  ;;  %v13700_v56 = vld [vmem:[%s14485_s4] ss:$0 sm:$0xff] }
 0x44d   :  { %4648 = vst.msk [vmem:[#allocation2 + $0x70] sm:$0xff] %vm445_vm2, %v4612_v6 }
 0x44e   :  { %9997 = vmatmul.mubr.msk.bf16.gmra.mrb[100].mxu1 %vm27_vm1, %v6223_v19 }
 0x44f   :  { %v4676_v15 = vpop.permute.xlu1 %4675  ;;  %v4674_v29 = vpop.permute.xlu0 %4673 }
 0x450   :  { %4712 = vst.msk [vmem:[#allocation2 + $0x6f] sm:$0xff] %vm510_vm3, %v4676_v15  ;;  %4711 = vst.msk [vmem:[#allocation2 + $0x67] sm:$0xff] %vm510_vm3, %v4674_v29 }
 0x453   :  { %v4678_v7 = vpop.permute.xlu0 %4677  ;;  %v6192_v49 = vld [vmem:[#allocation2 + $0x58] sm:$0xff]  ;;  %v5634_v47 = vpop.permute.xlu1 %5633 }
 0x454   :  { %4713 = vst.msk [vmem:[#allocation2 + $0x77] sm:$0xff] %vm510_vm3, %v4678_v7  ;;  %v6202_v2 = vpack.c.bf16 %v6192_v49, %v13581_v44 }
 0x457   :  { %v5570_v22 = vpop.permute.xlu0 %5569  ;;  %v13591_v63 = vld [vmem:[#allocation2 + $0x60] sm:$0xff]  ;;  %v6194_v31 = vld [vmem:[#allocation2 + $0x68] sm:$0xff] }
 0x458   :  { %5615 = vst.msk [vmem:[#allocation2 + $0x128] sm:$0xff] %vm445_vm2, %v5570_v22  ;;  %v6224_v36 = vpack.c.bf16 %v13591_v63, %v6192_v49  ;;  %v13678_v43 = vpack.c.bf16 %v6194_v31, %v13591_v63 }
 0x45a   :  { %10000 = vmatprep.mubr.msk.bf16.mxu1 %vm27_vm1, %v6224_v36 }
 0x45b   :  { %v13598_v3 = vld [vmem:[#allocation2 + $0x70] sm:$0xff]  ;;  %v13600_v33 = vld [vmem:[#allocation2 + $0x78] sm:$0xff] }
 0x45c   :  { %v6225_v30 = vpack.c.bf16 %v13598_v3, %v6194_v31  ;;  %v6226_v27 = vpack.c.bf16 %v13596_v38, %v13600_v33  ;;  %v6204_v26 = vpack.c.bf16 %v13600_v33, %v13598_v3 }
 0x45e   :  { %10001 = vmatmul.mubr.msk.bf16.gmra.mrb[104].mxu1 %vm27_vm1, %v6225_v30 }
 0x45f   :  { %10004 = vmatprep.mubr.msk.bf16.mxu1 %vm27_vm1, %v6226_v27 }
 0x464   :  { %v13611_v4 = vpop.permute.xlu1 %5932 }
 0x466   :  { %10005 = vmatmul.mubr.msk.bf16.gmra.mrb[108].mxu1 %vm27_vm1, %v6227_v32 }
 0x467   :  { %10020 = vmatprep.mubr.msk.bf16.mxu1 %vm27_vm1, %v6197_v58 }
 0x468   :  { %v13617_v52 = vpop.permute.xlu1 %5942  ;;  %v13619_v62 = vpop.permute.xlu0 %5937 }
 0x46c   :  { %v5572_v10 = vpop.permute.xlu1 %5571  ;;  %v5636_v0 = vpop.permute.xlu0 %5635 }
 0x46d   :  { %5616 = vst.msk [vmem:[#allocation2 + $0x130] sm:$0xff] %vm445_vm2, %v5572_v10 }
 0x46e   :  { %5680 = vst.msk [vmem:[#allocation2 + $0x12f] sm:$0xff] %vm510_vm3, %v5636_v0  ;;  %10021 = vmatmul.mubr.msk.bf16.vlgmr.msra.gmra.mrb[96].mxu1 %vm27_vm1, %v6198_v57 }
 0x46f   :  { %10024 = vmatprep.mubr.msk.bf16.mxu1 %vm27_vm1, %v6199_v14  ;;  %10037 = vmatpush3.bf16.msra.mxu1 %v13492_v8  ;;  %v6200_v14 = vpack.c.bf16 %v13570_v18, %v13420_v55 }
 0x470   :  { %v5568_v39 = vpop.permute.xlu1 %5567  ;;  %v5632_v25 = vpop.permute.xlu0 %5631  ;;  %10038 = vmatprep.subr.bf16.mxu1 %v13625_v48 }
 0x471   :  { %5614 = vst.msk [vmem:[#allocation2 + $0x120] sm:$0xff] %vm445_vm2, %v5568_v39 }
 0x472   :  { %5679 = vst.msk [vmem:[#allocation2 + $0x127] sm:$0xff] %vm510_vm3, %v5634_v47  ;;  %5678 = vst.msk [vmem:[#allocation2 + $0x11f] sm:$0xff] %vm510_vm3, %v5632_v25 }
 0x473   :  { %10039 = vmatpush3.bf16.msra.mxu1 %v13625_v48 }
 0x474   :  { %v5574_v54 = vpop.permute.xlu1 %5573  ;;  %v5578_v45 = vpop.permute.xlu0 %5577  ;;  %10040 = vmatprep.subr.bf16.mxu1 %v13639_v41 }
 0x475   :  { %5617 = vst.msk [vmem:[#allocation2 + $0x138] sm:$0xff] %vm445_vm2, %v5574_v54  ;;  %5619 = vst.msk [vmem:[#allocation2 + $0x148] sm:$0xff] %vm445_vm2, %v5578_v45 }
 0x476   :  { %10025 = vmatmul.mubr.msk.bf16.gmra.mrb[100].mxu1 %vm27_vm1, %v6200_v14 }
 0x477   :  { %10028 = vmatprep.mubr.msk.bf16.mxu1 %vm27_vm1, %v6201_v23  ;;  %10041 = vmatpush3.bf16.msra.mxu1 %v13639_v41 }
 0x478   :  { %v5580_v55 = vpop.permute.xlu1 %5579  ;;  %v5642_v51 = vpop.permute.xlu0 %5641  ;;  %10042 = vmatprep.subr.bf16.mxu1 %v13651_v28 }
 0x479   :  { %5620 = vst.msk [vmem:[#allocation2 + $0x150] sm:$0xff] %vm445_vm2, %v5580_v55 }
 0x47b   :  { %10043 = vmatpush3.bf16.msra.mxu1 %v13651_v28 }
 0x47c   :  { %v5644_v1 = vpop.permute.xlu1 %5643  ;;  %v5638_v13 = vpop.permute.xlu0 %5637  ;;  %10044 = vmatprep.subr.bf16.mxu1 %v13664_v12 }
 0x47d   :  { %5684 = vst.msk [vmem:[#allocation2 + $0x14f] sm:$0xff] %vm510_vm3, %v5644_v1  ;;  %5681 = vst.msk [vmem:[#allocation2 + $0x137] sm:$0xff] %vm510_vm3, %v5638_v13 }
 0x47e   :  { %10029 = vmatmul.mubr.msk.bf16.gmra.mrb[104].mxu1 %vm27_vm1, %v6202_v2 }
 0x47f   :  { %10032 = vmatprep.mubr.msk.bf16.mxu1 %vm27_vm1, %v13678_v43  ;;  %10045 = vmatpush3.bf16.msra.mxu1 %v13664_v12 }
 0x480   :  { %v5576_v59 = vpop.permute.xlu1 %5575  ;;  %v5586_v53 = vpop.permute.xlu0 %5585  ;;  %10046 = vmatprep.subr.bf16.mxu1 %v13673_v34 }
 0x481   :  { %5618 = vst.msk [vmem:[#allocation2 + $0x140] sm:$0xff] %vm445_vm2, %v5576_v59  ;;  %5623 = vst.msk [vmem:[#allocation2 + $0x168] sm:$0xff] %vm445_vm2, %v5586_v53 }
 0x482   :  { %5683 = vst.msk [vmem:[#allocation2 + $0x147] sm:$0xff] %vm510_vm3, %v5642_v51 }
 0x483   :  { %10047 = vmatpush3.bf16.msra.mxu1 %v13673_v34 }
 0x484   :  { %v5640_v50 = vpop.permute.xlu1 %5639  ;;  %v5650_v18 = vpop.permute.xlu0 %5649  ;;  %10148 = vmatprep.subr.bf16.mxu1 %v10853_v20  ;;  %v13705_v63 = vld [vmem:[#allocation2 + $0x130] sm:$0xff] }
 0x485   :  { %5682 = vst.msk [vmem:[#allocation2 + $0x13f] sm:$0xff] %vm510_vm3, %v5640_v50 }
 0x486   :  { %10033 = vmatmul.mubr.msk.bf16.gmra.mrb[108].mxu1 %vm27_vm1, %v6204_v26 }
 0x487   :  { %10048 = vmatprep.mubr.msk.bf16.mxu1 %vm27_vm1, %v6200_v14 }
 0x488   :  { %v5588_v60 = vpop.permute.xlu1 %5587  ;;  %v5582_v37 = vpop.permute.xlu0 %5581 }
 0x489   :  { %5624 = vst.msk [vmem:[#allocation2 + $0x170] sm:$0xff] %vm445_vm2, %v5588_v60  ;;  %5621 = vst.msk [vmem:[#allocation2 + $0x158] sm:$0xff] %vm445_vm2, %v5582_v37  ;;  %v9866_v6 = vpop.f32.mrb[68].mxu0  ;;  %v13713_v30 = vld [vmem:[#allocation2 + $0x148] sm:$0xff] }
 0x48a   :  { %v4145_v44 = vadd.f32 %v13700_v56, %v9866_v6  ;;  %v4064_v19 = vpop.f32.mrb[69].mxu0 }
 0x48b   :  { %v4143_v15 = vadd.f32 %v13700_v56, %v4064_v19  ;;  %v9867_v29 = vpop.f32.mrb[70].mxu0 }
 0x48c   :  { %v4146_v7 = vadd.f32 %v13700_v56, %v9867_v29  ;;  %v4067_v22 = vpop.f32.mrb[71].mxu0  ;;  %v5652_v49 = vpop.permute.xlu1 %5651  ;;  %v13707_v36 = vld [vmem:[#allocation2 + $0x138] sm:$0xff]  ;;  %v13709_v31 = vld [vmem:[#allocation2 + $0x140] sm:$0xff]  ;;  %v4161_v47 = vmax.f32 %v4145_v44, 0.0 }
 0x48d   :  { %v4144_v3 = vadd.f32 %v13700_v56, %v4067_v22  ;;  %5688 = vst.msk [vmem:[#allocation2 + $0x16f] sm:$0xff] %vm510_vm3, %v5652_v49  ;;  %v5646_v33 = vpop.permute.xlu0 %5645  ;;  %v13717_v27 = vpack.c.bf16 %v13707_v36, %v13705_v63  ;;  %v13723_v9 = vpack.c.bf16 %v13713_v30, %v13709_v31  ;;  %v4159_v58 = vmax.f32 %v4143_v15, 0.0 }
 0x48e   :  { %v4162_v61 = vmax.f32 %v4146_v7, 0.0  ;;  %5685 = vst.msk [vmem:[#allocation2 + $0x157] sm:$0xff] %vm510_vm3, %v5646_v33  ;;  %10049 = vmatmul.mubr.msk.bf16.vlgmr.msra.gmra.mrb[96].mxu1 %vm27_vm1, %v6201_v23  ;;  %v13751_v49 = vpack.c.bf16 %v13609_v40, %v13596_v38 }
 0x48f   :  { %v4160_v32 = vmax.f32 %v4144_v3, 0.0  ;;  %10052 = vmatprep.mubr.msk.bf16.mxu1 %vm27_vm1, %v6202_v2 }
 0x490   :  { %v4178_v42 = vpack.c.bf16 %v4162_v61, %v4161_v47  ;;  %v5584_v57 = vpop.permute.xlu1 %5583 }
 0x491   :  { %v4177_v10 = vpack.c.bf16 %v4160_v32, %v4159_v58  ;;  %5622 = vst.msk [vmem:[#allocation2 + $0x160] sm:$0xff] %vm445_vm2, %v5584_v57  ;;  %v13727_v0 = vpop.permute.xlu0 %5657  ;;  %v9870_v39 = vpop.f32.mrb[72].mxu0 }
 0x492   :  { %5687 = vst.msk [vmem:[#allocation2 + $0x167] sm:$0xff] %vm510_vm3, %v5650_v18  ;;  %v4149_v25 = vadd.f32 %v13700_v56, %v9870_v39  ;;  %v4080_v54 = vpop.f32.mrb[73].mxu0 }
 0x493   :  { %v4147_v45 = vadd.f32 %v13700_v56, %v4080_v54  ;;  %v9871_v14 = vpop.f32.mrb[74].mxu0  ;;  %9881 = vmatpush3.bf16.msra.mxu0 %v4177_v10 }
 0x494   :  { %v4150_v23 = vadd.f32 %v13700_v56, %v9871_v14  ;;  %v4083_v55 = vpop.f32.mrb[75].mxu0  ;;  %v5648_v51 = vpop.permute.xlu1 %5647  ;;  %9882 = vmatprep.subr.bf16.mxu0 %v10853_v20  ;;  %v4165_v2 = vmax.f32 %v4149_v25, 0.0 }
 0x495   :  { %v4148_v1 = vadd.f32 %v13700_v56, %v4083_v55  ;;  %5686 = vst.msk [vmem:[#allocation2 + $0x15f] sm:$0xff] %vm510_vm3, %v5648_v51  ;;  %v5590_v13 = vpop.permute.xlu0 %5589  ;;  %v4163_v53 = vmax.f32 %v4147_v45, 0.0  ;;  %v13753_v3 = vld [vmem:[#allocation2 + $0x150] sm:$0xff]  ;;  %v13782_v55 = vld [vmem:[#allocation2 + $0xa8] sm:$0xff] }
 0x496   :  { %v4166_v59 = vmax.f32 %v4150_v23, 0.0  ;;  %5625 = vst.msk [vmem:[#allocation2 + $0x178] sm:$0xff] %vm445_vm2, %v5590_v13  ;;  %10053 = vmatmul.mubr.msk.bf16.gmra.mrb[100].mxu1 %vm27_vm1, %v13678_v43  ;;  %v13744_v43 = vld [vmem:[#allocation2 + $0x98] sm:$0xff]  ;;  %v13780_v23 = vld [vmem:[#allocation2 + $0xa0] sm:$0xff] }
 0x497   :  { %v4164_v50 = vmax.f32 %v4148_v1, 0.0  ;;  %9883 = vmatpush3.bf16.msra.mxu0 %v4178_v42  ;;  %10056 = vmatprep.mubr.msk.bf16.mxu1 %vm27_vm1, %v6204_v26  ;;  %v13762_v32 = vpack.c.bf16 %v13744_v43, %v13607_v5 }
 0x498   :  { %v4180_v18 = vpack.c.bf16 %v4166_v59, %v4165_v2  ;;  %v5594_v60 = vpop.permute.xlu1 %5593  ;;  %9884 = vmatprep.subr.bf16.mxu0 %v10853_v20 }
 0x499   :  { %v4179_v37 = vpack.c.bf16 %v4164_v50, %v4163_v53  ;;  %5627 = vst.msk [vmem:[#allocation2 + $0x188] sm:$0xff] %vm445_vm2, %v5594_v60  ;;  %v5654_v6 = vpop.permute.xlu0 %5653  ;;  %v9874_v44 = vpop.f32.mrb[76].mxu0  ;;  %v13764_v42 = vld [vmem:[#allocation2 + $0x168] sm:$0xff] }
 0x49a   :  { %5689 = vst.msk [vmem:[#allocation2 + $0x177] sm:$0xff] %vm510_vm3, %v5654_v6  ;;  %v4153_v19 = vadd.f32 %v13700_v56, %v9874_v44  ;;  %v4096_v15 = vpop.f32.mrb[77].mxu0 }
 0x49b   :  { %v4151_v29 = vadd.f32 %v13700_v56, %v4096_v15  ;;  %v9875_v7 = vpop.f32.mrb[78].mxu0  ;;  %9885 = vmatpush3.bf16.msra.mxu0 %v4179_v37 }
 0x49c   :  { %v4154_v26 = vadd.f32 %v13700_v56, %v9875_v7  ;;  %v4099_v22 = vpop.f32.mrb[79].mxu0  ;;  %9886 = vmatprep.subr.bf16.mxu0 %v10853_v20  ;;  %v13755_v33 = vld [vmem:[#allocation2 + $0x158] sm:$0xff]  ;;  %v13757_v47 = vld [vmem:[#allocation2 + $0x160] sm:$0xff]  ;;  %v4169_v38 = vmax.f32 %v4153_v19, 0.0  ;;  %v5656_v51 = vpop.permute.xlu1 %5655 }
 0x49d   :  { %v4152_v61 = vadd.f32 %v13700_v56, %v4099_v22  ;;  %v5596_v58 = vpop.permute.xlu0 %5595  ;;  %v13768_v57 = vpack.c.bf16 %v13755_v33, %v13753_v3  ;;  %v13775_v10 = vpack.c.bf16 %v13764_v42, %v13757_v47  ;;  %v4167_v39 = vmax.f32 %v4151_v29, 0.0 }
 0x49e   :  { %v4170_v40 = vmax.f32 %v4154_v26, 0.0  ;;  %5628 = vst.msk [vmem:[#allocation2 + $0x190] sm:$0xff] %vm445_vm2, %v5596_v58  ;;  %10057 = vmatmul.mubr.msk.bf16.gmra.mrb[104].mxu1 %vm27_vm1, %v13751_v49  ;;  %v4175_v26 = vld [vmem:[%s14486_s6 + $0x3] sm:$0x1] }
 0x49f   :  { %v4168_v5 = vmax.f32 %v4152_v61, 0.0  ;;  %9887 = vmatpush3.bf16.msra.mxu0 %v4180_v18  ;;  %10060 = vmatprep.mubr.msk.bf16.mxu1 %vm27_vm1, %v13762_v32  ;;  %v13794_v18 = vpack.c.bf16 %v13782_v55, %v13780_v23  ;;  %v10789_v61 = vld [vmem:[%s14481_s1] sm:$0xff]   ;;  %v4176_v58 = vpack.c.bf16 %v4175_v26, %v4175_v26 }
 0x4a0   :  { %v4182_v25 = vpack.c.bf16 %v4170_v40, %v4169_v38  ;;  %9888 = vmatprep.subr.bf16.mxu0 %v10853_v20  ;;  %v10791_v38 = vld [vmem:[%s14482_s0 + $0x1c0] sm:$0xff]   ;;  %v10790_v40 = vld [vmem:[%s14481_s1 + $0x8] sm:$0xff]  }
 0x4a1   :  { %v4181_v54 = vpack.c.bf16 %v4168_v5, %v4167_v39  ;;  %v5592_v45 = vpop.permute.xlu0 %5591  ;;  %v9878_v14 = vpop.f32.mrb[80].mxu0  ;;  %v13803_v7 = vld [vmem:[#allocation2 + $0x170] sm:$0xff]  ;;  %v10792_v39 = vld [vmem:[%s14482_s0 + $0x1c8] sm:$0xff]  }
 0x4a2   :  { %5626 = vst.msk [vmem:[#allocation2 + $0x180] sm:$0xff] %vm445_vm2, %v5592_v45  ;;  %v4157_v1 = vadd.f32 %v13700_v56, %v9878_v14  ;;  %v4112_v13 = vpop.f32.mrb[81].mxu0  ;;  %v10793_v5 = vld [vmem:[%s14482_s0 + $0x1d0] sm:$0xff]   ;;  %v10794_v45 = vld [vmem:[%s14482_s0 + $0x1d8] sm:$0xff]   ;;  %v10795_v14 = vld [vmem:[%s14482_s0 + $0x1e0] sm:$0xff]  }
 0x4a3   :  { %5690 = vst.msk [vmem:[#allocation2 + $0x17f] sm:$0xff] %vm510_vm3, %v5656_v51  ;;  %5691 = vst.msk [vmem:[#allocation2 + $0x187] sm:$0xff] %vm510_vm3, %v13727_v0  ;;  %v4155_v2 = vadd.f32 %v13700_v56, %v4112_v13  ;;  %v9879_v59 = vpop.f32.mrb[82].mxu0  ;;  %9889 = vmatpush3.bf16.msra.mxu0 %v4181_v54  ;;  %v13843_v54 = vld [vmem:[%s14484_s3 + $0x38] sm:$0xff]   ;;  %v13856_v51 = vld [vmem:[%s14484_s3 + $0x40] sm:$0xff]  }
 0x4a4   :  { %v4158_v53 = vadd.f32 %v13700_v56, %v9879_v59  ;;  %v4115_v50 = vpop.f32.mrb[83].mxu0  ;;  %9890 = vmatprep.subr.bf16.mxu0 %v10853_v20  ;;  %v4173_v6 = vmax.f32 %v4157_v1, 0.0  ;;  %v13865_v1 = vld [vmem:[%s14484_s3 + $0x48] sm:$0xff]   ;;  %v13878_v59 = vld [vmem:[%s14484_s3 + $0x50] sm:$0xff]  }
 0x4a5   :  { %v4156_v60 = vadd.f32 %v13700_v56, %v4115_v50  ;;  %v5660_v37 = vpop.permute.xlu0 %5659  ;;  %v4171_v0 = vmax.f32 %v4155_v2, 0.0  ;;  %v10796_v13 = vld [vmem:[%s14482_s0 + $0x1e8] sm:$0xff]   ;;  %v10797_v2 = vld [vmem:[%s14482_s0 + $0x1f0] sm:$0xff]   ;;  %v10798_v50 = vld [vmem:[%s14482_s0 + $0x1f8] sm:$0xff]  }
 0x4a6   :  { %v4174_v44 = vmax.f32 %v4158_v53, 0.0  ;;  %5692 = vst.msk [vmem:[#allocation2 + $0x18f] sm:$0xff] %vm510_vm3, %v5660_v37  ;;  %10061 = vmatmul.mubr.msk.bf16.gmra.mrb[108].mxu1 %vm27_vm1, %v13794_v18  ;;  %v13887_v53 = vld [vmem:[%s14484_s3 + $0x58] sm:$0xff]   ;;  %v6818_v37 = vld [vmem:[#allocation2 + $0xb0] sm:$0xff] }
 0x4a7   :  { %v4172_v19 = vmax.f32 %v4156_v60, 0.0  ;;  %9891 = vmatpush3.bf16.msra.mxu0 %v4182_v25  ;;  %10164 = vmatprep.mubr.msk.bf16.mxu1 %vm10856_vm4, %v10853_v20  ;;  %v13834_v25 = vld [vmem:[%s14484_s3 + $0x30] sm:$0xff]   ;;  %v6839_v60 = vpack.c.bf16 %v13780_v23, %v13744_v43  ;;  %v6823_v43 = vld [vmem:[#allocation2 + $0xd8] sm:$0xff]  ;;  %v6824_v23 = vld [vmem:[#allocation2 + $0xe0] sm:$0xff] }
 0x4a8   :  { %v4184_v15 = vpack.c.bf16 %v4174_v44, %v4173_v6  ;;  %9892 = vmatprep.subr.bf16.mxu0 %v10853_v20  ;;  %v6819_v6 = vld [vmem:[#allocation2 + $0xb8] sm:$0xff]  ;;  %v6820_v44 = vld [vmem:[#allocation2 + $0xc0] sm:$0xff] }
 0x4a9   :  { %v4183_v29 = vpack.c.bf16 %v4172_v19, %v4171_v0  ;;  %v6840_v0 = vpack.c.bf16 %v6818_v37, %v13782_v55  ;;  %v6841_v19 = vpack.c.bf16 %v6820_v44, %v6819_v6  ;;  %v6827_v55 = vld [vmem:[#allocation2 + $0xf8] sm:$0xff] }
 0x4aa   :  { %v13805_v56 = vld [vmem:[#allocation2 + $0x178] sm:$0xff] }
 0x4ab   :  { %9893 = vmatpush3.bf16.msra.mxu0 %v4183_v29  ;;  %v13812_v22 = vpack.c.bf16 %v13805_v56, %v13803_v7  ;;  %v6821_v29 = vld [vmem:[#allocation2 + $0xc8] sm:$0xff] }
 0x4ac   :  { %9894 = vmatprep.subr.bf16.mxu0 %v10853_v20 }
 0x4af   :  { %9895 = vmatpush3.bf16.msra.mxu0 %v4184_v15  ;;  %v6822_v15 = vld [vmem:[#allocation2 + $0xd0] sm:$0xff] }
 0x4b0   :  { %9960 = vmatprep.subr.bf16.mxu0 %v10789_v61  ;;  %v6842_v26 = vpack.c.bf16 %v6822_v15, %v6821_v29 }
 0x4b2   :  { %9897 = vmatmul.mubr.bf16.vlgmr.msra.gmra.mrb[64].mxu0 %v4176_v58  ;;  %v6836_v58 = vld [vmem:[#allocation2 + $0x100] sm:$0xff] }
 0x4b3   :  { %9961 = vmatpush3.bf16.msra.mxu0 %v10789_v61  ;;  %9964 = vmatprep.mubr.msk.bf16.mxu0 %vm115_vm0, %v10791_v38  ;;  %v6843_v61 = vpack.c.bf16 %v6824_v23, %v6823_v43  ;;  %v6825_v38 = vld [vmem:[#allocation2 + $0xe8] sm:$0xff] }
 0x4b4   :  { %9962 = vmatprep.subr.bf16.mxu0 %v10790_v40 }
 0x4b7   :  { %9963 = vmatpush3.bf16.msra.mxu0 %v10790_v40 }
 0x4b8   :  { %10064 = vmatprep.subr.bf16.mxu0 %v13834_v25 }
 0x4ba   :  { %9965 = vmatmul.mubr.msk.bf16.vlgmr.msra.gmra.mrb[84].mxu0 %vm115_vm0, %v10792_v39  ;;  %v6838_v39 = vld [vmem:[#allocation2 + $0x110] sm:$0xff] }
 0x4bb   :  { %9968 = vmatprep.mubr.msk.bf16.mxu0 %vm115_vm0, %v10793_v5  ;;  %10065 = vmatpush3.bf16.msra.mxu0 %v13834_v25  ;;  %v6837_v5 = vld [vmem:[#allocation2 + $0x108] sm:$0xff] }
 0x4bc   :  { %10066 = vmatprep.subr.bf16.mxu0 %v13843_v54 }
 0x4bf   :  { %10067 = vmatpush3.bf16.msra.mxu0 %v13843_v54 }
 0x4c0   :  { %10068 = vmatprep.subr.bf16.mxu0 %v13856_v51 }
 0x4c2   :  { %9969 = vmatmul.mubr.msk.bf16.gmra.mrb[88].mxu0 %vm115_vm0, %v10794_v45  ;;  %v6846_v45 = vpack.c.bf16 %v6838_v39, %v6837_v5 }
 0x4c3   :  { %9972 = vmatprep.mubr.msk.bf16.mxu0 %vm115_vm0, %v10795_v14  ;;  %10069 = vmatpush3.bf16.msra.mxu0 %v13856_v51  ;;  %v6831_v14 = vpack.c.bf16 %v6819_v6, %v6818_v37 }
 0x4c4   :  { %10070 = vmatprep.subr.bf16.mxu0 %v13865_v1 }
 0x4c7   :  { %10071 = vmatpush3.bf16.msra.mxu0 %v13865_v1 }
 0x4c8   :  { %10072 = vmatprep.subr.bf16.mxu0 %v13878_v59 }
 0x4ca   :  { %9973 = vmatmul.mubr.msk.bf16.gmra.mrb[92].mxu0 %vm115_vm0, %v10796_v13  ;;  %v6832_v13 = vpack.c.bf16 %v6821_v29, %v6820_v44 }
 0x4cb   :  { %9976 = vmatprep.mubr.msk.bf16.mxu0 %vm115_vm0, %v10797_v2  ;;  %10073 = vmatpush3.bf16.msra.mxu0 %v13878_v59  ;;  %v7401_v2 = vpack.c.bf16 %v13709_v31, %v13707_v36  ;;  %v13991_v36 = vld [vmem:[#allocation2 + $0x180] sm:$0xff]  ;;  %v7404_v31 = vpack.c.bf16 %v13803_v7, %v13764_v42 }
 0x4cc   :  { %10074 = vmatprep.subr.bf16.mxu0 %v13887_v53 }
 0x4cf   :  { %10075 = vmatpush3.bf16.msra.mxu0 %v13887_v53 }
 0x4d0   :  { %10092 = vmatprep.subr.bf16.mxu0 %v13369_v24 }
 0x4d2   :  { %9977 = vmatmul.mubr.msk.bf16.gmra.mrb[96].mxu0 %vm115_vm0, %v10798_v50 }
 0x4d3   :  { %10076 = vmatprep.mubr.msk.bf16.mxu0 %vm27_vm1, %v6839_v60 }
 0x4da   :  { %10077 = vmatmul.mubr.msk.bf16.vlgmr.msra.gmra.mrb[100].mxu0 %vm27_vm1, %v6840_v0 }
 0x4db   :  { %10080 = vmatprep.mubr.msk.bf16.mxu0 %vm27_vm1, %v6841_v19  ;;  %10093 = vmatpush3.bf16.msra.mxu0 %v13369_v24  ;;  %v6826_v24 = vld [vmem:[#allocation2 + $0xf0] sm:$0xff] }
 0x4dc   :  { %10094 = vmatprep.subr.bf16.mxu0 %v13427_v16  ;;  %v6844_v40 = vpack.c.bf16 %v6826_v24, %v6825_v38 }
 0x4df   :  { %10095 = vmatpush3.bf16.msra.mxu0 %v13427_v16  ;;  %v6845_v16 = vpack.c.bf16 %v6836_v58, %v6827_v55 }
 0x4e0   :  { %10096 = vmatprep.subr.bf16.mxu0 %v13441_v35 }
 0x4e2   :  { %10081 = vmatmul.mubr.msk.bf16.gmra.mrb[104].mxu0 %vm27_vm1, %v6842_v26 }
 0x4e3   :  { %10084 = vmatprep.mubr.msk.bf16.mxu0 %vm27_vm1, %v6843_v61  ;;  %10097 = vmatpush3.bf16.msra.mxu0 %v13441_v35 }
 0x4e4   :  { %10098 = vmatprep.subr.bf16.mxu0 %v13454_v17 }
 0x4e7   :  { %10099 = vmatpush3.bf16.msra.mxu0 %v13454_v17 }
 0x4e8   :  { %10100 = vmatprep.subr.bf16.mxu0 %v13468_v21 }
 0x4ea   :  { %10085 = vmatmul.mubr.msk.bf16.gmra.mrb[108].mxu0 %vm27_vm1, %v6844_v40 }
 0x4eb   :  { %10088 = vmatprep.mubr.msk.bf16.mxu0 %vm27_vm1, %v6845_v16  ;;  %10101 = vmatpush3.bf16.msra.mxu0 %v13468_v21 }
 0x4ec   :  { %10102 = vmatprep.subr.bf16.mxu0 %v13480_v46 }
 0x4ef   :  { %10103 = vmatpush3.bf16.msra.mxu0 %v13480_v46 }
 0x4f0   :  { %10120 = vmatprep.subr.bf16.mxu0 %v13492_v8 }
 0x4f2   :  { %10089 = vmatmul.mubr.msk.bf16.gmra.mrb[112].mxu0 %vm27_vm1, %v6846_v45 }
 0x4f3   :  { %10104 = vmatprep.mubr.msk.bf16.mxu0 %vm27_vm1, %v13751_v49  ;;  %v6833_v49 = vpack.c.bf16 %v6823_v43, %v6822_v15 }
 0x4fa   :  { %10105 = vmatmul.mubr.msk.bf16.vlgmr.msra.gmra.mrb[100].mxu0 %vm27_vm1, %v13762_v32  ;;  %v6834_v32 = vpack.c.bf16 %v6825_v38, %v6824_v23 }
 0x4fb   :  { %10108 = vmatprep.mubr.msk.bf16.mxu0 %vm27_vm1, %v13794_v18  ;;  %10121 = vmatpush3.bf16.msra.mxu0 %v13492_v8  ;;  %v7104_v18 = vld [vmem:[#allocation2 + $0x128] sm:$0xff] }
 0x4fc   :  { %10122 = vmatprep.subr.bf16.mxu0 %v13625_v48 }
 0x4ff   :  { %10123 = vmatpush3.bf16.msra.mxu0 %v13625_v48  ;;  %v6835_v48 = vpack.c.bf16 %v6827_v55, %v6826_v24 }
 0x500   :  { %10124 = vmatprep.subr.bf16.mxu0 %v13639_v41 }
 0x502   :  { %10109 = vmatmul.mubr.msk.bf16.gmra.mrb[104].mxu0 %vm27_vm1, %v6831_v14 }
 0x503   :  { %10112 = vmatprep.mubr.msk.bf16.mxu0 %vm27_vm1, %v6832_v13  ;;  %10125 = vmatpush3.bf16.msra.mxu0 %v13639_v41  ;;  %v7102_v41 = vld [vmem:[#allocation2 + $0x118] sm:$0xff] }
 0x504   :  { %10126 = vmatprep.subr.bf16.mxu0 %v13651_v28 }
 0x507   :  { %10127 = vmatpush3.bf16.msra.mxu0 %v13651_v28  ;;  %v13954_v28 = vpack.c.bf16 %v6837_v5, %v6836_v58 }
 0x508   :  { %10128 = vmatprep.subr.bf16.mxu0 %v13664_v12 }
 0x50a   :  { %10113 = vmatmul.mubr.msk.bf16.gmra.mrb[108].mxu0 %vm27_vm1, %v6833_v49 }
 0x50b   :  { %10116 = vmatprep.mubr.msk.bf16.mxu0 %vm27_vm1, %v6834_v32  ;;  %10129 = vmatpush3.bf16.msra.mxu0 %v13664_v12  ;;  %v13957_v12 = vpack.c.bf16 %v7102_v41, %v6838_v39 }
 0x50c   :  { %10130 = vmatprep.subr.bf16.mxu0 %v13673_v34 }
 0x50f   :  { %10131 = vmatpush3.bf16.msra.mxu0 %v13673_v34  ;;  %v7103_v34 = vld [vmem:[#allocation2 + $0x120] sm:$0xff] }
 0x510   :  { %10188 = vmatprep.subr.bf16.mxu0 %v13834_v25 }
 0x512   :  { %10117 = vmatmul.mubr.msk.bf16.gmra.mrb[112].mxu0 %vm27_vm1, %v6835_v48 }
 0x513   :  { %10132 = vmatprep.mubr.msk.bf16.mxu0 %vm27_vm1, %v6831_v14 }
 0x51a   :  { %10133 = vmatmul.mubr.msk.bf16.vlgmr.msra.gmra.mrb[100].mxu0 %vm27_vm1, %v6832_v13 }
 0x51b   :  { %10136 = vmatprep.mubr.msk.bf16.mxu0 %vm27_vm1, %v6833_v49  ;;  %10189 = vmatpush3.bf16.msra.mxu0 %v13834_v25  ;;  %v13966_v25 = vpack.c.bf16 %v7104_v18, %v7103_v34 }
 0x51c   :  { %10190 = vmatprep.subr.bf16.mxu0 %v13843_v54 }
 0x51f   :  { %10191 = vmatpush3.bf16.msra.mxu0 %v13843_v54  ;;  %v10831_v54 = vld [vmem:[%s14484_s3] sm:$0xff]  }
 0x520   :  { %10192 = vmatprep.subr.bf16.mxu0 %v13856_v51 }
 0x522   :  { %10137 = vmatmul.mubr.msk.bf16.gmra.mrb[104].mxu0 %vm27_vm1, %v6834_v32 }
 0x523   :  { %10140 = vmatprep.mubr.msk.bf16.mxu0 %vm27_vm1, %v6835_v48  ;;  %10193 = vmatpush3.bf16.msra.mxu0 %v13856_v51  ;;  %v7399_v51 = vpack.c.bf16 %v7103_v34, %v7102_v41 }
 0x524   :  { %10194 = vmatprep.subr.bf16.mxu0 %v13865_v1 }
 0x527   :  { %10195 = vmatpush3.bf16.msra.mxu0 %v13865_v1  ;;  %v7400_v1 = vpack.c.bf16 %v13705_v63, %v7104_v18  ;;  %v7403_v63 = vpack.c.bf16 %v13757_v47, %v13755_v33 }
 0x528   :  { %10196 = vmatprep.subr.bf16.mxu0 %v13878_v59 }
 0x52a   :  { %10141 = vmatmul.mubr.msk.bf16.gmra.mrb[108].mxu0 %vm27_vm1, %v13954_v28 }
 0x52b   :  { %10144 = vmatprep.mubr.msk.bf16.mxu0 %vm27_vm1, %v13957_v12  ;;  %10197 = vmatpush3.bf16.msra.mxu0 %v13878_v59  ;;  %v10832_v59 = vld [vmem:[%s14484_s3 + $0x8] sm:$0xff]  }
 0x52c   :  { %10198 = vmatprep.subr.bf16.mxu0 %v13887_v53 }
 0x52f   :  { %10199 = vmatpush3.bf16.msra.mxu0 %v13887_v53  ;;  %v7402_v53 = vpack.c.bf16 %v13753_v3, %v13713_v30  ;;  %v7405_v30 = vpack.c.bf16 %v13991_v36, %v13805_v56 }
 0x530   :  { %10216 = vmatprep.subr.bf16.mxu0 %v10831_v54 }
 0x532   :  { %10145 = vmatmul.mubr.msk.bf16.gmra.mrb[112].mxu0 %vm27_vm1, %v13966_v25 }
 0x533   :  { %10200 = vmatprep.mubr.msk.bf16.mxu0 %vm27_vm1, %v7399_v51 }
 0x53a   :  { %10201 = vmatmul.mubr.msk.bf16.vlgmr.msra.gmra.mrb[116].mxu0 %vm27_vm1, %v7400_v1 }
 0x53b   :  { %10204 = vmatprep.mubr.msk.bf16.mxu0 %vm27_vm1, %v7401_v2  ;;  %10217 = vmatpush3.bf16.msra.mxu0 %v10831_v54 }
 0x53c   :  { %10218 = vmatprep.subr.bf16.mxu0 %v10832_v59 }
 0x53f   :  { %10219 = vmatpush3.bf16.msra.mxu0 %v10832_v59 }
 0x540   :  { %10220 = vmatprep.subr.bf16.mxu0 %v13441_v35 }
 0x542   :  { %10205 = vmatmul.mubr.msk.bf16.gmra.mrb[120].mxu0 %vm27_vm1, %v7402_v53 }
 0x543   :  { %10208 = vmatprep.mubr.msk.bf16.mxu0 %vm27_vm1, %v7403_v63  ;;  %10221 = vmatpush3.bf16.msra.mxu0 %v13441_v35  ;;  %v14008_v35 = vld [vmem:[%s14485_s4] ss:$0 sm:$0xff] }
 0x544   :  { %10222 = vmatprep.subr.bf16.mxu0 %v13454_v17 }
 0x547   :  { %10223 = vmatpush3.bf16.msra.mxu0 %v13454_v17 }
 0x548   :  { %10224 = vmatprep.subr.bf16.mxu0 %v13468_v21 }
 0x54a   :  { %10209 = vmatmul.mubr.msk.bf16.gmra.mrb[124].mxu0 %vm27_vm1, %v7404_v31 }
 0x54b   :  { %10212 = vmatprep.mubr.msk.bf16.mxu0 %vm27_vm1, %v7405_v30  ;;  %10225 = vmatpush3.bf16.msra.mxu0 %v13468_v21 }
 0x54c   :  { %10226 = vmatprep.subr.bf16.mxu0 %v13480_v46 }
 0x54f   :  { %10227 = vmatpush3.bf16.msra.mxu0 %v13480_v46 }
 0x550   :  { %10244 = vmatprep.subr.bf16.mxu0 %v13492_v8 }
 0x561   :  { %v10050_v17 = vpop.f32.mrb[96].mxu1 }
 0x562   :  { %v6772_v3 = vadd.f32 %v10050_v17, %v14008_v35  ;;  %v6684_v33 = vpop.f32.mrb[97].mxu1 }
 0x563   :  { %v6770_v47 = vadd.f32 %v14008_v35, %v6684_v33  ;;  %v10051_v42 = vpop.f32.mrb[98].mxu1 }
 0x564   :  { %v6773_v21 = vadd.f32 %v10051_v42, %v14008_v35  ;;  %v6687_v7 = vpop.f32.mrb[99].mxu1  ;;  %v6788_v46 = vmax.f32 %v6772_v3, 0.0 }
 0x565   :  { %v6771_v56 = vadd.f32 %v14008_v35, %v6687_v7  ;;  %v6786_v8 = vmax.f32 %v6770_v47, 0.0 }
 0x566   :  { %v6789_v50 = vmax.f32 %v6773_v21, 0.0 }
 0x567   :  { %v6787_v60 = vmax.f32 %v6771_v56, 0.0 }
 0x568   :  { %v14014_v37 = vpack.c.bf16 %v6789_v50, %v6788_v46 }
 0x569   :  { %v14016_v6 = vpack.c.bf16 %v6787_v60, %v6786_v8  ;;  %v10054_v44 = vpop.f32.mrb[100].mxu1 }
 0x56a   :  { %v6776_v0 = vadd.f32 %v10054_v44, %v14008_v35  ;;  %v6700_v19 = vpop.f32.mrb[101].mxu1  ;;  %v8757_v44 = vld [vmem:[%s14483_s2] ss:$0 sm:$0xff] }
 0x56b   :  { %v6774_v15 = vadd.f32 %v14008_v35, %v6700_v19  ;;  %v10055_v43 = vpop.f32.mrb[102].mxu1 }
 0x56c   :  { %v6777_v23 = vadd.f32 %v10055_v43, %v14008_v35  ;;  %v6703_v29 = vpop.f32.mrb[103].mxu1  ;;  %v6792_v61 = vmax.f32 %v6776_v0, 0.0 }
 0x56d   :  { %v6775_v26 = vadd.f32 %v14008_v35, %v6703_v29  ;;  %v6790_v55 = vmax.f32 %v6774_v15, 0.0 }
 0x56e   :  { %v6793_v24 = vmax.f32 %v6777_v23, 0.0 }
 0x56f   :  { %v6791_v58 = vmax.f32 %v6775_v26, 0.0 }
 0x570   :  { %v14022_v38 = vpack.c.bf16 %v6793_v24, %v6792_v61 }
 0x571   :  { %v14024_v40 = vpack.c.bf16 %v6791_v58, %v6790_v55  ;;  %v10058_v16 = vpop.f32.mrb[104].mxu1 }
 0x572   :  { %v6780_v39 = vadd.f32 %v10058_v16, %v14008_v35  ;;  %v6716_v5 = vpop.f32.mrb[105].mxu1 }
 0x573   :  { %v6778_v45 = vadd.f32 %v14008_v35, %v6716_v5  ;;  %v10059_v14 = vpop.f32.mrb[106].mxu1 }
 0x574   :  { %v6781_v13 = vadd.f32 %v10059_v14, %v14008_v35  ;;  %v6719_v49 = vpop.f32.mrb[107].mxu1  ;;  %v6796_v48 = vmax.f32 %v6780_v39, 0.0 }
 0x575   :  { %v6779_v32 = vadd.f32 %v14008_v35, %v6719_v49  ;;  %v6794_v34 = vmax.f32 %v6778_v45, 0.0 }
 0x576   :  { %v6797_v41 = vmax.f32 %v6781_v13, 0.0 }
 0x577   :  { %v6795_v18 = vmax.f32 %v6779_v32, 0.0 }
 0x578   :  { %v14030_v54 = vpack.c.bf16 %v6797_v41, %v6796_v48 }
 0x579   :  { %v14032_v51 = vpack.c.bf16 %v6795_v18, %v6794_v34  ;;  %v10062_v1 = vpop.f32.mrb[108].mxu1 }
 0x57a   :  { %v6784_v2 = vadd.f32 %v10062_v1, %v14008_v35  ;;  %v6732_v59 = vpop.f32.mrb[109].mxu1  ;;  %v5913_v1 = vld [vmem:[%s14480_s5 + $0x1a0] sm:$0xff] }
 0x57b   :  { %v6782_v53 = vadd.f32 %v14008_v35, %v6732_v59  ;;  %v10063_v63 = vpop.f32.mrb[110].mxu1 }
 0x57c   :  { %v6785_v31 = vadd.f32 %v10063_v63, %v14008_v35  ;;  %v6735_v30 = vpop.f32.mrb[111].mxu1  ;;  %v6800_v3 = vmax.f32 %v6784_v2, 0.0 }
 0x57d   :  { %v6783_v17 = vadd.f32 %v14008_v35, %v6735_v30  ;;  %v6798_v47 = vmax.f32 %v6782_v53, 0.0  ;;  %v5915_v30 = vld [vmem:[%s14480_s5 + $0x1b0] sm:$0xff] }
 0x57e   :  { %v6801_v33 = vmax.f32 %v6785_v31, 0.0 }
 0x57f   :  { %v6799_v42 = vmax.f32 %v6783_v17, 0.0 }
 0x580   :  { %v14038_v21 = vpack.c.bf16 %v6801_v33, %v6800_v3  ;;  %v5914_v3 = vld [vmem:[%s14480_s5 + $0x1a8] sm:$0xff] }
 0x581   :  { %v14040_v7 = vpack.c.bf16 %v6799_v42, %v6798_v47  ;;  %v5917_v42 = vld [vmem:[%s14480_s5 + $0x1c0] sm:$0xff] }
 0x585   :  { %v4219_v56 = vpop.f32.mrb[64].mxu0 }
 0x586   :  { %v4226_v46 = vmul.f32 0.00390625, %v4219_v56  ;;  %v9898_v50 = vpop.f32.mrb[65].mxu0 }
 0x587   :  { %v4222_v8 = vpop.f32.mrb[66].mxu0 }
 0x588   :  { %4227 = vst [vmem:[%s14487_s7] sm:$0x1] %v4226_v46  ;;  %v9899_v60 = vpop.f32.mrb[67].mxu0 }
 0x58d   :  { %v9966_v0 = vpop.f32.mrb[84].mxu0 }
 0x58e   :  { %v5839_v19 = vadd.f32 %v9966_v0, %v8757_v44  ;;  %v5830_v15 = vpop.f32.mrb[85].mxu0  ;;  %v5916_v0 = vld [vmem:[%s14480_s5 + $0x1b8] sm:$0xff] }
 0x58f   :  { %v5831_v43 = vadd.f32 %v8757_v44, %v5830_v15  ;;  %v9967_v23 = vpop.f32.mrb[86].mxu0  ;;  %v5918_v15 = vld [vmem:[%s14480_s5 + $0x1c8] sm:$0xff] }
 0x590   :  { %v5895_v29 = vmax.f32 %v5839_v19, 0.0  ;;  %v5842_v26 = vadd.f32 %v9967_v23, %v8757_v44  ;;  %v5833_v61 = vpop.f32.mrb[87].mxu0  ;;  %v5919_v19 = vld [vmem:[%s14480_s5 + $0x1d0] sm:$0xff] }
 0x591   :  { %v5893_v24 = vmax.f32 %v5831_v43, 0.0  ;;  %v5834_v55 = vadd.f32 %v8757_v44, %v5833_v61  ;;  %v5920_v43 = vld [vmem:[%s14480_s5 + $0x1d8] sm:$0xff]  ;;  %v5923_v23 = vld [vmem:[%s14480_s5 + $0x1f0] sm:$0xff] }
 0x592   :  { %v6007_v58 = vmul.f32 %v13619_v62, %v5895_v29  ;;  %v5896_v16 = vmax.f32 %v5842_v26, 0.0  ;;  %v5922_v29 = vld [vmem:[%s14480_s5 + $0x1e8] sm:$0xff]  ;;  %v5924_v26 = vld [vmem:[%s14480_s5 + $0x1f8] sm:$0xff] }
 0x593   :  { %v6005_v39 = vmul.f32 %v13351_v11, %v5893_v24  ;;  %v5894_v5 = vmax.f32 %v5834_v55, 0.0 }
 0x594   :  { %6023 = vst.msk [vmem:[#allocation2 + $0x1a9] sm:$0xff] %vm115_vm0, %v6007_v58  ;;  %v6008_v45 = vmul.f32 %v13617_v52, %v5896_v16 }
 0x595   :  { %6021 = vst.msk [vmem:[#allocation2 + $0x199] sm:$0xff] %vm115_vm0, %v6005_v39  ;;  %v6006_v14 = vmul.f32 %v13611_v4, %v5894_v5  ;;  %6053 = vrot.lane.b32.xlu1 %v6005_v39, %s10855_s15  ;;  %v9970_v13 = vpop.f32.mrb[88].mxu0 }
 0x596   :  { %6024 = vst.msk [vmem:[#allocation2 + $0x1b1] sm:$0xff] %vm115_vm0, %v6008_v45  ;;  %6059 = vrot.lane.b32.xlu0 %v6008_v45, %s10855_s15  ;;  %v14057_v62 = vadd.f32 %v9970_v13, %v8757_v44  ;;  %v5846_v49 = vpop.f32.mrb[89].mxu0 }
 0x597   :  { %6022 = vst.msk [vmem:[#allocation2 + $0x1a1] sm:$0xff] %vm115_vm0, %v6006_v14  ;;  %v14060_v11 = vadd.f32 %v8757_v44, %v5846_v49  ;;  %v9971_v32 = vpop.f32.mrb[90].mxu0 }
 0x598   :  { %v14062_v52 = vadd.f32 %v9971_v32, %v8757_v44  ;;  %v5849_v48 = vpop.f32.mrb[91].mxu0 }
 0x599   :  { %6117 = vrot.lane.b32.xlu1 %v6005_v39, %s10854_s14  ;;  %v14065_v4 = vadd.f32 %v8757_v44, %v5849_v48 }
 0x59a   :  { %6055 = vrot.lane.b32.xlu0 %v6006_v14, %s10855_s15 }
 0x59d   :  { %6057 = vrot.lane.b32.xlu1 %v6007_v58, %s10855_s15  ;;  %v9974_v41 = vpop.f32.mrb[92].mxu0 }
 0x59e   :  { %6121 = vrot.lane.b32.xlu0 %v6007_v58, %s10854_s14  ;;  %v14070_v34 = vadd.f32 %v9974_v41, %v8757_v44  ;;  %v5862_v18 = vpop.f32.mrb[93].mxu0 }
 0x59f   :  { %v14075_v2 = vadd.f32 %v8757_v44, %v5862_v18  ;;  %v9975_v59 = vpop.f32.mrb[94].mxu0 }
 0x5a0   :  { %v14077_v53 = vadd.f32 %v9975_v59, %v8757_v44  ;;  %v5865_v63 = vpop.f32.mrb[95].mxu0 }
 0x5a1   :  { %6119 = vrot.lane.b32.xlu1 %v6006_v14, %s10854_s14  ;;  %v14080_v31 = vadd.f32 %v8757_v44, %v5865_v63 }
 0x5a2   :  { %5947 = vperm.xlu0 %10681, %v5913_v1  }
 0x5a5   :  { %6123 = vrot.lane.b32.xlu1 %v6008_v45, %s10854_s14  ;;  %v9978_v17 = vpop.f32.mrb[96].mxu0 }
 0x5a6   :  { %5957 = vperm.xlu0 %10681, %v5915_v30   ;;  %v14089_v33 = vadd.f32 %v9978_v17, %v8757_v44  ;;  %v5878_v47 = vpop.f32.mrb[97].mxu0 }
 0x5a7   :  { %v14094_v56 = vadd.f32 %v8757_v44, %v5878_v47  ;;  %v9979_v46 = vpop.f32.mrb[98].mxu0 }
 0x5a8   :  { %v14096_v50 = vadd.f32 %v9979_v46, %v8757_v44  ;;  %v5881_v8 = vpop.f32.mrb[99].mxu0 }
 0x5a9   :  { %5952 = vperm.xlu1 %10682, %v5914_v3   ;;  %v14098_v60 = vadd.f32 %v8757_v44, %v5881_v8  ;;  %v5921_v44 = vld [vmem:[%s14480_s5 + $0x1e0] sm:$0xff] }
 0x5aa   :  { %5967 = vperm.xlu0 %10681, %v5917_v42  }
 0x5ad   :  { %5962 = vperm.xlu1 %10682, %v5916_v0  }
 0x5ae   :  { %5977 = vperm.xlu0 %10681, %v5919_v19  }
 0x5b1   :  { %5972 = vperm.xlu1 %10682, %v5918_v15  }
 0x5b2   :  { %5987 = vperm.xlu0 %10681, %v5921_v44  }
 0x5b5   :  { %5982 = vperm.xlu1 %10682, %v5920_v43  }
 0x5b6   :  { %5997 = vperm.xlu0 %10681, %v5923_v23  }
 0x5b9   :  { %5992 = vperm.xlu1 %10682, %v5922_v29  }
 0x5bd   :  { %6002 = vperm.xlu1 %10682, %v5924_v26  }
 0x5ed   :  { %v10134_v61 = vpop.f32.mrb[100].mxu0 }
 0x5ee   :  { %v7252_v24 = vadd.f32 %v10134_v61, %v14008_v35  ;;  %v7171_v55 = vpop.f32.mrb[101].mxu0 }
 0x5ef   :  { %v7250_v58 = vadd.f32 %v14008_v35, %v7171_v55  ;;  %v10135_v16 = vpop.f32.mrb[102].mxu0 }
 0x5f0   :  { %v7253_v39 = vadd.f32 %v10135_v16, %v14008_v35  ;;  %v7174_v5 = vpop.f32.mrb[103].mxu0  ;;  %v7268_v14 = vmax.f32 %v7252_v24, 0.0 }
 0x5f1   :  { %v7251_v45 = vadd.f32 %v14008_v35, %v7174_v5  ;;  %v7266_v49 = vmax.f32 %v7250_v58, 0.0 }
 0x5f2   :  { %v7269_v13 = vmax.f32 %v7253_v39, 0.0 }
 0x5f3   :  { %v7267_v32 = vmax.f32 %v7251_v45, 0.0 }
 0x5f4   :  { %v7285_v48 = vpack.c.bf16 %v7269_v13, %v7268_v14 }
 0x5f5   :  { %v7284_v41 = vpack.c.bf16 %v7267_v32, %v7266_v49  ;;  %v10138_v18 = vpop.f32.mrb[104].mxu0 }
 0x5f6   :  { %v7256_v1 = vadd.f32 %v10138_v18, %v14008_v35  ;;  %v7187_v59 = vpop.f32.mrb[105].mxu0 }
 0x5f7   :  { %v7254_v63 = vadd.f32 %v14008_v35, %v7187_v59  ;;  %v10139_v30 = vpop.f32.mrb[106].mxu0  ;;  %10149 = vmatpush3.bf16.msra.mxu1 %v7284_v41 }
 0x5f8   :  { %v7257_v17 = vadd.f32 %v10139_v30, %v14008_v35  ;;  %v7190_v3 = vpop.f32.mrb[107].mxu0  ;;  %10150 = vmatprep.subr.bf16.mxu1 %v10853_v20  ;;  %v7272_v42 = vmax.f32 %v7256_v1, 0.0 }
 0x5f9   :  { %v7255_v47 = vadd.f32 %v14008_v35, %v7190_v3  ;;  %v7270_v8 = vmax.f32 %v7254_v63, 0.0 }
 0x5fa   :  { %v7273_v46 = vmax.f32 %v7257_v17, 0.0 }
 0x5fb   :  { %v7271_v0 = vmax.f32 %v7255_v47, 0.0  ;;  %10151 = vmatpush3.bf16.msra.mxu1 %v7285_v48 }
 0x5fc   :  { %v7287_v19 = vpack.c.bf16 %v7273_v46, %v7272_v42  ;;  %10152 = vmatprep.subr.bf16.mxu1 %v10853_v20 }
 0x5fd   :  { %v7286_v15 = vpack.c.bf16 %v7271_v0, %v7270_v8  ;;  %v10142_v44 = vpop.f32.mrb[108].mxu0 }
 0x5fe   :  { %v7260_v43 = vadd.f32 %v10142_v44, %v14008_v35  ;;  %v7203_v23 = vpop.f32.mrb[109].mxu0  ;;  %v7282_v44 = vld [vmem:[%s14486_s6 + $0x1] sm:$0x1] }
 0x5ff   :  { %v7258_v29 = vadd.f32 %v14008_v35, %v7203_v23  ;;  %v10143_v26 = vpop.f32.mrb[110].mxu0  ;;  %10153 = vmatpush3.bf16.msra.mxu1 %v7286_v15  ;;  %v7283_v23 = vpack.c.bf16 %v7282_v44, %v7282_v44 }
 0x600   :  { %v7261_v61 = vadd.f32 %v10143_v26, %v14008_v35  ;;  %v7206_v24 = vpop.f32.mrb[111].mxu0  ;;  %10154 = vmatprep.subr.bf16.mxu1 %v10853_v20  ;;  %v7276_v58 = vmax.f32 %v7260_v43, 0.0  ;;  %v14156_v26 = vld [vmem:[#allocation2 + $0x188] sm:$0xff] }
 0x601   :  { %v7259_v55 = vadd.f32 %v14008_v35, %v7206_v24  ;;  %v7274_v39 = vmax.f32 %v7258_v29, 0.0 }
 0x602   :  { %v7277_v16 = vmax.f32 %v7261_v61, 0.0 }
 0x603   :  { %v7275_v5 = vmax.f32 %v7259_v55, 0.0  ;;  %10155 = vmatpush3.bf16.msra.mxu1 %v7287_v19 }
 0x604   :  { %v7289_v45 = vpack.c.bf16 %v7277_v16, %v7276_v58  ;;  %10156 = vmatprep.subr.bf16.mxu1 %v10853_v20 }
 0x605   :  { %v7288_v14 = vpack.c.bf16 %v7275_v5, %v7274_v39  ;;  %v10146_v13 = vpop.f32.mrb[112].mxu0 }
 0x606   :  { %v7264_v49 = vadd.f32 %v10146_v13, %v14008_v35  ;;  %v7219_v32 = vpop.f32.mrb[113].mxu0 }
 0x607   :  { %v7262_v48 = vadd.f32 %v14008_v35, %v7219_v32  ;;  %v10147_v41 = vpop.f32.mrb[114].mxu0  ;;  %10157 = vmatpush3.bf16.msra.mxu1 %v7288_v14  ;;  %v6054_v18 = vpop.permute.xlu1 %6053  ;;  %v5900_v14 = vmax.f32 %v14062_v52, 0.0 }
 0x608   :  { %v7265_v1 = vadd.f32 %v10147_v41, %v14008_v35  ;;  %6101 = vst.msk [vmem:[#allocation2 + $0x198] sm:$0xff] %vm445_vm2, %v6054_v18  ;;  %v6060_v59 = vpop.permute.xlu0 %6059  ;;  %v7222_v63 = vpop.f32.mrb[115].mxu0  ;;  %10158 = vmatprep.subr.bf16.mxu1 %v10853_v20  ;;  %v7280_v17 = vmax.f32 %v7264_v49, 0.0  ;;  %v5903_v49 = vmax.f32 %v14070_v34, 0.0  ;;  %v5902_v34 = vmax.f32 %v14080_v31, 0.0 }
 0x609   :  { %6104 = vst.msk [vmem:[#allocation2 + $0x1b0] sm:$0xff] %vm445_vm2, %v6060_v59  ;;  %v7263_v30 = vadd.f32 %v14008_v35, %v7222_v63  ;;  %v7278_v47 = vmax.f32 %v7262_v48, 0.0  ;;  %v5905_v18 = vmax.f32 %v14094_v56, 0.0  ;;  %v5904_v56 = vmax.f32 %v14077_v53, 0.0 }
 0x60a   :  { %v7281_v3 = vmax.f32 %v7265_v1, 0.0 }
 0x60b   :  { %v7279_v42 = vmax.f32 %v7263_v30, 0.0  ;;  %10159 = vmatpush3.bf16.msra.mxu1 %v7289_v45  ;;  %v6118_v46 = vpop.permute.xlu1 %6117  ;;  %v14209_v45 = vld [vmem:[%s14484_s3 + $0x70] sm:$0xff]  }
 0x60c   :  { %v7291_v8 = vpack.c.bf16 %v7281_v3, %v7280_v17  ;;  %6165 = vst.msk [vmem:[#allocation2 + $0x197] sm:$0xff] %vm510_vm3, %v6118_v46  ;;  %v6056_v0 = vpop.permute.xlu0 %6055  ;;  %10160 = vmatprep.subr.bf16.mxu1 %v10853_v20  ;;  %v14263_v17 = vld [vmem:[%s14484_s3 + $0x88] sm:$0xff]  }
 0x60d   :  { %v7290_v19 = vpack.c.bf16 %v7279_v42, %v7278_v47  ;;  %6102 = vst.msk [vmem:[#allocation2 + $0x1a0] sm:$0xff] %vm445_vm2, %v6056_v0 }
 0x60f   :  { %10161 = vmatpush3.bf16.msra.mxu1 %v7290_v19  ;;  %v6058_v15 = vpop.permute.xlu1 %6057 }
 0x610   :  { %6103 = vst.msk [vmem:[#allocation2 + $0x1a8] sm:$0xff] %vm445_vm2, %v6058_v15  ;;  %v6122_v43 = vpop.permute.xlu0 %6121  ;;  %10162 = vmatprep.subr.bf16.mxu1 %v10853_v20 }
 0x611   :  { %6167 = vst.msk [vmem:[#allocation2 + $0x1a7] sm:$0xff] %vm510_vm3, %v6122_v43 }
 0x613   :  { %10163 = vmatpush3.bf16.msra.mxu1 %v7291_v8  ;;  %v6120_v29 = vpop.permute.xlu1 %6119  ;;  %v14158_v61 = vld [vmem:[#allocation2 + $0x190] sm:$0xff] }
 0x614   :  { %6166 = vst.msk [vmem:[#allocation2 + $0x19f] sm:$0xff] %vm510_vm3, %v6120_v29  ;;  %10168 = vmatprep.subr.bf16.mxu1 %v10853_v20  ;;  %v7406_v24 = vpack.c.bf16 %v14158_v61, %v14156_v26 }
 0x616   :  { %10213 = vmatmul.mubr.msk.bf16.gmra.mrb[128].mxu0 %vm27_vm1, %v7406_v24  ;;  %10165 = vmatmul.mubr.bf16.vlgmr.msra.gmra.mrb[112].mxu1 %v7283_v23 }
 0x617   :  { %10169 = vmatpush3.bf16.msra.mxu1 %v14016_v6  ;;  %v6124_v55 = vpop.permute.xlu1 %6123  ;;  %10228 = vmatprep.mubr.msk.bf16.mxu0 %vm27_vm1, %v13954_v28  ;;  %v5897_v28 = vmax.f32 %v14060_v11, 0.0  ;;  %v14196_v11 = vld [vmem:[%s14484_s3 + $0x68] sm:$0xff]  }
 0x618   :  { %6168 = vst.msk [vmem:[#allocation2 + $0x1af] sm:$0xff] %vm510_vm3, %v6124_v55  ;;  %10170 = vmatprep.subr.bf16.mxu1 %v10853_v20  ;;  %10184 = vmatprep.mubr.msk.bf16.mxu1 %vm10856_vm4, %v10853_v20 }
 0x61b   :  { %10171 = vmatpush3.bf16.msra.mxu1 %v14014_v37  ;;  %v14173_v58 = vld [vmem:[#allocation2 + $0x198] sm:$0xff]  ;;  %v14175_v16 = vld [vmem:[#allocation2 + $0x1a0] sm:$0xff] }
 0x61c   :  { %10172 = vmatprep.subr.bf16.mxu1 %v10853_v20  ;;  %v7920_v6 = vpack.c.bf16 %v14175_v16, %v14173_v58  ;;  %v14189_v37 = vld [vmem:[%s14484_s3 + $0x60] sm:$0xff]  }
 0x61e   :  { %10229 = vmatmul.mubr.msk.bf16.vlgmr.msra.gmra.mrb[116].mxu0 %vm27_vm1, %v13957_v12  ;;  %v5899_v12 = vmax.f32 %v14057_v62, 0.0 }
 0x61f   :  { %10173 = vmatpush3.bf16.msra.mxu1 %v14024_v40  ;;  %10232 = vmatprep.mubr.msk.bf16.mxu0 %vm27_vm1, %v13966_v25  ;;  %v5898_v40 = vmax.f32 %v14065_v4, 0.0 }
 0x620   :  { %10245 = vmatpush3.bf16.msra.mxu0 %v14189_v37  ;;  %10174 = vmatprep.subr.bf16.mxu1 %v10853_v20 }
 0x621   :  { %v5948_v39 = vpop.permute.xlu0 %5947  ;;  %10246 = vmatprep.subr.bf16.mxu0 %v14196_v11 }
 0x622   :  { %v6009_v25 = vmul.f32 %v5948_v39, %v5897_v28 }
 0x623   :  { %10175 = vmatpush3.bf16.msra.mxu1 %v14022_v38  ;;  %v5901_v38 = vmax.f32 %v14075_v2, 0.0 }
 0x624   :  { %6025 = vst.msk [vmem:[#allocation2 + $0x1b9] sm:$0xff] %vm115_vm0, %v6009_v25  ;;  %6061 = vrot.lane.b32.xlu0 %v6009_v25, %s10855_s15  ;;  %10247 = vmatpush3.bf16.msra.mxu0 %v14196_v11 }
 0x625   :  { %v5958_v5 = vpop.permute.xlu0 %5957  ;;  %10176 = vmatprep.subr.bf16.mxu1 %v10853_v20  ;;  %10248 = vmatprep.subr.bf16.mxu0 %v14209_v45 }
 0x626   :  { %v6011_v62 = vmul.f32 %v5958_v5, %v5899_v12  ;;  %10233 = vmatmul.mubr.msk.bf16.gmra.mrb[120].mxu0 %vm27_vm1, %v13717_v27 }
 0x627   :  { %10177 = vmatpush3.bf16.msra.mxu1 %v14032_v51  ;;  %10236 = vmatprep.mubr.msk.bf16.mxu0 %vm27_vm1, %v13723_v9  ;;  %v14229_v51 = vld [vmem:[%s14484_s3 + $0x78] sm:$0xff]  }
 0x628   :  { %6027 = vst.msk [vmem:[#allocation2 + $0x1c9] sm:$0xff] %vm115_vm0, %v6011_v62  ;;  %6065 = vrot.lane.b32.xlu1 %v6011_v62, %s10855_s15  ;;  %v5953_v4 = vpop.permute.xlu1 %5952  ;;  %10178 = vmatprep.subr.bf16.mxu1 %v10853_v20 }
 0x629   :  { %v6010_v13 = vmul.f32 %v5953_v4, %v5898_v40  ;;  %v5968_v2 = vpop.permute.xlu0 %5967  ;;  %10249 = vmatpush3.bf16.msra.mxu0 %v14209_v45 }
 0x62a   :  { %v14224_v32 = vmul.f32 %v5968_v2, %v5901_v38  ;;  %10250 = vmatprep.subr.bf16.mxu0 %v14229_v51 }
 0x62b   :  { %6026 = vst.msk [vmem:[#allocation2 + $0x1c1] sm:$0xff] %vm115_vm0, %v6010_v13  ;;  %10179 = vmatpush3.bf16.msra.mxu1 %v14030_v54  ;;  %v14246_v54 = vld [vmem:[%s14484_s3 + $0x80] sm:$0xff]  }
 0x62c   :  { %6029 = vst.msk [vmem:[#allocation2 + $0x1d9] sm:$0xff] %vm115_vm0, %v14224_v32  ;;  %6129 = vrot.lane.b32.xlu1 %v6011_v62, %s10854_s14  ;;  %v5963_v52 = vpop.permute.xlu1 %5962  ;;  %10180 = vmatprep.subr.bf16.mxu1 %v10853_v20 }
 0x62d   :  { %v6012_v48 = vmul.f32 %v5963_v52, %v5900_v14  ;;  %v5978_v41 = vpop.permute.xlu0 %5977  ;;  %10251 = vmatpush3.bf16.msra.mxu0 %v14229_v51 }
 0x62e   :  { %v6015_v1 = vmul.f32 %v5978_v41, %v5903_v49  ;;  %10237 = vmatmul.mubr.msk.bf16.gmra.mrb[124].mxu0 %vm27_vm1, %v13768_v57  ;;  %10252 = vmatprep.subr.bf16.mxu0 %v14246_v54 }
 0x62f   :  { %6028 = vst.msk [vmem:[#allocation2 + $0x1d1] sm:$0xff] %vm115_vm0, %v6012_v48  ;;  %10181 = vmatpush3.bf16.msra.mxu1 %v14040_v7  ;;  %6067 = vrot.lane.b32.xlu0 %v6012_v48, %s10855_s15  ;;  %v5907_v7 = vmax.f32 %v14089_v33, 0.0  ;;  %v5906_v33 = vmax.f32 %v14098_v60, 0.0  ;;  %v5908_v60 = vmax.f32 %v14096_v50, 0.0 }
 0x630   :  { %6031 = vst.msk [vmem:[#allocation2 + $0x1e9] sm:$0xff] %vm115_vm0, %v6015_v1  ;;  %10240 = vmatprep.mubr.msk.bf16.mxu0 %vm27_vm1, %v13775_v10  ;;  %6125 = vrot.lane.b32.xlu1 %v6009_v25, %s10854_s14  ;;  %v5973_v31 = vpop.permute.xlu1 %5972 }
 0x631   :  { %v6014_v59 = vmul.f32 %v5973_v31, %v5902_v34  ;;  %v5988_v63 = vpop.permute.xlu0 %5987  ;;  %10182 = vmatprep.subr.bf16.mxu1 %v10853_v20  ;;  %10253 = vmatpush3.bf16.msra.mxu0 %v14246_v54 }
 0x632   :  { %v6017_v30 = vmul.f32 %v5988_v63, %v5905_v18  ;;  %10254 = vmatprep.subr.bf16.mxu0 %v14263_v17 }
 0x633   :  { %6030 = vst.msk [vmem:[#allocation2 + $0x1e1] sm:$0xff] %vm115_vm0, %v6014_v59  ;;  %10183 = vmatpush3.bf16.msra.mxu1 %v14038_v21  ;;  %6131 = vrot.lane.b32.xlu0 %v6012_v48, %s10854_s14 }
 0x634   :  { %6033 = vst.msk [vmem:[#allocation2 + $0x1f9] sm:$0xff] %vm115_vm0, %v6017_v30  ;;  %6073 = vrot.lane.b32.xlu1 %v6015_v1, %s10855_s15  ;;  %v5983_v53 = vpop.permute.xlu1 %5982  ;;  %10272 = vmatprep.subr.bf16.mxu1 %v10853_v20 }
 0x635   :  { %v6016_v3 = vmul.f32 %v5983_v53, %v5904_v56  ;;  %v5998_v47 = vpop.permute.xlu0 %5997  ;;  %10255 = vmatpush3.bf16.msra.mxu0 %v14263_v17 }
 0x636   :  { %v6019_v42 = vmul.f32 %v5998_v47, %v5907_v7  ;;  %10241 = vmatmul.mubr.msk.bf16.gmra.mrb[128].mxu0 %vm27_vm1, %v13812_v22 }
 0x637   :  { %6032 = vst.msk [vmem:[#allocation2 + $0x1f1] sm:$0xff] %vm115_vm0, %v6016_v3  ;;  %6063 = vrot.lane.b32.xlu0 %v6010_v13, %s10855_s15  ;;  %10256 = vmatprep.mubr.msk.bf16.mxu0 %vm27_vm1, %v13717_v27  ;;  %v7670_v27 = vpack.c.bf16 %v14156_v26, %v13991_v36  ;;  %v6802_v36 = vld [vmem:[%s14486_s6] sm:$0x1] }
 0x638   :  { %6035 = vst.msk [vmem:[#allocation2 + $0x209] sm:$0xff] %vm115_vm0, %v6019_v42  ;;  %6137 = vrot.lane.b32.xlu1 %v6015_v1, %s10854_s14  ;;  %v5993_v21 = vpop.permute.xlu1 %5992  ;;  %v6803_v19 = vpack.c.bf16 %v6802_v36, %v6802_v36 }
 0x639   :  { %v6018_v46 = vmul.f32 %v5993_v21, %v5906_v33 }
 0x63a   :  { %10185 = vmatmul.mubr.bf16.vlgmr.msra.gmra.mrb[112].mxu1 %v6803_v19 }
 0x63b   :  { %6034 = vst.msk [vmem:[#allocation2 + $0x201] sm:$0xff] %vm115_vm0, %v6018_v46  ;;  %6127 = vrot.lane.b32.xlu0 %v6010_v13, %s10854_s14  ;;  %10288 = vmatprep.mubr.msk.bf16.mxu1 %vm10856_vm4, %v10853_v20 }
 0x63c   :  { %6069 = vrot.lane.b32.xlu1 %v14224_v32, %s10855_s15  ;;  %v6003_v8 = vpop.permute.xlu1 %6002 }
 0x63d   :  { %v6020_v0 = vmul.f32 %v6003_v8, %v5908_v60 }
 0x63e   :  { %10257 = vmatmul.mubr.msk.bf16.vlgmr.msra.gmra.mrb[116].mxu0 %vm27_vm1, %v13723_v9  ;;  %v14309_v9 = vpack.c.bf16 %v14173_v58, %v14158_v61  ;;  %v10843_v58 = vld [vmem:[%s14484_s3 + $0x50] sm:$0xff]  }
 0x63f   :  { %6036 = vst.msk [vmem:[#allocation2 + $0x211] sm:$0xff] %vm115_vm0, %v6020_v0  ;;  %6075 = vrot.lane.b32.xlu0 %v6016_v3, %s10855_s15  ;;  %10260 = vmatprep.mubr.msk.bf16.mxu0 %vm27_vm1, %v13768_v57  ;;  %v14316_v57 = vld [vmem:[#allocation2 + $0x1a8] sm:$0xff] }
 0x640   :  { %6133 = vrot.lane.b32.xlu1 %v14224_v32, %s10854_s14 }
 0x643   :  { %6139 = vrot.lane.b32.xlu0 %v6016_v3, %s10854_s14 }
 0x644   :  { %6081 = vrot.lane.b32.xlu1 %v6019_v42, %s10855_s15 }
 0x646   :  { %10261 = vmatmul.mubr.msk.bf16.gmra.mrb[120].mxu0 %vm27_vm1, %v13775_v10  ;;  %v14322_v10 = vpack.c.bf16 %v14316_v57, %v14175_v16  ;;  %v10844_v16 = vld [vmem:[%s14484_s3 + $0x58] sm:$0xff]  }
 0x647   :  { %6071 = vrot.lane.b32.xlu0 %v6014_v59, %s10855_s15  ;;  %10264 = vmatprep.mubr.msk.bf16.mxu0 %vm27_vm1, %v13812_v22 }
 0x648   :  { %6077 = vrot.lane.b32.xlu1 %v6017_v30, %s10855_s15 }
 0x64b   :  { %6135 = vrot.lane.b32.xlu0 %v6014_v59, %s10854_s14 }
 0x64c   :  { %6141 = vrot.lane.b32.xlu1 %v6017_v30, %s10854_s14 }
 0x64e   :  { %10265 = vmatmul.mubr.msk.bf16.gmra.mrb[124].mxu0 %vm27_vm1, %v7670_v27 }
 0x64f   :  { %6083 = vrot.lane.b32.xlu0 %v6020_v0, %s10855_s15  ;;  %10268 = vmatprep.mubr.msk.bf16.mxu0 %vm27_vm1, %v14309_v9 }
 0x650   :  { %6143 = vrot.lane.b32.xlu1 %v6018_v46, %s10854_s14 }
 0x653   :  { %6079 = vrot.lane.b32.xlu0 %v6018_v46, %s10855_s15 }
 0x654   :  { %6147 = vrot.lane.b32.xlu1 %v6020_v0, %s10854_s14 }
 0x656   :  { %10269 = vmatmul.mubr.msk.bf16.gmra.mrb[128].mxu0 %vm27_vm1, %v14322_v10 }
 0x657   :  { %6145 = vrot.lane.b32.xlu0 %v6019_v42, %s10854_s14 }
 0x696   :  { %v6062_v22 = vpop.permute.xlu0 %6061 }
 0x697   :  { %6105 = vst.msk [vmem:[#allocation2 + $0x1b8] sm:$0xff] %vm445_vm2, %v6062_v22 }
 0x69a   :  { %v6066_v50 = vpop.permute.xlu1 %6065 }
 0x69b   :  { %6107 = vst.msk [vmem:[#allocation2 + $0x1c8] sm:$0xff] %vm445_vm2, %v6066_v50 }
 0x69e   :  { %v6130_v15 = vpop.permute.xlu1 %6129 }
 0x6a1   :  { %v6068_v44 = vpop.permute.xlu0 %6067 }
 0x6a2   :  { %6108 = vst.msk [vmem:[#allocation2 + $0x1d0] sm:$0xff] %vm445_vm2, %v6068_v44  ;;  %v6126_v43 = vpop.permute.xlu1 %6125 }
 0x6a3   :  { %6169 = vst.msk [vmem:[#allocation2 + $0x1b7] sm:$0xff] %vm510_vm3, %v6126_v43 }
 0x6a5   :  { %v6132_v23 = vpop.permute.xlu0 %6131 }
 0x6a6   :  { %6172 = vst.msk [vmem:[#allocation2 + $0x1cf] sm:$0xff] %vm510_vm3, %v6132_v23  ;;  %v6074_v29 = vpop.permute.xlu1 %6073 }
 0x6a7   :  { %6111 = vst.msk [vmem:[#allocation2 + $0x1e8] sm:$0xff] %vm445_vm2, %v6074_v29 }
 0x6a9   :  { %v6064_v61 = vpop.permute.xlu0 %6063 }
 0x6aa   :  { %6106 = vst.msk [vmem:[#allocation2 + $0x1c0] sm:$0xff] %vm445_vm2, %v6064_v61  ;;  %v6138_v24 = vpop.permute.xlu1 %6137 }
 0x6ab   :  { %6171 = vst.msk [vmem:[#allocation2 + $0x1c7] sm:$0xff] %vm510_vm3, %v6130_v15 }
 0x6ad   :  { %v6128_v55 = vpop.permute.xlu0 %6127 }
 0x6ae   :  { %6170 = vst.msk [vmem:[#allocation2 + $0x1bf] sm:$0xff] %vm510_vm3, %v6128_v55  ;;  %v6070_v28 = vpop.permute.xlu1 %6069 }
 0x6af   :  { %6109 = vst.msk [vmem:[#allocation2 + $0x1d8] sm:$0xff] %vm445_vm2, %v6070_v28 }
 0x6b1   :  { %v6076_v39 = vpop.permute.xlu0 %6075 }
 0x6b2   :  { %6112 = vst.msk [vmem:[#allocation2 + $0x1f0] sm:$0xff] %vm445_vm2, %v6076_v39  ;;  %v6134_v12 = vpop.permute.xlu1 %6133 }
 0x6b3   :  { %6173 = vst.msk [vmem:[#allocation2 + $0x1d7] sm:$0xff] %vm510_vm3, %v6134_v12 }
 0x6b5   :  { %v6140_v25 = vpop.permute.xlu0 %6139 }
 0x6b6   :  { %6176 = vst.msk [vmem:[#allocation2 + $0x1ef] sm:$0xff] %vm510_vm3, %v6140_v25  ;;  %v6082_v40 = vpop.permute.xlu1 %6081 }
 0x6b7   :  { %6115 = vst.msk [vmem:[#allocation2 + $0x208] sm:$0xff] %vm445_vm2, %v6082_v40 }
 0x6b9   :  { %v6072_v5 = vpop.permute.xlu0 %6071 }
 0x6ba   :  { %6110 = vst.msk [vmem:[#allocation2 + $0x1e0] sm:$0xff] %vm445_vm2, %v6072_v5  ;;  %v6078_v38 = vpop.permute.xlu1 %6077 }
 0x6bb   :  { %6113 = vst.msk [vmem:[#allocation2 + $0x1f8] sm:$0xff] %vm445_vm2, %v6078_v38 }
 0x6bc   :  { %6175 = vst.msk [vmem:[#allocation2 + $0x1e7] sm:$0xff] %vm510_vm3, %v6138_v24 }
 0x6bd   :  { %v6136_v62 = vpop.permute.xlu0 %6135 }
 0x6be   :  { %6174 = vst.msk [vmem:[#allocation2 + $0x1df] sm:$0xff] %vm510_vm3, %v6136_v62  ;;  %v6142_v4 = vpop.permute.xlu1 %6141 }
 0x6bf   :  { %6177 = vst.msk [vmem:[#allocation2 + $0x1f7] sm:$0xff] %vm510_vm3, %v6142_v4 }
 0x6c1   :  { %v6084_v14 = vpop.permute.xlu0 %6083 }
 0x6c2   :  { %6116 = vst.msk [vmem:[#allocation2 + $0x210] sm:$0xff] %vm445_vm2, %v6084_v14  ;;  %v6144_v13 = vpop.permute.xlu1 %6143 }
 0x6c5   :  { %v6080_v2 = vpop.permute.xlu0 %6079 }
 0x6c6   :  { %6114 = vst.msk [vmem:[#allocation2 + $0x200] sm:$0xff] %vm445_vm2, %v6080_v2  ;;  %v6148_v49 = vpop.permute.xlu1 %6147 }
 0x6c7   :  { %6180 = vst.msk [vmem:[#allocation2 + $0x20f] sm:$0xff] %vm510_vm3, %v6148_v49  ;;  %6178 = vst.msk [vmem:[#allocation2 + $0x1ff] sm:$0xff] %vm510_vm3, %v6144_v13 }
 0x6c9   :  { %v6146_v32 = vpop.permute.xlu0 %6145 }
 0x6ca   :  { %6179 = vst.msk [vmem:[#allocation2 + $0x207] sm:$0xff] %vm510_vm3, %v6146_v32 }
 0x711   :  { %v10258_v52 = vpop.f32.mrb[116].mxu0 }
 0x712   :  { %v7812_v34 = vadd.f32 %v10258_v52, %v14008_v35  ;;  %v7731_v48 = vpop.f32.mrb[117].mxu0 }
 0x713   :  { %v7810_v41 = vadd.f32 %v14008_v35, %v7731_v48  ;;  %v10259_v18 = vpop.f32.mrb[118].mxu0 }
 0x714   :  { %v7813_v1 = vadd.f32 %v10259_v18, %v14008_v35  ;;  %v7734_v31 = vpop.f32.mrb[119].mxu0  ;;  %v7828_v59 = vmax.f32 %v7812_v34, 0.0 }
 0x715   :  { %v7811_v56 = vadd.f32 %v14008_v35, %v7734_v31  ;;  %v7826_v7 = vmax.f32 %v7810_v41, 0.0 }
 0x716   :  { %v7829_v63 = vmax.f32 %v7813_v1, 0.0 }
 0x717   :  { %v7827_v30 = vmax.f32 %v7811_v56, 0.0  ;;  %v7842_v56 = vld [vmem:[%s14486_s6 + $0x2] sm:$0x1] }
 0x718   :  { %v7845_v53 = vpack.c.bf16 %v7829_v63, %v7828_v59  ;;  %v7843_v59 = vpack.c.bf16 %v7842_v56, %v7842_v56  ;;  %v10840_v63 = vld [vmem:[%s14484_s3 + $0x38] sm:$0xff]  }
 0x719   :  { %v7844_v33 = vpack.c.bf16 %v7827_v30, %v7826_v7  ;;  %v10262_v3 = vpop.f32.mrb[120].mxu0  ;;  %v10841_v7 = vld [vmem:[%s14484_s3 + $0x40] sm:$0xff]   ;;  %v10842_v30 = vld [vmem:[%s14484_s3 + $0x48] sm:$0xff]  }
 0x71a   :  { %v7816_v47 = vadd.f32 %v10262_v3, %v14008_v35  ;;  %v7747_v42 = vpop.f32.mrb[121].mxu0 }
 0x71b   :  { %v7814_v21 = vadd.f32 %v14008_v35, %v7747_v42  ;;  %v10263_v60 = vpop.f32.mrb[122].mxu0  ;;  %10273 = vmatpush3.bf16.msra.mxu1 %v7844_v33  ;;  %v7901_v33 = vld [vmem:[#allocation2 + $0x1c0] sm:$0xff] }
 0x71c   :  { %v7817_v46 = vadd.f32 %v10263_v60, %v14008_v35  ;;  %v7750_v8 = vpop.f32.mrb[123].mxu0  ;;  %10274 = vmatprep.subr.bf16.mxu1 %v10853_v20  ;;  %v7832_v27 = vmax.f32 %v7816_v47, 0.0  ;;  %v10845_v47 = vld [vmem:[%s14484_s3] sm:$0xff]   ;;  %v7903_v60 = vld [vmem:[#allocation2 + $0x1d0] sm:$0xff] }
 0x71d   :  { %v7815_v0 = vadd.f32 %v14008_v35, %v7750_v8  ;;  %v7830_v36 = vmax.f32 %v7814_v21, 0.0  ;;  %v10846_v21 = vld [vmem:[%s14484_s3 + $0x8] sm:$0xff]   ;;  %v7905_v8 = vld [vmem:[#allocation2 + $0x1e0] sm:$0xff] }
 0x71e   :  { %v7833_v22 = vmax.f32 %v7817_v46, 0.0  ;;  %v7904_v46 = vld [vmem:[#allocation2 + $0x1d8] sm:$0xff] }
 0x71f   :  { %v7831_v50 = vmax.f32 %v7815_v0, 0.0  ;;  %10275 = vmatpush3.bf16.msra.mxu1 %v7845_v53  ;;  %v7900_v53 = vld [vmem:[#allocation2 + $0x1b8] sm:$0xff] }
 0x720   :  { %v7847_v19 = vpack.c.bf16 %v7833_v22, %v7832_v27  ;;  %10276 = vmatprep.subr.bf16.mxu1 %v10853_v20  ;;  %v7922_v42 = vpack.c.bf16 %v7901_v33, %v7900_v53  ;;  %v10847_v27 = vld [vmem:[%s14484_s3 + $0x10] sm:$0xff]   ;;  %v7924_v22 = vpack.c.bf16 %v7905_v8, %v7904_v46 }
 0x721   :  { %v7846_v15 = vpack.c.bf16 %v7831_v50, %v7830_v36  ;;  %v10266_v44 = vpop.f32.mrb[124].mxu0  ;;  %v10848_v36 = vld [vmem:[%s14484_s3 + $0x18] sm:$0xff]   ;;  %v7907_v50 = vld [vmem:[#allocation2 + $0x1f0] sm:$0xff] }
 0x722   :  { %v7820_v43 = vadd.f32 %v10266_v44, %v14008_v35  ;;  %v7763_v23 = vpop.f32.mrb[125].mxu0 }
 0x723   :  { %v7818_v29 = vadd.f32 %v14008_v35, %v7763_v23  ;;  %v10267_v61 = vpop.f32.mrb[126].mxu0  ;;  %10277 = vmatpush3.bf16.msra.mxu1 %v7846_v15  ;;  %v7906_v15 = vld [vmem:[#allocation2 + $0x1e8] sm:$0xff]  ;;  %v10849_v23 = vld [vmem:[%s14484_s3 + $0x20] sm:$0xff]  }
 0x724   :  { %v7821_v24 = vadd.f32 %v10267_v61, %v14008_v35  ;;  %v7766_v55 = vpop.f32.mrb[127].mxu0  ;;  %10278 = vmatprep.subr.bf16.mxu1 %v10853_v20  ;;  %v7836_v39 = vmax.f32 %v7820_v43, 0.0  ;;  %v7925_v44 = vpack.c.bf16 %v7907_v50, %v7906_v15  ;;  %v7908_v43 = vld [vmem:[#allocation2 + $0x1f8] sm:$0xff]  ;;  %v10850_v61 = vld [vmem:[%s14484_s3 + $0x28] sm:$0xff]  }
 0x725   :  { %v7819_v28 = vadd.f32 %v14008_v35, %v7766_v55  ;;  %v7834_v25 = vmax.f32 %v7818_v29, 0.0  ;;  %v7919_v55 = vld [vmem:[#allocation2 + $0x210] sm:$0xff] }
 0x726   :  { %v7837_v12 = vmax.f32 %v7821_v24, 0.0  ;;  %v7918_v24 = vld [vmem:[#allocation2 + $0x208] sm:$0xff] }
 0x727   :  { %v7835_v40 = vmax.f32 %v7819_v28, 0.0  ;;  %10279 = vmatpush3.bf16.msra.mxu1 %v7847_v19  ;;  %v7917_v19 = vld [vmem:[#allocation2 + $0x200] sm:$0xff]  ;;  %v7927_v28 = vpack.c.bf16 %v7919_v55, %v7918_v24 }
 0x728   :  { %v7849_v5 = vpack.c.bf16 %v7837_v12, %v7836_v39  ;;  %10280 = vmatprep.subr.bf16.mxu1 %v10853_v20  ;;  %v7926_v29 = vpack.c.bf16 %v7917_v19, %v7908_v43  ;;  %v7893_v39 = vld [vmem:[#allocation2 + $0x180] sm:$0xff] }
 0x729   :  { %v7848_v38 = vpack.c.bf16 %v7835_v40, %v7834_v25  ;;  %v10270_v62 = vpop.f32.mrb[128].mxu0  ;;  %v7909_v12 = vpack.c.bf16 %v14156_v26, %v7893_v39 }
 0x72a   :  { %v7824_v4 = vadd.f32 %v10270_v62, %v14008_v35  ;;  %v7779_v14 = vpop.f32.mrb[129].mxu0 }
 0x72b   :  { %v7822_v13 = vadd.f32 %v14008_v35, %v7779_v14  ;;  %v10271_v2 = vpop.f32.mrb[130].mxu0  ;;  %10281 = vmatpush3.bf16.msra.mxu1 %v7848_v38  ;;  %v10851_v38 = vld [vmem:[%s14485_s4] ss:$0 sm:$0xff] }
 0x72c   :  { %v7825_v49 = vadd.f32 %v10271_v2, %v14008_v35  ;;  %v7782_v32 = vpop.f32.mrb[131].mxu0  ;;  %10282 = vmatprep.subr.bf16.mxu1 %v10853_v20  ;;  %v7840_v34 = vmax.f32 %v7824_v4, 0.0 }
 0x72d   :  { %v7823_v52 = vadd.f32 %v14008_v35, %v7782_v32  ;;  %v7838_v41 = vmax.f32 %v7822_v13, 0.0  ;;  %v10839_v35 = vld [vmem:[%s14484_s3 + $0x30] sm:$0xff]  }
 0x72e   :  { %v7841_v48 = vmax.f32 %v7825_v49, 0.0 }
 0x72f   :  { %v7839_v18 = vmax.f32 %v7823_v52, 0.0  ;;  %10283 = vmatpush3.bf16.msra.mxu1 %v7849_v5 }
 0x730   :  { %v7851_v1 = vpack.c.bf16 %v7841_v48, %v7840_v34  ;;  %10284 = vmatprep.subr.bf16.mxu1 %v10853_v20 }
 0x731   :  { %v7850_v31 = vpack.c.bf16 %v7839_v18, %v7838_v41 }
 0x733   :  { %10285 = vmatpush3.bf16.msra.mxu1 %v7850_v31 }
 0x734   :  { %10286 = vmatprep.subr.bf16.mxu1 %v10853_v20 }
 0x737   :  { %10287 = vmatpush3.bf16.msra.mxu1 %v7851_v1 }
 0x738   :  { %10292 = vmatprep.subr.bf16.mxu1 %v10839_v35 }
 0x73a   :  { %10289 = vmatmul.mubr.bf16.vlgmr.msra.gmra.mrb[112].mxu1 %v7843_v59 }
 0x73b   :  { %10293 = vmatpush3.bf16.msra.mxu1 %v10839_v35  ;;  %10304 = vmatprep.mubr.msk.bf16.mxu1 %vm27_vm1, %v7920_v6  ;;  %v7899_v6 = vld [vmem:[#allocation2 + $0x1b0] sm:$0xff] }
 0x73c   :  { %10294 = vmatprep.subr.bf16.mxu1 %v10840_v63  ;;  %v7921_v3 = vpack.c.bf16 %v7899_v6, %v14316_v57  ;;  %v7902_v57 = vld [vmem:[#allocation2 + $0x1c8] sm:$0xff]  ;;  %v7912_v25 = vpack.c.bf16 %v7900_v53, %v7899_v6 }
 0x73d   :  { %v7923_v0 = vpack.c.bf16 %v7903_v60, %v7902_v57  ;;  %v7913_v26 = vpack.c.bf16 %v7902_v57, %v7901_v33 }
 0x73f   :  { %10295 = vmatpush3.bf16.msra.mxu1 %v10840_v63 }
 0x740   :  { %10296 = vmatprep.subr.bf16.mxu1 %v10841_v7 }
 0x743   :  { %10297 = vmatpush3.bf16.msra.mxu1 %v10841_v7 }
 0x744   :  { %10298 = vmatprep.subr.bf16.mxu1 %v10842_v30 }
 0x747   :  { %10299 = vmatpush3.bf16.msra.mxu1 %v10842_v30 }
 0x748   :  { %10300 = vmatprep.subr.bf16.mxu1 %v10843_v58 }
 0x74b   :  { %10301 = vmatpush3.bf16.msra.mxu1 %v10843_v58 }
 0x74c   :  { %10302 = vmatprep.subr.bf16.mxu1 %v10844_v16 }
 0x74f   :  { %10303 = vmatpush3.bf16.msra.mxu1 %v10844_v16 }
 0x750   :  { %10320 = vmatprep.subr.bf16.mxu1 %v10845_v47 }
 0x752   :  { %10305 = vmatmul.mubr.msk.bf16.vlgmr.msra.gmra.mrb[116].mxu1 %vm27_vm1, %v7921_v3 }
 0x753   :  { %10308 = vmatprep.mubr.msk.bf16.mxu1 %vm27_vm1, %v7922_v42  ;;  %10321 = vmatpush3.bf16.msra.mxu1 %v10845_v47 }
 0x754   :  { %10322 = vmatprep.subr.bf16.mxu1 %v10846_v21 }
 0x757   :  { %10323 = vmatpush3.bf16.msra.mxu1 %v10846_v21 }
 0x758   :  { %10324 = vmatprep.subr.bf16.mxu1 %v10847_v27 }
 0x75a   :  { %10309 = vmatmul.mubr.msk.bf16.gmra.mrb[120].mxu1 %vm27_vm1, %v7923_v0 }
 0x75b   :  { %10312 = vmatprep.mubr.msk.bf16.mxu1 %vm27_vm1, %v7924_v22  ;;  %10325 = vmatpush3.bf16.msra.mxu1 %v10847_v27 }
 0x75c   :  { %10326 = vmatprep.subr.bf16.mxu1 %v10848_v36 }
 0x75f   :  { %10327 = vmatpush3.bf16.msra.mxu1 %v10848_v36 }
 0x760   :  { %10328 = vmatprep.subr.bf16.mxu1 %v10849_v23 }
 0x762   :  { %10313 = vmatmul.mubr.msk.bf16.gmra.mrb[124].mxu1 %vm27_vm1, %v7925_v44 }
 0x763   :  { %10316 = vmatprep.mubr.msk.bf16.mxu1 %vm27_vm1, %v7926_v29  ;;  %10329 = vmatpush3.bf16.msra.mxu1 %v10849_v23 }
 0x764   :  { %10330 = vmatprep.subr.bf16.mxu1 %v10850_v61 }
 0x767   :  { %10331 = vmatpush3.bf16.msra.mxu1 %v10850_v61 }
 0x768   :  { %10348 = vmatprep.subr.bf16.mxu1 %v14189_v37 }
 0x76a   :  { %10317 = vmatmul.mubr.msk.bf16.gmra.mrb[128].mxu1 %vm27_vm1, %v7927_v28 }
 0x76b   :  { %10332 = vmatprep.mubr.msk.bf16.mxu1 %vm27_vm1, %v7909_v12 }
 0x772   :  { %10333 = vmatmul.mubr.msk.bf16.vlgmr.msra.gmra.mrb[116].mxu1 %vm27_vm1, %v14309_v9  ;;  %v7914_v9 = vpack.c.bf16 %v7904_v46, %v7903_v60 }
 0x773   :  { %10336 = vmatprep.mubr.msk.bf16.mxu1 %vm27_vm1, %v14322_v10  ;;  %10349 = vmatpush3.bf16.msra.mxu1 %v14189_v37  ;;  %v7915_v37 = vpack.c.bf16 %v7906_v15, %v7905_v8  ;;  %v8185_v10 = vld [vmem:[#allocation2 + $0x228] sm:$0xff] }
 0x774   :  { %10350 = vmatprep.subr.bf16.mxu1 %v14196_v11 }
 0x777   :  { %10351 = vmatpush3.bf16.msra.mxu1 %v14196_v11  ;;  %v7916_v11 = vpack.c.bf16 %v7908_v43, %v7907_v50 }
 0x778   :  { %10352 = vmatprep.subr.bf16.mxu1 %v14209_v45 }
 0x77a   :  { %10337 = vmatmul.mubr.msk.bf16.gmra.mrb[120].mxu1 %vm27_vm1, %v7912_v25 }
 0x77b   :  { %10340 = vmatprep.mubr.msk.bf16.mxu1 %vm27_vm1, %v7913_v26  ;;  %10353 = vmatpush3.bf16.msra.mxu1 %v14209_v45  ;;  %v8191_v45 = vpack.c.bf16 %v7918_v24, %v7917_v19 }
 0x77c   :  { %10354 = vmatprep.subr.bf16.mxu1 %v14229_v51 }
 0x77f   :  { %10355 = vmatpush3.bf16.msra.mxu1 %v14229_v51  ;;  %v8183_v51 = vld [vmem:[#allocation2 + $0x218] sm:$0xff] }
 0x780   :  { %10356 = vmatprep.subr.bf16.mxu1 %v14246_v54 }
 0x782   :  { %10341 = vmatmul.mubr.msk.bf16.gmra.mrb[124].mxu1 %vm27_vm1, %v7914_v9 }
 0x783   :  { %10344 = vmatprep.mubr.msk.bf16.mxu1 %vm27_vm1, %v7915_v37  ;;  %10357 = vmatpush3.bf16.msra.mxu1 %v14246_v54  ;;  %v8192_v54 = vpack.c.bf16 %v8183_v51, %v7919_v55 }
 0x784   :  { %10358 = vmatprep.subr.bf16.mxu1 %v14263_v17 }
 0x787   :  { %10359 = vmatpush3.bf16.msra.mxu1 %v14263_v17  ;;  %v8184_v17 = vld [vmem:[#allocation2 + $0x220] sm:$0xff] }
 0x788   :  { %10376 = vmatprep.subr.bf16.mxu1 %v10853_v20  ;;  %v8193_v40 = vpack.c.bf16 %v8185_v10, %v8184_v17 }
 0x78a   :  { %10345 = vmatmul.mubr.msk.bf16.gmra.mrb[128].mxu1 %vm27_vm1, %v7916_v11 }
 0x78b   :  { %10360 = vmatprep.mubr.msk.bf16.mxu1 %vm27_vm1, %v7912_v25 }
 0x792   :  { %10361 = vmatmul.mubr.msk.bf16.vlgmr.msra.gmra.mrb[116].mxu1 %vm27_vm1, %v7913_v26 }
 0x793   :  { %10364 = vmatprep.mubr.msk.bf16.mxu1 %vm27_vm1, %v7914_v9 }
 0x79a   :  { %10365 = vmatmul.mubr.msk.bf16.gmra.mrb[120].mxu1 %vm27_vm1, %v7915_v37 }
 0x79b   :  { %10368 = vmatprep.mubr.msk.bf16.mxu1 %vm27_vm1, %v7916_v11 }
 0x7a2   :  { %10369 = vmatmul.mubr.msk.bf16.gmra.mrb[124].mxu1 %vm27_vm1, %v8191_v45  ;;  %v8363_v45 = vld [vmem:[%s14486_s6 + $0x3] sm:$0x1] }
 0x7a3   :  { %10372 = vmatprep.mubr.msk.bf16.mxu1 %vm27_vm1, %v8192_v54  ;;  %v8364_v51 = vpack.c.bf16 %v8363_v45, %v8363_v45 }
 0x7aa   :  { %10373 = vmatmul.mubr.msk.bf16.gmra.mrb[128].mxu1 %vm27_vm1, %v8193_v40 }
 0x7ab   :  { %10392 = vmatprep.mubr.msk.bf16.mxu1 %vm10856_vm4, %v10853_v20 }
 0x865   :  { %v10362_v5 = vpop.f32.mrb[116].mxu1 }
 0x866   :  { %v8333_v62 = vadd.f32 %v10851_v38, %v10362_v5  ;;  %v8252_v4 = vpop.f32.mrb[117].mxu1 }
 0x867   :  { %v8331_v14 = vadd.f32 %v10851_v38, %v8252_v4  ;;  %v10363_v13 = vpop.f32.mrb[118].mxu1 }
 0x868   :  { %v8334_v2 = vadd.f32 %v10851_v38, %v10363_v13  ;;  %v8255_v49 = vpop.f32.mrb[119].mxu1  ;;  %v8349_v52 = vmax.f32 %v8333_v62, 0.0 }
 0x869   :  { %v8332_v32 = vadd.f32 %v10851_v38, %v8255_v49  ;;  %v8347_v48 = vmax.f32 %v8331_v14, 0.0 }
 0x86a   :  { %v8350_v34 = vmax.f32 %v8334_v2, 0.0 }
 0x86b   :  { %v8348_v41 = vmax.f32 %v8332_v32, 0.0 }
 0x86c   :  { %v8366_v18 = vpack.c.bf16 %v8350_v34, %v8349_v52 }
 0x86d   :  { %v8365_v1 = vpack.c.bf16 %v8348_v41, %v8347_v48  ;;  %v10366_v31 = vpop.f32.mrb[120].mxu1 }
 0x86e   :  { %v8337_v56 = vadd.f32 %v10851_v38, %v10366_v31  ;;  %v8268_v59 = vpop.f32.mrb[121].mxu1 }
 0x86f   :  { %v8335_v35 = vadd.f32 %v10851_v38, %v8268_v59  ;;  %v10367_v63 = vpop.f32.mrb[122].mxu1  ;;  %10377 = vmatpush3.bf16.msra.mxu1 %v8365_v1 }
 0x870   :  { %v8338_v7 = vadd.f32 %v10851_v38, %v10367_v63  ;;  %v8271_v30 = vpop.f32.mrb[123].mxu1  ;;  %10378 = vmatprep.subr.bf16.mxu1 %v10853_v20  ;;  %v8353_v16 = vmax.f32 %v8337_v56, 0.0 }
 0x871   :  { %v8336_v58 = vadd.f32 %v10851_v38, %v8271_v30  ;;  %v8351_v53 = vmax.f32 %v8335_v35, 0.0 }
 0x872   :  { %v8354_v6 = vmax.f32 %v8338_v7, 0.0 }
 0x873   :  { %v8352_v33 = vmax.f32 %v8336_v58, 0.0  ;;  %10379 = vmatpush3.bf16.msra.mxu1 %v8366_v18 }
 0x874   :  { %v8368_v3 = vpack.c.bf16 %v8354_v6, %v8353_v16  ;;  %10380 = vmatprep.subr.bf16.mxu1 %v10853_v20 }
 0x875   :  { %v8367_v47 = vpack.c.bf16 %v8352_v33, %v8351_v53  ;;  %v10370_v42 = vpop.f32.mrb[124].mxu1 }
 0x876   :  { %v8341_v21 = vadd.f32 %v10851_v38, %v10370_v42  ;;  %v8284_v60 = vpop.f32.mrb[125].mxu1 }
 0x877   :  { %v8339_v46 = vadd.f32 %v10851_v38, %v8284_v60  ;;  %v10371_v8 = vpop.f32.mrb[126].mxu1  ;;  %10381 = vmatpush3.bf16.msra.mxu1 %v8367_v47 }
 0x878   :  { %v8342_v57 = vadd.f32 %v10851_v38, %v10371_v8  ;;  %v8287_v0 = vpop.f32.mrb[127].mxu1  ;;  %10382 = vmatprep.subr.bf16.mxu1 %v10853_v20  ;;  %v8357_v22 = vmax.f32 %v8341_v21, 0.0 }
 0x879   :  { %v8340_v27 = vadd.f32 %v10851_v38, %v8287_v0  ;;  %v8355_v50 = vmax.f32 %v8339_v46, 0.0 }
 0x87a   :  { %v8358_v36 = vmax.f32 %v8342_v57, 0.0 }
 0x87b   :  { %v8356_v19 = vmax.f32 %v8340_v27, 0.0  ;;  %10383 = vmatpush3.bf16.msra.mxu1 %v8368_v3 }
 0x87c   :  { %v8370_v15 = vpack.c.bf16 %v8358_v36, %v8357_v22  ;;  %10384 = vmatprep.subr.bf16.mxu1 %v10853_v20 }
 0x87d   :  { %v8369_v44 = vpack.c.bf16 %v8356_v19, %v8355_v50  ;;  %v10374_v43 = vpop.f32.mrb[128].mxu1 }
 0x87e   :  { %v8345_v23 = vadd.f32 %v10851_v38, %v10374_v43  ;;  %v8300_v29 = vpop.f32.mrb[129].mxu1 }
 0x87f   :  { %v8343_v61 = vadd.f32 %v10851_v38, %v8300_v29  ;;  %v10375_v24 = vpop.f32.mrb[130].mxu1  ;;  %10385 = vmatpush3.bf16.msra.mxu1 %v8369_v44 }
 0x880   :  { %v8346_v55 = vadd.f32 %v10851_v38, %v10375_v24  ;;  %v8303_v28 = vpop.f32.mrb[131].mxu1  ;;  %10386 = vmatprep.subr.bf16.mxu1 %v10853_v20  ;;  %v8361_v12 = vmax.f32 %v8345_v23, 0.0 }
 0x881   :  { %v8344_v39 = vadd.f32 %v10851_v38, %v8303_v28  ;;  %v8359_v26 = vmax.f32 %v8343_v61, 0.0 }
 0x882   :  { %v8362_v25 = vmax.f32 %v8346_v55, 0.0 }
 0x883   :  { %v8360_v9 = vmax.f32 %v8344_v39, 0.0  ;;  %10387 = vmatpush3.bf16.msra.mxu1 %v8370_v15 }
 0x884   :  { %v8372_v37 = vpack.c.bf16 %v8362_v25, %v8361_v12  ;;  %10388 = vmatprep.subr.bf16.mxu1 %v10853_v20 }
 0x885   :  { %v8371_v11 = vpack.c.bf16 %v8360_v9, %v8359_v26 }
 0x887   :  { %10389 = vmatpush3.bf16.msra.mxu1 %v8371_v11 }
 0x888   :  { %10390 = vmatprep.subr.bf16.mxu1 %v10853_v20 }
 0x88b   :  { %10391 = vmatpush3.bf16.msra.mxu1 %v8372_v37 }
 0x88e   :  { %10393 = vmatmul.mubr.bf16.vlgmr.msra.gmra.mrb[112].mxu1 %v8364_v51 }
 0x961   :  { %v8407_v54 = vpop.f32.mrb[112].mxu1 }
 0x962   :  { %v8414_v17 = vmul.f32 0.00390625, %v8407_v54  ;;  %v10394_v10 = vpop.f32.mrb[113].mxu1 }
 0x963   :  { %v8410_v40 = vpop.f32.mrb[114].mxu1 }
 0x964   :  { %8915 = vst [vmem:[%s14487_s7 + $0x1] sm:$0x1] %v8414_v17  ;;  %v10395_v5 = vpop.f32.mrb[115].mxu1 }

</bundles_post_ra>
